<compile_context>
chip_gen: v7x
topology: tpu7x:2x2x1
jax: 0.10.0
libtpu: 0.0.40
codegen_flags: <defaults>
</compile_context>

<pallas_src>
import functools

import numpy as np

import jax
import jax.numpy as jnp
from jax.experimental import pallas as pl
from jax.experimental.pallas import tpu as pltpu


_H1, _W1 = 28, 28      # conv blocks 1-3
_H2, _W2 = 14, 14      # after 2x2 max pool
_H3, _W3 = 16, 16      # after 1x1 conv with padding=1
_AVG_K = 14            # AvgPool2d(kernel_size=14) window


# -----------------------------------------------------------------------------
# Host-side constant matrices (index logic kept out of the kernel)
# -----------------------------------------------------------------------------
def _conv_masks(h, w):
    """(9, h*w) validity masks for the 9 taps of a 3x3, pad=1 conv."""
    q = np.arange(h * w)
    i, j = q // w, q % w
    rows = []
    for dy in (-1, 0, 1):
        for dx in (-1, 0, 1):
            ok = (i + dy >= 0) & (i + dy < h) & (j + dx >= 0) & (j + dx < w)
            rows.append(ok.astype(np.float32))
    return np.stack(rows, axis=0)


def _maxpool_selector(h, w):
    """(h*w, (h//2)*(w//2)) one-hot: column r selects flat index of (2r_i, 2r_j)."""
    ho, wo = h // 2, w // 2
    sel = np.zeros((h * w, ho * wo), np.float32)
    r = np.arange(ho * wo)
    sel[2 * (r // wo) * w + 2 * (r % wo), r] = 1.0
    return sel


def _pad_scatter(h, w):
    """(h*w, (h+2)*(w+2)) one-hot: scatter an h x w map into the interior of
    an (h+2) x (w+2) map (ring of zeros)."""
    hp, wp = h + 2, w + 2
    scat = np.zeros((h * w, hp * wp), np.float32)
    b = np.arange(h * w)
    scat[b, (b // w + 1) * wp + (b % w + 1)] = 1.0
    return scat


def _avgpool_weights(h, w, k):
    """(h*w, 1) averaging vector over the top-left k x k window of an h x w map."""
    q = np.arange(h * w)
    ok = ((q // w) < k) & ((q % w) < k)
    return (ok.astype(np.float32) / float(k * k)).reshape(h * w, 1)


# -----------------------------------------------------------------------------
# Fused Actor-forward kernel (single pallas_call)
# -----------------------------------------------------------------------------
def _actor_kernel(img_ref,
                  w1_ref, s1_ref, t1_ref,
                  w2_ref, s2_ref, t2_ref,
                  w3_ref, s3_ref, t3_ref,
                  mask28_ref, pool_sel_ref,
                  w4_ref, s4_ref, t4_ref, pad_scat_ref,
                  w5_ref, s5_ref, t5_ref,
                  mask16_ref,
                  w6_ref, b6_ref, avg_w_ref,
                  state_ref,
                  w_l1a_ref, w_l1b_ref, b_l1_ref,
                  w_l2_ref, b_l2_ref,
                  w_l3_ref, b_l3_ref,
                  out_ref, *, max_action):
    f32 = jnp.float32

    def shift_lanes(x, s):
        """out[:, q] = x[:, q + s]  (zero fill for out-of-range q+s)."""
        if s == 0:
            return x
        c = x.shape[0]
        z = jnp.zeros((c, abs(s)), x.dtype)
        if s > 0:
            return jnp.concatenate([x[:, s:], z], axis=1)
        return jnp.concatenate([z, x[:, :s]], axis=1)

    def conv3x3(x, w_ref, mask_ref, width):
        """3x3, pad=1 conv on lane-dense x:(Cin, H*W) -> (Cout, H*W).
        In-kernel im2col: 9 shifted+masked lane slices, 9 small MXU dots."""
        acc = None
        k = 0
        for dy in (-1, 0, 1):
            for dx in (-1, 0, 1):
                xs = shift_lanes(x, dy * width + dx) * mask_ref[k:k + 1, :]
                part = jnp.dot(w_ref[k], xs, preferred_element_type=f32)
                acc = part if acc is None else acc + part
                k += 1
        return acc

    def relu_bn(y, s_ref, t_ref):
        # Conv -> ReLU -> Dropout(eval=id) -> BatchNorm(eval) fused epilogue.
        return jnp.maximum(y, 0.0) * s_ref[...] + t_ref[...]

    # ---------------- ImageEncoder ----------------
    x = img_ref[...]                                                  # (3, 784)
    x = relu_bn(conv3x3(x, w1_ref, mask28_ref, _W1), s1_ref, t1_ref)  # (8, 784)
    x = relu_bn(conv3x3(x, w2_ref, mask28_ref, _W1), s2_ref, t2_ref)  # (10, 784)
    x = relu_bn(conv3x3(x, w3_ref, mask28_ref, _W1), s3_ref, t3_ref)  # (12, 784)

    # MaxPool2d(2, 2): element-wise max of the 4 window members, then a one-hot
    # selection matmul to compact 28x28 -> 14x14 (keeps the lane-dense layout).
    m = jnp.maximum(jnp.maximum(x, shift_lanes(x, 1)),
                    jnp.maximum(shift_lanes(x, _W1), shift_lanes(x, _W1 + 1)))
    x = jnp.dot(m, pool_sel_ref[...], preferred_element_type=f32)     # (12, 196)

    # Conv2d(1x1, padding=1) -> ReLU -> BN: compute the 14x14 interior, scatter
    # into a 16x16 map; the zero-padded ring evaluates to the BN shift.
    z = jnp.maximum(jnp.dot(w4_ref[...], x, preferred_element_type=f32),
                    0.0) * s4_ref[...]                                # (16, 196)
    x = jnp.dot(z, pad_scat_ref[...],
                preferred_element_type=f32) + t4_ref[...]             # (16, 256)

    x = relu_bn(conv3x3(x, w5_ref, mask16_ref, _W3), s5_ref, t5_ref)  # (18, 256)
    x = conv3x3(x, w6_ref, mask16_ref, _W3) + b6_ref[...]             # (20, 256)

    # AvgPool2d(kernel_size=14): single top-left 14x14 window of the 16x16 map.
    feat = jnp.dot(x, avg_w_ref[...], preferred_element_type=f32)     # (20, 1)

    # ---------------- MLP head (column orientation; concat folded into a
    # split weight:  W^T @ [feat; state] = W_a^T @ feat + W_b^T @ state) -------
    h = (jnp.dot(w_l1a_ref[...], feat, preferred_element_type=f32)
         + jnp.dot(w_l1b_ref[...], state_ref[...], preferred_element_type=f32)
         + b_l1_ref[...])
    h = jnp.maximum(h, 0.0)                                           # (400, 1)
    h = jnp.maximum(jnp.dot(w_l2_ref[...], h, preferred_element_type=f32)
                    + b_l2_ref[...], 0.0)                             # (300, 1)
    a = jnp.dot(w_l3_ref[...], h, preferred_element_type=f32) + b_l3_ref[...]
    out_ref[...] = max_action * jnp.tanh(10.0 * a)                    # (A, 1)


def _full_spec(a):
    index_maps = {2: (lambda i: (0, 0)), 3: (lambda i: (0, 0, 0))}
    return pl.BlockSpec(a.shape, index_maps[a.ndim])


# -----------------------------------------------------------------------------
# Wrapper: weight re-packing + single pallas_call
# -----------------------------------------------------------------------------
def actor_forward(params, image_nchw, state_vec, max_action=1.0):
    """image_nchw: (1, 3, 28, 28) NCHW; state_vec: (1, 2) = [orientation, distance]."""
    assert image_nchw.shape == (1, 3, _H1, _W1)
    assert state_vec.shape == (1, 2)
    action_dim = params["w_l3"].shape[1]
    enc = params["enc"]

    def taps(w):  # HWIO (kh, kw, Cin, Cout) -> (kh*kw, Cout, Cin) per-tap matrices
        kh, kw, cin, cout = w.shape
        return jnp.transpose(w.reshape(kh * kw, cin, cout), (0, 2, 1)).astype(jnp.float32)

    def bn_fold(bn):  # eval-mode BN -> (scale, shift) column vectors
        gamma, beta, mean, var = bn
        scale = gamma / jnp.sqrt(var + 1e-5)
        shift = beta - mean * scale
        return (scale.reshape(-1, 1).astype(jnp.float32),
                shift.reshape(-1, 1).astype(jnp.float32))

    s1, t1 = bn_fold(enc["bn1"]); s2, t2 = bn_fold(enc["bn2"])
    s3, t3 = bn_fold(enc["bn3"]); s4, t4 = bn_fold(enc["bn4"])
    s5, t5 = bn_fold(enc["bn5"])

    args = (
        image_nchw.reshape(3, _H1 * _W1).astype(jnp.float32),   # lane-dense (C, H*W)
        taps(enc["w1"]), s1, t1,
        taps(enc["w2"]), s2, t2,
        taps(enc["w3"]), s3, t3,
        jnp.asarray(_conv_masks(_H1, _W1)),
        jnp.asarray(_maxpool_selector(_H1, _W1)),
        jnp.transpose(enc["w4"].reshape(12, 16)).astype(jnp.float32), s4, t4,
        jnp.asarray(_pad_scatter(_H2, _W2)),
        taps(enc["w5"]), s5, t5,
        jnp.asarray(_conv_masks(_H3, _W3)),
        taps(enc["w6"]), enc["b6"].reshape(-1, 1).astype(jnp.float32),
        jnp.asarray(_avgpool_weights(_H3, _W3, _AVG_K)),
        state_vec.reshape(2, 1).astype(jnp.float32),
        jnp.transpose(params["w_l1"][:20]).astype(jnp.float32),  # (400, 20)
        jnp.transpose(params["w_l1"][20:]).astype(jnp.float32),  # (400, 2)
        params["b_l1"].reshape(-1, 1).astype(jnp.float32),
        jnp.transpose(params["w_l2"]).astype(jnp.float32),       # (300, 400)
        params["b_l2"].reshape(-1, 1).astype(jnp.float32),
        jnp.transpose(params["w_l3"]).astype(jnp.float32),       # (A, 300)
        params["b_l3"].reshape(-1, 1).astype(jnp.float32),
    )

    out = pl.pallas_call(
        functools.partial(_actor_kernel, max_action=float(max_action)),
        out_shape=jax.ShapeDtypeStruct((action_dim, 1), jnp.float32),
        grid=(1,),
        in_specs=[_full_spec(a) for a in args],
        out_specs=pl.BlockSpec((action_dim, 1), lambda i: (0, 0)),
        compiler_params=pltpu.CompilerParams(
            dimension_semantics=("arbitrary",)),
    )(*args)
    return out.reshape(1, action_dim)


# -----------------------------------------------------------------------------
# Pure-JAX reference (correctness check)
# -----------------------------------------------------------------------------
def _reference_forward(params, image_nchw, state_vec, max_action):
    enc = params["enc"]

    def conv(x, w):
        return jax.lax.conv_general_dilated(
            x, w, window_strides=(1, 1), padding=((1, 1), (1, 1)),
            dimension_numbers=("NCHW", "HWIO", "NCHW"))

    def block(x, w, bnp):
        gamma, beta, mean, var = bnp
        scale = gamma / jnp.sqrt(var + 1e-5)
        shift = beta - mean * scale
        y = jax.nn.relu(conv(x, w))
        return y * scale[None, :, None, None] + shift[None, :, None, None]

    x = image_nchw.astype(jnp.float32)
    x = block(x, enc["w1"], enc["bn1"])
    x = block(x, enc["w2"], enc["bn2"])
    x = block(x, enc["w3"], enc["bn3"])
    b, c, h, w = x.shape
    x = x.reshape(b, c, h // 2, 2, w // 2, 2).max(axis=(3, 5))
    x = block(x, enc["w4"], enc["bn4"])
    x = block(x, enc["w5"], enc["bn5"])
    x = conv(x, enc["w6"]) + enc["b6"][None, :, None, None]
    feat = x[:, :, :_AVG_K, :_AVG_K].mean(axis=(2, 3))
    xu = jnp.concatenate([feat, state_vec], axis=1)
    hdn = jax.nn.relu(xu @ params["w_l1"] + params["b_l1"])
    hdn = jax.nn.relu(hdn @ params["w_l2"] + params["b_l2"])
    return max_action * jnp.tanh(10.0 * (hdn @ params["w_l3"] + params["b_l3"]))


# -----------------------------------------------------------------------------
# Deterministic parameter initialization
# -----------------------------------------------------------------------------
def _normal(key, shape, scale=0.05):
    return scale * jax.random.normal(key, shape, dtype=jnp.float32)


def _bn_params(key, c):
    k1, k2, k3, k4 = jax.random.split(key, 4)
    gamma = 1.0 + 0.1 * jax.random.normal(k1, (c,), jnp.float32)
    beta = 0.1 * jax.random.normal(k2, (c,), jnp.float32)
    mean = 0.1 * jax.random.normal(k3, (c,), jnp.float32)
    var = 1.0 + 0.1 * jnp.abs(jax.random.normal(k4, (c,), jnp.float32))
    return (gamma, beta, mean, var)


def init_encoder(key):
    ks = jax.random.split(key, 12)
    return {
        "w1": _normal(ks[0], (3, 3, 3, 8)),   "bn1": _bn_params(ks[1], 8),
        "w2": _normal(ks[2], (3, 3, 8, 10)),  "bn2": _bn_params(ks[3], 10),
        "w3": _normal(ks[4], (3, 3, 10, 12)), "bn3": _bn_params(ks[5], 12),
        "w4": _normal(ks[6], (1, 1, 12, 16)), "bn4": _bn_params(ks[7], 16),
        "w5": _normal(ks[8], (3, 3, 16, 18)), "bn5": _bn_params(ks[9], 18),
        "w6": _normal(ks[10], (3, 3, 18, 20)),
        "b6": _normal(ks[11], (20,)),
    }


def init_actor(key, action_dim):
    ks = jax.random.split(key, 7)
    in_dim = 20 + 2  # 20 image features + [orientation, distance]
    return {
        "enc": init_encoder(ks[0]),
        "w_l1": _normal(ks[1], (in_dim, 400)), "b_l1": _normal(ks[2], (400,)),
        "w_l2": _normal(ks[3], (400, 300)),    "b_l2": _normal(ks[4], (300,)),
        "w_l3": _normal(ks[5], (300, action_dim)),
        "b_l3": _normal(ks[6], (action_dim,)),
    }


if __name__ == "__main__":
    key = jax.random.PRNGKey(0)
    k_params, k_img, k_state = jax.random.split(key, 3)

    ACTION_DIM, MAX_ACTION = 2, 2.0
    params = init_actor(k_params, ACTION_DIM)

    # decompress_state yields one resized 28x28 RGB image + [orientation, distance]
    image = jax.random.uniform(k_img, (1, 3, 28, 28), dtype=jnp.float32)  # NCHW
    state_vec = jax.random.normal(k_state, (1, 2), dtype=jnp.float32)

    fwd = jax.jit(functools.partial(actor_forward, max_action=MAX_ACTION))
    action = fwd(params, image, state_vec)
    jax.block_until_ready(action)
    assert action.shape == (1, ACTION_DIM)

    ref = _reference_forward(params, image, state_vec, MAX_ACTION)
    assert jnp.allclose(action, ref, rtol=1e-3, atol=1e-3), (action, ref)
    print("KERNEL_OK")
</pallas_src>

<mosaic_0001>
module attributes {stable_mosaic.version = 11 : i64} {
  func.func @_actor_kernel(%arg0: i32, %arg1: memref<3x784xf32, #tpu.memory_space<vmem>>, %arg2: memref<9x8x3xf32, #tpu.memory_space<vmem>>, %arg3: memref<8x1xf32, #tpu.memory_space<vmem>>, %arg4: memref<8x1xf32, #tpu.memory_space<vmem>>, %arg5: memref<9x10x8xf32, #tpu.memory_space<vmem>>, %arg6: memref<10x1xf32, #tpu.memory_space<vmem>>, %arg7: memref<10x1xf32, #tpu.memory_space<vmem>>, %arg8: memref<9x12x10xf32, #tpu.memory_space<vmem>>, %arg9: memref<12x1xf32, #tpu.memory_space<vmem>>, %arg10: memref<12x1xf32, #tpu.memory_space<vmem>>, %arg11: memref<9x784xf32, #tpu.memory_space<vmem>>, %arg12: memref<784x196xf32, #tpu.memory_space<vmem>>, %arg13: memref<16x12xf32, #tpu.memory_space<vmem>>, %arg14: memref<16x1xf32, #tpu.memory_space<vmem>>, %arg15: memref<16x1xf32, #tpu.memory_space<vmem>>, %arg16: memref<196x256xf32, #tpu.memory_space<vmem>>, %arg17: memref<9x18x16xf32, #tpu.memory_space<vmem>>, %arg18: memref<18x1xf32, #tpu.memory_space<vmem>>, %arg19: memref<18x1xf32, #tpu.memory_space<vmem>>, %arg20: memref<9x256xf32, #tpu.memory_space<vmem>>, %arg21: memref<9x20x18xf32, #tpu.memory_space<vmem>>, %arg22: memref<20x1xf32, #tpu.memory_space<vmem>>, %arg23: memref<256x1xf32, #tpu.memory_space<vmem>>, %arg24: memref<2x1xf32, #tpu.memory_space<vmem>>, %arg25: memref<400x20xf32, #tpu.memory_space<vmem>>, %arg26: memref<400x2xf32, #tpu.memory_space<vmem>>, %arg27: memref<400x1xf32, #tpu.memory_space<vmem>>, %arg28: memref<300x400xf32, #tpu.memory_space<vmem>>, %arg29: memref<300x1xf32, #tpu.memory_space<vmem>>, %arg30: memref<2x300xf32, #tpu.memory_space<vmem>>, %arg31: memref<2x1xf32, #tpu.memory_space<vmem>>, %arg32: memref<2x1xf32, #tpu.memory_space<vmem>>) attributes {dimension_semantics = [#tpu.dimension_semantics<arbitrary>], iteration_bounds = array<i64: 1>, scalar_prefetch = 0 : i64, scratch_operands = 0 : i64, tpu.core_type = #tpu.core_type<tc>, window_params = [{pipeline_mode = #tpu.pipeline_mode<synchronous>, transform_indices = @transform_0, window_bounds = array<i64: 3, 784>}, {pipeline_mode = #tpu.pipeline_mode<synchronous>, transform_indices = @transform_1, window_bounds = array<i64: 9, 8, 3>}, {pipeline_mode = #tpu.pipeline_mode<synchronous>, transform_indices = @transform_2, window_bounds = array<i64: 8, 1>}, {pipeline_mode = #tpu.pipeline_mode<synchronous>, transform_indices = @transform_3, window_bounds = array<i64: 8, 1>}, {pipeline_mode = #tpu.pipeline_mode<synchronous>, transform_indices = @transform_4, window_bounds = array<i64: 9, 10, 8>}, {pipeline_mode = #tpu.pipeline_mode<synchronous>, transform_indices = @transform_5, window_bounds = array<i64: 10, 1>}, {pipeline_mode = #tpu.pipeline_mode<synchronous>, transform_indices = @transform_6, window_bounds = array<i64: 10, 1>}, {pipeline_mode = #tpu.pipeline_mode<synchronous>, transform_indices = @transform_7, window_bounds = array<i64: 9, 12, 10>}, {pipeline_mode = #tpu.pipeline_mode<synchronous>, transform_indices = @transform_8, window_bounds = array<i64: 12, 1>}, {pipeline_mode = #tpu.pipeline_mode<synchronous>, transform_indices = @transform_9, window_bounds = array<i64: 12, 1>}, {pipeline_mode = #tpu.pipeline_mode<synchronous>, transform_indices = @transform_10, window_bounds = array<i64: 9, 784>}, {pipeline_mode = #tpu.pipeline_mode<synchronous>, transform_indices = @transform_11, window_bounds = array<i64: 784, 196>}, {pipeline_mode = #tpu.pipeline_mode<synchronous>, transform_indices = @transform_12, window_bounds = array<i64: 16, 12>}, {pipeline_mode = #tpu.pipeline_mode<synchronous>, transform_indices = @transform_13, window_bounds = array<i64: 16, 1>}, {pipeline_mode = #tpu.pipeline_mode<synchronous>, transform_indices = @transform_14, window_bounds = array<i64: 16, 1>}, {pipeline_mode = #tpu.pipeline_mode<synchronous>, transform_indices = @transform_15, window_bounds = array<i64: 196, 256>}, {pipeline_mode = #tpu.pipeline_mode<synchronous>, transform_indices = @transform_16, window_bounds = array<i64: 9, 18, 16>}, {pipeline_mode = #tpu.pipeline_mode<synchronous>, transform_indices = @transform_17, window_bounds = array<i64: 18, 1>}, {pipeline_mode = #tpu.pipeline_mode<synchronous>, transform_indices = @transform_18, window_bounds = array<i64: 18, 1>}, {pipeline_mode = #tpu.pipeline_mode<synchronous>, transform_indices = @transform_19, window_bounds = array<i64: 9, 256>}, {pipeline_mode = #tpu.pipeline_mode<synchronous>, transform_indices = @transform_20, window_bounds = array<i64: 9, 20, 18>}, {pipeline_mode = #tpu.pipeline_mode<synchronous>, transform_indices = @transform_21, window_bounds = array<i64: 20, 1>}, {pipeline_mode = #tpu.pipeline_mode<synchronous>, transform_indices = @transform_22, window_bounds = array<i64: 256, 1>}, {pipeline_mode = #tpu.pipeline_mode<synchronous>, transform_indices = @transform_23, window_bounds = array<i64: 2, 1>}, {pipeline_mode = #tpu.pipeline_mode<synchronous>, transform_indices = @transform_24, window_bounds = array<i64: 400, 20>}, {pipeline_mode = #tpu.pipeline_mode<synchronous>, transform_indices = @transform_25, window_bounds = array<i64: 400, 2>}, {pipeline_mode = #tpu.pipeline_mode<synchronous>, transform_indices = @transform_26, window_bounds = array<i64: 400, 1>}, {pipeline_mode = #tpu.pipeline_mode<synchronous>, transform_indices = @transform_27, window_bounds = array<i64: 300, 400>}, {pipeline_mode = #tpu.pipeline_mode<synchronous>, transform_indices = @transform_28, window_bounds = array<i64: 300, 1>}, {pipeline_mode = #tpu.pipeline_mode<synchronous>, transform_indices = @transform_29, window_bounds = array<i64: 2, 300>}, {pipeline_mode = #tpu.pipeline_mode<synchronous>, transform_indices = @transform_30, window_bounds = array<i64: 2, 1>}, {pipeline_mode = #tpu.pipeline_mode<synchronous>, transform_indices = @transform_31, window_bounds = array<i64: 2, 1>}]} {
    %c0 = arith.constant 0 : index
    %c0_0 = arith.constant 0 : index
    %0 = vector.load %arg1[%c0, %c0_0] : memref<3x784xf32, #tpu.memory_space<vmem>>, vector<3x784xf32>
    %cst = arith.constant 0.000000e+00 : f32
    %1 = vector.broadcast %cst : f32 to vector<3x29xf32>
    %2 = vector.extract_strided_slice %0 {offsets = [0, 0], sizes = [3, 755], strides = [1, 1]} : vector<3x784xf32> to vector<3x755xf32>
    %3 = tpu.concatenate %1, %2 in 1 : vector<3x29xf32>, vector<3x755xf32> -> vector<3x784xf32>
    %c0_1 = arith.constant 0 : index
    %c0_2 = arith.constant 0 : index
    %4 = vector.load %arg11[%c0_1, %c0_2] : memref<9x784xf32, #tpu.memory_space<vmem>>, vector<1x784xf32>
    %5 = vector.broadcast %4 : vector<1x784xf32> to vector<3x784xf32>
    %6 = arith.mulf %3, %5 : vector<3x784xf32>
    %c0_3 = arith.constant 0 : index
    %c0_4 = arith.constant 0 : index
    %c0_5 = arith.constant 0 : index
    %7 = vector.load %arg2[%c0_3, %c0_4, %c0_5] : memref<9x8x3xf32, #tpu.memory_space<vmem>>, vector<1x8x3xf32>
    %8 = vector.shape_cast %7 : vector<1x8x3xf32> to vector<8x3xf32>
    %cst_6 = arith.constant dense<0.000000e+00> : vector<8x784xf32>
    %9 = tpu.matmul %8, %6, %cst_6 {dimension_numbers = #tpu.dot_dimension_numbers<[1], [0], [0], [1], [0, 0, 1, 1], [], []>} : vector<8x3xf32>, vector<3x784xf32>, vector<8x784xf32> -> vector<8x784xf32>
    %cst_7 = arith.constant 0.000000e+00 : f32
    %10 = vector.broadcast %cst_7 : f32 to vector<3x28xf32>
    %11 = vector.extract_strided_slice %0 {offsets = [0, 0], sizes = [3, 756], strides = [1, 1]} : vector<3x784xf32> to vector<3x756xf32>
    %12 = tpu.concatenate %10, %11 in 1 : vector<3x28xf32>, vector<3x756xf32> -> vector<3x784xf32>
    %c1 = arith.constant 1 : index
    %c0_8 = arith.constant 0 : index
    %13 = vector.load %arg11[%c1, %c0_8] : memref<9x784xf32, #tpu.memory_space<vmem>>, vector<1x784xf32>
    %14 = vector.broadcast %13 : vector<1x784xf32> to vector<3x784xf32>
    %15 = arith.mulf %12, %14 : vector<3x784xf32>
    %c1_9 = arith.constant 1 : index
    %c0_10 = arith.constant 0 : index
    %c0_11 = arith.constant 0 : index
    %16 = vector.load %arg2[%c1_9, %c0_10, %c0_11] : memref<9x8x3xf32, #tpu.memory_space<vmem>>, vector<1x8x3xf32>
    %17 = vector.shape_cast %16 : vector<1x8x3xf32> to vector<8x3xf32>
    %cst_12 = arith.constant dense<0.000000e+00> : vector<8x784xf32>
    %18 = tpu.matmul %17, %15, %cst_12 {dimension_numbers = #tpu.dot_dimension_numbers<[1], [0], [0], [1], [0, 0, 1, 1], [], []>} : vector<8x3xf32>, vector<3x784xf32>, vector<8x784xf32> -> vector<8x784xf32>
    %19 = arith.addf %9, %18 : vector<8x784xf32>
    %cst_13 = arith.constant 0.000000e+00 : f32
    %20 = vector.broadcast %cst_13 : f32 to vector<3x27xf32>
    %21 = vector.extract_strided_slice %0 {offsets = [0, 0], sizes = [3, 757], strides = [1, 1]} : vector<3x784xf32> to vector<3x757xf32>
    %22 = tpu.concatenate %20, %21 in 1 : vector<3x27xf32>, vector<3x757xf32> -> vector<3x784xf32>
    %c2 = arith.constant 2 : index
    %c0_14 = arith.constant 0 : index
    %23 = vector.load %arg11[%c2, %c0_14] : memref<9x784xf32, #tpu.memory_space<vmem>>, vector<1x784xf32>
    %24 = vector.broadcast %23 : vector<1x784xf32> to vector<3x784xf32>
    %25 = arith.mulf %22, %24 : vector<3x784xf32>
    %c2_15 = arith.constant 2 : index
    %c0_16 = arith.constant 0 : index
    %c0_17 = arith.constant 0 : index
    %26 = vector.load %arg2[%c2_15, %c0_16, %c0_17] : memref<9x8x3xf32, #tpu.memory_space<vmem>>, vector<1x8x3xf32>
    %27 = vector.shape_cast %26 : vector<1x8x3xf32> to vector<8x3xf32>
    %cst_18 = arith.constant dense<0.000000e+00> : vector<8x784xf32>
    %28 = tpu.matmul %27, %25, %cst_18 {dimension_numbers = #tpu.dot_dimension_numbers<[1], [0], [0], [1], [0, 0, 1, 1], [], []>} : vector<8x3xf32>, vector<3x784xf32>, vector<8x784xf32> -> vector<8x784xf32>
    %29 = arith.addf %19, %28 : vector<8x784xf32>
    %cst_19 = arith.constant 0.000000e+00 : f32
    %30 = vector.broadcast %cst_19 : f32 to vector<3x1xf32>
    %31 = vector.extract_strided_slice %0 {offsets = [0, 0], sizes = [3, 783], strides = [1, 1]} : vector<3x784xf32> to vector<3x783xf32>
    %32 = tpu.concatenate %30, %31 in 1 : vector<3x1xf32>, vector<3x783xf32> -> vector<3x784xf32>
    %c3 = arith.constant 3 : index
    %c0_20 = arith.constant 0 : index
    %33 = vector.load %arg11[%c3, %c0_20] : memref<9x784xf32, #tpu.memory_space<vmem>>, vector<1x784xf32>
    %34 = vector.broadcast %33 : vector<1x784xf32> to vector<3x784xf32>
    %35 = arith.mulf %32, %34 : vector<3x784xf32>
    %c3_21 = arith.constant 3 : index
    %c0_22 = arith.constant 0 : index
    %c0_23 = arith.constant 0 : index
    %36 = vector.load %arg2[%c3_21, %c0_22, %c0_23] : memref<9x8x3xf32, #tpu.memory_space<vmem>>, vector<1x8x3xf32>
    %37 = vector.shape_cast %36 : vector<1x8x3xf32> to vector<8x3xf32>
    %cst_24 = arith.constant dense<0.000000e+00> : vector<8x784xf32>
    %38 = tpu.matmul %37, %35, %cst_24 {dimension_numbers = #tpu.dot_dimension_numbers<[1], [0], [0], [1], [0, 0, 1, 1], [], []>} : vector<8x3xf32>, vector<3x784xf32>, vector<8x784xf32> -> vector<8x784xf32>
    %39 = arith.addf %29, %38 : vector<8x784xf32>
    %c4 = arith.constant 4 : index
    %c0_25 = arith.constant 0 : index
    %40 = vector.load %arg11[%c4, %c0_25] : memref<9x784xf32, #tpu.memory_space<vmem>>, vector<1x784xf32>
    %41 = vector.broadcast %40 : vector<1x784xf32> to vector<3x784xf32>
    %42 = arith.mulf %0, %41 : vector<3x784xf32>
    %c4_26 = arith.constant 4 : index
    %c0_27 = arith.constant 0 : index
    %c0_28 = arith.constant 0 : index
    %43 = vector.load %arg2[%c4_26, %c0_27, %c0_28] : memref<9x8x3xf32, #tpu.memory_space<vmem>>, vector<1x8x3xf32>
    %44 = vector.shape_cast %43 : vector<1x8x3xf32> to vector<8x3xf32>
    %cst_29 = arith.constant dense<0.000000e+00> : vector<8x784xf32>
    %45 = tpu.matmul %44, %42, %cst_29 {dimension_numbers = #tpu.dot_dimension_numbers<[1], [0], [0], [1], [0, 0, 1, 1], [], []>} : vector<8x3xf32>, vector<3x784xf32>, vector<8x784xf32> -> vector<8x784xf32>
    %46 = arith.addf %39, %45 : vector<8x784xf32>
    %cst_30 = arith.constant 0.000000e+00 : f32
    %47 = vector.broadcast %cst_30 : f32 to vector<3x1xf32>
    %48 = vector.extract_strided_slice %0 {offsets = [0, 1], sizes = [3, 783], strides = [1, 1]} : vector<3x784xf32> to vector<3x783xf32>
    %49 = tpu.concatenate %48, %47 in 1 : vector<3x783xf32>, vector<3x1xf32> -> vector<3x784xf32>
    %c5 = arith.constant 5 : index
    %c0_31 = arith.constant 0 : index
    %50 = vector.load %arg11[%c5, %c0_31] : memref<9x784xf32, #tpu.memory_space<vmem>>, vector<1x784xf32>
    %51 = vector.broadcast %50 : vector<1x784xf32> to vector<3x784xf32>
    %52 = arith.mulf %49, %51 : vector<3x784xf32>
    %c5_32 = arith.constant 5 : index
    %c0_33 = arith.constant 0 : index
    %c0_34 = arith.constant 0 : index
    %53 = vector.load %arg2[%c5_32, %c0_33, %c0_34] : memref<9x8x3xf32, #tpu.memory_space<vmem>>, vector<1x8x3xf32>
    %54 = vector.shape_cast %53 : vector<1x8x3xf32> to vector<8x3xf32>
    %cst_35 = arith.constant dense<0.000000e+00> : vector<8x784xf32>
    %55 = tpu.matmul %54, %52, %cst_35 {dimension_numbers = #tpu.dot_dimension_numbers<[1], [0], [0], [1], [0, 0, 1, 1], [], []>} : vector<8x3xf32>, vector<3x784xf32>, vector<8x784xf32> -> vector<8x784xf32>
    %56 = arith.addf %46, %55 : vector<8x784xf32>
    %cst_36 = arith.constant 0.000000e+00 : f32
    %57 = vector.broadcast %cst_36 : f32 to vector<3x27xf32>
    %58 = vector.extract_strided_slice %0 {offsets = [0, 27], sizes = [3, 757], strides = [1, 1]} : vector<3x784xf32> to vector<3x757xf32>
    %59 = tpu.concatenate %58, %57 in 1 : vector<3x757xf32>, vector<3x27xf32> -> vector<3x784xf32>
    %c6 = arith.constant 6 : index
    %c0_37 = arith.constant 0 : index
    %60 = vector.load %arg11[%c6, %c0_37] : memref<9x784xf32, #tpu.memory_space<vmem>>, vector<1x784xf32>
    %61 = vector.broadcast %60 : vector<1x784xf32> to vector<3x784xf32>
    %62 = arith.mulf %59, %61 : vector<3x784xf32>
    %c6_38 = arith.constant 6 : index
    %c0_39 = arith.constant 0 : index
    %c0_40 = arith.constant 0 : index
    %63 = vector.load %arg2[%c6_38, %c0_39, %c0_40] : memref<9x8x3xf32, #tpu.memory_space<vmem>>, vector<1x8x3xf32>
    %64 = vector.shape_cast %63 : vector<1x8x3xf32> to vector<8x3xf32>
    %cst_41 = arith.constant dense<0.000000e+00> : vector<8x784xf32>
    %65 = tpu.matmul %64, %62, %cst_41 {dimension_numbers = #tpu.dot_dimension_numbers<[1], [0], [0], [1], [0, 0, 1, 1], [], []>} : vector<8x3xf32>, vector<3x784xf32>, vector<8x784xf32> -> vector<8x784xf32>
    %66 = arith.addf %56, %65 : vector<8x784xf32>
    %cst_42 = arith.constant 0.000000e+00 : f32
    %67 = vector.broadcast %cst_42 : f32 to vector<3x28xf32>
    %68 = vector.extract_strided_slice %0 {offsets = [0, 28], sizes = [3, 756], strides = [1, 1]} : vector<3x784xf32> to vector<3x756xf32>
    %69 = tpu.concatenate %68, %67 in 1 : vector<3x756xf32>, vector<3x28xf32> -> vector<3x784xf32>
    %c7 = arith.constant 7 : index
    %c0_43 = arith.constant 0 : index
    %70 = vector.load %arg11[%c7, %c0_43] : memref<9x784xf32, #tpu.memory_space<vmem>>, vector<1x784xf32>
    %71 = vector.broadcast %70 : vector<1x784xf32> to vector<3x784xf32>
    %72 = arith.mulf %69, %71 : vector<3x784xf32>
    %c7_44 = arith.constant 7 : index
    %c0_45 = arith.constant 0 : index
    %c0_46 = arith.constant 0 : index
    %73 = vector.load %arg2[%c7_44, %c0_45, %c0_46] : memref<9x8x3xf32, #tpu.memory_space<vmem>>, vector<1x8x3xf32>
    %74 = vector.shape_cast %73 : vector<1x8x3xf32> to vector<8x3xf32>
    %cst_47 = arith.constant dense<0.000000e+00> : vector<8x784xf32>
    %75 = tpu.matmul %74, %72, %cst_47 {dimension_numbers = #tpu.dot_dimension_numbers<[1], [0], [0], [1], [0, 0, 1, 1], [], []>} : vector<8x3xf32>, vector<3x784xf32>, vector<8x784xf32> -> vector<8x784xf32>
    %76 = arith.addf %66, %75 : vector<8x784xf32>
    %cst_48 = arith.constant 0.000000e+00 : f32
    %77 = vector.broadcast %cst_48 : f32 to vector<3x29xf32>
    %78 = vector.extract_strided_slice %0 {offsets = [0, 29], sizes = [3, 755], strides = [1, 1]} : vector<3x784xf32> to vector<3x755xf32>
    %79 = tpu.concatenate %78, %77 in 1 : vector<3x755xf32>, vector<3x29xf32> -> vector<3x784xf32>
    %c8 = arith.constant 8 : index
    %c0_49 = arith.constant 0 : index
    %80 = vector.load %arg11[%c8, %c0_49] : memref<9x784xf32, #tpu.memory_space<vmem>>, vector<1x784xf32>
    %81 = vector.broadcast %80 : vector<1x784xf32> to vector<3x784xf32>
    %82 = arith.mulf %79, %81 : vector<3x784xf32>
    %c8_50 = arith.constant 8 : index
    %c0_51 = arith.constant 0 : index
    %c0_52 = arith.constant 0 : index
    %83 = vector.load %arg2[%c8_50, %c0_51, %c0_52] : memref<9x8x3xf32, #tpu.memory_space<vmem>>, vector<1x8x3xf32>
    %84 = vector.shape_cast %83 : vector<1x8x3xf32> to vector<8x3xf32>
    %cst_53 = arith.constant dense<0.000000e+00> : vector<8x784xf32>
    %85 = tpu.matmul %84, %82, %cst_53 {dimension_numbers = #tpu.dot_dimension_numbers<[1], [0], [0], [1], [0, 0, 1, 1], [], []>} : vector<8x3xf32>, vector<3x784xf32>, vector<8x784xf32> -> vector<8x784xf32>
    %86 = arith.addf %76, %85 : vector<8x784xf32>
    %cst_54 = arith.constant 0.000000e+00 : f32
    %87 = vector.broadcast %cst_54 : f32 to vector<8x784xf32>
    %88 = arith.maximumf %86, %87 : vector<8x784xf32>
    %c0_55 = arith.constant 0 : index
    %c0_56 = arith.constant 0 : index
    %89 = vector.load %arg3[%c0_55, %c0_56] : memref<8x1xf32, #tpu.memory_space<vmem>>, vector<8x1xf32>
    %90 = vector.broadcast %89 : vector<8x1xf32> to vector<8x784xf32>
    %91 = arith.mulf %88, %90 : vector<8x784xf32>
    %c0_57 = arith.constant 0 : index
    %c0_58 = arith.constant 0 : index
    %92 = vector.load %arg4[%c0_57, %c0_58] : memref<8x1xf32, #tpu.memory_space<vmem>>, vector<8x1xf32>
    %93 = vector.broadcast %92 : vector<8x1xf32> to vector<8x784xf32>
    %94 = arith.addf %91, %93 : vector<8x784xf32>
    %cst_59 = arith.constant 0.000000e+00 : f32
    %95 = vector.broadcast %cst_59 : f32 to vector<8x29xf32>
    %96 = vector.extract_strided_slice %94 {offsets = [0, 0], sizes = [8, 755], strides = [1, 1]} : vector<8x784xf32> to vector<8x755xf32>
    %97 = tpu.concatenate %95, %96 in 1 : vector<8x29xf32>, vector<8x755xf32> -> vector<8x784xf32>
    %c0_60 = arith.constant 0 : index
    %c0_61 = arith.constant 0 : index
    %98 = vector.load %arg11[%c0_60, %c0_61] : memref<9x784xf32, #tpu.memory_space<vmem>>, vector<1x784xf32>
    %99 = vector.broadcast %98 : vector<1x784xf32> to vector<8x784xf32>
    %100 = arith.mulf %97, %99 : vector<8x784xf32>
    %c0_62 = arith.constant 0 : index
    %c0_63 = arith.constant 0 : index
    %c0_64 = arith.constant 0 : index
    %101 = vector.load %arg5[%c0_62, %c0_63, %c0_64] : memref<9x10x8xf32, #tpu.memory_space<vmem>>, vector<1x10x8xf32>
    %102 = vector.shape_cast %101 : vector<1x10x8xf32> to vector<10x8xf32>
    %cst_65 = arith.constant dense<0.000000e+00> : vector<10x784xf32>
    %103 = tpu.matmul %102, %100, %cst_65 {dimension_numbers = #tpu.dot_dimension_numbers<[1], [0], [0], [1], [0, 0, 1, 1], [], []>} : vector<10x8xf32>, vector<8x784xf32>, vector<10x784xf32> -> vector<10x784xf32>
    %cst_66 = arith.constant 0.000000e+00 : f32
    %104 = vector.broadcast %cst_66 : f32 to vector<8x28xf32>
    %105 = vector.extract_strided_slice %94 {offsets = [0, 0], sizes = [8, 756], strides = [1, 1]} : vector<8x784xf32> to vector<8x756xf32>
    %106 = tpu.concatenate %104, %105 in 1 : vector<8x28xf32>, vector<8x756xf32> -> vector<8x784xf32>
    %c1_67 = arith.constant 1 : index
    %c0_68 = arith.constant 0 : index
    %107 = vector.load %arg11[%c1_67, %c0_68] : memref<9x784xf32, #tpu.memory_space<vmem>>, vector<1x784xf32>
    %108 = vector.broadcast %107 : vector<1x784xf32> to vector<8x784xf32>
    %109 = arith.mulf %106, %108 : vector<8x784xf32>
    %c1_69 = arith.constant 1 : index
    %c0_70 = arith.constant 0 : index
    %c0_71 = arith.constant 0 : index
    %110 = vector.load %arg5[%c1_69, %c0_70, %c0_71] : memref<9x10x8xf32, #tpu.memory_space<vmem>>, vector<1x10x8xf32>
    %111 = vector.shape_cast %110 : vector<1x10x8xf32> to vector<10x8xf32>
    %cst_72 = arith.constant dense<0.000000e+00> : vector<10x784xf32>
    %112 = tpu.matmul %111, %109, %cst_72 {dimension_numbers = #tpu.dot_dimension_numbers<[1], [0], [0], [1], [0, 0, 1, 1], [], []>} : vector<10x8xf32>, vector<8x784xf32>, vector<10x784xf32> -> vector<10x784xf32>
    %113 = arith.addf %103, %112 : vector<10x784xf32>
    %cst_73 = arith.constant 0.000000e+00 : f32
    %114 = vector.broadcast %cst_73 : f32 to vector<8x27xf32>
    %115 = vector.extract_strided_slice %94 {offsets = [0, 0], sizes = [8, 757], strides = [1, 1]} : vector<8x784xf32> to vector<8x757xf32>
    %116 = tpu.concatenate %114, %115 in 1 : vector<8x27xf32>, vector<8x757xf32> -> vector<8x784xf32>
    %c2_74 = arith.constant 2 : index
    %c0_75 = arith.constant 0 : index
    %117 = vector.load %arg11[%c2_74, %c0_75] : memref<9x784xf32, #tpu.memory_space<vmem>>, vector<1x784xf32>
    %118 = vector.broadcast %117 : vector<1x784xf32> to vector<8x784xf32>
    %119 = arith.mulf %116, %118 : vector<8x784xf32>
    %c2_76 = arith.constant 2 : index
    %c0_77 = arith.constant 0 : index
    %c0_78 = arith.constant 0 : index
    %120 = vector.load %arg5[%c2_76, %c0_77, %c0_78] : memref<9x10x8xf32, #tpu.memory_space<vmem>>, vector<1x10x8xf32>
    %121 = vector.shape_cast %120 : vector<1x10x8xf32> to vector<10x8xf32>
    %cst_79 = arith.constant dense<0.000000e+00> : vector<10x784xf32>
    %122 = tpu.matmul %121, %119, %cst_79 {dimension_numbers = #tpu.dot_dimension_numbers<[1], [0], [0], [1], [0, 0, 1, 1], [], []>} : vector<10x8xf32>, vector<8x784xf32>, vector<10x784xf32> -> vector<10x784xf32>
    %123 = arith.addf %113, %122 : vector<10x784xf32>
    %cst_80 = arith.constant 0.000000e+00 : f32
    %124 = vector.broadcast %cst_80 : f32 to vector<8x1xf32>
    %125 = vector.extract_strided_slice %94 {offsets = [0, 0], sizes = [8, 783], strides = [1, 1]} : vector<8x784xf32> to vector<8x783xf32>
    %126 = tpu.concatenate %124, %125 in 1 : vector<8x1xf32>, vector<8x783xf32> -> vector<8x784xf32>
    %c3_81 = arith.constant 3 : index
    %c0_82 = arith.constant 0 : index
    %127 = vector.load %arg11[%c3_81, %c0_82] : memref<9x784xf32, #tpu.memory_space<vmem>>, vector<1x784xf32>
    %128 = vector.broadcast %127 : vector<1x784xf32> to vector<8x784xf32>
    %129 = arith.mulf %126, %128 : vector<8x784xf32>
    %c3_83 = arith.constant 3 : index
    %c0_84 = arith.constant 0 : index
    %c0_85 = arith.constant 0 : index
    %130 = vector.load %arg5[%c3_83, %c0_84, %c0_85] : memref<9x10x8xf32, #tpu.memory_space<vmem>>, vector<1x10x8xf32>
    %131 = vector.shape_cast %130 : vector<1x10x8xf32> to vector<10x8xf32>
    %cst_86 = arith.constant dense<0.000000e+00> : vector<10x784xf32>
    %132 = tpu.matmul %131, %129, %cst_86 {dimension_numbers = #tpu.dot_dimension_numbers<[1], [0], [0], [1], [0, 0, 1, 1], [], []>} : vector<10x8xf32>, vector<8x784xf32>, vector<10x784xf32> -> vector<10x784xf32>
    %133 = arith.addf %123, %132 : vector<10x784xf32>
    %c4_87 = arith.constant 4 : index
    %c0_88 = arith.constant 0 : index
    %134 = vector.load %arg11[%c4_87, %c0_88] : memref<9x784xf32, #tpu.memory_space<vmem>>, vector<1x784xf32>
    %135 = vector.broadcast %134 : vector<1x784xf32> to vector<8x784xf32>
    %136 = arith.mulf %94, %135 : vector<8x784xf32>
    %c4_89 = arith.constant 4 : index
    %c0_90 = arith.constant 0 : index
    %c0_91 = arith.constant 0 : index
    %137 = vector.load %arg5[%c4_89, %c0_90, %c0_91] : memref<9x10x8xf32, #tpu.memory_space<vmem>>, vector<1x10x8xf32>
    %138 = vector.shape_cast %137 : vector<1x10x8xf32> to vector<10x8xf32>
    %cst_92 = arith.constant dense<0.000000e+00> : vector<10x784xf32>
    %139 = tpu.matmul %138, %136, %cst_92 {dimension_numbers = #tpu.dot_dimension_numbers<[1], [0], [0], [1], [0, 0, 1, 1], [], []>} : vector<10x8xf32>, vector<8x784xf32>, vector<10x784xf32> -> vector<10x784xf32>
    %140 = arith.addf %133, %139 : vector<10x784xf32>
    %cst_93 = arith.constant 0.000000e+00 : f32
    %141 = vector.broadcast %cst_93 : f32 to vector<8x1xf32>
    %142 = vector.extract_strided_slice %94 {offsets = [0, 1], sizes = [8, 783], strides = [1, 1]} : vector<8x784xf32> to vector<8x783xf32>
    %143 = tpu.concatenate %142, %141 in 1 : vector<8x783xf32>, vector<8x1xf32> -> vector<8x784xf32>
    %c5_94 = arith.constant 5 : index
    %c0_95 = arith.constant 0 : index
    %144 = vector.load %arg11[%c5_94, %c0_95] : memref<9x784xf32, #tpu.memory_space<vmem>>, vector<1x784xf32>
    %145 = vector.broadcast %144 : vector<1x784xf32> to vector<8x784xf32>
    %146 = arith.mulf %143, %145 : vector<8x784xf32>
    %c5_96 = arith.constant 5 : index
    %c0_97 = arith.constant 0 : index
    %c0_98 = arith.constant 0 : index
    %147 = vector.load %arg5[%c5_96, %c0_97, %c0_98] : memref<9x10x8xf32, #tpu.memory_space<vmem>>, vector<1x10x8xf32>
    %148 = vector.shape_cast %147 : vector<1x10x8xf32> to vector<10x8xf32>
    %cst_99 = arith.constant dense<0.000000e+00> : vector<10x784xf32>
    %149 = tpu.matmul %148, %146, %cst_99 {dimension_numbers = #tpu.dot_dimension_numbers<[1], [0], [0], [1], [0, 0, 1, 1], [], []>} : vector<10x8xf32>, vector<8x784xf32>, vector<10x784xf32> -> vector<10x784xf32>
    %150 = arith.addf %140, %149 : vector<10x784xf32>
    %cst_100 = arith.constant 0.000000e+00 : f32
    %151 = vector.broadcast %cst_100 : f32 to vector<8x27xf32>
    %152 = vector.extract_strided_slice %94 {offsets = [0, 27], sizes = [8, 757], strides = [1, 1]} : vector<8x784xf32> to vector<8x757xf32>
    %153 = tpu.concatenate %152, %151 in 1 : vector<8x757xf32>, vector<8x27xf32> -> vector<8x784xf32>
    %c6_101 = arith.constant 6 : index
    %c0_102 = arith.constant 0 : index
    %154 = vector.load %arg11[%c6_101, %c0_102] : memref<9x784xf32, #tpu.memory_space<vmem>>, vector<1x784xf32>
    %155 = vector.broadcast %154 : vector<1x784xf32> to vector<8x784xf32>
    %156 = arith.mulf %153, %155 : vector<8x784xf32>
    %c6_103 = arith.constant 6 : index
    %c0_104 = arith.constant 0 : index
    %c0_105 = arith.constant 0 : index
    %157 = vector.load %arg5[%c6_103, %c0_104, %c0_105] : memref<9x10x8xf32, #tpu.memory_space<vmem>>, vector<1x10x8xf32>
    %158 = vector.shape_cast %157 : vector<1x10x8xf32> to vector<10x8xf32>
    %cst_106 = arith.constant dense<0.000000e+00> : vector<10x784xf32>
    %159 = tpu.matmul %158, %156, %cst_106 {dimension_numbers = #tpu.dot_dimension_numbers<[1], [0], [0], [1], [0, 0, 1, 1], [], []>} : vector<10x8xf32>, vector<8x784xf32>, vector<10x784xf32> -> vector<10x784xf32>
    %160 = arith.addf %150, %159 : vector<10x784xf32>
    %cst_107 = arith.constant 0.000000e+00 : f32
    %161 = vector.broadcast %cst_107 : f32 to vector<8x28xf32>
    %162 = vector.extract_strided_slice %94 {offsets = [0, 28], sizes = [8, 756], strides = [1, 1]} : vector<8x784xf32> to vector<8x756xf32>
    %163 = tpu.concatenate %162, %161 in 1 : vector<8x756xf32>, vector<8x28xf32> -> vector<8x784xf32>
    %c7_108 = arith.constant 7 : index
    %c0_109 = arith.constant 0 : index
    %164 = vector.load %arg11[%c7_108, %c0_109] : memref<9x784xf32, #tpu.memory_space<vmem>>, vector<1x784xf32>
    %165 = vector.broadcast %164 : vector<1x784xf32> to vector<8x784xf32>
    %166 = arith.mulf %163, %165 : vector<8x784xf32>
    %c7_110 = arith.constant 7 : index
    %c0_111 = arith.constant 0 : index
    %c0_112 = arith.constant 0 : index
    %167 = vector.load %arg5[%c7_110, %c0_111, %c0_112] : memref<9x10x8xf32, #tpu.memory_space<vmem>>, vector<1x10x8xf32>
    %168 = vector.shape_cast %167 : vector<1x10x8xf32> to vector<10x8xf32>
    %cst_113 = arith.constant dense<0.000000e+00> : vector<10x784xf32>
    %169 = tpu.matmul %168, %166, %cst_113 {dimension_numbers = #tpu.dot_dimension_numbers<[1], [0], [0], [1], [0, 0, 1, 1], [], []>} : vector<10x8xf32>, vector<8x784xf32>, vector<10x784xf32> -> vector<10x784xf32>
    %170 = arith.addf %160, %169 : vector<10x784xf32>
    %cst_114 = arith.constant 0.000000e+00 : f32
    %171 = vector.broadcast %cst_114 : f32 to vector<8x29xf32>
    %172 = vector.extract_strided_slice %94 {offsets = [0, 29], sizes = [8, 755], strides = [1, 1]} : vector<8x784xf32> to vector<8x755xf32>
    %173 = tpu.concatenate %172, %171 in 1 : vector<8x755xf32>, vector<8x29xf32> -> vector<8x784xf32>
    %c8_115 = arith.constant 8 : index
    %c0_116 = arith.constant 0 : index
    %174 = vector.load %arg11[%c8_115, %c0_116] : memref<9x784xf32, #tpu.memory_space<vmem>>, vector<1x784xf32>
    %175 = vector.broadcast %174 : vector<1x784xf32> to vector<8x784xf32>
    %176 = arith.mulf %173, %175 : vector<8x784xf32>
    %c8_117 = arith.constant 8 : index
    %c0_118 = arith.constant 0 : index
    %c0_119 = arith.constant 0 : index
    %177 = vector.load %arg5[%c8_117, %c0_118, %c0_119] : memref<9x10x8xf32, #tpu.memory_space<vmem>>, vector<1x10x8xf32>
    %178 = vector.shape_cast %177 : vector<1x10x8xf32> to vector<10x8xf32>
    %cst_120 = arith.constant dense<0.000000e+00> : vector<10x784xf32>
    %179 = tpu.matmul %178, %176, %cst_120 {dimension_numbers = #tpu.dot_dimension_numbers<[1], [0], [0], [1], [0, 0, 1, 1], [], []>} : vector<10x8xf32>, vector<8x784xf32>, vector<10x784xf32> -> vector<10x784xf32>
    %180 = arith.addf %170, %179 : vector<10x784xf32>
    %cst_121 = arith.constant 0.000000e+00 : f32
    %181 = vector.broadcast %cst_121 : f32 to vector<10x784xf32>
    %182 = arith.maximumf %180, %181 : vector<10x784xf32>
    %c0_122 = arith.constant 0 : index
    %c0_123 = arith.constant 0 : index
    %183 = vector.load %arg6[%c0_122, %c0_123] : memref<10x1xf32, #tpu.memory_space<vmem>>, vector<10x1xf32>
    %184 = vector.broadcast %183 : vector<10x1xf32> to vector<10x784xf32>
    %185 = arith.mulf %182, %184 : vector<10x784xf32>
    %c0_124 = arith.constant 0 : index
    %c0_125 = arith.constant 0 : index
    %186 = vector.load %arg7[%c0_124, %c0_125] : memref<10x1xf32, #tpu.memory_space<vmem>>, vector<10x1xf32>
    %187 = vector.broadcast %186 : vector<10x1xf32> to vector<10x784xf32>
    %188 = arith.addf %185, %187 : vector<10x784xf32>
    %cst_126 = arith.constant 0.000000e+00 : f32
    %189 = vector.broadcast %cst_126 : f32 to vector<10x29xf32>
    %190 = vector.extract_strided_slice %188 {offsets = [0, 0], sizes = [10, 755], strides = [1, 1]} : vector<10x784xf32> to vector<10x755xf32>
    %191 = tpu.concatenate %189, %190 in 1 : vector<10x29xf32>, vector<10x755xf32> -> vector<10x784xf32>
    %c0_127 = arith.constant 0 : index
    %c0_128 = arith.constant 0 : index
    %192 = vector.load %arg11[%c0_127, %c0_128] : memref<9x784xf32, #tpu.memory_space<vmem>>, vector<1x784xf32>
    %193 = vector.broadcast %192 : vector<1x784xf32> to vector<10x784xf32>
    %194 = arith.mulf %191, %193 : vector<10x784xf32>
    %c0_129 = arith.constant 0 : index
    %c0_130 = arith.constant 0 : index
    %c0_131 = arith.constant 0 : index
    %195 = vector.load %arg8[%c0_129, %c0_130, %c0_131] : memref<9x12x10xf32, #tpu.memory_space<vmem>>, vector<1x12x10xf32>
    %196 = vector.shape_cast %195 : vector<1x12x10xf32> to vector<12x10xf32>
    %cst_132 = arith.constant dense<0.000000e+00> : vector<12x784xf32>
    %197 = tpu.matmul %196, %194, %cst_132 {dimension_numbers = #tpu.dot_dimension_numbers<[1], [0], [0], [1], [0, 0, 1, 1], [], []>} : vector<12x10xf32>, vector<10x784xf32>, vector<12x784xf32> -> vector<12x784xf32>
    %cst_133 = arith.constant 0.000000e+00 : f32
    %198 = vector.broadcast %cst_133 : f32 to vector<10x28xf32>
    %199 = vector.extract_strided_slice %188 {offsets = [0, 0], sizes = [10, 756], strides = [1, 1]} : vector<10x784xf32> to vector<10x756xf32>
    %200 = tpu.concatenate %198, %199 in 1 : vector<10x28xf32>, vector<10x756xf32> -> vector<10x784xf32>
    %c1_134 = arith.constant 1 : index
    %c0_135 = arith.constant 0 : index
    %201 = vector.load %arg11[%c1_134, %c0_135] : memref<9x784xf32, #tpu.memory_space<vmem>>, vector<1x784xf32>
    %202 = vector.broadcast %201 : vector<1x784xf32> to vector<10x784xf32>
    %203 = arith.mulf %200, %202 : vector<10x784xf32>
    %c1_136 = arith.constant 1 : index
    %c0_137 = arith.constant 0 : index
    %c0_138 = arith.constant 0 : index
    %204 = vector.load %arg8[%c1_136, %c0_137, %c0_138] : memref<9x12x10xf32, #tpu.memory_space<vmem>>, vector<1x12x10xf32>
    %205 = vector.shape_cast %204 : vector<1x12x10xf32> to vector<12x10xf32>
    %cst_139 = arith.constant dense<0.000000e+00> : vector<12x784xf32>
    %206 = tpu.matmul %205, %203, %cst_139 {dimension_numbers = #tpu.dot_dimension_numbers<[1], [0], [0], [1], [0, 0, 1, 1], [], []>} : vector<12x10xf32>, vector<10x784xf32>, vector<12x784xf32> -> vector<12x784xf32>
    %207 = arith.addf %197, %206 : vector<12x784xf32>
    %cst_140 = arith.constant 0.000000e+00 : f32
    %208 = vector.broadcast %cst_140 : f32 to vector<10x27xf32>
    %209 = vector.extract_strided_slice %188 {offsets = [0, 0], sizes = [10, 757], strides = [1, 1]} : vector<10x784xf32> to vector<10x757xf32>
    %210 = tpu.concatenate %208, %209 in 1 : vector<10x27xf32>, vector<10x757xf32> -> vector<10x784xf32>
    %c2_141 = arith.constant 2 : index
    %c0_142 = arith.constant 0 : index
    %211 = vector.load %arg11[%c2_141, %c0_142] : memref<9x784xf32, #tpu.memory_space<vmem>>, vector<1x784xf32>
    %212 = vector.broadcast %211 : vector<1x784xf32> to vector<10x784xf32>
    %213 = arith.mulf %210, %212 : vector<10x784xf32>
    %c2_143 = arith.constant 2 : index
    %c0_144 = arith.constant 0 : index
    %c0_145 = arith.constant 0 : index
    %214 = vector.load %arg8[%c2_143, %c0_144, %c0_145] : memref<9x12x10xf32, #tpu.memory_space<vmem>>, vector<1x12x10xf32>
    %215 = vector.shape_cast %214 : vector<1x12x10xf32> to vector<12x10xf32>
    %cst_146 = arith.constant dense<0.000000e+00> : vector<12x784xf32>
    %216 = tpu.matmul %215, %213, %cst_146 {dimension_numbers = #tpu.dot_dimension_numbers<[1], [0], [0], [1], [0, 0, 1, 1], [], []>} : vector<12x10xf32>, vector<10x784xf32>, vector<12x784xf32> -> vector<12x784xf32>
    %217 = arith.addf %207, %216 : vector<12x784xf32>
    %cst_147 = arith.constant 0.000000e+00 : f32
    %218 = vector.broadcast %cst_147 : f32 to vector<10x1xf32>
    %219 = vector.extract_strided_slice %188 {offsets = [0, 0], sizes = [10, 783], strides = [1, 1]} : vector<10x784xf32> to vector<10x783xf32>
    %220 = tpu.concatenate %218, %219 in 1 : vector<10x1xf32>, vector<10x783xf32> -> vector<10x784xf32>
    %c3_148 = arith.constant 3 : index
    %c0_149 = arith.constant 0 : index
    %221 = vector.load %arg11[%c3_148, %c0_149] : memref<9x784xf32, #tpu.memory_space<vmem>>, vector<1x784xf32>
    %222 = vector.broadcast %221 : vector<1x784xf32> to vector<10x784xf32>
    %223 = arith.mulf %220, %222 : vector<10x784xf32>
    %c3_150 = arith.constant 3 : index
    %c0_151 = arith.constant 0 : index
    %c0_152 = arith.constant 0 : index
    %224 = vector.load %arg8[%c3_150, %c0_151, %c0_152] : memref<9x12x10xf32, #tpu.memory_space<vmem>>, vector<1x12x10xf32>
    %225 = vector.shape_cast %224 : vector<1x12x10xf32> to vector<12x10xf32>
    %cst_153 = arith.constant dense<0.000000e+00> : vector<12x784xf32>
    %226 = tpu.matmul %225, %223, %cst_153 {dimension_numbers = #tpu.dot_dimension_numbers<[1], [0], [0], [1], [0, 0, 1, 1], [], []>} : vector<12x10xf32>, vector<10x784xf32>, vector<12x784xf32> -> vector<12x784xf32>
    %227 = arith.addf %217, %226 : vector<12x784xf32>
    %c4_154 = arith.constant 4 : index
    %c0_155 = arith.constant 0 : index
    %228 = vector.load %arg11[%c4_154, %c0_155] : memref<9x784xf32, #tpu.memory_space<vmem>>, vector<1x784xf32>
    %229 = vector.broadcast %228 : vector<1x784xf32> to vector<10x784xf32>
    %230 = arith.mulf %188, %229 : vector<10x784xf32>
    %c4_156 = arith.constant 4 : index
    %c0_157 = arith.constant 0 : index
    %c0_158 = arith.constant 0 : index
    %231 = vector.load %arg8[%c4_156, %c0_157, %c0_158] : memref<9x12x10xf32, #tpu.memory_space<vmem>>, vector<1x12x10xf32>
    %232 = vector.shape_cast %231 : vector<1x12x10xf32> to vector<12x10xf32>
    %cst_159 = arith.constant dense<0.000000e+00> : vector<12x784xf32>
    %233 = tpu.matmul %232, %230, %cst_159 {dimension_numbers = #tpu.dot_dimension_numbers<[1], [0], [0], [1], [0, 0, 1, 1], [], []>} : vector<12x10xf32>, vector<10x784xf32>, vector<12x784xf32> -> vector<12x784xf32>
    %234 = arith.addf %227, %233 : vector<12x784xf32>
    %cst_160 = arith.constant 0.000000e+00 : f32
    %235 = vector.broadcast %cst_160 : f32 to vector<10x1xf32>
    %236 = vector.extract_strided_slice %188 {offsets = [0, 1], sizes = [10, 783], strides = [1, 1]} : vector<10x784xf32> to vector<10x783xf32>
    %237 = tpu.concatenate %236, %235 in 1 : vector<10x783xf32>, vector<10x1xf32> -> vector<10x784xf32>
    %c5_161 = arith.constant 5 : index
    %c0_162 = arith.constant 0 : index
    %238 = vector.load %arg11[%c5_161, %c0_162] : memref<9x784xf32, #tpu.memory_space<vmem>>, vector<1x784xf32>
    %239 = vector.broadcast %238 : vector<1x784xf32> to vector<10x784xf32>
    %240 = arith.mulf %237, %239 : vector<10x784xf32>
    %c5_163 = arith.constant 5 : index
    %c0_164 = arith.constant 0 : index
    %c0_165 = arith.constant 0 : index
    %241 = vector.load %arg8[%c5_163, %c0_164, %c0_165] : memref<9x12x10xf32, #tpu.memory_space<vmem>>, vector<1x12x10xf32>
    %242 = vector.shape_cast %241 : vector<1x12x10xf32> to vector<12x10xf32>
    %cst_166 = arith.constant dense<0.000000e+00> : vector<12x784xf32>
    %243 = tpu.matmul %242, %240, %cst_166 {dimension_numbers = #tpu.dot_dimension_numbers<[1], [0], [0], [1], [0, 0, 1, 1], [], []>} : vector<12x10xf32>, vector<10x784xf32>, vector<12x784xf32> -> vector<12x784xf32>
    %244 = arith.addf %234, %243 : vector<12x784xf32>
    %cst_167 = arith.constant 0.000000e+00 : f32
    %245 = vector.broadcast %cst_167 : f32 to vector<10x27xf32>
    %246 = vector.extract_strided_slice %188 {offsets = [0, 27], sizes = [10, 757], strides = [1, 1]} : vector<10x784xf32> to vector<10x757xf32>
    %247 = tpu.concatenate %246, %245 in 1 : vector<10x757xf32>, vector<10x27xf32> -> vector<10x784xf32>
    %c6_168 = arith.constant 6 : index
    %c0_169 = arith.constant 0 : index
    %248 = vector.load %arg11[%c6_168, %c0_169] : memref<9x784xf32, #tpu.memory_space<vmem>>, vector<1x784xf32>
    %249 = vector.broadcast %248 : vector<1x784xf32> to vector<10x784xf32>
    %250 = arith.mulf %247, %249 : vector<10x784xf32>
    %c6_170 = arith.constant 6 : index
    %c0_171 = arith.constant 0 : index
    %c0_172 = arith.constant 0 : index
    %251 = vector.load %arg8[%c6_170, %c0_171, %c0_172] : memref<9x12x10xf32, #tpu.memory_space<vmem>>, vector<1x12x10xf32>
    %252 = vector.shape_cast %251 : vector<1x12x10xf32> to vector<12x10xf32>
    %cst_173 = arith.constant dense<0.000000e+00> : vector<12x784xf32>
    %253 = tpu.matmul %252, %250, %cst_173 {dimension_numbers = #tpu.dot_dimension_numbers<[1], [0], [0], [1], [0, 0, 1, 1], [], []>} : vector<12x10xf32>, vector<10x784xf32>, vector<12x784xf32> -> vector<12x784xf32>
    %254 = arith.addf %244, %253 : vector<12x784xf32>
    %cst_174 = arith.constant 0.000000e+00 : f32
    %255 = vector.broadcast %cst_174 : f32 to vector<10x28xf32>
    %256 = vector.extract_strided_slice %188 {offsets = [0, 28], sizes = [10, 756], strides = [1, 1]} : vector<10x784xf32> to vector<10x756xf32>
    %257 = tpu.concatenate %256, %255 in 1 : vector<10x756xf32>, vector<10x28xf32> -> vector<10x784xf32>
    %c7_175 = arith.constant 7 : index
    %c0_176 = arith.constant 0 : index
    %258 = vector.load %arg11[%c7_175, %c0_176] : memref<9x784xf32, #tpu.memory_space<vmem>>, vector<1x784xf32>
    %259 = vector.broadcast %258 : vector<1x784xf32> to vector<10x784xf32>
    %260 = arith.mulf %257, %259 : vector<10x784xf32>
    %c7_177 = arith.constant 7 : index
    %c0_178 = arith.constant 0 : index
    %c0_179 = arith.constant 0 : index
    %261 = vector.load %arg8[%c7_177, %c0_178, %c0_179] : memref<9x12x10xf32, #tpu.memory_space<vmem>>, vector<1x12x10xf32>
    %262 = vector.shape_cast %261 : vector<1x12x10xf32> to vector<12x10xf32>
    %cst_180 = arith.constant dense<0.000000e+00> : vector<12x784xf32>
    %263 = tpu.matmul %262, %260, %cst_180 {dimension_numbers = #tpu.dot_dimension_numbers<[1], [0], [0], [1], [0, 0, 1, 1], [], []>} : vector<12x10xf32>, vector<10x784xf32>, vector<12x784xf32> -> vector<12x784xf32>
    %264 = arith.addf %254, %263 : vector<12x784xf32>
    %cst_181 = arith.constant 0.000000e+00 : f32
    %265 = vector.broadcast %cst_181 : f32 to vector<10x29xf32>
    %266 = vector.extract_strided_slice %188 {offsets = [0, 29], sizes = [10, 755], strides = [1, 1]} : vector<10x784xf32> to vector<10x755xf32>
    %267 = tpu.concatenate %266, %265 in 1 : vector<10x755xf32>, vector<10x29xf32> -> vector<10x784xf32>
    %c8_182 = arith.constant 8 : index
    %c0_183 = arith.constant 0 : index
    %268 = vector.load %arg11[%c8_182, %c0_183] : memref<9x784xf32, #tpu.memory_space<vmem>>, vector<1x784xf32>
    %269 = vector.broadcast %268 : vector<1x784xf32> to vector<10x784xf32>
    %270 = arith.mulf %267, %269 : vector<10x784xf32>
    %c8_184 = arith.constant 8 : index
    %c0_185 = arith.constant 0 : index
    %c0_186 = arith.constant 0 : index
    %271 = vector.load %arg8[%c8_184, %c0_185, %c0_186] : memref<9x12x10xf32, #tpu.memory_space<vmem>>, vector<1x12x10xf32>
    %272 = vector.shape_cast %271 : vector<1x12x10xf32> to vector<12x10xf32>
    %cst_187 = arith.constant dense<0.000000e+00> : vector<12x784xf32>
    %273 = tpu.matmul %272, %270, %cst_187 {dimension_numbers = #tpu.dot_dimension_numbers<[1], [0], [0], [1], [0, 0, 1, 1], [], []>} : vector<12x10xf32>, vector<10x784xf32>, vector<12x784xf32> -> vector<12x784xf32>
    %274 = arith.addf %264, %273 : vector<12x784xf32>
    %cst_188 = arith.constant 0.000000e+00 : f32
    %275 = vector.broadcast %cst_188 : f32 to vector<12x784xf32>
    %276 = arith.maximumf %274, %275 : vector<12x784xf32>
    %c0_189 = arith.constant 0 : index
    %c0_190 = arith.constant 0 : index
    %277 = vector.load %arg9[%c0_189, %c0_190] : memref<12x1xf32, #tpu.memory_space<vmem>>, vector<12x1xf32>
    %278 = vector.broadcast %277 : vector<12x1xf32> to vector<12x784xf32>
    %279 = arith.mulf %276, %278 : vector<12x784xf32>
    %c0_191 = arith.constant 0 : index
    %c0_192 = arith.constant 0 : index
    %280 = vector.load %arg10[%c0_191, %c0_192] : memref<12x1xf32, #tpu.memory_space<vmem>>, vector<12x1xf32>
    %281 = vector.broadcast %280 : vector<12x1xf32> to vector<12x784xf32>
    %282 = arith.addf %279, %281 : vector<12x784xf32>
    %cst_193 = arith.constant 0.000000e+00 : f32
    %283 = vector.broadcast %cst_193 : f32 to vector<12x1xf32>
    %284 = vector.extract_strided_slice %282 {offsets = [0, 1], sizes = [12, 783], strides = [1, 1]} : vector<12x784xf32> to vector<12x783xf32>
    %285 = tpu.concatenate %284, %283 in 1 : vector<12x783xf32>, vector<12x1xf32> -> vector<12x784xf32>
    %286 = arith.maximumf %282, %285 : vector<12x784xf32>
    %cst_194 = arith.constant 0.000000e+00 : f32
    %287 = vector.broadcast %cst_194 : f32 to vector<12x28xf32>
    %288 = vector.extract_strided_slice %282 {offsets = [0, 28], sizes = [12, 756], strides = [1, 1]} : vector<12x784xf32> to vector<12x756xf32>
    %289 = tpu.concatenate %288, %287 in 1 : vector<12x756xf32>, vector<12x28xf32> -> vector<12x784xf32>
    %cst_195 = arith.constant 0.000000e+00 : f32
    %290 = vector.broadcast %cst_195 : f32 to vector<12x29xf32>
    %291 = vector.extract_strided_slice %282 {offsets = [0, 29], sizes = [12, 755], strides = [1, 1]} : vector<12x784xf32> to vector<12x755xf32>
    %292 = tpu.concatenate %291, %290 in 1 : vector<12x755xf32>, vector<12x29xf32> -> vector<12x784xf32>
    %293 = arith.maximumf %289, %292 : vector<12x784xf32>
    %294 = arith.maximumf %286, %293 : vector<12x784xf32>
    %c0_196 = arith.constant 0 : index
    %c0_197 = arith.constant 0 : index
    %295 = vector.load %arg12[%c0_196, %c0_197] : memref<784x196xf32, #tpu.memory_space<vmem>>, vector<784x196xf32>
    %cst_198 = arith.constant dense<0.000000e+00> : vector<12x196xf32>
    %296 = tpu.matmul %294, %295, %cst_198 {dimension_numbers = #tpu.dot_dimension_numbers<[1], [0], [0], [1], [0, 0, 1, 1], [], []>} : vector<12x784xf32>, vector<784x196xf32>, vector<12x196xf32> -> vector<12x196xf32>
    %c0_199 = arith.constant 0 : index
    %c0_200 = arith.constant 0 : index
    %297 = vector.load %arg13[%c0_199, %c0_200] : memref<16x12xf32, #tpu.memory_space<vmem>>, vector<16x12xf32>
    %cst_201 = arith.constant dense<0.000000e+00> : vector<16x196xf32>
    %298 = tpu.matmul %297, %296, %cst_201 {dimension_numbers = #tpu.dot_dimension_numbers<[1], [0], [0], [1], [0, 0, 1, 1], [], []>} : vector<16x12xf32>, vector<12x196xf32>, vector<16x196xf32> -> vector<16x196xf32>
    %cst_202 = arith.constant 0.000000e+00 : f32
    %299 = vector.broadcast %cst_202 : f32 to vector<16x196xf32>
    %300 = arith.maximumf %298, %299 : vector<16x196xf32>
    %c0_203 = arith.constant 0 : index
    %c0_204 = arith.constant 0 : index
    %301 = vector.load %arg14[%c0_203, %c0_204] : memref<16x1xf32, #tpu.memory_space<vmem>>, vector<16x1xf32>
    %302 = vector.broadcast %301 : vector<16x1xf32> to vector<16x196xf32>
    %303 = arith.mulf %300, %302 : vector<16x196xf32>
    %c0_205 = arith.constant 0 : index
    %c0_206 = arith.constant 0 : index
    %304 = vector.load %arg16[%c0_205, %c0_206] : memref<196x256xf32, #tpu.memory_space<vmem>>, vector<196x256xf32>
    %cst_207 = arith.constant dense<0.000000e+00> : vector<16x256xf32>
    %305 = tpu.matmul %303, %304, %cst_207 {dimension_numbers = #tpu.dot_dimension_numbers<[1], [0], [0], [1], [0, 0, 1, 1], [], []>} : vector<16x196xf32>, vector<196x256xf32>, vector<16x256xf32> -> vector<16x256xf32>
    %c0_208 = arith.constant 0 : index
    %c0_209 = arith.constant 0 : index
    %306 = vector.load %arg15[%c0_208, %c0_209] : memref<16x1xf32, #tpu.memory_space<vmem>>, vector<16x1xf32>
    %307 = vector.broadcast %306 : vector<16x1xf32> to vector<16x256xf32>
    %308 = arith.addf %305, %307 : vector<16x256xf32>
    %cst_210 = arith.constant 0.000000e+00 : f32
    %309 = vector.broadcast %cst_210 : f32 to vector<16x17xf32>
    %310 = vector.extract_strided_slice %308 {offsets = [0, 0], sizes = [16, 239], strides = [1, 1]} : vector<16x256xf32> to vector<16x239xf32>
    %311 = tpu.concatenate %309, %310 in 1 : vector<16x17xf32>, vector<16x239xf32> -> vector<16x256xf32>
    %c0_211 = arith.constant 0 : index
    %c0_212 = arith.constant 0 : index
    %312 = vector.load %arg20[%c0_211, %c0_212] : memref<9x256xf32, #tpu.memory_space<vmem>>, vector<1x256xf32>
    %313 = vector.broadcast %312 : vector<1x256xf32> to vector<16x256xf32>
    %314 = arith.mulf %311, %313 : vector<16x256xf32>
    %c0_213 = arith.constant 0 : index
    %c0_214 = arith.constant 0 : index
    %c0_215 = arith.constant 0 : index
    %315 = vector.load %arg17[%c0_213, %c0_214, %c0_215] : memref<9x18x16xf32, #tpu.memory_space<vmem>>, vector<1x18x16xf32>
    %316 = vector.shape_cast %315 : vector<1x18x16xf32> to vector<18x16xf32>
    %cst_216 = arith.constant dense<0.000000e+00> : vector<18x256xf32>
    %317 = tpu.matmul %316, %314, %cst_216 {dimension_numbers = #tpu.dot_dimension_numbers<[1], [0], [0], [1], [0, 0, 1, 1], [], []>} : vector<18x16xf32>, vector<16x256xf32>, vector<18x256xf32> -> vector<18x256xf32>
    %cst_217 = arith.constant 0.000000e+00 : f32
    %318 = vector.broadcast %cst_217 : f32 to vector<16x16xf32>
    %319 = vector.extract_strided_slice %308 {offsets = [0, 0], sizes = [16, 240], strides = [1, 1]} : vector<16x256xf32> to vector<16x240xf32>
    %320 = tpu.concatenate %318, %319 in 1 : vector<16x16xf32>, vector<16x240xf32> -> vector<16x256xf32>
    %c1_218 = arith.constant 1 : index
    %c0_219 = arith.constant 0 : index
    %321 = vector.load %arg20[%c1_218, %c0_219] : memref<9x256xf32, #tpu.memory_space<vmem>>, vector<1x256xf32>
    %322 = vector.broadcast %321 : vector<1x256xf32> to vector<16x256xf32>
    %323 = arith.mulf %320, %322 : vector<16x256xf32>
    %c1_220 = arith.constant 1 : index
    %c0_221 = arith.constant 0 : index
    %c0_222 = arith.constant 0 : index
    %324 = vector.load %arg17[%c1_220, %c0_221, %c0_222] : memref<9x18x16xf32, #tpu.memory_space<vmem>>, vector<1x18x16xf32>
    %325 = vector.shape_cast %324 : vector<1x18x16xf32> to vector<18x16xf32>
    %cst_223 = arith.constant dense<0.000000e+00> : vector<18x256xf32>
    %326 = tpu.matmul %325, %323, %cst_223 {dimension_numbers = #tpu.dot_dimension_numbers<[1], [0], [0], [1], [0, 0, 1, 1], [], []>} : vector<18x16xf32>, vector<16x256xf32>, vector<18x256xf32> -> vector<18x256xf32>
    %327 = arith.addf %317, %326 : vector<18x256xf32>
    %cst_224 = arith.constant 0.000000e+00 : f32
    %328 = vector.broadcast %cst_224 : f32 to vector<16x15xf32>
    %329 = vector.extract_strided_slice %308 {offsets = [0, 0], sizes = [16, 241], strides = [1, 1]} : vector<16x256xf32> to vector<16x241xf32>
    %330 = tpu.concatenate %328, %329 in 1 : vector<16x15xf32>, vector<16x241xf32> -> vector<16x256xf32>
    %c2_225 = arith.constant 2 : index
    %c0_226 = arith.constant 0 : index
    %331 = vector.load %arg20[%c2_225, %c0_226] : memref<9x256xf32, #tpu.memory_space<vmem>>, vector<1x256xf32>
    %332 = vector.broadcast %331 : vector<1x256xf32> to vector<16x256xf32>
    %333 = arith.mulf %330, %332 : vector<16x256xf32>
    %c2_227 = arith.constant 2 : index
    %c0_228 = arith.constant 0 : index
    %c0_229 = arith.constant 0 : index
    %334 = vector.load %arg17[%c2_227, %c0_228, %c0_229] : memref<9x18x16xf32, #tpu.memory_space<vmem>>, vector<1x18x16xf32>
    %335 = vector.shape_cast %334 : vector<1x18x16xf32> to vector<18x16xf32>
    %cst_230 = arith.constant dense<0.000000e+00> : vector<18x256xf32>
    %336 = tpu.matmul %335, %333, %cst_230 {dimension_numbers = #tpu.dot_dimension_numbers<[1], [0], [0], [1], [0, 0, 1, 1], [], []>} : vector<18x16xf32>, vector<16x256xf32>, vector<18x256xf32> -> vector<18x256xf32>
    %337 = arith.addf %327, %336 : vector<18x256xf32>
    %cst_231 = arith.constant 0.000000e+00 : f32
    %338 = vector.broadcast %cst_231 : f32 to vector<16x1xf32>
    %339 = vector.extract_strided_slice %308 {offsets = [0, 0], sizes = [16, 255], strides = [1, 1]} : vector<16x256xf32> to vector<16x255xf32>
    %340 = tpu.concatenate %338, %339 in 1 : vector<16x1xf32>, vector<16x255xf32> -> vector<16x256xf32>
    %c3_232 = arith.constant 3 : index
    %c0_233 = arith.constant 0 : index
    %341 = vector.load %arg20[%c3_232, %c0_233] : memref<9x256xf32, #tpu.memory_space<vmem>>, vector<1x256xf32>
    %342 = vector.broadcast %341 : vector<1x256xf32> to vector<16x256xf32>
    %343 = arith.mulf %340, %342 : vector<16x256xf32>
    %c3_234 = arith.constant 3 : index
    %c0_235 = arith.constant 0 : index
    %c0_236 = arith.constant 0 : index
    %344 = vector.load %arg17[%c3_234, %c0_235, %c0_236] : memref<9x18x16xf32, #tpu.memory_space<vmem>>, vector<1x18x16xf32>
    %345 = vector.shape_cast %344 : vector<1x18x16xf32> to vector<18x16xf32>
    %cst_237 = arith.constant dense<0.000000e+00> : vector<18x256xf32>
    %346 = tpu.matmul %345, %343, %cst_237 {dimension_numbers = #tpu.dot_dimension_numbers<[1], [0], [0], [1], [0, 0, 1, 1], [], []>} : vector<18x16xf32>, vector<16x256xf32>, vector<18x256xf32> -> vector<18x256xf32>
    %347 = arith.addf %337, %346 : vector<18x256xf32>
    %c4_238 = arith.constant 4 : index
    %c0_239 = arith.constant 0 : index
    %348 = vector.load %arg20[%c4_238, %c0_239] : memref<9x256xf32, #tpu.memory_space<vmem>>, vector<1x256xf32>
    %349 = vector.broadcast %348 : vector<1x256xf32> to vector<16x256xf32>
    %350 = arith.mulf %308, %349 : vector<16x256xf32>
    %c4_240 = arith.constant 4 : index
    %c0_241 = arith.constant 0 : index
    %c0_242 = arith.constant 0 : index
    %351 = vector.load %arg17[%c4_240, %c0_241, %c0_242] : memref<9x18x16xf32, #tpu.memory_space<vmem>>, vector<1x18x16xf32>
    %352 = vector.shape_cast %351 : vector<1x18x16xf32> to vector<18x16xf32>
    %cst_243 = arith.constant dense<0.000000e+00> : vector<18x256xf32>
    %353 = tpu.matmul %352, %350, %cst_243 {dimension_numbers = #tpu.dot_dimension_numbers<[1], [0], [0], [1], [0, 0, 1, 1], [], []>} : vector<18x16xf32>, vector<16x256xf32>, vector<18x256xf32> -> vector<18x256xf32>
    %354 = arith.addf %347, %353 : vector<18x256xf32>
    %cst_244 = arith.constant 0.000000e+00 : f32
    %355 = vector.broadcast %cst_244 : f32 to vector<16x1xf32>
    %356 = vector.extract_strided_slice %308 {offsets = [0, 1], sizes = [16, 255], strides = [1, 1]} : vector<16x256xf32> to vector<16x255xf32>
    %357 = tpu.concatenate %356, %355 in 1 : vector<16x255xf32>, vector<16x1xf32> -> vector<16x256xf32>
    %c5_245 = arith.constant 5 : index
    %c0_246 = arith.constant 0 : index
    %358 = vector.load %arg20[%c5_245, %c0_246] : memref<9x256xf32, #tpu.memory_space<vmem>>, vector<1x256xf32>
    %359 = vector.broadcast %358 : vector<1x256xf32> to vector<16x256xf32>
    %360 = arith.mulf %357, %359 : vector<16x256xf32>
    %c5_247 = arith.constant 5 : index
    %c0_248 = arith.constant 0 : index
    %c0_249 = arith.constant 0 : index
    %361 = vector.load %arg17[%c5_247, %c0_248, %c0_249] : memref<9x18x16xf32, #tpu.memory_space<vmem>>, vector<1x18x16xf32>
    %362 = vector.shape_cast %361 : vector<1x18x16xf32> to vector<18x16xf32>
    %cst_250 = arith.constant dense<0.000000e+00> : vector<18x256xf32>
    %363 = tpu.matmul %362, %360, %cst_250 {dimension_numbers = #tpu.dot_dimension_numbers<[1], [0], [0], [1], [0, 0, 1, 1], [], []>} : vector<18x16xf32>, vector<16x256xf32>, vector<18x256xf32> -> vector<18x256xf32>
    %364 = arith.addf %354, %363 : vector<18x256xf32>
    %cst_251 = arith.constant 0.000000e+00 : f32
    %365 = vector.broadcast %cst_251 : f32 to vector<16x15xf32>
    %366 = vector.extract_strided_slice %308 {offsets = [0, 15], sizes = [16, 241], strides = [1, 1]} : vector<16x256xf32> to vector<16x241xf32>
    %367 = tpu.concatenate %366, %365 in 1 : vector<16x241xf32>, vector<16x15xf32> -> vector<16x256xf32>
    %c6_252 = arith.constant 6 : index
    %c0_253 = arith.constant 0 : index
    %368 = vector.load %arg20[%c6_252, %c0_253] : memref<9x256xf32, #tpu.memory_space<vmem>>, vector<1x256xf32>
    %369 = vector.broadcast %368 : vector<1x256xf32> to vector<16x256xf32>
    %370 = arith.mulf %367, %369 : vector<16x256xf32>
    %c6_254 = arith.constant 6 : index
    %c0_255 = arith.constant 0 : index
    %c0_256 = arith.constant 0 : index
    %371 = vector.load %arg17[%c6_254, %c0_255, %c0_256] : memref<9x18x16xf32, #tpu.memory_space<vmem>>, vector<1x18x16xf32>
    %372 = vector.shape_cast %371 : vector<1x18x16xf32> to vector<18x16xf32>
    %cst_257 = arith.constant dense<0.000000e+00> : vector<18x256xf32>
    %373 = tpu.matmul %372, %370, %cst_257 {dimension_numbers = #tpu.dot_dimension_numbers<[1], [0], [0], [1], [0, 0, 1, 1], [], []>} : vector<18x16xf32>, vector<16x256xf32>, vector<18x256xf32> -> vector<18x256xf32>
    %374 = arith.addf %364, %373 : vector<18x256xf32>
    %cst_258 = arith.constant 0.000000e+00 : f32
    %375 = vector.broadcast %cst_258 : f32 to vector<16x16xf32>
    %376 = vector.extract_strided_slice %308 {offsets = [0, 16], sizes = [16, 240], strides = [1, 1]} : vector<16x256xf32> to vector<16x240xf32>
    %377 = tpu.concatenate %376, %375 in 1 : vector<16x240xf32>, vector<16x16xf32> -> vector<16x256xf32>
    %c7_259 = arith.constant 7 : index
    %c0_260 = arith.constant 0 : index
    %378 = vector.load %arg20[%c7_259, %c0_260] : memref<9x256xf32, #tpu.memory_space<vmem>>, vector<1x256xf32>
    %379 = vector.broadcast %378 : vector<1x256xf32> to vector<16x256xf32>
    %380 = arith.mulf %377, %379 : vector<16x256xf32>
    %c7_261 = arith.constant 7 : index
    %c0_262 = arith.constant 0 : index
    %c0_263 = arith.constant 0 : index
    %381 = vector.load %arg17[%c7_261, %c0_262, %c0_263] : memref<9x18x16xf32, #tpu.memory_space<vmem>>, vector<1x18x16xf32>
    %382 = vector.shape_cast %381 : vector<1x18x16xf32> to vector<18x16xf32>
    %cst_264 = arith.constant dense<0.000000e+00> : vector<18x256xf32>
    %383 = tpu.matmul %382, %380, %cst_264 {dimension_numbers = #tpu.dot_dimension_numbers<[1], [0], [0], [1], [0, 0, 1, 1], [], []>} : vector<18x16xf32>, vector<16x256xf32>, vector<18x256xf32> -> vector<18x256xf32>
    %384 = arith.addf %374, %383 : vector<18x256xf32>
    %cst_265 = arith.constant 0.000000e+00 : f32
    %385 = vector.broadcast %cst_265 : f32 to vector<16x17xf32>
    %386 = vector.extract_strided_slice %308 {offsets = [0, 17], sizes = [16, 239], strides = [1, 1]} : vector<16x256xf32> to vector<16x239xf32>
    %387 = tpu.concatenate %386, %385 in 1 : vector<16x239xf32>, vector<16x17xf32> -> vector<16x256xf32>
    %c8_266 = arith.constant 8 : index
    %c0_267 = arith.constant 0 : index
    %388 = vector.load %arg20[%c8_266, %c0_267] : memref<9x256xf32, #tpu.memory_space<vmem>>, vector<1x256xf32>
    %389 = vector.broadcast %388 : vector<1x256xf32> to vector<16x256xf32>
    %390 = arith.mulf %387, %389 : vector<16x256xf32>
    %c8_268 = arith.constant 8 : index
    %c0_269 = arith.constant 0 : index
    %c0_270 = arith.constant 0 : index
    %391 = vector.load %arg17[%c8_268, %c0_269, %c0_270] : memref<9x18x16xf32, #tpu.memory_space<vmem>>, vector<1x18x16xf32>
    %392 = vector.shape_cast %391 : vector<1x18x16xf32> to vector<18x16xf32>
    %cst_271 = arith.constant dense<0.000000e+00> : vector<18x256xf32>
    %393 = tpu.matmul %392, %390, %cst_271 {dimension_numbers = #tpu.dot_dimension_numbers<[1], [0], [0], [1], [0, 0, 1, 1], [], []>} : vector<18x16xf32>, vector<16x256xf32>, vector<18x256xf32> -> vector<18x256xf32>
    %394 = arith.addf %384, %393 : vector<18x256xf32>
    %cst_272 = arith.constant 0.000000e+00 : f32
    %395 = vector.broadcast %cst_272 : f32 to vector<18x256xf32>
    %396 = arith.maximumf %394, %395 : vector<18x256xf32>
    %c0_273 = arith.constant 0 : index
    %c0_274 = arith.constant 0 : index
    %397 = vector.load %arg18[%c0_273, %c0_274] : memref<18x1xf32, #tpu.memory_space<vmem>>, vector<18x1xf32>
    %398 = vector.broadcast %397 : vector<18x1xf32> to vector<18x256xf32>
    %399 = arith.mulf %396, %398 : vector<18x256xf32>
    %c0_275 = arith.constant 0 : index
    %c0_276 = arith.constant 0 : index
    %400 = vector.load %arg19[%c0_275, %c0_276] : memref<18x1xf32, #tpu.memory_space<vmem>>, vector<18x1xf32>
    %401 = vector.broadcast %400 : vector<18x1xf32> to vector<18x256xf32>
    %402 = arith.addf %399, %401 : vector<18x256xf32>
    %cst_277 = arith.constant 0.000000e+00 : f32
    %403 = vector.broadcast %cst_277 : f32 to vector<18x17xf32>
    %404 = vector.extract_strided_slice %402 {offsets = [0, 0], sizes = [18, 239], strides = [1, 1]} : vector<18x256xf32> to vector<18x239xf32>
    %405 = tpu.concatenate %403, %404 in 1 : vector<18x17xf32>, vector<18x239xf32> -> vector<18x256xf32>
    %c0_278 = arith.constant 0 : index
    %c0_279 = arith.constant 0 : index
    %406 = vector.load %arg20[%c0_278, %c0_279] : memref<9x256xf32, #tpu.memory_space<vmem>>, vector<1x256xf32>
    %407 = vector.broadcast %406 : vector<1x256xf32> to vector<18x256xf32>
    %408 = arith.mulf %405, %407 : vector<18x256xf32>
    %c0_280 = arith.constant 0 : index
    %c0_281 = arith.constant 0 : index
    %c0_282 = arith.constant 0 : index
    %409 = vector.load %arg21[%c0_280, %c0_281, %c0_282] : memref<9x20x18xf32, #tpu.memory_space<vmem>>, vector<1x20x18xf32>
    %410 = vector.shape_cast %409 : vector<1x20x18xf32> to vector<20x18xf32>
    %cst_283 = arith.constant dense<0.000000e+00> : vector<20x256xf32>
    %411 = tpu.matmul %410, %408, %cst_283 {dimension_numbers = #tpu.dot_dimension_numbers<[1], [0], [0], [1], [0, 0, 1, 1], [], []>} : vector<20x18xf32>, vector<18x256xf32>, vector<20x256xf32> -> vector<20x256xf32>
    %cst_284 = arith.constant 0.000000e+00 : f32
    %412 = vector.broadcast %cst_284 : f32 to vector<18x16xf32>
    %413 = vector.extract_strided_slice %402 {offsets = [0, 0], sizes = [18, 240], strides = [1, 1]} : vector<18x256xf32> to vector<18x240xf32>
    %414 = tpu.concatenate %412, %413 in 1 : vector<18x16xf32>, vector<18x240xf32> -> vector<18x256xf32>
    %c1_285 = arith.constant 1 : index
    %c0_286 = arith.constant 0 : index
    %415 = vector.load %arg20[%c1_285, %c0_286] : memref<9x256xf32, #tpu.memory_space<vmem>>, vector<1x256xf32>
    %416 = vector.broadcast %415 : vector<1x256xf32> to vector<18x256xf32>
    %417 = arith.mulf %414, %416 : vector<18x256xf32>
    %c1_287 = arith.constant 1 : index
    %c0_288 = arith.constant 0 : index
    %c0_289 = arith.constant 0 : index
    %418 = vector.load %arg21[%c1_287, %c0_288, %c0_289] : memref<9x20x18xf32, #tpu.memory_space<vmem>>, vector<1x20x18xf32>
    %419 = vector.shape_cast %418 : vector<1x20x18xf32> to vector<20x18xf32>
    %cst_290 = arith.constant dense<0.000000e+00> : vector<20x256xf32>
    %420 = tpu.matmul %419, %417, %cst_290 {dimension_numbers = #tpu.dot_dimension_numbers<[1], [0], [0], [1], [0, 0, 1, 1], [], []>} : vector<20x18xf32>, vector<18x256xf32>, vector<20x256xf32> -> vector<20x256xf32>
    %421 = arith.addf %411, %420 : vector<20x256xf32>
    %cst_291 = arith.constant 0.000000e+00 : f32
    %422 = vector.broadcast %cst_291 : f32 to vector<18x15xf32>
    %423 = vector.extract_strided_slice %402 {offsets = [0, 0], sizes = [18, 241], strides = [1, 1]} : vector<18x256xf32> to vector<18x241xf32>
    %424 = tpu.concatenate %422, %423 in 1 : vector<18x15xf32>, vector<18x241xf32> -> vector<18x256xf32>
    %c2_292 = arith.constant 2 : index
    %c0_293 = arith.constant 0 : index
    %425 = vector.load %arg20[%c2_292, %c0_293] : memref<9x256xf32, #tpu.memory_space<vmem>>, vector<1x256xf32>
    %426 = vector.broadcast %425 : vector<1x256xf32> to vector<18x256xf32>
    %427 = arith.mulf %424, %426 : vector<18x256xf32>
    %c2_294 = arith.constant 2 : index
    %c0_295 = arith.constant 0 : index
    %c0_296 = arith.constant 0 : index
    %428 = vector.load %arg21[%c2_294, %c0_295, %c0_296] : memref<9x20x18xf32, #tpu.memory_space<vmem>>, vector<1x20x18xf32>
    %429 = vector.shape_cast %428 : vector<1x20x18xf32> to vector<20x18xf32>
    %cst_297 = arith.constant dense<0.000000e+00> : vector<20x256xf32>
    %430 = tpu.matmul %429, %427, %cst_297 {dimension_numbers = #tpu.dot_dimension_numbers<[1], [0], [0], [1], [0, 0, 1, 1], [], []>} : vector<20x18xf32>, vector<18x256xf32>, vector<20x256xf32> -> vector<20x256xf32>
    %431 = arith.addf %421, %430 : vector<20x256xf32>
    %cst_298 = arith.constant 0.000000e+00 : f32
    %432 = vector.broadcast %cst_298 : f32 to vector<18x1xf32>
    %433 = vector.extract_strided_slice %402 {offsets = [0, 0], sizes = [18, 255], strides = [1, 1]} : vector<18x256xf32> to vector<18x255xf32>
    %434 = tpu.concatenate %432, %433 in 1 : vector<18x1xf32>, vector<18x255xf32> -> vector<18x256xf32>
    %c3_299 = arith.constant 3 : index
    %c0_300 = arith.constant 0 : index
    %435 = vector.load %arg20[%c3_299, %c0_300] : memref<9x256xf32, #tpu.memory_space<vmem>>, vector<1x256xf32>
    %436 = vector.broadcast %435 : vector<1x256xf32> to vector<18x256xf32>
    %437 = arith.mulf %434, %436 : vector<18x256xf32>
    %c3_301 = arith.constant 3 : index
    %c0_302 = arith.constant 0 : index
    %c0_303 = arith.constant 0 : index
    %438 = vector.load %arg21[%c3_301, %c0_302, %c0_303] : memref<9x20x18xf32, #tpu.memory_space<vmem>>, vector<1x20x18xf32>
    %439 = vector.shape_cast %438 : vector<1x20x18xf32> to vector<20x18xf32>
    %cst_304 = arith.constant dense<0.000000e+00> : vector<20x256xf32>
    %440 = tpu.matmul %439, %437, %cst_304 {dimension_numbers = #tpu.dot_dimension_numbers<[1], [0], [0], [1], [0, 0, 1, 1], [], []>} : vector<20x18xf32>, vector<18x256xf32>, vector<20x256xf32> -> vector<20x256xf32>
    %441 = arith.addf %431, %440 : vector<20x256xf32>
    %c4_305 = arith.constant 4 : index
    %c0_306 = arith.constant 0 : index
    %442 = vector.load %arg20[%c4_305, %c0_306] : memref<9x256xf32, #tpu.memory_space<vmem>>, vector<1x256xf32>
    %443 = vector.broadcast %442 : vector<1x256xf32> to vector<18x256xf32>
    %444 = arith.mulf %402, %443 : vector<18x256xf32>
    %c4_307 = arith.constant 4 : index
    %c0_308 = arith.constant 0 : index
    %c0_309 = arith.constant 0 : index
    %445 = vector.load %arg21[%c4_307, %c0_308, %c0_309] : memref<9x20x18xf32, #tpu.memory_space<vmem>>, vector<1x20x18xf32>
    %446 = vector.shape_cast %445 : vector<1x20x18xf32> to vector<20x18xf32>
    %cst_310 = arith.constant dense<0.000000e+00> : vector<20x256xf32>
    %447 = tpu.matmul %446, %444, %cst_310 {dimension_numbers = #tpu.dot_dimension_numbers<[1], [0], [0], [1], [0, 0, 1, 1], [], []>} : vector<20x18xf32>, vector<18x256xf32>, vector<20x256xf32> -> vector<20x256xf32>
    %448 = arith.addf %441, %447 : vector<20x256xf32>
    %cst_311 = arith.constant 0.000000e+00 : f32
    %449 = vector.broadcast %cst_311 : f32 to vector<18x1xf32>
    %450 = vector.extract_strided_slice %402 {offsets = [0, 1], sizes = [18, 255], strides = [1, 1]} : vector<18x256xf32> to vector<18x255xf32>
    %451 = tpu.concatenate %450, %449 in 1 : vector<18x255xf32>, vector<18x1xf32> -> vector<18x256xf32>
    %c5_312 = arith.constant 5 : index
    %c0_313 = arith.constant 0 : index
    %452 = vector.load %arg20[%c5_312, %c0_313] : memref<9x256xf32, #tpu.memory_space<vmem>>, vector<1x256xf32>
    %453 = vector.broadcast %452 : vector<1x256xf32> to vector<18x256xf32>
    %454 = arith.mulf %451, %453 : vector<18x256xf32>
    %c5_314 = arith.constant 5 : index
    %c0_315 = arith.constant 0 : index
    %c0_316 = arith.constant 0 : index
    %455 = vector.load %arg21[%c5_314, %c0_315, %c0_316] : memref<9x20x18xf32, #tpu.memory_space<vmem>>, vector<1x20x18xf32>
    %456 = vector.shape_cast %455 : vector<1x20x18xf32> to vector<20x18xf32>
    %cst_317 = arith.constant dense<0.000000e+00> : vector<20x256xf32>
    %457 = tpu.matmul %456, %454, %cst_317 {dimension_numbers = #tpu.dot_dimension_numbers<[1], [0], [0], [1], [0, 0, 1, 1], [], []>} : vector<20x18xf32>, vector<18x256xf32>, vector<20x256xf32> -> vector<20x256xf32>
    %458 = arith.addf %448, %457 : vector<20x256xf32>
    %cst_318 = arith.constant 0.000000e+00 : f32
    %459 = vector.broadcast %cst_318 : f32 to vector<18x15xf32>
    %460 = vector.extract_strided_slice %402 {offsets = [0, 15], sizes = [18, 241], strides = [1, 1]} : vector<18x256xf32> to vector<18x241xf32>
    %461 = tpu.concatenate %460, %459 in 1 : vector<18x241xf32>, vector<18x15xf32> -> vector<18x256xf32>
    %c6_319 = arith.constant 6 : index
    %c0_320 = arith.constant 0 : index
    %462 = vector.load %arg20[%c6_319, %c0_320] : memref<9x256xf32, #tpu.memory_space<vmem>>, vector<1x256xf32>
    %463 = vector.broadcast %462 : vector<1x256xf32> to vector<18x256xf32>
    %464 = arith.mulf %461, %463 : vector<18x256xf32>
    %c6_321 = arith.constant 6 : index
    %c0_322 = arith.constant 0 : index
    %c0_323 = arith.constant 0 : index
    %465 = vector.load %arg21[%c6_321, %c0_322, %c0_323] : memref<9x20x18xf32, #tpu.memory_space<vmem>>, vector<1x20x18xf32>
    %466 = vector.shape_cast %465 : vector<1x20x18xf32> to vector<20x18xf32>
    %cst_324 = arith.constant dense<0.000000e+00> : vector<20x256xf32>
    %467 = tpu.matmul %466, %464, %cst_324 {dimension_numbers = #tpu.dot_dimension_numbers<[1], [0], [0], [1], [0, 0, 1, 1], [], []>} : vector<20x18xf32>, vector<18x256xf32>, vector<20x256xf32> -> vector<20x256xf32>
    %468 = arith.addf %458, %467 : vector<20x256xf32>
    %cst_325 = arith.constant 0.000000e+00 : f32
    %469 = vector.broadcast %cst_325 : f32 to vector<18x16xf32>
    %470 = vector.extract_strided_slice %402 {offsets = [0, 16], sizes = [18, 240], strides = [1, 1]} : vector<18x256xf32> to vector<18x240xf32>
    %471 = tpu.concatenate %470, %469 in 1 : vector<18x240xf32>, vector<18x16xf32> -> vector<18x256xf32>
    %c7_326 = arith.constant 7 : index
    %c0_327 = arith.constant 0 : index
    %472 = vector.load %arg20[%c7_326, %c0_327] : memref<9x256xf32, #tpu.memory_space<vmem>>, vector<1x256xf32>
    %473 = vector.broadcast %472 : vector<1x256xf32> to vector<18x256xf32>
    %474 = arith.mulf %471, %473 : vector<18x256xf32>
    %c7_328 = arith.constant 7 : index
    %c0_329 = arith.constant 0 : index
    %c0_330 = arith.constant 0 : index
    %475 = vector.load %arg21[%c7_328, %c0_329, %c0_330] : memref<9x20x18xf32, #tpu.memory_space<vmem>>, vector<1x20x18xf32>
    %476 = vector.shape_cast %475 : vector<1x20x18xf32> to vector<20x18xf32>
    %cst_331 = arith.constant dense<0.000000e+00> : vector<20x256xf32>
    %477 = tpu.matmul %476, %474, %cst_331 {dimension_numbers = #tpu.dot_dimension_numbers<[1], [0], [0], [1], [0, 0, 1, 1], [], []>} : vector<20x18xf32>, vector<18x256xf32>, vector<20x256xf32> -> vector<20x256xf32>
    %478 = arith.addf %468, %477 : vector<20x256xf32>
    %cst_332 = arith.constant 0.000000e+00 : f32
    %479 = vector.broadcast %cst_332 : f32 to vector<18x17xf32>
    %480 = vector.extract_strided_slice %402 {offsets = [0, 17], sizes = [18, 239], strides = [1, 1]} : vector<18x256xf32> to vector<18x239xf32>
    %481 = tpu.concatenate %480, %479 in 1 : vector<18x239xf32>, vector<18x17xf32> -> vector<18x256xf32>
    %c8_333 = arith.constant 8 : index
    %c0_334 = arith.constant 0 : index
    %482 = vector.load %arg20[%c8_333, %c0_334] : memref<9x256xf32, #tpu.memory_space<vmem>>, vector<1x256xf32>
    %483 = vector.broadcast %482 : vector<1x256xf32> to vector<18x256xf32>
    %484 = arith.mulf %481, %483 : vector<18x256xf32>
    %c8_335 = arith.constant 8 : index
    %c0_336 = arith.constant 0 : index
    %c0_337 = arith.constant 0 : index
    %485 = vector.load %arg21[%c8_335, %c0_336, %c0_337] : memref<9x20x18xf32, #tpu.memory_space<vmem>>, vector<1x20x18xf32>
    %486 = vector.shape_cast %485 : vector<1x20x18xf32> to vector<20x18xf32>
    %cst_338 = arith.constant dense<0.000000e+00> : vector<20x256xf32>
    %487 = tpu.matmul %486, %484, %cst_338 {dimension_numbers = #tpu.dot_dimension_numbers<[1], [0], [0], [1], [0, 0, 1, 1], [], []>} : vector<20x18xf32>, vector<18x256xf32>, vector<20x256xf32> -> vector<20x256xf32>
    %488 = arith.addf %478, %487 : vector<20x256xf32>
    %c0_339 = arith.constant 0 : index
    %c0_340 = arith.constant 0 : index
    %489 = vector.load %arg22[%c0_339, %c0_340] : memref<20x1xf32, #tpu.memory_space<vmem>>, vector<20x1xf32>
    %490 = vector.broadcast %489 : vector<20x1xf32> to vector<20x256xf32>
    %491 = arith.addf %488, %490 : vector<20x256xf32>
    %c0_341 = arith.constant 0 : index
    %c0_342 = arith.constant 0 : index
    %492 = vector.load %arg23[%c0_341, %c0_342] : memref<256x1xf32, #tpu.memory_space<vmem>>, vector<256x1xf32>
    %cst_343 = arith.constant dense<0.000000e+00> : vector<20x1xf32>
    %493 = tpu.matmul %491, %492, %cst_343 {dimension_numbers = #tpu.dot_dimension_numbers<[1], [0], [0], [1], [0, 0, 1, 1], [], []>} : vector<20x256xf32>, vector<256x1xf32>, vector<20x1xf32> -> vector<20x1xf32>
    %c0_344 = arith.constant 0 : index
    %c0_345 = arith.constant 0 : index
    %494 = vector.load %arg25[%c0_344, %c0_345] : memref<400x20xf32, #tpu.memory_space<vmem>>, vector<400x20xf32>
    %cst_346 = arith.constant dense<0.000000e+00> : vector<400x1xf32>
    %495 = tpu.matmul %494, %493, %cst_346 {dimension_numbers = #tpu.dot_dimension_numbers<[1], [0], [0], [1], [0, 0, 1, 1], [], []>} : vector<400x20xf32>, vector<20x1xf32>, vector<400x1xf32> -> vector<400x1xf32>
    %c0_347 = arith.constant 0 : index
    %c0_348 = arith.constant 0 : index
    %496 = vector.load %arg26[%c0_347, %c0_348] : memref<400x2xf32, #tpu.memory_space<vmem>>, vector<400x2xf32>
    %c0_349 = arith.constant 0 : index
    %c0_350 = arith.constant 0 : index
    %497 = vector.load %arg24[%c0_349, %c0_350] : memref<2x1xf32, #tpu.memory_space<vmem>>, vector<2x1xf32>
    %cst_351 = arith.constant dense<0.000000e+00> : vector<400x1xf32>
    %498 = tpu.matmul %496, %497, %cst_351 {dimension_numbers = #tpu.dot_dimension_numbers<[1], [0], [0], [1], [0, 0, 1, 1], [], []>} : vector<400x2xf32>, vector<2x1xf32>, vector<400x1xf32> -> vector<400x1xf32>
    %499 = arith.addf %495, %498 : vector<400x1xf32>
    %c0_352 = arith.constant 0 : index
    %c0_353 = arith.constant 0 : index
    %500 = vector.load %arg27[%c0_352, %c0_353] : memref<400x1xf32, #tpu.memory_space<vmem>>, vector<400x1xf32>
    %501 = arith.addf %499, %500 : vector<400x1xf32>
    %cst_354 = arith.constant 0.000000e+00 : f32
    %502 = vector.broadcast %cst_354 : f32 to vector<400x1xf32>
    %503 = arith.maximumf %501, %502 : vector<400x1xf32>
    %c0_355 = arith.constant 0 : index
    %c0_356 = arith.constant 0 : index
    %504 = vector.load %arg28[%c0_355, %c0_356] : memref<300x400xf32, #tpu.memory_space<vmem>>, vector<300x400xf32>
    %cst_357 = arith.constant dense<0.000000e+00> : vector<300x1xf32>
    %505 = tpu.matmul %504, %503, %cst_357 {dimension_numbers = #tpu.dot_dimension_numbers<[1], [0], [0], [1], [0, 0, 1, 1], [], []>} : vector<300x400xf32>, vector<400x1xf32>, vector<300x1xf32> -> vector<300x1xf32>
    %c0_358 = arith.constant 0 : index
    %c0_359 = arith.constant 0 : index
    %506 = vector.load %arg29[%c0_358, %c0_359] : memref<300x1xf32, #tpu.memory_space<vmem>>, vector<300x1xf32>
    %507 = arith.addf %505, %506 : vector<300x1xf32>
    %cst_360 = arith.constant 0.000000e+00 : f32
    %508 = vector.broadcast %cst_360 : f32 to vector<300x1xf32>
    %509 = arith.maximumf %507, %508 : vector<300x1xf32>
    %c0_361 = arith.constant 0 : index
    %c0_362 = arith.constant 0 : index
    %510 = vector.load %arg30[%c0_361, %c0_362] : memref<2x300xf32, #tpu.memory_space<vmem>>, vector<2x300xf32>
    %cst_363 = arith.constant dense<0.000000e+00> : vector<2x1xf32>
    %511 = tpu.matmul %510, %509, %cst_363 {dimension_numbers = #tpu.dot_dimension_numbers<[1], [0], [0], [1], [0, 0, 1, 1], [], []>} : vector<2x300xf32>, vector<300x1xf32>, vector<2x1xf32> -> vector<2x1xf32>
    %c0_364 = arith.constant 0 : index
    %c0_365 = arith.constant 0 : index
    %512 = vector.load %arg31[%c0_364, %c0_365] : memref<2x1xf32, #tpu.memory_space<vmem>>, vector<2x1xf32>
    %513 = arith.addf %511, %512 : vector<2x1xf32>
    %cst_366 = arith.constant 1.000000e+01 : f32
    %514 = vector.broadcast %cst_366 : f32 to vector<2x1xf32>
    %515 = arith.mulf %514, %513 : vector<2x1xf32>
    %516 = math.tanh %515 : vector<2x1xf32>
    %cst_367 = arith.constant 2.000000e+00 : f32
    %517 = vector.broadcast %cst_367 : f32 to vector<2x1xf32>
    %518 = arith.mulf %517, %516 : vector<2x1xf32>
    %c0_368 = arith.constant 0 : index
    %c0_369 = arith.constant 0 : index
    %519 = vector.load %arg32[%c0_368, %c0_369] : memref<2x1xf32, #tpu.memory_space<vmem>>, vector<2x1xf32>
    tpu.vector_store %arg32[%c0_368, %c0_369], %518 {strides = array<i32>} : memref<2x1xf32, #tpu.memory_space<vmem>>, vector<2x1xf32>,
    return
  }
  func.func @transform_0(%arg0: i32) -> (i32, i32) {
    %c0_i32 = arith.constant 0 : i32
    %c0_i32_0 = arith.constant 0 : i32
    %c0_i32_1 = arith.constant 0 : i32
    return %c0_i32, %c0_i32_0 : i32, i32
  }
  func.func @transform_1(%arg0: i32) -> (i32, i32, i32) {
    %c0_i32 = arith.constant 0 : i32
    %c0_i32_0 = arith.constant 0 : i32
    %c0_i32_1 = arith.constant 0 : i32
    %c0_i32_2 = arith.constant 0 : i32
    return %c0_i32, %c0_i32_0, %c0_i32_1 : i32, i32, i32
  }
  func.func @transform_2(%arg0: i32) -> (i32, i32) {
    %c0_i32 = arith.constant 0 : i32
    %c0_i32_0 = arith.constant 0 : i32
    %c0_i32_1 = arith.constant 0 : i32
    return %c0_i32, %c0_i32_0 : i32, i32
  }
  func.func @transform_3(%arg0: i32) -> (i32, i32) {
    %c0_i32 = arith.constant 0 : i32
    %c0_i32_0 = arith.constant 0 : i32
    %c0_i32_1 = arith.constant 0 : i32
    return %c0_i32, %c0_i32_0 : i32, i32
  }
  func.func @transform_4(%arg0: i32) -> (i32, i32, i32) {
    %c0_i32 = arith.constant 0 : i32
    %c0_i32_0 = arith.constant 0 : i32
    %c0_i32_1 = arith.constant 0 : i32
    %c0_i32_2 = arith.constant 0 : i32
    return %c0_i32, %c0_i32_0, %c0_i32_1 : i32, i32, i32
  }
  func.func @transform_5(%arg0: i32) -> (i32, i32) {
    %c0_i32 = arith.constant 0 : i32
    %c0_i32_0 = arith.constant 0 : i32
    %c0_i32_1 = arith.constant 0 : i32
    return %c0_i32, %c0_i32_0 : i32, i32
  }
  func.func @transform_6(%arg0: i32) -> (i32, i32) {
    %c0_i32 = arith.constant 0 : i32
    %c0_i32_0 = arith.constant 0 : i32
    %c0_i32_1 = arith.constant 0 : i32
    return %c0_i32, %c0_i32_0 : i32, i32
  }
  func.func @transform_7(%arg0: i32) -> (i32, i32, i32) {
    %c0_i32 = arith.constant 0 : i32
    %c0_i32_0 = arith.constant 0 : i32
    %c0_i32_1 = arith.constant 0 : i32
    %c0_i32_2 = arith.constant 0 : i32
    return %c0_i32, %c0_i32_0, %c0_i32_1 : i32, i32, i32
  }
  func.func @transform_8(%arg0: i32) -> (i32, i32) {
    %c0_i32 = arith.constant 0 : i32
    %c0_i32_0 = arith.constant 0 : i32
    %c0_i32_1 = arith.constant 0 : i32
    return %c0_i32, %c0_i32_0 : i32, i32
  }
  func.func @transform_9(%arg0: i32) -> (i32, i32) {
    %c0_i32 = arith.constant 0 : i32
    %c0_i32_0 = arith.constant 0 : i32
    %c0_i32_1 = arith.constant 0 : i32
    return %c0_i32, %c0_i32_0 : i32, i32
  }
  func.func @transform_10(%arg0: i32) -> (i32, i32) {
    %c0_i32 = arith.constant 0 : i32
    %c0_i32_0 = arith.constant 0 : i32
    %c0_i32_1 = arith.constant 0 : i32
    return %c0_i32, %c0_i32_0 : i32, i32
  }
  func.func @transform_11(%arg0: i32) -> (i32, i32) {
    %c0_i32 = arith.constant 0 : i32
    %c0_i32_0 = arith.constant 0 : i32
    %c0_i32_1 = arith.constant 0 : i32
    return %c0_i32, %c0_i32_0 : i32, i32
  }
  func.func @transform_12(%arg0: i32) -> (i32, i32) {
    %c0_i32 = arith.constant 0 : i32
    %c0_i32_0 = arith.constant 0 : i32
    %c0_i32_1 = arith.constant 0 : i32
    return %c0_i32, %c0_i32_0 : i32, i32
  }
  func.func @transform_13(%arg0: i32) -> (i32, i32) {
    %c0_i32 = arith.constant 0 : i32
    %c0_i32_0 = arith.constant 0 : i32
    %c0_i32_1 = arith.constant 0 : i32
    return %c0_i32, %c0_i32_0 : i32, i32
  }
  func.func @transform_14(%arg0: i32) -> (i32, i32) {
    %c0_i32 = arith.constant 0 : i32
    %c0_i32_0 = arith.constant 0 : i32
    %c0_i32_1 = arith.constant 0 : i32
    return %c0_i32, %c0_i32_0 : i32, i32
  }
  func.func @transform_15(%arg0: i32) -> (i32, i32) {
    %c0_i32 = arith.constant 0 : i32
    %c0_i32_0 = arith.constant 0 : i32
    %c0_i32_1 = arith.constant 0 : i32
    return %c0_i32, %c0_i32_0 : i32, i32
  }
  func.func @transform_16(%arg0: i32) -> (i32, i32, i32) {
    %c0_i32 = arith.constant 0 : i32
    %c0_i32_0 = arith.constant 0 : i32
    %c0_i32_1 = arith.constant 0 : i32
    %c0_i32_2 = arith.constant 0 : i32
    return %c0_i32, %c0_i32_0, %c0_i32_1 : i32, i32, i32
  }
  func.func @transform_17(%arg0: i32) -> (i32, i32) {
    %c0_i32 = arith.constant 0 : i32
    %c0_i32_0 = arith.constant 0 : i32
    %c0_i32_1 = arith.constant 0 : i32
    return %c0_i32, %c0_i32_0 : i32, i32
  }
  func.func @transform_18(%arg0: i32) -> (i32, i32) {
    %c0_i32 = arith.constant 0 : i32
    %c0_i32_0 = arith.constant 0 : i32
    %c0_i32_1 = arith.constant 0 : i32
    return %c0_i32, %c0_i32_0 : i32, i32
  }
  func.func @transform_19(%arg0: i32) -> (i32, i32) {
    %c0_i32 = arith.constant 0 : i32
    %c0_i32_0 = arith.constant 0 : i32
    %c0_i32_1 = arith.constant 0 : i32
    return %c0_i32, %c0_i32_0 : i32, i32
  }
  func.func @transform_20(%arg0: i32) -> (i32, i32, i32) {
    %c0_i32 = arith.constant 0 : i32
    %c0_i32_0 = arith.constant 0 : i32
    %c0_i32_1 = arith.constant 0 : i32
    %c0_i32_2 = arith.constant 0 : i32
    return %c0_i32, %c0_i32_0, %c0_i32_1 : i32, i32, i32
  }
  func.func @transform_21(%arg0: i32) -> (i32, i32) {
    %c0_i32 = arith.constant 0 : i32
    %c0_i32_0 = arith.constant 0 : i32
    %c0_i32_1 = arith.constant 0 : i32
    return %c0_i32, %c0_i32_0 : i32, i32
  }
  func.func @transform_22(%arg0: i32) -> (i32, i32) {
    %c0_i32 = arith.constant 0 : i32
    %c0_i32_0 = arith.constant 0 : i32
    %c0_i32_1 = arith.constant 0 : i32
    return %c0_i32, %c0_i32_0 : i32, i32
  }
  func.func @transform_23(%arg0: i32) -> (i32, i32) {
    %c0_i32 = arith.constant 0 : i32
    %c0_i32_0 = arith.constant 0 : i32
    %c0_i32_1 = arith.constant 0 : i32
    return %c0_i32, %c0_i32_0 : i32, i32
  }
  func.func @transform_24(%arg0: i32) -> (i32, i32) {
    %c0_i32 = arith.constant 0 : i32
    %c0_i32_0 = arith.constant 0 : i32
    %c0_i32_1 = arith.constant 0 : i32
    return %c0_i32, %c0_i32_0 : i32, i32
  }
  func.func @transform_25(%arg0: i32) -> (i32, i32) {
    %c0_i32 = arith.constant 0 : i32
    %c0_i32_0 = arith.constant 0 : i32
    %c0_i32_1 = arith.constant 0 : i32
    return %c0_i32, %c0_i32_0 : i32, i32
  }
  func.func @transform_26(%arg0: i32) -> (i32, i32) {
    %c0_i32 = arith.constant 0 : i32
    %c0_i32_0 = arith.constant 0 : i32
    %c0_i32_1 = arith.constant 0 : i32
    return %c0_i32, %c0_i32_0 : i32, i32
  }
  func.func @transform_27(%arg0: i32) -> (i32, i32) {
    %c0_i32 = arith.constant 0 : i32
    %c0_i32_0 = arith.constant 0 : i32
    %c0_i32_1 = arith.constant 0 : i32
    return %c0_i32, %c0_i32_0 : i32, i32
  }
  func.func @transform_28(%arg0: i32) -> (i32, i32) {
    %c0_i32 = arith.constant 0 : i32
    %c0_i32_0 = arith.constant 0 : i32
    %c0_i32_1 = arith.constant 0 : i32
    return %c0_i32, %c0_i32_0 : i32, i32
  }
  func.func @transform_29(%arg0: i32) -> (i32, i32) {
    %c0_i32 = arith.constant 0 : i32
    %c0_i32_0 = arith.constant 0 : i32
    %c0_i32_1 = arith.constant 0 : i32
    return %c0_i32, %c0_i32_0 : i32, i32
  }
  func.func @transform_30(%arg0: i32) -> (i32, i32) {
    %c0_i32 = arith.constant 0 : i32
    %c0_i32_0 = arith.constant 0 : i32
    %c0_i32_1 = arith.constant 0 : i32
    return %c0_i32, %c0_i32_0 : i32, i32
  }
  func.func @transform_31(%arg0: i32) -> (i32, i32) {
    %c0_i32 = arith.constant 0 : i32
    %c0_i32_0 = arith.constant 0 : i32
    %c0_i32_1 = arith.constant 0 : i32
    return %c0_i32, %c0_i32_0 : i32, i32
  }
}

</mosaic_0001>

<bundles_post_ra>
// kernel: actor_forward.1
= control target key start
LH: loop header
LB: loop body
LE: loop exit
PB: predicated region body
PF: predicated region fallthrough
CT: control target
= control target key end

     0   :  { %s19146_s6 = smov 28   ;;  %v23401_v4 = vmov 0.0   ;;  %s19148_s7 = smov 29   ;;  %v19155_v8 = vmov 0   ;;  %v170_v9 = vlaneseq  ;;  %vm225_vm0 = vcmask 228352   ;;  %s23391_s0 = inlined_call_operand.smem [shape: u32[32], index: -1, kind: input, shape index: {}] }
   0x1   :  { %s19198_s5 = sld [smem:[%s23391_s0]]   ;;  %378 = vmatprep.mubr.f32.mxu1 %v23401_v4  ;;  %520 = vmatprep.mubr.f32.mxu0 %v23401_v4  ;;  %s19149_s8 = smov 27   ;;  %vm292_vm1 = vcmask 1042432   ;;  %vm152_vm2 = vcmask 236544   ;;  %vm288_vm3 = vcmask 23552   ;;  %vm23474_vm4 = vmmov 0  }
   0x2   :  { %s19150_s9 = smov 1   ;;  %s19151_s10 = smov 127   ;;  %19058 = vset.pattern.permute.xlu1 %v19155_v8  ;;  %19059 = vset.pattern.permute.xlu0 %v19155_v8  ;;  %v19313_v12 = vshrl.u32 %v170_v9, 7  ;;  %vm916_vm5 = vcmask 220160   ;;  %vm1308_vm6 = vcmask 7168   ;;  %vm2060_vm7 = vcmask 1039360  }
   0x3   :  { %s19152_s11 = smov 101   ;;  %s19153_s12 = smov 100   ;;  %vm2453_vm8 = vcmask 826368   ;;  %vm2074_vm9 = vcmask 121856   ;;  %vm2466_vm10 = vcmask 957440   ;;  %vm2845_vm11 = vcmask 818176  }
   0x4   :  { %s19154_s13 = smov 99   ;;  %s19156_s14 = smov 2   ;;  %23477 = vst [vmem:[#allocation2_spill] sm:$0xff] %v19313_v12  ;;  %v19318_v15 = vsub.s32 5, %v19313_v12  ;;  %v19321_v19 = vsub.s32 1, %v19313_v12  ;;  %v19327_v21 = vsub.s32 4, %v19313_v12 }
   0x5   :  { %s16483_s17 = sld [smem:[%s23391_s0 + %s19156_s14]]   ;;  %s19157_s18 = smov 3   ;;  %v19330_v22 = vsub.s32 0, %v19313_v12  ;;  %v19342_v28 = vsub.s32 2, %v19313_v12  ;;  %v19349_v31 = vsub.s32 3, %v19313_v12  ;;  %v19361_v36 = vsub.s32 6, %v19313_v12 }
   0x6   :  { %s16484_s21 = sld [smem:[%s23391_s0 + %s19157_s18]]   ;;  %s19158_s22 = smov 10   ;;  %23478 = vst [vmem:[#allocation3_spill] sm:$0xff] %v19321_v19  ;;  %vm2858_vm12 = vcmask 949248   ;;  %vm3237_vm13 = vcmask 809984   ;;  %vm3250_vm14 = vcmask 941056   ;;  %vm3723_vm15 = vcmask 64512  }
   0x7   :  { %v19201_v0 = vld [vmem:[%s19198_s5 + $0x10] sm:$0x77]  ;;  %v19204_v1 = vld [vmem:[%s19198_s5] sm:$0x77]  ;;  %v19213_v3 = vld [vmem:[%s19198_s5 + $0x8] sm:$0x77]  ;;  %s19309_s25 = sld [smem:[%s23391_s0 + %s19158_s22]]  }
   0x8   :  { %221 = vrot.lane.b32.xlu0 %v19201_v0, %s19146_s6  ;;  %213 = vrot.lane.b32.xlu1 %v19204_v1, %s19146_s6  ;;  %v139_v2 = vcombine.high %v19201_v0, %v19201_v0  ;;  %v138_v5 = vcombine.high %v19213_v3, %v19213_v3  ;;  %v137_v6 = vcombine.high %v19204_v1, %v19204_v1  ;;  %v19254_v7 = vld [vmem:[%s19198_s5 + $0x18] sm:$0x7]  ;;  %s19336_s28 = sld [smem:[%s23391_s0 + %s19150_s9]]   ;;  %s19160_s29 = smov 5  }
   0x9   :  { %23480 = vst [vmem:[#allocation5_spill] sm:$0xff] %v19330_v22  ;;  %s16486_s2 = sld [smem:[%s23391_s0 + %s19160_s29]]   ;;  %s19161_s3 = smov 6  }
   0xa   :  { %s16487_s14 = sld [smem:[%s23391_s0 + %s19161_s3]]   ;;  %s19162_s15 = smov 4  }
   0xb   :  { %v3622_v10 = vld [vmem:[%s16483_s17] sm:$0xff]  ;;  %s20080_s18 = sld [smem:[%s23391_s0 + %s19162_s15]]   ;;  %s19163_s19 = smov 7  }
   0xc   :  { %223 = vrot.lane.b32.xlu0 %v139_v2, %s19146_s6  ;;  %140 = vrot.lane.b32.xlu1 %v19204_v1, %s19148_s7  ;;  %v3635_v11 = vld [vmem:[%s16484_s21] sm:$0xff]  ;;  %s20669_s22 = sld [smem:[%s23391_s0 + %s19163_s19]]   ;;  %s19166_s26 = smov 9  }
   0xd   :  { %v16513_v13 = vld [vmem:[%s19309_s25 + $0x1] ss:$8 sm:$0xf]  ;;  %v166_v24 = vld [vmem:[%s19309_s25] ss:$8 sm:$0xf]  ;;  %s20982_s29 = sld [smem:[%s23391_s0 + %s19166_s26]]  }
   0xe   :  { %v16514_v14 = vld [vmem:[%s19309_s25 + $0x1] ss:$8 sm:$0x70]  ;;  %v167_v25 = vld [vmem:[%s19309_s25] ss:$8 sm:$0x70] }
   0xf   :  { %v242_v18 = vor.u32 %v16514_v14, %v16513_v13  ;;  %v19354_v33 = vor.u32 %v167_v25, %v166_v24  ;;  %v16515_v48 = vld [vmem:[%s19336_s28 + $0x8] sm:$0xff]  ;;  %s19167_s30 = smov 11   ;;  %s19168_s4 = smov 13  }
  0x10   :  { %219 = vrot.lane.b32.xlu1 %v138_v5, %s19146_s6  ;;  %215 = vrot.lane.b32.xlu0 %v137_v6, %s19146_s6  ;;  %v16538_v61 = vld [vmem:[%s19309_s25 + $0x2] ss:$8 sm:$0xf]  ;;  %s21528_s3 = sld [smem:[%s23391_s0 + %s19167_s30]]   ;;  %s19169_s16 = smov 14  }
  0x11   :  { %v19324_v20 = vrot.slane %v242_v18, %v19318_v15  ;;  %v19346_v30 = vrot.slane %v242_v18, %v19327_v21  ;;  %v19352_v32 = vrot.slane %v242_v18, %v19321_v19  ;;  %v19357_v34 = vrot.slane %v242_v18, %v19330_v22  ;;  %s16494_s15 = sld [smem:[%s23391_s0 + %s19168_s4]]   ;;  %s19174_s30 = smov 17  }
  0x12   :  { %v19366_v40 = vrot.slane %v242_v18, %v19342_v28  ;;  %v19371_v43 = vrot.slane %v242_v18, %v19349_v31  ;;  %v19376_v45 = vrot.slane %v19354_v33, %v19321_v19  ;;  %v19380_v46 = vrot.slane %v19354_v33, %v19330_v22  ;;  %s16495_s19 = sld [smem:[%s23391_s0 + %s19169_s16]]   ;;  %s19175_s1 = smov 113  }
  0x13   :  { %23479 = vst [vmem:[#allocation4_spill] sm:$0xff] %v19324_v20  ;;  %23481 = vst [vmem:[#allocation6_spill] sm:$0xff] %v19346_v30  ;;  %v19385_v49 = vrot.slane %v242_v18, %v19361_v36  ;;  %v19392_v53 = vrot.slane %v19354_v33, %v19318_v15  ;;  %v19437_v18 = vrot.slane %v19354_v33, %v19342_v28  ;;  %s16498_s5 = sld [smem:[%s23391_s0 + %s19174_s30]]  }
  0x14   :  { %217 = vrot.lane.b32.xlu1 %v19213_v3, %s19146_s6  ;;  %142 = vrot.lane.b32.xlu0 %v137_v6, %s19148_s7  ;;  %23482 = vst [vmem:[#allocation7_spill] sm:$0xff] %v19352_v32  ;;  %23483 = vst [vmem:[#allocation8_spill] sm:$0xff] %v19357_v34 }
  0x15   :  { %23484 = vst [vmem:[#allocation9_spill] sm:$0xff] %v19376_v45  ;;  %23485 = vst [vmem:[#allocation10_spill] sm:$0xff] %v19380_v46 }
  0x16   :  { %23486 = vst [vmem:[#allocation11_spill] sm:$0xff] %v19392_v53 }
  0x18   :  { %150 = vrot.lane.b32.xlu1 %v139_v2, %s19148_s7  ;;  %148 = vrot.lane.b32.xlu0 %v19201_v0, %s19148_s7 }
  0x1c   :  { %904 = vrot.lane.b32.xlu1 %v19204_v1, %s19149_s8  ;;  %146 = vrot.lane.b32.xlu0 %v138_v5, %s19148_s7 }
  0x20   :  { %144 = vrot.lane.b32.xlu1 %v19213_v3, %s19148_s7  ;;  %906 = vrot.lane.b32.xlu0 %v137_v6, %s19149_s8 }
  0x24   :  { %914 = vrot.lane.b32.xlu1 %v139_v2, %s19149_s8  ;;  %912 = vrot.lane.b32.xlu0 %v19201_v0, %s19149_s8 }
  0x28   :  { %1294 = vrot.lane.b32.xlu1 %v19204_v1, %s19150_s9  ;;  %910 = vrot.lane.b32.xlu0 %v138_v5, %s19149_s8 }
  0x2c   :  { %908 = vrot.lane.b32.xlu1 %v19213_v3, %s19149_s8  ;;  %1296 = vrot.lane.b32.xlu0 %v137_v6, %s19150_s9 }
  0x30   :  { %1304 = vrot.lane.b32.xlu1 %v139_v2, %s19150_s9  ;;  %1302 = vrot.lane.b32.xlu0 %v19201_v0, %s19150_s9 }
  0x34   :  { %1298 = vrot.lane.b32.xlu1 %v19213_v3, %s19150_s9  ;;  %1300 = vrot.lane.b32.xlu0 %v138_v5, %s19150_s9 }
  0x38   :  { %2048 = vrot.lane.b32.xlu1 %v137_v6, %s19151_s10  ;;  %1306 = vrot.lane.b32.xlu0 %v19254_v7, %s19150_s9 }
  0x3c   :  { %2046 = vrot.lane.b32.xlu1 %v19204_v1, %s19151_s10  ;;  %2050 = vrot.lane.b32.xlu0 %v19213_v3, %s19151_s10 }
  0x40   :  { %2058 = vrot.lane.b32.xlu1 %v19254_v7, %s19151_s10  ;;  %2056 = vrot.lane.b32.xlu0 %v139_v2, %s19151_s10 }
  0x44   :  { %2441 = vrot.lane.b32.xlu1 %v137_v6, %s19152_s11  ;;  %2054 = vrot.lane.b32.xlu0 %v19201_v0, %s19151_s10 }
  0x48   :  { %2439 = vrot.lane.b32.xlu1 %v19204_v1, %s19152_s11  ;;  %2443 = vrot.lane.b32.xlu0 %v19213_v3, %s19152_s11 }
  0x4c   :  { %2449 = vrot.lane.b32.xlu1 %v139_v2, %s19152_s11  ;;  %2052 = vrot.lane.b32.xlu0 %v138_v5, %s19151_s10 }
  0x50   :  { %2447 = vrot.lane.b32.xlu1 %v19201_v0, %s19152_s11  ;;  %2451 = vrot.lane.b32.xlu0 %v19254_v7, %s19152_s11 }
  0x54   :  { %2835 = vrot.lane.b32.xlu1 %v19213_v3, %s19153_s12  ;;  %2833 = vrot.lane.b32.xlu0 %v137_v6, %s19153_s12 }
  0x58   :  { %2445 = vrot.lane.b32.xlu1 %v138_v5, %s19152_s11  ;;  %2831 = vrot.lane.b32.xlu0 %v19204_v1, %s19153_s12 }
  0x5c   :  { %2843 = vrot.lane.b32.xlu1 %v19254_v7, %s19153_s12  ;;  %2841 = vrot.lane.b32.xlu0 %v139_v2, %s19153_s12 }
  0x60   :  { %3225 = vrot.lane.b32.xlu1 %v137_v6, %s19154_s13  ;;  %2839 = vrot.lane.b32.xlu0 %v19201_v0, %s19153_s12 }
  0x64   :  { %3223 = vrot.lane.b32.xlu1 %v19204_v1, %s19154_s13  ;;  %3227 = vrot.lane.b32.xlu0 %v19213_v3, %s19154_s13 }
  0x68   :  { %3233 = vrot.lane.b32.xlu1 %v139_v2, %s19154_s13  ;;  %2837 = vrot.lane.b32.xlu0 %v138_v5, %s19153_s12  ;;  %v16539_v2 = vld [vmem:[%s19309_s25 + $0x2] ss:$8 sm:$0x70] }
  0x6c   :  { %3229 = vrot.lane.b32.xlu1 %v138_v5, %s19154_s13  ;;  %3235 = vrot.lane.b32.xlu0 %v19254_v7, %s19154_s13  ;;  %v19411_v5 = vld [vmem:[%s19336_s28] sm:$0xff] }
  0x70   :  { %3231 = vrot.lane.b32.xlu0 %v19201_v0, %s19154_s13  ;;  %3625 = vperm.xlu1 %19058, %v3622_v10   ;;  %v19422_v10 = vrot.slane %v19354_v33, %v19327_v21 }
  0x72   :  { %23487 = vst [vmem:[#allocation12_spill] sm:$0xff] %v19422_v10 }
  0x74   :  { %3638 = vperm.xlu0 %19059, %v3635_v11   ;;  %v19425_v11 = vor.u32 %v16539_v2, %v16538_v61 }
  0x76   :  { %v19445_v24 = vrot.slane %v19425_v11, %v19321_v19  ;;  %v19450_v25 = vrot.slane %v19425_v11, %v19330_v22  ;;  %v19494_v61 = vrot.slane %v19425_v11, %v19327_v21 }
  0x78   :  { %23488 = vst [vmem:[#allocation13_spill] sm:$0xff] %v19445_v24 }
  0x7a   :  { %v222_v16 = vpop.permute.xlu0 %221  ;;  %v214_v17 = vpop.permute.xlu1 %213 }
  0x7b   :  { %v238_v35 = vsel %vm225_vm0, 0.0, %v214_v17 }
  0x7c   :  { %v279_v47 = vmul.f32 %v19357_v34, %v238_v35  ;;  %v19457_v35 = vrot.slane %v19354_v33, %v19361_v36 }
  0x7e   :  { %v224_v23 = vpop.permute.xlu0 %223  ;;  %v141_v26 = vpop.permute.xlu1 %140 }
  0x7f   :  { %v230_v27 = vsel %vm225_vm0, %v222_v16, %v224_v23  ;;  %v165_v50 = vsel %vm152_vm2, 0.0, %v141_v26  ;;  %v285_v6 = vmul.f32 %v19385_v49, %v224_v23  ;;  %v19441_v23 = vrot.slane %v19354_v33, %v19349_v31 }
  0x80   :  { %v284_v29 = vmul.f32 %v19324_v20, %v230_v27  ;;  %v205_v60 = vmul.f32 %v19380_v46, %v165_v50 }
  0x82   :  { %16522 = vmatprep.subr.msk.mxu0 %vm292_vm1, %v284_v29  ;;  %v220_v37 = vpop.permute.xlu1 %219  ;;  %v216_v38 = vpop.permute.xlu0 %215 }
  0x83   :  { %v229_v39 = vsel %vm225_vm0, %v220_v37, %v222_v16  ;;  %v226_v41 = vsel %vm225_vm0, %v214_v17, %v216_v38 }
  0x84   :  { %v283_v42 = vmul.f32 %v19346_v30, %v229_v39  ;;  %v280_v44 = vmul.f32 %v19352_v32, %v226_v41  ;;  %v16566_v41 = vld [vmem:[%s19309_s25 + $0x4] ss:$8 sm:$0xf] }
  0x86   :  { %16523 = vmatpush1.msk.msra.mxu0 %vm292_vm1, %v283_v42  ;;  %v218_v51 = vpop.permute.xlu1 %217  ;;  %16516 = vmatprep.subr.msk.mxu1 %vm292_vm1, %v280_v44  ;;  %v143_v52 = vpop.permute.xlu0 %142  ;;  %v16567_v42 = vld [vmem:[%s19309_s25 + $0x4] ss:$8 sm:$0x70] }
  0x87   :  { %v227_v54 = vsel %vm225_vm0, %v216_v38, %v218_v51  ;;  %v228_v55 = vsel %vm225_vm0, %v218_v51, %v220_v37  ;;  %v153_v56 = vsel %vm152_vm2, %v141_v26, %v143_v52  ;;  %16517 = vmatpush1.msk.msra.mxu1 %vm292_vm1, %v279_v47  ;;  %16524 = vmatmul.mubr.msk.f32.vlgmr.msra.gmra.mrb[0].mxu0 %vm288_vm3, %v16515_v48  ;;  %v16552_v51 = vld [vmem:[%s19309_s25 + $0x3] ss:$8 sm:$0xf] }
  0x88   :  { %v281_v57 = vmul.f32 %v19366_v40, %v227_v54  ;;  %v282_v58 = vmul.f32 %v19371_v43, %v228_v55  ;;  %v206_v59 = vmul.f32 %v19376_v45, %v153_v56  ;;  %16518 = vmatmul.mubr.msk.f32.vlgmr.msra.gmra.mrb[0].mxu1 %vm288_vm3, %v16515_v48  ;;  %685 = vmatprep.mubr.f32.mxu0 %v23401_v4  ;;  %v16553_v55 = vld [vmem:[%s19309_s25 + $0x3] ss:$8 sm:$0x70] }
  0x89   :  { %449 = vmatprep.mubr.f32.mxu1 %v23401_v4  ;;  %v19480_v56 = vld [vmem:[%s19336_s28 + $0x10] sm:$0xff] }
  0x8a   :  { %v151_v62 = vpop.permute.xlu1 %150  ;;  %16519 = vmatprep.subr.msk.mxu1 %vm292_vm1, %v282_v58  ;;  %16527 = vmatprep.subr.msk.mxu0 %vm292_vm1, %v206_v59  ;;  %v149_v63 = vpop.permute.xlu0 %148 }
  0x8b   :  { %v157_v8 = vsel %vm152_vm2, %v149_v63, %v151_v62  ;;  %16520 = vmatpush1.msk.msra.mxu1 %vm292_vm1, %v281_v57  ;;  %16528 = vmatpush1.msk.msra.mxu0 %vm292_vm1, %v205_v60  ;;  %v19482_v57 = vor.u32 %v16567_v42, %v16566_v41  ;;  %v211_v58 = vmul.f32 %v19457_v35, %v151_v62 }
  0x8c   :  { %v210_v9 = vmul.f32 %v19392_v53, %v157_v8  ;;  %17423 = vmatprep.subr.mxu1 %v23401_v4  ;;  %16521 = vmatmul.mubr.msk.f32.vlgmr.msra.gmra.mrb[2].mxu1 %vm288_vm3, %v16515_v48  ;;  %v19497_v62 = vor.u32 %v16553_v55, %v16552_v51 }
  0x8d   :  { %17424 = vmatpush3.msk.msra.mxu1 %vm292_vm1, %v285_v6  ;;  %16529 = vmatmul.mubr.msk.f32.vlgmr.msra.gmra.mrb[2].mxu0 %vm288_vm3, %v19411_v5  ;;  %v19506_v6 = vrot.slane %v19482_v57, %v19330_v22  ;;  %v19510_v8 = vrot.slane %v19482_v57, %v19321_v19  ;;  %v19566_v55 = vrot.slane %v19482_v57, %v19342_v28 }
  0x8e   :  { %v905_v13 = vpop.permute.xlu1 %904  ;;  %16533 = vmatprep.subr.msk.mxu0 %vm292_vm1, %v210_v9  ;;  %v147_v14 = vpop.permute.xlu0 %146  ;;  %17425 = vmatprep.mubr.msk.f32.mxu1 %vm23474_vm4, %v23401_v4 }
  0x8f   :  { %v156_v16 = vsel %vm152_vm2, %v147_v14, %v149_v63  ;;  %827 = vmatprep.mubr.f32.mxu0 %v23401_v4  ;;  %v929_v26 = vsel %vm916_vm5, 0.0, %v905_v13  ;;  %v1720_v41 = vcombine.low %v19506_v6, %v19510_v8  ;;  %23490 = vst [vmem:[#allocation15_spill] sm:$0xff] %v19566_v55 }
  0x90   :  { %v209_v17 = vmul.f32 %v19422_v10, %v156_v16  ;;  %17426 = vmatmul.mubr.msk.f32.vlgmr.msra.gmra.mrb[4].mxu1 %vm288_vm3, %v16515_v48  ;;  %v19471_v48 = vrot.slane %v19425_v11, %v19318_v15  ;;  %v970_v50 = vmul.f32 %v19450_v25, %v929_v26  ;;  %v19521_v16 = vrot.slane %v19425_v11, %v19349_v31 }
  0x91   :  { %756 = vmatprep.mubr.f32.mxu1 %v23401_v4  ;;  %v19531_v26 = vrot.slane %v19497_v62, %v19330_v22 }
  0x92   :  { %v145_v27 = vpop.permute.xlu1 %144  ;;  %16534 = vmatpush1.msk.msra.mxu0 %vm292_vm1, %v209_v17  ;;  %v907_v29 = vpop.permute.xlu0 %906  ;;  %v19525_v17 = vrot.slane %v19497_v62, %v19321_v19 }
  0x93   :  { %v154_v37 = vsel %vm152_vm2, %v143_v52, %v145_v27  ;;  %v155_v38 = vsel %vm152_vm2, %v145_v27, %v147_v14  ;;  %v917_v39 = vsel %vm916_vm5, %v905_v13, %v907_v29  ;;  %16535 = vmatmul.mubr.msk.f32.vlgmr.msra.gmra.mrb[0].mxu0 %vm288_vm3, %v19411_v5  ;;  %v19517_v14 = vrot.slane %v19425_v11, %v19342_v28 }
  0x94   :  { %v207_v44 = vmul.f32 %v19437_v18, %v154_v37  ;;  %v208_v47 = vmul.f32 %v19441_v23, %v155_v38  ;;  %v971_v33 = vmul.f32 %v19445_v24, %v917_v39  ;;  %1067 = vmatprep.mubr.f32.mxu0 %v23401_v4  ;;  %v19536_v27 = vrot.slane %v19425_v11, %v19361_v36 }
  0x96   :  { %v915_v52 = vpop.permute.xlu1 %914  ;;  %16530 = vmatprep.subr.msk.mxu1 %vm292_vm1, %v208_v47  ;;  %16541 = vmatprep.subr.msk.mxu0 %vm292_vm1, %v971_v33  ;;  %v913_v54 = vpop.permute.xlu0 %912  ;;  %v19553_v47 = vrot.slane %v19482_v57, %v19318_v15 }
  0x97   :  { %v921_v59 = vsel %vm916_vm5, %v913_v54, %v915_v52  ;;  %16531 = vmatpush1.msk.msra.mxu1 %vm292_vm1, %v207_v44  ;;  %16542 = vmatpush1.msk.msra.mxu0 %vm292_vm1, %v970_v50 }
  0x98   :  { %v975_v60 = vmul.f32 %v19471_v48, %v921_v59  ;;  %17428 = vmatprep.subr.mxu1 %v23401_v4  ;;  %16532 = vmatmul.mubr.msk.f32.vlgmr.msra.gmra.mrb[2].mxu1 %vm288_vm3, %v19411_v5 }
  0x99   :  { %17429 = vmatpush3.msk.msra.mxu1 %vm292_vm1, %v211_v58  ;;  %16543 = vmatmul.mubr.msk.f32.vlgmr.msra.gmra.mrb[2].mxu0 %vm288_vm3, %v19480_v56  ;;  %v19570_v58 = vrot.slane %v19482_v57, %v19349_v31 }
  0x9a   :  { %v1295_v63 = vpop.permute.xlu1 %1294  ;;  %16547 = vmatprep.subr.msk.mxu0 %vm292_vm1, %v975_v60  ;;  %v911_v2 = vpop.permute.xlu0 %910  ;;  %17430 = vmatprep.mubr.msk.f32.mxu1 %vm23474_vm4, %v23401_v4 }
  0x9b   :  { %v920_v9 = vsel %vm916_vm5, %v911_v2, %v913_v54  ;;  %1209 = vmatprep.mubr.f32.mxu0 %v23401_v4  ;;  %v1322_v37 = vsel %vm1308_vm6, 0.0, %v1295_v63  ;;  %23491 = vst [vmem:[#allocation16_spill] sm:$0xff] %v19570_v58 }
  0x9c   :  { %v974_v13 = vmul.f32 %v19494_v61, %v920_v9  ;;  %17431 = vmatmul.mubr.msk.f32.vlgmr.msra.gmra.mrb[4].mxu1 %vm288_vm3, %v19411_v5  ;;  %v19544_v5 = vrot.slane %v19482_v57, %v19327_v21  ;;  %v1363_v54 = vmul.f32 %v19531_v26, %v1322_v37  ;;  %v1726_v9 = vmul.f32 %v1720_v41, %v19204_v1  ;;  %v16580_v41 = vld [vmem:[%s19309_s25 + $0x5] ss:$8 sm:$0xf] }
  0x9d   :  { %1138 = vmatprep.mubr.f32.mxu1 %v23401_v4  ;;  %v19594_v1 = vrot.slane %v19497_v62, %v19349_v31 }
  0x9e   :  { %v909_v38 = vpop.permute.xlu1 %908  ;;  %16548 = vmatpush1.msk.msra.mxu0 %vm292_vm1, %v974_v13  ;;  %v1297_v39 = vpop.permute.xlu0 %1296  ;;  %23489 = vst [vmem:[#allocation14_spill] sm:$0xff] %v19544_v5  ;;  %v976_v13 = vmul.f32 %v19536_v27, %v915_v52  ;;  %v19598_v52 = vrot.slane %v19497_v62, %v19327_v21 }
  0x9f   :  { %v918_v42 = vsel %vm916_vm5, %v907_v29, %v909_v38  ;;  %v919_v44 = vsel %vm916_vm5, %v909_v38, %v911_v2  ;;  %v1309_v11 = vsel %vm1308_vm6, %v1295_v63, %v1297_v39  ;;  %16549 = vmatmul.mubr.msk.f32.vlgmr.msra.gmra.mrb[0].mxu0 %vm288_vm3, %v19480_v56  ;;  %v19560_v29 = vrot.slane %v19497_v62, %v19318_v15  ;;  %v19579_v2 = vld [vmem:[%s19336_s28 + $0x18] sm:$0xff] }
  0xa0   :  { %v972_v33 = vmul.f32 %v19517_v14, %v918_v42  ;;  %v973_v50 = vmul.f32 %v19521_v16, %v919_v44  ;;  %v1364_v51 = vmul.f32 %v19525_v17, %v1309_v11  ;;  %1460 = vmatprep.mubr.f32.mxu0 %v23401_v4  ;;  %v19576_v63 = vrot.slane %v19497_v62, %v19342_v28  ;;  %v16581_v44 = vld [vmem:[%s19309_s25 + $0x5] ss:$8 sm:$0x70] }
  0xa1   :  { %v1722_v38 = vcombine.low %v19544_v5, %v19553_v47  ;;  %v1721_v11 = vcombine.low %v19566_v55, %v19570_v58 }
  0xa2   :  { %v1305_v59 = vpop.permute.xlu1 %1304  ;;  %16544 = vmatprep.subr.msk.mxu1 %vm292_vm1, %v973_v50  ;;  %16555 = vmatprep.subr.msk.mxu0 %vm292_vm1, %v1364_v51  ;;  %v1303_v60 = vpop.permute.xlu0 %1302  ;;  %v19612_v51 = vrot.slane %v19497_v62, %v19361_v36  ;;  %v19624_v62 = vor.u32 %v16581_v44, %v16580_v41 }
  0xa3   :  { %v1313_v37 = vsel %vm1308_vm6, %v1303_v60, %v1305_v59  ;;  %16545 = vmatpush1.msk.msra.mxu1 %vm292_vm1, %v972_v33  ;;  %16556 = vmatpush1.msk.msra.mxu0 %vm292_vm1, %v1363_v54  ;;  %v1736_v54 = vcombine.high %v1726_v9, %v1726_v9  ;;  %v1728_v55 = vmul.f32 %v1722_v38, %v19201_v0 }
  0xa4   :  { %v1368_v42 = vmul.f32 %v19560_v29, %v1313_v37  ;;  %17433 = vmatprep.subr.mxu1 %v23401_v4  ;;  %16546 = vmatmul.mubr.msk.f32.vlgmr.msra.gmra.mrb[2].mxu1 %vm288_vm3, %v19480_v56 }
  0xa5   :  { %17434 = vmatpush3.msk.msra.mxu1 %vm292_vm1, %v976_v13  ;;  %16557 = vmatmul.mubr.msk.f32.vlgmr.msra.gmra.mrb[2].mxu0 %vm288_vm3, %v19579_v2 }
  0xa6   :  { %v1299_v33 = vpop.permute.xlu1 %1298  ;;  %16561 = vmatprep.subr.msk.mxu0 %vm292_vm1, %v1368_v42  ;;  %v1301_v50 = vpop.permute.xlu0 %1300  ;;  %17435 = vmatprep.mubr.msk.f32.mxu1 %vm23474_vm4, %v23401_v4 }
  0xa7   :  { %v1310_v13 = vsel %vm1308_vm6, %v1297_v39, %v1299_v33  ;;  %v1311_v37 = vsel %vm1308_vm6, %v1299_v33, %v1301_v50  ;;  %v1312_v12 = vsel %vm1308_vm6, %v1301_v50, %v1303_v60  ;;  %1602 = vmatprep.mubr.f32.mxu0 %v23401_v4  ;;  %v1727_v39 = vmul.f32 %v1721_v11, %v19213_v3 }
  0xa8   :  { %v1365_v42 = vmul.f32 %v19576_v63, %v1310_v13  ;;  %v1366_v5 = vmul.f32 %v19594_v1, %v1311_v37  ;;  %v1367_v58 = vmul.f32 %v19598_v52, %v1312_v12  ;;  %17436 = vmatmul.mubr.msk.f32.vlgmr.msra.gmra.mrb[4].mxu1 %vm288_vm3, %v19480_v56  ;;  %v1738_v12 = vcombine.high %v1728_v55, %v1728_v55  ;;  %v16594_v37 = vld [vmem:[%s19309_s25 + $0x6] ss:$8 sm:$0xf] }
  0xa9   :  { %1531 = vmatprep.mubr.f32.mxu1 %v23401_v4  ;;  %v19639_v3 = vrot.slane %v19624_v62, %v19330_v22  ;;  %v19668_v13 = vrot.slane %v19624_v62, %v19318_v15 }
  0xaa   :  { %v2049_v60 = vpop.permute.xlu1 %2048  ;;  %16558 = vmatprep.subr.msk.mxu1 %vm292_vm1, %v1366_v5  ;;  %16562 = vmatpush1.msk.msra.mxu0 %vm292_vm1, %v1367_v58  ;;  %v1307_v0 = vpop.permute.xlu0 %1306  ;;  %v19643_v5 = vrot.slane %v19624_v62, %v19321_v19  ;;  %v16568_v58 = vld [vmem:[%s19336_s28 + $0x20] sm:$0xff] }
  0xab   :  { %v1314_v38 = vsel %vm1308_vm6, %v1305_v59, %v1307_v0  ;;  %16559 = vmatpush1.msk.msra.mxu1 %vm292_vm1, %v1365_v42  ;;  %16563 = vmatmul.mubr.msk.f32.vlgmr.msra.gmra.mrb[0].mxu0 %vm288_vm3, %v19579_v2  ;;  %23492 = vst [vmem:[#allocation17_spill] sm:$0xff] %v19639_v3  ;;  %v1737_v59 = vcombine.high %v1727_v39, %v1727_v39  ;;  %23493 = vst [vmem:[#allocation18_spill] sm:$0xff] %v19668_v13  ;;  %v16595_v42 = vld [vmem:[%s19309_s25 + $0x6] ss:$8 sm:$0x70] }
  0xac   :  { %v1369_v56 = vmul.f32 %v19612_v51, %v1314_v38  ;;  %17438 = vmatprep.subr.mxu1 %v23401_v4  ;;  %16569 = vmatprep.subr.msk.mxu0 %vm292_vm1, %v1736_v54 }
  0xad   :  { %16560 = vmatmul.mubr.msk.f32.vlgmr.msra.gmra.mrb[2].mxu1 %vm288_vm3, %v19579_v2  ;;  %16570 = vmatpush1.msk.msra.mxu0 %vm292_vm1, %v1726_v9  ;;  %v19660_v9 = vrot.slane %v19482_v57, %v19361_v36 }
  0xae   :  { %v2047_v41 = vpop.permute.xlu1 %2046  ;;  %17439 = vmatpush3.msk.msra.mxu1 %vm292_vm1, %v1369_v56  ;;  %1820 = vmatprep.mubr.f32.mxu0 %v23401_v4  ;;  %v19651_v44 = vpop.permute.xlu0 %2050  ;;  %v19693_v56 = vld [vmem:[%s19336_s28 + $0x28] sm:$0xff] }
  0xaf   :  { %v2061_v11 = vsel %vm2060_vm7, %v2047_v41, %v2049_v60  ;;  %v2062_v33 = vsel %vm2060_vm7, %v2049_v60, %v19651_v44  ;;  %16571 = vmatmul.mubr.msk.f32.vlgmr.msra.gmra.mrb[2].mxu0 %vm288_vm3, %v16568_v58  ;;  %16575 = vmatprep.subr.msk.mxu0 %vm292_vm1, %v1738_v12  ;;  %v1729_v0 = vmul.f32 %v19660_v9, %v19254_v7 }
  0xb0   :  { %v2116_v50 = vmul.f32 %v19639_v3, %v2061_v11  ;;  %v2117_v54 = vmul.f32 %v19643_v5, %v2062_v33  ;;  %16576 = vmatpush1.msk.msra.mxu0 %vm292_vm1, %v1728_v55  ;;  %1962 = vmatprep.mubr.f32.mxu0 %v23401_v4  ;;  %v19687_v12 = vrot.slane %v19624_v62, %v19327_v21 }
  0xb1   :  { %17440 = vmatprep.mubr.msk.f32.mxu1 %vm23474_vm4, %v23401_v4  ;;  %16572 = vmatprep.subr.msk.mxu1 %vm292_vm1, %v1737_v59 }
  0xb2   :  { %v2059_v57 = vpop.permute.xlu1 %2058  ;;  %16583 = vmatprep.subr.msk.mxu0 %vm292_vm1, %v2117_v54  ;;  %v2057_v60 = vpop.permute.xlu0 %2056  ;;  %17441 = vmatmul.mubr.msk.f32.vlgmr.msra.gmra.mrb[4].mxu1 %vm288_vm3, %v19579_v2  ;;  %23494 = vst [vmem:[#allocation19_spill] sm:$0xff] %v19687_v12  ;;  %v19690_v2 = vor.u32 %v16595_v42, %v16594_v37 }
  0xb3   :  { %v2066_v55 = vsel %vm2060_vm7, %v2057_v60, %v2059_v57  ;;  %16577 = vmatmul.mubr.msk.f32.vlgmr.msra.gmra.mrb[0].mxu0 %vm288_vm3, %v16568_v58  ;;  %16573 = vmatpush1.msk.msra.mxu1 %vm292_vm1, %v1727_v39 }
  0xb4   :  { %v2121_v38 = vmul.f32 %v19668_v13, %v2066_v55  ;;  %16584 = vmatpush1.msk.msra.mxu0 %vm292_vm1, %v2116_v50  ;;  %2213 = vmatprep.mubr.f32.mxu0 %v23401_v4  ;;  %v19706_v11 = vrot.slane %v19690_v2, %v19330_v22  ;;  %v19710_v33 = vrot.slane %v19690_v2, %v19321_v19 }
  0xb5   :  { %1891 = vmatprep.mubr.f32.mxu1 %v23401_v4  ;;  %17443 = vmatprep.subr.mxu1 %v23401_v4 }
  0xb6   :  { %v2442_v39 = vpop.permute.xlu1 %2441  ;;  %16589 = vmatprep.subr.msk.mxu0 %vm292_vm1, %v2121_v38  ;;  %v2055_v7 = vpop.permute.xlu0 %2054  ;;  %16574 = vmatmul.mubr.msk.f32.vlgmr.msra.gmra.mrb[2].mxu1 %vm288_vm3, %v16568_v58  ;;  %23495 = vst [vmem:[#allocation20_spill] sm:$0xff] %v19706_v11  ;;  %23496 = vst [vmem:[#allocation21_spill] sm:$0xff] %v19710_v33  ;;  %v16608_v38 = vld [vmem:[%s19309_s25 + $0x7] ss:$8 sm:$0xf] }
  0xb7   :  { %v2065_v59 = vsel %vm2060_vm7, %v2055_v7, %v2057_v60  ;;  %16585 = vmatmul.mubr.msk.f32.vlgmr.msra.gmra.mrb[2].mxu0 %vm288_vm3, %v19693_v56  ;;  %17444 = vmatpush3.msk.msra.mxu1 %vm292_vm1, %v1729_v0  ;;  %v19729_v0 = vrot.slane %v19624_v62, %v19342_v28 }
  0xb8   :  { %v2120_v41 = vmul.f32 %v19687_v12, %v2065_v59  ;;  %2355 = vmatprep.mubr.f32.mxu0 %v23401_v4  ;;  %17445 = vmatprep.mubr.msk.f32.mxu1 %vm23474_vm4, %v23401_v4  ;;  %v19739_v59 = vld [vmem:[%s19336_s28 + $0x30] sm:$0xff] }
  0xb9   :  { %23497 = vst [vmem:[#allocation22_spill] sm:$0xff] %v19729_v0 }
  0xba   :  { %v2440_v50 = vpop.permute.xlu1 %2439  ;;  %16590 = vmatpush1.msk.msra.mxu0 %vm292_vm1, %v2120_v41  ;;  %v19716_v54 = vpop.permute.xlu0 %2443  ;;  %17446 = vmatmul.mubr.msk.f32.vlgmr.msra.gmra.mrb[4].mxu1 %vm288_vm3, %v16568_v58  ;;  %v19733_v58 = vrot.slane %v19624_v62, %v19349_v31 }
  0xbb   :  { %v2454_v37 = vsel %vm2453_vm8, %v2440_v50, %v2442_v39  ;;  %v2455_v42 = vsel %vm2453_vm8, %v2442_v39, %v19716_v54  ;;  %16591 = vmatmul.mubr.msk.f32.vlgmr.msra.gmra.mrb[0].mxu0 %vm288_vm3, %v19693_v56  ;;  %2284 = vmatprep.mubr.f32.mxu1 %v23401_v4  ;;  %v16609_v39 = vld [vmem:[%s19309_s25 + $0x7] ss:$8 sm:$0x70] }
  0xbc   :  { %v2508_v60 = vmul.f32 %v19706_v11, %v2454_v37  ;;  %v2509_v55 = vmul.f32 %v19710_v33, %v2455_v42  ;;  %23498 = vst [vmem:[#allocation23_spill] sm:$0xff] %v19733_v58  ;;  %2605 = vmatprep.mubr.f32.mxu0 %v23401_v4  ;;  %v19744_v37 = vrot.slane %v19624_v62, %v19361_v36  ;;  %v2075_v4 = vsel %vm2074_vm9, %v2059_v57, 0.0 }
  0xbd   :  { %v19753_v13 = vor.u32 %v16609_v39, %v16608_v38  ;;  %v19759_v62 = vrot.slane %v19690_v2, %v19318_v15 }
  0xbe   :  { %v2450_v41 = vpop.permute.xlu1 %2449  ;;  %16597 = vmatprep.subr.msk.mxu0 %vm292_vm1, %v2509_v55  ;;  %v2053_v50 = vpop.permute.xlu0 %2052  ;;  %23499 = vst [vmem:[#allocation24_spill] sm:$0xff] %v19744_v37 }
  0xbf   :  { %v2063_v42 = vsel %vm2060_vm7, %v19651_v44, %v2053_v50  ;;  %v2064_v11 = vsel %vm2060_vm7, %v2053_v50, %v2055_v7  ;;  %16598 = vmatpush1.msk.msra.mxu0 %vm292_vm1, %v2508_v60  ;;  %23500 = vst [vmem:[#allocation25_spill] sm:$0xff] %v19759_v62  ;;  %v23501_v44 = vmov 0.0   ;;  %v19764_v7 = vrot.slane %v19690_v2, %v19327_v21 }
  0xc0   :  { %v2118_v33 = vmul.f32 %v19729_v0, %v2063_v42  ;;  %v2119_v12 = vmul.f32 %v19733_v58, %v2064_v11  ;;  %16599 = vmatmul.mubr.msk.f32.vlgmr.msra.gmra.mrb[2].mxu0 %vm288_vm3, %v19739_v59  ;;  %v2122_v60 = vmul.f32 %v19744_v37, %v2075_v4  ;;  %v19824_v0 = vrot.slane %v19753_v13, %v19318_v15  ;;  %v16623_v58 = vld [vmem:[%s19309_s25 + $0x38] ss:$8 sm:$0x70] }
  0xc1   :  { %2747 = vmatprep.mubr.f32.mxu0 %v23501_v44  ;;  %23502 = vst [vmem:[#allocation26_spill] sm:$0xff] %v19764_v7 }
  0xc2   :  { %v2448_v57 = vpop.permute.xlu1 %2447  ;;  %16586 = vmatprep.subr.msk.mxu1 %vm292_vm1, %v2119_v12  ;;  %v2452_v11 = vpop.permute.xlu0 %2451  ;;  %v19777_v12 = vrot.slane %v19753_v13, %v19321_v19  ;;  %23507 = vst [vmem:[#allocation31_spill] sm:$0xff] %v19824_v0 }
  0xc3   :  { %v2458_v55 = vsel %vm2453_vm8, %v2448_v57, %v2450_v41  ;;  %v2459_v38 = vsel %vm2453_vm8, %v2450_v41, %v2452_v11  ;;  %16587 = vmatpush1.msk.msra.mxu1 %vm292_vm1, %v2118_v33  ;;  %v19791_v11 = vrot.slane %v19690_v2, %v19342_v28 }
  0xc4   :  { %v2467_v39 = vsel %vm2466_vm10, %v2459_v38, 0.0  ;;  %17448 = vmatprep.subr.mxu1 %v23501_v44  ;;  %16588 = vmatmul.mubr.msk.f32.vlgmr.msra.gmra.mrb[2].mxu1 %vm288_vm3, %v19693_v56  ;;  %23503 = vst [vmem:[#allocation27_spill] sm:$0xff] %v19777_v12  ;;  %v2512_v33 = vmul.f32 %v19764_v7, %v2458_v55  ;;  %v19801_v55 = vrot.slane %v19753_v13, %v19330_v22 }
  0xc5   :  { %v2513_v4 = vmul.f32 %v19759_v62, %v2467_v39  ;;  %17449 = vmatpush3.msk.msra.mxu1 %vm292_vm1, %v2122_v60  ;;  %17450 = vmatprep.mubr.msk.f32.mxu1 %vm23474_vm4, %v23501_v44  ;;  %23504 = vst [vmem:[#allocation28_spill] sm:$0xff] %v19791_v11  ;;  %v19797_v60 = vrot.slane %v19690_v2, %v19349_v31 }
  0xc6   :  { %v19784_v41 = vpop.permute.xlu1 %2835  ;;  %v2834_v50 = vpop.permute.xlu0 %2833  ;;  %23506 = vst [vmem:[#allocation30_spill] sm:$0xff] %v19801_v55 }
  0xc7   :  { %v2847_v42 = vsel %vm2845_vm11, %v2834_v50, %v19784_v41  ;;  %16603 = vmatprep.subr.msk.mxu0 %vm292_vm1, %v2513_v4  ;;  %23505 = vst [vmem:[#allocation29_spill] sm:$0xff] %v19797_v60 }
  0xc8   :  { %v2901_v38 = vmul.f32 %v19777_v12, %v2847_v42  ;;  %16604 = vmatpush1.msk.msra.mxu0 %vm292_vm1, %v2512_v33  ;;  %17451 = vmatmul.mubr.msk.f32.vlgmr.msra.gmra.mrb[4].mxu1 %vm288_vm3, %v19693_v56  ;;  %v2500_v33 = vrot.slane %v19690_v2, %v19361_v36  ;;  %v16622_v2 = vld [vmem:[%s19309_s25 + $0x38] ss:$8 sm:$0xf] }
  0xc9   :  { %16605 = vmatmul.mubr.msk.f32.vlgmr.msra.gmra.mrb[0].mxu0 %vm288_vm3, %v19739_v59  ;;  %2676 = vmatprep.mubr.f32.mxu1 %v23501_v44 }
  0xca   :  { %v2446_v39 = vpop.permute.xlu1 %2445  ;;  %16611 = vmatprep.subr.msk.mxu0 %vm292_vm1, %v2901_v38  ;;  %v2832_v4 = vpop.permute.xlu0 %2831  ;;  %2997 = vmatprep.mubr.f32.mxu0 %v23501_v44  ;;  %v19820_v38 = vld [vmem:[%s19336_s28 + $0x38] sm:$0xff] }
  0xcb   :  { %v2456_v42 = vsel %vm2453_vm8, %v19716_v54, %v2446_v39  ;;  %v2457_v56 = vsel %vm2453_vm8, %v2446_v39, %v2448_v57  ;;  %v2846_v12 = vsel %vm2845_vm11, %v2832_v4, %v2834_v50  ;;  %v19830_v50 = vmul.f32 0.0, %v2500_v33 }
  0xcc   :  { %v2510_v7 = vmul.f32 %v19791_v11, %v2456_v42  ;;  %v2511_v62 = vmul.f32 %v19797_v60, %v2457_v56  ;;  %v2900_v37 = vmul.f32 %v19801_v55, %v2846_v12  ;;  %v19839_v4 = vrot.slane %v19753_v13, %v19327_v21 }
  0xcd   :  { %23508 = vst [vmem:[#allocation32_spill] sm:$0xff] %v19830_v50  ;;  %v19841_v42 = vor.u32 %v16623_v58, %v16622_v2 }
  0xce   :  { %v2844_v54 = vpop.permute.xlu1 %2843  ;;  %16600 = vmatprep.subr.msk.mxu1 %vm292_vm1, %v2511_v62  ;;  %16612 = vmatpush1.msk.msra.mxu0 %vm292_vm1, %v2900_v37  ;;  %v2842_v57 = vpop.permute.xlu0 %2841  ;;  %23509 = vst [vmem:[#allocation33_spill] sm:$0xff] %v19839_v4 }
  0xcf   :  { %v2851_v39 = vsel %vm2845_vm11, %v2842_v57, %v2844_v54  ;;  %16601 = vmatpush1.msk.msra.mxu1 %vm292_vm1, %v2510_v7  ;;  %16613 = vmatmul.mubr.msk.f32.vlgmr.msra.gmra.mrb[2].mxu0 %vm288_vm3, %v19820_v38  ;;  %v19857_v56 = vrot.slane %v19841_v42, %v19330_v22  ;;  %v19861_v2 = vrot.slane %v19841_v42, %v19321_v19 }
  0xd0   :  { %v2859_v12 = vsel %vm2858_vm12, %v2851_v39, 0.0  ;;  %3139 = vmatprep.mubr.f32.mxu0 %v23501_v44  ;;  %16602 = vmatmul.mubr.msk.f32.vlgmr.msra.gmra.mrb[2].mxu1 %vm288_vm3, %v19739_v59  ;;  %v19879_v19 = vrot.slane %v19753_v13, %v19349_v31 }
  0xd1   :  { %v2905_v37 = vmul.f32 %v19824_v0, %v2859_v12  ;;  %17453 = vmatprep.subr.mxu1 %v23501_v44  ;;  %17455 = vmatprep.mubr.msk.f32.mxu1 %vm23474_vm4, %v23501_v44  ;;  %23510 = vst [vmem:[#allocation34_spill] sm:$0xff] %v19857_v56  ;;  %23511 = vst [vmem:[#allocation35_spill] sm:$0xff] %v19861_v2 }
  0xd2   :  { %v3226_v62 = vpop.permute.xlu1 %3225  ;;  %v2840_v7 = vpop.permute.xlu0 %2839  ;;  %17454 = vmatpush3.msk.msra.mxu1 %vm292_vm1, %v19830_v50  ;;  %23513 = vst [vmem:[#allocation37_spill] sm:$0xff] %v19879_v19 }
  0xd3   :  { %v2850_v58 = vsel %vm2845_vm11, %v2840_v7, %v2842_v57  ;;  %16617 = vmatprep.subr.msk.mxu0 %vm292_vm1, %v2905_v37 }
  0xd4   :  { %v2904_v33 = vmul.f32 %v19839_v4, %v2850_v58  ;;  %17456 = vmatmul.mubr.msk.f32.vlgmr.msra.gmra.mrb[4].mxu1 %vm288_vm3, %v19739_v59  ;;  %v19875_v59 = vrot.slane %v19753_v13, %v19342_v28 }
  0xd5   :  { %3068 = vmatprep.mubr.f32.mxu1 %v23501_v44 }
  0xd6   :  { %v3224_v54 = vpop.permute.xlu1 %3223  ;;  %16618 = vmatpush1.msk.msra.mxu0 %vm292_vm1, %v2904_v33  ;;  %v3228_v57 = vpop.permute.xlu0 %3227  ;;  %23512 = vst [vmem:[#allocation36_spill] sm:$0xff] %v19875_v59  ;;  %v16624_v33 = vld [vmem:[%s19336_s28 + $0x40] sm:$0xff] }
  0xd7   :  { %v3238_v39 = vsel %vm3237_vm13, %v3224_v54, %v3226_v62  ;;  %v3239_v12 = vsel %vm3237_vm13, %v3226_v62, %v3228_v57  ;;  %16619 = vmatmul.mubr.msk.f32.vlgmr.msra.gmra.mrb[0].mxu0 %vm288_vm3, %v19820_v38  ;;  %v2892_v62 = vrot.slane %v19753_v13, %v19361_v36  ;;  %v19895_v13 = vrot.slane %v19841_v42, %v19318_v15 }
  0xd8   :  { %v3292_v37 = vmul.f32 %v19857_v56, %v3238_v39  ;;  %v3293_v58 = vmul.f32 %v19861_v2, %v3239_v12  ;;  %3389 = vmatprep.mubr.f32.mxu0 %v23501_v44  ;;  %v19909_v15 = vrot.slane %v19841_v42, %v19349_v31  ;;  %v3284_v31 = vrot.slane %v19841_v42, %v19361_v36 }
  0xd9   :  { %23514 = vst [vmem:[#allocation38_spill] sm:$0xff] %v19895_v13 }
  0xda   :  { %v3234_v54 = vpop.permute.xlu1 %3233  ;;  %16625 = vmatprep.subr.msk.mxu0 %vm292_vm1, %v3293_v58  ;;  %v2838_v39 = vpop.permute.xlu0 %2837  ;;  %v19897_v58 = vmul.f32 0.0, %v2892_v62  ;;  %23516 = vst [vmem:[#allocation40_spill] sm:$0xff] %v19909_v15  ;;  %v19917_v62 = vrot.slane %v19841_v42, %v19342_v28  ;;  %v19936_v36 = vmul.f32 0.0, %v3284_v31 }
  0xdb   :  { %v2848_v12 = vsel %vm2845_vm11, %v19784_v41, %v2838_v39  ;;  %v2849_v22 = vsel %vm2845_vm11, %v2838_v39, %v2840_v7  ;;  %16626 = vmatpush1.msk.msra.mxu0 %vm292_vm1, %v3292_v37 }
  0xdc   :  { %v2902_v56 = vmul.f32 %v19875_v59, %v2848_v12  ;;  %v2903_v2 = vmul.f32 %v19879_v19, %v2849_v22  ;;  %16627 = vmatmul.mubr.msk.f32.vlgmr.msra.gmra.mrb[2].mxu0 %vm288_vm3, %v16624_v33  ;;  %23515 = vst [vmem:[#allocation39_spill] sm:$0xff] %v19897_v58  ;;  %23518 = vst [vmem:[#allocation42_spill] sm:$0xff] %v19917_v62 }
  0xdd   :  { %3531 = vmatprep.mubr.f32.mxu0 %v23501_v44  ;;  %23519 = vst [vmem:[#allocation43_spill] sm:$0xff] %v19936_v36 }
  0xde   :  { %16614 = vmatprep.subr.msk.mxu1 %vm292_vm1, %v2903_v2  ;;  %v3236_v41 = vpop.permute.xlu0 %3235  ;;  %v3230_v7 = vpop.permute.xlu1 %3229  ;;  %v19913_v2 = vrot.slane %v19841_v42, %v19327_v21 }
  0xdf   :  { %v3243_v37 = vsel %vm3237_vm13, %v3234_v54, %v3236_v41  ;;  %16615 = vmatpush1.msk.msra.mxu1 %vm292_vm1, %v2902_v56  ;;  %v3240_v39 = vsel %vm3237_vm13, %v3228_v57, %v3230_v7 }
  0xe0   :  { %v3251_v22 = vsel %vm3250_vm14, %v3243_v37, 0.0  ;;  %16616 = vmatmul.mubr.msk.f32.vlgmr.msra.gmra.mrb[2].mxu1 %vm288_vm3, %v19820_v38  ;;  %17458 = vmatprep.subr.mxu1 %v23501_v44  ;;  %23517 = vst [vmem:[#allocation41_spill] sm:$0xff] %v19913_v2 }
  0xe1   :  { %v3297_v56 = vmul.f32 %v19895_v13, %v3251_v22  ;;  %17459 = vmatpush3.msk.msra.mxu1 %vm292_vm1, %v19897_v58  ;;  %17460 = vmatprep.mubr.msk.f32.mxu1 %vm23474_vm4, %v23501_v44  ;;  %v3294_v22 = vmul.f32 %v19917_v62, %v3240_v39 }
  0xe2   :  { %v3232_v12 = vpop.permute.xlu0 %3231 }
  0xe3   :  { %v3241_v21 = vsel %vm3237_vm13, %v3230_v7, %v3232_v12  ;;  %v3242_v41 = vsel %vm3237_vm13, %v3232_v12, %v3234_v54  ;;  %16631 = vmatprep.subr.msk.mxu0 %vm292_vm1, %v3297_v56 }
  0xe4   :  { %v3295_v28 = vmul.f32 %v19909_v15, %v3241_v21  ;;  %v3296_v37 = vmul.f32 %v19913_v2, %v3242_v41  ;;  %17461 = vmatmul.mubr.msk.f32.vlgmr.msra.gmra.mrb[4].mxu1 %vm288_vm3, %v19820_v38 }
  0xe5   :  { %3460 = vmatprep.mubr.f32.mxu1 %v23501_v44 }
  0xe6   :  { %16628 = vmatprep.subr.msk.mxu1 %vm292_vm1, %v3295_v28  ;;  %16632 = vmatpush1.msk.msra.mxu0 %vm292_vm1, %v3296_v37 }
  0xe7   :  { %16629 = vmatpush1.msk.msra.mxu1 %vm292_vm1, %v3294_v22  ;;  %16633 = vmatmul.mubr.msk.f32.vlgmr.msra.gmra.mrb[0].mxu0 %vm288_vm3, %v16624_v33 }
  0xe8   :  { %16630 = vmatmul.mubr.msk.f32.vlgmr.msra.gmra.mrb[2].mxu1 %vm288_vm3, %v16624_v33  ;;  %17463 = vmatprep.subr.mxu1 %v23501_v44 }
  0xe9   :  { %17464 = vmatpush3.msk.msra.mxu1 %vm292_vm1, %v19936_v36  ;;  %17465 = vmatprep.mubr.msk.f32.mxu1 %vm23474_vm4, %v23501_v44  ;;  %vm7084_vm1 = vcmask 1041408   ;;  %vm7077_vm4 = vcmask 80896  }
  0xea   :  { %3794 = vmatprep.mubr.f32.mxu0 %v23501_v44 }
  0xec   :  { %17466 = vmatmul.mubr.msk.f32.vlgmr.msra.gmra.mrb[4].mxu1 %vm288_vm3, %v16624_v33  ;;  %vm19164_vm3 = vmmov 1  }
  0xed   :  { %3871 = vmatprep.mubr.f32.mxu1 %v23501_v44 }
  0xef   :  { %v3626_v31 = vpop.permute.xlu1 %3625 }
  0xf3   :  { %v3639_v21 = vpop.permute.xlu0 %3638 }
 0x15b   :  { %v380_v38 = vpop.f32.mrb[0].mxu1 }
 0x15c   :  { %v382_v42 = vpop.f32.mrb[1].mxu1 }
 0x1af   :  { %v3391_v57 = vpop.f32.mrb[2].mxu0 }
 0x1b0   :  { %v18472_v54 = vadd.f32 %v3391_v57, %v380_v38  ;;  %v3393_v7 = vpop.f32.mrb[3].mxu0 }
 0x1b1   :  { %v18473_v56 = vadd.f32 %v3393_v7, %v382_v42 }
 0x1b2   :  { %v3615_v39 = vmax.f32 %v18472_v54, 0.0 }
 0x1b3   :  { %v3616_v12 = vmax.f32 %v18473_v56, 0.0 }
 0x1b4   :  { %v3628_v41 = vmul.f32 %v3626_v31, %v3615_v39 }
 0x1b5   :  { %v3629_v28 = vmul.f32 %v3626_v31, %v3616_v12 }
 0x1b6   :  { %v19951_v37 = vadd.f32 %v3639_v21, %v3628_v41 }
 0x1b7   :  { %v19955_v33 = vadd.f32 %v3639_v21, %v3629_v28 }
 0x1b8   :  { %3688 = vrot.lane.b32.xlu1 %v19951_v37, %s19146_s6 }
 0x1ba   :  { %v3533_v22 = vpop.f32.mrb[0].mxu0 }
 0x1bb   :  { %v3619_v2 = vmax.f32 %v3533_v22, 0.0  ;;  %v3462_v13 = vpop.f32.mrb[2].mxu1  ;;  %v3535_v36 = vpop.f32.mrb[1].mxu0 }
 0x1bc   :  { %v3620_v38 = vmax.f32 %v3535_v36, 0.0  ;;  %v3464_v57 = vpop.f32.mrb[3].mxu1  ;;  %3690 = vrot.lane.b32.xlu1 %v19955_v33, %s19146_s6 }
 0x1bd   :  { %v3632_v42 = vmul.f32 %v3626_v31, %v3619_v2  ;;  %v3618_v54 = vmax.f32 %v3464_v57, 0.0  ;;  %v3617_v2 = vmax.f32 %v3462_v13, 0.0 }
 0x1be   :  { %v3633_v7 = vmul.f32 %v3626_v31, %v3620_v38 }
 0x1bf   :  { %v19959_v56 = vadd.f32 %v3639_v21, %v3632_v42  ;;  %v3631_v39 = vmul.f32 %v3626_v31, %v3618_v54  ;;  %v3604_v12 = vpop.f32.mrb[4].mxu1  ;;  %v3630_v22 = vmul.f32 %v3626_v31, %v3617_v2  ;;  %v6906_v54 = vld [vmem:[%s16487_s14] sm:$0xff] }
 0x1c0   :  { %v19961_v41 = vadd.f32 %v3639_v21, %v3633_v7  ;;  %v17467_v28 = vpop.f32.mrb[5].mxu1  ;;  %v3621_v13 = vmax.f32 %v3604_v12, 0.0 }
 0x1c1   :  { %3696 = vrot.lane.b32.xlu0 %v19959_v56, %s19146_s6  ;;  %v19967_v36 = vadd.f32 %v3639_v21, %v3631_v39  ;;  %v19985_v38 = vadd.f32 %v3639_v21, %v3630_v22  ;;  %v6907_v39 = vld [vmem:[%s16487_s14 + $0x8] sm:$0x3]  ;;  %s19177_s14 = smov 111  }
 0x1c2   :  { %3698 = vrot.lane.b32.xlu1 %v19961_v41, %s19146_s6  ;;  %v3634_v57 = vmul.f32 %v3626_v31, %v3621_v13  ;;  %v6880_v31 = vld [vmem:[%s16486_s2] sm:$0xff] }
 0x1c4   :  { %v20015_v42 = vadd.f32 %v3639_v21, %v3634_v57  ;;  %v6881_v21 = vld [vmem:[%s16486_s2 + $0x8] sm:$0x3]  ;;  %v20087_v57 = vld [vmem:[%s20080_s18 + $0x10] sm:$0xff]  ;;  %s19176_s2 = smov 112  }
 0x1c5   :  { %3694 = vrot.lane.b32.xlu0 %v19967_v36, %s19146_s6 }
 0x1c6   :  { %3654 = vrot.lane.b32.xlu1 %v19951_v37, %s19148_s7 }
 0x1c9   :  { %3656 = vrot.lane.b32.xlu0 %v19955_v33, %s19148_s7 }
 0x1ca   :  { %3662 = vrot.lane.b32.xlu1 %v19959_v56, %s19148_s7 }
 0x1cd   :  { %3664 = vrot.lane.b32.xlu0 %v19961_v41, %s19148_s7 }
 0x1ce   :  { %3660 = vrot.lane.b32.xlu1 %v19967_v36, %s19148_s7 }
 0x1d1   :  { %4348 = vrot.lane.b32.xlu0 %v19951_v37, %s19149_s8 }
 0x1d2   :  { %4350 = vrot.lane.b32.xlu1 %v19955_v33, %s19149_s8 }
 0x1d5   :  { %3692 = vrot.lane.b32.xlu0 %v19985_v38, %s19146_s6 }
 0x1d6   :  { %4356 = vrot.lane.b32.xlu1 %v19959_v56, %s19149_s8 }
 0x1d9   :  { %4358 = vrot.lane.b32.xlu0 %v19961_v41, %s19149_s8 }
 0x1da   :  { %4354 = vrot.lane.b32.xlu1 %v19967_v36, %s19149_s8 }
 0x1dd   :  { %4710 = vrot.lane.b32.xlu0 %v19951_v37, %s19150_s9 }
 0x1de   :  { %4712 = vrot.lane.b32.xlu1 %v19955_v33, %s19150_s9 }
 0x1e1   :  { %3658 = vrot.lane.b32.xlu0 %v19985_v38, %s19148_s7 }
 0x1e2   :  { %4718 = vrot.lane.b32.xlu1 %v19959_v56, %s19150_s9 }
 0x1e5   :  { %4720 = vrot.lane.b32.xlu0 %v19961_v41, %s19150_s9 }
 0x1e6   :  { %4716 = vrot.lane.b32.xlu1 %v19967_v36, %s19150_s9 }
 0x1e9   :  { %4352 = vrot.lane.b32.xlu0 %v19985_v38, %s19149_s8 }
 0x1ea   :  { %4714 = vrot.lane.b32.xlu1 %v19985_v38, %s19150_s9 }
 0x1ed   :  { %5418 = vrot.lane.b32.xlu0 %v19955_v33, %s19151_s10 }
 0x1ee   :  { %5420 = vrot.lane.b32.xlu1 %v19985_v38, %s19151_s10 }
 0x1f1   :  { %5416 = vrot.lane.b32.xlu0 %v19951_v37, %s19151_s10 }
 0x1f2   :  { %4722 = vrot.lane.b32.xlu1 %v20015_v42, %s19150_s9 }
 0x1f5   :  { %5426 = vrot.lane.b32.xlu0 %v19961_v41, %s19151_s10 }
 0x1f6   :  { %5428 = vrot.lane.b32.xlu1 %v20015_v42, %s19151_s10 }
 0x1f9   :  { %5424 = vrot.lane.b32.xlu0 %v19959_v56, %s19151_s10 }
 0x1fa   :  { %5782 = vrot.lane.b32.xlu1 %v19955_v33, %s19152_s11 }
 0x1fd   :  { %5784 = vrot.lane.b32.xlu0 %v19985_v38, %s19152_s11 }
 0x1fe   :  { %5780 = vrot.lane.b32.xlu1 %v19951_v37, %s19152_s11 }
 0x201   :  { %5422 = vrot.lane.b32.xlu0 %v19967_v36, %s19151_s10 }
 0x202   :  { %5790 = vrot.lane.b32.xlu1 %v19961_v41, %s19152_s11 }
 0x205   :  { %5792 = vrot.lane.b32.xlu0 %v20015_v42, %s19152_s11 }
 0x206   :  { %5788 = vrot.lane.b32.xlu1 %v19959_v56, %s19152_s11 }
 0x209   :  { %5786 = vrot.lane.b32.xlu0 %v19967_v36, %s19152_s11 }
 0x20a   :  { %6144 = vrot.lane.b32.xlu1 %v19955_v33, %s19153_s12 }
 0x20d   :  { %6146 = vrot.lane.b32.xlu0 %v19985_v38, %s19153_s12 }
 0x20e   :  { %6142 = vrot.lane.b32.xlu1 %v19951_v37, %s19153_s12 }
 0x211   :  { %6152 = vrot.lane.b32.xlu0 %v19961_v41, %s19153_s12 }
 0x212   :  { %6154 = vrot.lane.b32.xlu1 %v20015_v42, %s19153_s12 }
 0x215   :  { %6150 = vrot.lane.b32.xlu0 %v19959_v56, %s19153_s12 }
 0x216   :  { %6148 = vrot.lane.b32.xlu1 %v19967_v36, %s19153_s12 }
 0x219   :  { %6506 = vrot.lane.b32.xlu0 %v19955_v33, %s19154_s13 }
 0x21a   :  { %6508 = vrot.lane.b32.xlu1 %v19985_v38, %s19154_s13 }
 0x21d   :  { %6504 = vrot.lane.b32.xlu0 %v19951_v37, %s19154_s13 }
 0x21e   :  { %6510 = vrot.lane.b32.xlu1 %v19967_v36, %s19154_s13 }
 0x221   :  { %6512 = vrot.lane.b32.xlu0 %v19959_v56, %s19154_s13 }
 0x222   :  { %6514 = vrot.lane.b32.xlu1 %v19961_v41, %s19154_s13 }
 0x225   :  { %6516 = vrot.lane.b32.xlu0 %v20015_v42, %s19154_s13 }
 0x226   :  { %6884 = vperm.xlu1 %19058, %v6880_v31  }
 0x229   :  { %6889 = vperm.xlu0 %19059, %v6881_v21  }
 0x22a   :  { %6910 = vperm.xlu1 %19058, %v6906_v54   ;;  %v3689_v7 = vpop.permute.xlu1 %3688 }
 0x22b   :  { %v3712_v12 = vsel %vm225_vm0, 0.0, %v3689_v7 }
 0x22c   :  { %v3713_v13 = vmul.f32 %v3712_v12, %v19357_v34 }
 0x22d   :  { %6915 = vperm.xlu0 %19059, %v6907_v39   ;;  %v20094_v39 = vld [vmem:[%s20080_s18 + $0x18] sm:$0x3] }
 0x22e   :  { %v3691_v28 = vpop.permute.xlu1 %3690 }
 0x22f   :  { %v3700_v2 = vsel %vm225_vm0, %v3689_v7, %v3691_v28 }
 0x230   :  { %v3714_v22 = vmul.f32 %v3700_v2, %v19352_v32 }
 0x232   :  { %3730 = vmatprep.subr.mxu0 %v3714_v22 }
 0x233   :  { %v3697_v31 = vpop.permute.xlu0 %3696  ;;  %3731 = vmatpush1.msra.mxu0 %v3713_v13 }
 0x234   :  { %16638 = vmatmul.mubr.msk.f32.vlgmr.msra.gmra.mrb[4].mxu0 %vm3723_vm15, %v20087_v57  ;;  %v3699_v21 = vpop.permute.xlu1 %3698 }
 0x235   :  { %v3704_v54 = vsel %vm225_vm0, %v3697_v31, %v3699_v21  ;;  %3800 = vmatprep.mubr.f32.mxu0 %v23501_v44 }
 0x236   :  { %v3718_v7 = vmul.f32 %v3704_v54, %v19324_v20 }
 0x237   :  { %v3695_v2 = vpop.permute.xlu0 %3694 }
 0x238   :  { %v3703_v12 = vsel %vm225_vm0, %v3695_v2, %v3697_v31  ;;  %16639 = vmatmul.mubr.msk.f32.gmra.mrb[6].mxu0 %vm3723_vm15, %v20094_v39  ;;  %3884 = vmatprep.subr.mxu0 %v3718_v7  ;;  %v3655_v22 = vpop.permute.xlu1 %3654 }
 0x239   :  { %v3717_v13 = vmul.f32 %v3703_v12, %v19346_v30  ;;  %3948 = vmatprep.mubr.f32.mxu0 %v23501_v44  ;;  %v3678_v34 = vsel %vm152_vm2, 0.0, %v3655_v22 }
 0x23a   :  { %v3679_v12 = vmul.f32 %v3678_v34, %v19380_v46 }
 0x23b   :  { %v20102_v32 = vpop.permute.xlu0 %3656  ;;  %3885 = vmatpush1.msra.mxu0 %v3717_v13 }
 0x23c   :  { %v3666_v54 = vsel %vm152_vm2, %v3655_v22, %v20102_v32  ;;  %16642 = vmatmul.mubr.msk.f32.vlgmr.msra.gmra.mrb[8].mxu0 %vm3723_vm15, %v20087_v57  ;;  %v3663_v31 = vpop.permute.xlu1 %3662 }
 0x23d   :  { %3954 = vmatprep.mubr.f32.mxu0 %v23501_v44  ;;  %v3680_v7 = vmul.f32 %v3666_v54, %v19376_v45  ;;  %v20122_v45 = vld [vmem:[%s20080_s18] sm:$0xff] }
 0x23f   :  { %v20112_v20 = vpop.permute.xlu0 %3664  ;;  %4042 = vmatprep.subr.mxu0 %v3680_v7 }
 0x240   :  { %v3670_v13 = vsel %vm152_vm2, %v3663_v31, %v20112_v20  ;;  %16643 = vmatmul.mubr.msk.f32.gmra.mrb[10].mxu0 %vm3723_vm15, %v20094_v39  ;;  %v3661_v22 = vpop.permute.xlu1 %3660 }
 0x241   :  { %4043 = vmatpush1.msra.mxu0 %v3679_v12  ;;  %v3669_v30 = vsel %vm152_vm2, %v3661_v22, %v3663_v31  ;;  %4106 = vmatprep.mubr.f32.mxu0 %v23501_v44  ;;  %v3684_v54 = vmul.f32 %v3670_v13, %v19392_v53  ;;  %v20133_v31 = vld [vmem:[%s20080_s18 + $0x8] sm:$0x3] }
 0x242   :  { %v3683_v34 = vmul.f32 %v3669_v30, %v19422_v10 }
 0x243   :  { %v4349_v7 = vpop.permute.xlu0 %4348  ;;  %4196 = vmatprep.subr.mxu0 %v3684_v54 }
 0x244   :  { %16646 = vmatmul.mubr.msk.f32.vlgmr.msra.gmra.mrb[4].mxu0 %vm3723_vm15, %v20122_v45  ;;  %v20127_v46 = vpop.permute.xlu1 %4350  ;;  %v4372_v30 = vsel %vm916_vm5, 0.0, %v4349_v7 }
 0x245   :  { %4197 = vmatpush1.msra.mxu0 %v3683_v34  ;;  %v4360_v12 = vsel %vm916_vm5, %v4349_v7, %v20127_v46  ;;  %4112 = vmatprep.mubr.f32.mxu0 %v23501_v44 }
 0x246   :  { %v4374_v13 = vmul.f32 %v4360_v12, %v19445_v24  ;;  %v4373_v12 = vmul.f32 %v4372_v30, %v19450_v25 }
 0x247   :  { %v3693_v53 = vpop.permute.xlu0 %3692 }
 0x248   :  { %v3701_v54 = vsel %vm225_vm0, %v3691_v28, %v3693_v53  ;;  %v3702_v10 = vsel %vm225_vm0, %v3693_v53, %v3695_v2  ;;  %16647 = vmatmul.mubr.msk.f32.gmra.mrb[6].mxu0 %vm3723_vm15, %v20133_v31  ;;  %4389 = vmatprep.subr.mxu0 %v4374_v13  ;;  %v4357_v34 = vpop.permute.xlu1 %4356  ;;  %v3719_v28 = vmul.f32 %v3699_v21, %v19385_v49  ;;  %v20168_v13 = vld [vmem:[%s20080_s18 + $0x20] sm:$0xff] }
 0x249   :  { %v3715_v62 = vmul.f32 %v3701_v54, %v19366_v40  ;;  %v3716_v4 = vmul.f32 %v3702_v10, %v19371_v43  ;;  %4260 = vmatprep.mubr.f32.mxu0 %v23501_v44 }
 0x24b   :  { %3807 = vmatprep.subr.mxu1 %v3716_v4  ;;  %v20145_v24 = vpop.permute.xlu0 %4358 }
 0x24c   :  { %v4364_v53 = vsel %vm916_vm5, %v4357_v34, %v20145_v24  ;;  %3808 = vmatpush1.msra.mxu1 %v3715_v62  ;;  %16650 = vmatmul.mubr.msk.f32.vlgmr.msra.gmra.mrb[8].mxu0 %vm3723_vm15, %v20122_v45  ;;  %v4355_v2 = vpop.permute.xlu1 %4354 }
 0x24d   :  { %4390 = vmatpush1.msra.mxu0 %v4373_v12  ;;  %16640 = vmatmul.mubr.msk.f32.vlgmr.msra.gmra.mrb[6].mxu1 %vm3723_vm15, %v20087_v57  ;;  %v4378_v10 = vmul.f32 %v4364_v53, %v19471_v48  ;;  %v4363_v21 = vsel %vm916_vm5, %v4355_v2, %v4357_v34 }
 0x24e   :  { %17468 = vmatprep.subr.mxu1 %v3719_v28  ;;  %4266 = vmatprep.mubr.f32.mxu0 %v23501_v44  ;;  %v4377_v54 = vmul.f32 %v4363_v21, %v19494_v61 }
 0x24f   :  { %17469 = vmatpush3.msra.mxu1 %v3719_v28  ;;  %v4711_v4 = vpop.permute.xlu0 %4710  ;;  %4543 = vmatprep.subr.mxu0 %v4378_v10 }
 0x250   :  { %3877 = vmatprep.mubr.f32.mxu1 %v23501_v44  ;;  %16651 = vmatmul.mubr.msk.f32.gmra.mrb[10].mxu0 %vm3723_vm15, %v20133_v31  ;;  %v20160_v62 = vpop.permute.xlu1 %4712  ;;  %v4737_v21 = vsel %vm1308_vm6, 0.0, %v4711_v4 }
 0x251   :  { %v4724_v7 = vsel %vm1308_vm6, %v4711_v4, %v20160_v62  ;;  %16641 = vmatmul.mubr.msk.f32.gmra.mrb[8].mxu1 %vm3723_vm15, %v20094_v39  ;;  %4453 = vmatprep.mubr.f32.mxu0 %v23501_v44 }
 0x252   :  { %17470 = vmatprep.mubr.msk.f32.mxu1 %vm3723_vm15, %v20087_v57  ;;  %v4739_v30 = vmul.f32 %v4724_v7, %v19525_v17  ;;  %v20184_v7 = vld [vmem:[%s20080_s18 + $0x28] sm:$0x3] }
 0x253   :  { %v3659_v34 = vpop.permute.xlu0 %3658 }
 0x254   :  { %v3667_v12 = vsel %vm152_vm2, %v20102_v32, %v3659_v34  ;;  %v3668_v28 = vsel %vm152_vm2, %v3659_v34, %v3661_v22  ;;  %16656 = vmatmul.mubr.msk.f32.vlgmr.msra.gmra.mrb[4].mxu0 %vm3723_vm15, %v20168_v13  ;;  %v4719_v53 = vpop.permute.xlu1 %4718  ;;  %v3685_v32 = vmul.f32 %v20112_v20, %v19457_v35  ;;  %v4738_v20 = vmul.f32 %v4737_v21, %v19531_v26 }
 0x255   :  { %v3681_v10 = vmul.f32 %v3667_v12, %v19437_v18  ;;  %4544 = vmatpush1.msra.mxu0 %v4377_v54  ;;  %17471 = vmatmul.mubr.msk.f32.vlgmr.msra.gmra.mrb[10].mxu1 %vm3723_vm15, %v20094_v39  ;;  %v3682_v57 = vmul.f32 %v3668_v28, %v19441_v23  ;;  %v4379_v21 = vmul.f32 %v20145_v24, %v19536_v27 }
 0x256   :  { %4754 = vmatprep.subr.mxu0 %v4739_v30  ;;  %4459 = vmatprep.mubr.f32.mxu0 %v23501_v44 }
 0x257   :  { %v4721_v22 = vpop.permute.xlu0 %4720  ;;  %4119 = vmatprep.subr.mxu1 %v3682_v57  ;;  %4183 = vmatprep.mubr.f32.mxu1 %v23501_v44 }
 0x258   :  { %4120 = vmatpush1.msra.mxu1 %v3681_v10  ;;  %16657 = vmatmul.mubr.msk.f32.gmra.mrb[6].mxu0 %vm3723_vm15, %v20184_v7  ;;  %v4717_v39 = vpop.permute.xlu1 %4716  ;;  %v4728_v54 = vsel %vm1308_vm6, %v4719_v53, %v4721_v22 }
 0x259   :  { %16648 = vmatmul.mubr.msk.f32.vlgmr.msra.gmra.mrb[6].mxu1 %vm3723_vm15, %v20122_v45  ;;  %17473 = vmatprep.subr.mxu1 %v3685_v32  ;;  %v4743_v12 = vmul.f32 %v4728_v54, %v19560_v29  ;;  %v4727_v57 = vsel %vm1308_vm6, %v4717_v39, %v4719_v53 }
 0x25a   :  { %17474 = vmatpush3.msra.mxu1 %v3685_v32  ;;  %4607 = vmatprep.mubr.f32.mxu0 %v23501_v44  ;;  %v4742_v54 = vmul.f32 %v4727_v57, %v19598_v52  ;;  %v5080_v57 = vmul.f32 %v19951_v37, %v19506_v6 }
 0x25b   :  { %v4353_v30 = vpop.permute.xlu0 %4352  ;;  %4189 = vmatprep.mubr.f32.mxu1 %v23501_v44 }
 0x25c   :  { %v4362_v4 = vsel %vm916_vm5, %v4353_v30, %v4355_v2  ;;  %16660 = vmatmul.mubr.msk.f32.vlgmr.msra.gmra.mrb[8].mxu0 %vm3723_vm15, %v20168_v13  ;;  %v4715_v34 = vpop.permute.xlu1 %4714  ;;  %v4361_v28 = vsel %vm916_vm5, %v20127_v46, %v4353_v30  ;;  %v16665_v30 = vld [vmem:[%s20080_s18 + $0x38] sm:$0x3] }
 0x25d   :  { %4755 = vmatpush1.msra.mxu0 %v4738_v20  ;;  %16649 = vmatmul.mubr.msk.f32.gmra.mrb[8].mxu1 %vm3723_vm15, %v20133_v31  ;;  %v4376_v10 = vmul.f32 %v4362_v4, %v19521_v16  ;;  %v4375_v32 = vmul.f32 %v4361_v28, %v19517_v14  ;;  %v4726_v53 = vsel %vm1308_vm6, %v4715_v34, %v4717_v39 }
 0x25e   :  { %4908 = vmatprep.subr.mxu0 %v4743_v12  ;;  %4613 = vmatprep.mubr.f32.mxu0 %v23501_v44  ;;  %v4741_v39 = vmul.f32 %v4726_v53, %v19594_v1  ;;  %v16674_v53 = vld [vmem:[%s20080_s18 + $0x40] sm:$0xff] }
 0x25f   :  { %v20209_v2 = vpop.permute.xlu0 %5418  ;;  %17475 = vmatprep.mubr.msk.f32.mxu1 %vm3723_vm15, %v20122_v45  ;;  %4466 = vmatprep.subr.mxu1 %v4376_v10  ;;  %v20225_v45 = vld [vmem:[%s20080_s18 + $0x30] sm:$0xff] }
 0x260   :  { %16661 = vmatmul.mubr.msk.f32.gmra.mrb[10].mxu0 %vm3723_vm15, %v20184_v7  ;;  %v20217_v46 = vpop.permute.xlu1 %5420 }
 0x261   :  { %17476 = vmatmul.mubr.msk.f32.vlgmr.msra.gmra.mrb[10].mxu1 %vm3723_vm15, %v20133_v31  ;;  %4818 = vmatprep.mubr.f32.mxu0 %v23501_v44  ;;  %v5081_v31 = vmul.f32 %v19955_v33, %v19510_v8  ;;  %v4725_v33 = vsel %vm1308_vm6, %v20160_v62, %v4715_v34  ;;  %v5085_v34 = vmul.f32 %v19961_v41, %v19553_v47 }
 0x262   :  { %4467 = vmatpush1.msra.mxu1 %v4375_v32  ;;  %4530 = vmatprep.mubr.f32.mxu1 %v23501_v44  ;;  %v4740_v32 = vmul.f32 %v4725_v33, %v19576_v63  ;;  %v5431_v41 = vsel %vm2060_vm7, %v20209_v2, %v20217_v46 }
 0x263   :  { %17478 = vmatprep.subr.mxu1 %v4379_v21  ;;  %v5417_v20 = vpop.permute.xlu0 %5416  ;;  %v5445_v33 = vmul.f32 %v5431_v41, %v19643_v5  ;;  %v5086_v41 = vmul.f32 %v20015_v42, %v19660_v9  ;;  %v23524_v42 = vld [vmem:[#allocation23_spill] sm:$0xff] }
 0x264   :  { %16666 = vmatmul.mubr.msk.f32.vlgmr.msra.gmra.mrb[4].mxu0 %vm3723_vm15, %v20225_v45  ;;  %v4723_v24 = vpop.permute.xlu1 %4722 }
 0x265   :  { %4909 = vmatpush1.msra.mxu0 %v4742_v54  ;;  %16658 = vmatmul.mubr.msk.f32.vlgmr.msra.gmra.mrb[6].mxu1 %vm3723_vm15, %v20168_v13  ;;  %v4729_v28 = vsel %vm1308_vm6, %v4721_v22, %v4723_v24  ;;  %v23521_v24 = vld [vmem:[#allocation14_spill] sm:$0xff] }
 0x266   :  { %17479 = vmatpush3.msra.mxu1 %v4379_v21  ;;  %5096 = vmatprep.subr.mxu0 %v5081_v31  ;;  %v4744_v22 = vmul.f32 %v4729_v28, %v19612_v51  ;;  %v5084_v31 = vmul.f32 %v19959_v56, %v23521_v24  ;;  %v5430_v56 = vsel %vm2060_vm7, %v5417_v20, %v20209_v2  ;;  %v23523_v20 = vld [vmem:[#allocation18_spill] sm:$0xff] }
 0x267   :  { %4831 = vmatprep.subr.mxu1 %v4741_v39  ;;  %v20238_v4 = vpop.permute.xlu0 %5426  ;;  %4824 = vmatprep.mubr.f32.mxu0 %v23501_v44 }
 0x268   :  { %4536 = vmatprep.mubr.f32.mxu1 %v23501_v44  ;;  %16667 = vmatmul.mubr.msk.f32.gmra.mrb[6].mxu0 %vm3723_vm15, %v16665_v30  ;;  %v20243_v12 = vpop.permute.xlu1 %5428 }
 0x269   :  { %16659 = vmatmul.mubr.msk.f32.gmra.mrb[8].mxu1 %vm3723_vm15, %v20184_v7  ;;  %4972 = vmatprep.mubr.f32.mxu0 %v23501_v44 }
 0x26a   :  { %17480 = vmatprep.mubr.msk.f32.mxu1 %vm3723_vm15, %v20168_v13 }
 0x26b   :  { %v20253_v10 = vpop.permute.xlu0 %5424 }
 0x26c   :  { %16670 = vmatmul.mubr.msk.f32.vlgmr.msra.gmra.mrb[8].mxu0 %vm3723_vm15, %v20225_v45  ;;  %v20260_v62 = vpop.permute.xlu1 %5782 }
 0x26d   :  { %5097 = vmatpush1.msra.mxu0 %v5080_v57  ;;  %17481 = vmatmul.mubr.msk.f32.vlgmr.msra.gmra.mrb[10].mxu1 %vm3723_vm15, %v20184_v7  ;;  %v23520_v7 = vld [vmem:[#allocation16_spill] sm:$0xff] }
 0x26e   :  { %4832 = vmatpush1.msra.mxu1 %v4740_v32  ;;  %5250 = vmatprep.subr.mxu0 %v5085_v34  ;;  %v5083_v21 = vmul.f32 %v19967_v36, %v23520_v7  ;;  %v16675_v36 = vld [vmem:[%s20080_s18 + $0x48] sm:$0x3] }
 0x26f   :  { %17483 = vmatprep.subr.mxu1 %v4744_v22  ;;  %v20267_v37 = vpop.permute.xlu0 %5784  ;;  %4978 = vmatprep.mubr.f32.mxu0 %v23501_v44  ;;  %v23522_v32 = vld [vmem:[#allocation15_spill] sm:$0xff] }
 0x270   :  { %4895 = vmatprep.mubr.f32.mxu1 %v23501_v44  ;;  %16671 = vmatmul.mubr.msk.f32.gmra.mrb[10].mxu0 %vm3723_vm15, %v16665_v30  ;;  %v20272_v13 = vpop.permute.xlu1 %5780  ;;  %v5082_v34 = vmul.f32 %v19985_v38, %v23522_v32 }
 0x271   :  { %16668 = vmatmul.mubr.msk.f32.vlgmr.msra.gmra.mrb[6].mxu1 %vm3723_vm15, %v20225_v45  ;;  %5160 = vmatprep.mubr.f32.mxu0 %v23501_v44 }
 0x272   :  { %17484 = vmatpush3.msra.mxu1 %v4744_v22  ;;  %4901 = vmatprep.mubr.f32.mxu1 %v23501_v44  ;;  %v5435_v22 = vsel %vm2060_vm7, %v20238_v4, %v20243_v12 }
 0x273   :  { %5173 = vmatprep.subr.mxu1 %v5083_v21  ;;  %v5423_v54 = vpop.permute.xlu0 %5422  ;;  %v5449_v21 = vmul.f32 %v5435_v22, %v23523_v20 }
 0x274   :  { %v20286_v39 = vpop.permute.xlu1 %5790  ;;  %16676 = vmatmul.mubr.msk.f32.vlgmr.msra.gmra.mrb[4].mxu0 %vm3723_vm15, %v16674_v53  ;;  %v5433_v2 = vsel %vm2060_vm7, %v5423_v54, %v20253_v10  ;;  %v5432_v22 = vsel %vm2060_vm7, %v20217_v46, %v5423_v54  ;;  %v23527_v46 = vld [vmem:[#allocation21_spill] sm:$0xff] }
 0x275   :  { %5251 = vmatpush1.msra.mxu0 %v5084_v31  ;;  %16669 = vmatmul.mubr.msk.f32.gmra.mrb[8].mxu1 %vm3723_vm15, %v16665_v30  ;;  %v5447_v31 = vmul.f32 %v5433_v2, %v23524_v42  ;;  %v23528_v42 = vld [vmem:[#allocation24_spill] sm:$0xff] }
 0x276   :  { %5460 = vmatprep.subr.mxu0 %v5445_v33  ;;  %5166 = vmatprep.mubr.f32.mxu0 %v23501_v44 }
 0x277   :  { %v5793_v28 = vpop.permute.xlu0 %5792  ;;  %17485 = vmatprep.mubr.msk.f32.mxu1 %vm3723_vm15, %v20225_v45  ;;  %v5444_v45 = vmul.f32 %v5430_v56, %v19639_v3  ;;  %v5434_v56 = vsel %vm2060_vm7, %v20253_v10, %v20238_v4  ;;  %v5443_v4 = vsel %vm2074_vm9, %v20243_v12, 0.0  ;;  %v23525_v10 = vld [vmem:[#allocation19_spill] sm:$0xff]  ;;  %v16685_v12 = vld [vmem:[%s20080_s18 + $0x58] sm:$0x3] }
 0x278   :  { %v20297_v57 = vpop.permute.xlu1 %5788  ;;  %16677 = vmatmul.mubr.msk.f32.gmra.mrb[6].mxu0 %vm3723_vm15, %v16675_v36  ;;  %v5448_v2 = vmul.f32 %v5434_v56, %v23525_v10  ;;  %v5450_v3 = vmul.f32 %v5443_v4, %v23528_v42  ;;  %v23529_v4 = vld [vmem:[#allocation20_spill] sm:$0xff] }
 0x279   :  { %17486 = vmatmul.mubr.msk.f32.vlgmr.msra.gmra.mrb[10].mxu1 %vm3723_vm15, %v16665_v30  ;;  %5314 = vmatprep.mubr.f32.mxu0 %v23501_v44 }
 0x27a   :  { %5174 = vmatpush1.msra.mxu1 %v5082_v34  ;;  %5237 = vmatprep.mubr.f32.mxu1 %v23501_v44  ;;  %v5795_v34 = vsel %vm2453_vm8, %v20260_v62, %v20267_v37 }
 0x27b   :  { %17488 = vmatprep.subr.mxu1 %v5086_v41  ;;  %v5787_v38 = vpop.permute.xlu0 %5786  ;;  %v5808_v54 = vmul.f32 %v5795_v34, %v23527_v46  ;;  %v5794_v34 = vsel %vm2453_vm8, %v20272_v13, %v20260_v62  ;;  %v23530_v13 = vld [vmem:[#allocation25_spill] sm:$0xff] }
 0x27c   :  { %16680 = vmatmul.mubr.msk.f32.vlgmr.msra.gmra.mrb[8].mxu0 %vm3723_vm15, %v16674_v53  ;;  %v20315_v30 = vpop.permute.xlu1 %6144  ;;  %v5797_v56 = vsel %vm2453_vm8, %v5787_v38, %v20297_v57  ;;  %v5807_v62 = vmul.f32 %v5794_v34, %v23529_v4 }
 0x27d   :  { %5461 = vmatpush1.msra.mxu0 %v5444_v45  ;;  %16678 = vmatmul.mubr.msk.f32.vlgmr.msra.gmra.mrb[6].mxu1 %vm3723_vm15, %v16674_v53 }
 0x27e   :  { %17489 = vmatpush3.msra.mxu1 %v5086_v41  ;;  %5614 = vmatprep.subr.mxu0 %v5449_v21  ;;  %v16684_v41 = vld [vmem:[%s20080_s18 + $0x50] sm:$0xff] }
 0x27f   :  { %5537 = vmatprep.subr.mxu1 %v5447_v31  ;;  %v20319_v33 = vpop.permute.xlu0 %6146  ;;  %5320 = vmatprep.mubr.f32.mxu0 %v23501_v44  ;;  %v23526_v31 = vld [vmem:[#allocation22_spill] sm:$0xff] }
 0x280   :  { %5243 = vmatprep.mubr.f32.mxu1 %v23501_v44  ;;  %16681 = vmatmul.mubr.msk.f32.gmra.mrb[10].mxu0 %vm3723_vm15, %v16675_v36  ;;  %v20339_v45 = vpop.permute.xlu1 %6142  ;;  %v5446_v20 = vmul.f32 %v5432_v22, %v23526_v31 }
 0x281   :  { %16679 = vmatmul.mubr.msk.f32.gmra.mrb[8].mxu1 %vm3723_vm15, %v16675_v36  ;;  %5524 = vmatprep.mubr.f32.mxu0 %v23501_v44 }
 0x282   :  { %17490 = vmatprep.mubr.msk.f32.mxu1 %vm3723_vm15, %v16674_v53  ;;  %v5799_v53 = vsel %vm2453_vm8, %v20286_v39, %v5793_v28 }
 0x283   :  { %v20341_v21 = vpop.permute.xlu0 %6152 }
 0x284   :  { %16686 = vmatmul.mubr.msk.f32.vlgmr.msra.gmra.mrb[4].mxu0 %vm3723_vm15, %v16684_v41  ;;  %v6155_v22 = vpop.permute.xlu1 %6154 }
 0x285   :  { %5615 = vmatpush1.msra.mxu0 %v5448_v2  ;;  %17491 = vmatmul.mubr.msk.f32.vlgmr.msra.gmra.mrb[10].mxu1 %vm3723_vm15, %v16675_v36  ;;  %v5806_v36 = vsel %vm2466_vm10, %v5799_v53, 0.0 }
 0x286   :  { %5538 = vmatpush1.msra.mxu1 %v5446_v20  ;;  %5822 = vmatprep.subr.mxu0 %v5808_v54  ;;  %v5810_v20 = vmul.f32 %v5797_v56, %v19797_v60  ;;  %v5812_v2 = vmul.f32 %v5806_v36, %v23530_v13  ;;  %v5796_v54 = vsel %vm2453_vm8, %v20267_v37, %v5787_v38  ;;  %v16694_v38 = vld [vmem:[%s20080_s18 + $0x60] sm:$0xff]  ;;  %v23532_v36 = vld [vmem:[#allocation27_spill] sm:$0xff] }
 0x287   :  { %17493 = vmatprep.subr.mxu1 %v5450_v3  ;;  %5530 = vmatprep.mubr.f32.mxu0 %v23501_v44  ;;  %v20360_v28 = vpop.permute.xlu0 %6150  ;;  %v5798_v56 = vsel %vm2453_vm8, %v20297_v57, %v20286_v39  ;;  %v5809_v34 = vmul.f32 %v5796_v54, %v19791_v11  ;;  %v6157_v37 = vsel %vm2845_vm11, %v20315_v30, %v20319_v33  ;;  %v23531_v39 = vld [vmem:[#allocation26_spill] sm:$0xff] }
 0x288   :  { %5601 = vmatprep.mubr.f32.mxu1 %v23501_v44  ;;  %16687 = vmatmul.mubr.msk.f32.gmra.mrb[6].mxu0 %vm3723_vm15, %v16685_v12  ;;  %v5811_v57 = vmul.f32 %v5798_v56, %v23531_v39  ;;  %v6161_v54 = vsel %vm2845_vm11, %v20341_v21, %v6155_v22 }
 0x289   :  { %16688 = vmatmul.mubr.msk.f32.vlgmr.msra.gmra.mrb[6].mxu1 %vm3723_vm15, %v16684_v41  ;;  %5678 = vmatprep.mubr.f32.mxu0 %v23501_v44 }
 0x28a   :  { %17494 = vmatpush3.msra.mxu1 %v5450_v3  ;;  %5607 = vmatprep.mubr.f32.mxu1 %v23501_v44  ;;  %v6149_v3 = vpop.permute.xlu1 %6148 }
 0x28b   :  { %5899 = vmatprep.subr.mxu1 %v5810_v20  ;;  %v20373_v53 = vpop.permute.xlu0 %6506  ;;  %v6170_v20 = vmul.f32 %v6157_v37, %v23532_v36  ;;  %v6168_v37 = vsel %vm2858_vm12, %v6161_v54, 0.0  ;;  %v6158_v22 = vsel %vm2845_vm11, %v20319_v33, %v6149_v3 }
 0x28c   :  { %16690 = vmatmul.mubr.msk.f32.vlgmr.msra.gmra.mrb[8].mxu0 %vm3723_vm15, %v16684_v41 }
 0x28d   :  { %5823 = vmatpush1.msra.mxu0 %v5807_v62  ;;  %16689 = vmatmul.mubr.msk.f32.gmra.mrb[8].mxu1 %vm3723_vm15, %v16685_v12 }
 0x28e   :  { %5976 = vmatprep.subr.mxu0 %v5812_v2  ;;  %5684 = vmatprep.mubr.f32.mxu0 %v23501_v44  ;;  %v16695_v2 = vld [vmem:[%s20080_s18 + $0x68] sm:$0x3]  ;;  %v6509_v56 = vpop.permute.xlu1 %6508 }
 0x28f   :  { %17495 = vmatprep.mubr.msk.f32.mxu1 %vm3723_vm15, %v16684_v41  ;;  %v6159_v41 = vsel %vm2845_vm11, %v6149_v3, %v20360_v28  ;;  %v6505_v62 = vpop.permute.xlu0 %6504  ;;  %v16704_v3 = vld [vmem:[%s20080_s18 + $0x70] sm:$0xff] }
 0x290   :  { %16691 = vmatmul.mubr.msk.f32.gmra.mrb[10].mxu0 %vm3723_vm15, %v16685_v12 }
 0x291   :  { %17496 = vmatmul.mubr.msk.f32.vlgmr.msra.gmra.mrb[10].mxu1 %vm3723_vm15, %v16685_v12  ;;  %5886 = vmatprep.mubr.f32.mxu0 %v23501_v44  ;;  %v6172_v12 = vmul.f32 %v6159_v41, %v19879_v19 }
 0x292   :  { %5900 = vmatpush1.msra.mxu1 %v5809_v34  ;;  %5963 = vmatprep.mubr.f32.mxu1 %v23501_v44  ;;  %v6156_v34 = vsel %vm2845_vm11, %v20339_v45, %v20315_v30  ;;  %v6174_v30 = vmul.f32 %v6168_v37, %v19824_v0  ;;  %v6171_v45 = vmul.f32 %v6158_v22, %v19875_v59  ;;  %v23533_v37 = vld [vmem:[#allocation33_spill] sm:$0xff] }
 0x293   :  { %17498 = vmatprep.subr.mxu1 %v19830_v50  ;;  %v6169_v41 = vmul.f32 %v6156_v34, %v19801_v55  ;;  %v16705_v34 = vld [vmem:[%s20080_s18 + $0x78] sm:$0x3] }
 0x294   :  { %16696 = vmatmul.mubr.msk.f32.vlgmr.msra.gmra.mrb[4].mxu0 %vm3723_vm15, %v16694_v38 }
 0x295   :  { %5977 = vmatpush1.msra.mxu0 %v5811_v57  ;;  %16698 = vmatmul.mubr.msk.f32.vlgmr.msra.gmra.mrb[6].mxu1 %vm3723_vm15, %v16694_v38  ;;  %v6513_v57 = vpop.permute.xlu0 %6512 }
 0x296   :  { %17499 = vmatpush3.msra.mxu1 %v19830_v50  ;;  %6184 = vmatprep.subr.mxu0 %v6170_v20  ;;  %v6511_v20 = vpop.permute.xlu1 %6510 }
 0x297   :  { %6261 = vmatprep.subr.mxu1 %v6172_v12  ;;  %5892 = vmatprep.mubr.f32.mxu0 %v23501_v44  ;;  %v6521_v33 = vsel %vm3237_vm13, %v6511_v20, %v6513_v57  ;;  %v6160_v12 = vsel %vm2845_vm11, %v20360_v28, %v20341_v21 }
 0x298   :  { %16697 = vmatmul.mubr.msk.f32.gmra.mrb[6].mxu0 %vm3723_vm15, %v16695_v2  ;;  %5969 = vmatprep.mubr.f32.mxu1 %v23501_v44  ;;  %v6534_v54 = vmul.f32 %v6521_v33, %v19909_v15  ;;  %v6173_v21 = vmul.f32 %v6160_v12, %v23533_v37  ;;  %v6518_v33 = vsel %vm3237_vm13, %v6505_v62, %v20373_v53  ;;  %v23535_v12 = vld [vmem:[#allocation42_spill] sm:$0xff] }
 0x299   :  { %16699 = vmatmul.mubr.msk.f32.gmra.mrb[8].mxu1 %vm3723_vm15, %v16695_v2  ;;  %6040 = vmatprep.mubr.f32.mxu0 %v23501_v44  ;;  %v6517_v28 = vpop.permute.xlu0 %6516 }
 0x29a   :  { %17500 = vmatprep.mubr.msk.f32.mxu1 %vm3723_vm15, %v16694_v38 }
 0x29c   :  { %16700 = vmatmul.mubr.msk.f32.vlgmr.msra.gmra.mrb[8].mxu0 %vm3723_vm15, %v16694_v38  ;;  %v6519_v38 = vsel %vm3237_vm13, %v20373_v53, %v6509_v56  ;;  %v23538_v53 = vld [vmem:[#allocation38_spill] sm:$0xff] }
 0x29d   :  { %6185 = vmatpush1.msra.mxu0 %v6169_v41  ;;  %17501 = vmatmul.mubr.msk.f32.vlgmr.msra.gmra.mrb[10].mxu1 %vm3723_vm15, %v16695_v2  ;;  %v6520_v41 = vsel %vm3237_vm13, %v6509_v56, %v6511_v20  ;;  %v16714_v20 = vld [vmem:[%s20080_s18 + $0x80] sm:$0xff] }
 0x29e   :  { %6262 = vmatpush1.msra.mxu1 %v6171_v45  ;;  %6338 = vmatprep.subr.mxu0 %v6174_v30  ;;  %v6515_v30 = vpop.permute.xlu1 %6514 }
 0x29f   :  { %6046 = vmatprep.mubr.f32.mxu0 %v23501_v44  ;;  %6325 = vmatprep.mubr.f32.mxu1 %v23501_v44  ;;  %v6523_v45 = vsel %vm3237_vm13, %v6515_v30, %v6517_v28  ;;  %v23537_v28 = vld [vmem:[#allocation43_spill] sm:$0xff] }
 0x2a0   :  { %16701 = vmatmul.mubr.msk.f32.gmra.mrb[10].mxu0 %vm3723_vm15, %v16695_v2  ;;  %17503 = vmatprep.subr.mxu1 %v19897_v58  ;;  %v23534_v2 = vld [vmem:[#allocation35_spill] sm:$0xff]  ;;  %v6530_v56 = vsel %vm3250_vm14, %v6523_v45, 0.0 }
 0x2a1   :  { %16708 = vmatmul.mubr.msk.f32.vlgmr.msra.gmra.mrb[6].mxu1 %vm3723_vm15, %v16704_v3  ;;  %6248 = vmatprep.mubr.f32.mxu0 %v23501_v44  ;;  %v6532_v22 = vmul.f32 %v6519_v38, %v23534_v2  ;;  %v23536_v38 = vld [vmem:[#allocation34_spill] sm:$0xff]  ;;  %v6536_v62 = vmul.f32 %v6530_v56, %v23538_v53 }
 0x2a2   :  { %17504 = vmatpush3.msra.mxu1 %v19897_v58  ;;  %6331 = vmatprep.mubr.f32.mxu1 %v23501_v44 }
 0x2a3   :  { %6623 = vmatprep.subr.mxu1 %v6534_v54  ;;  %v6533_v54 = vmul.f32 %v6520_v41, %v23535_v12  ;;  %v6522_v41 = vsel %vm3237_vm13, %v6513_v57, %v6515_v30 }
 0x2a4   :  { %16706 = vmatmul.mubr.msk.f32.vlgmr.msra.gmra.mrb[4].mxu0 %vm3723_vm15, %v16704_v3 }
 0x2a5   :  { %6339 = vmatpush1.msra.mxu0 %v6173_v21  ;;  %16709 = vmatmul.mubr.msk.f32.gmra.mrb[8].mxu1 %vm3723_vm15, %v16705_v34  ;;  %v6531_v21 = vmul.f32 %v6518_v33, %v23536_v38  ;;  %v20475_v33 = vpop.permute.xlu1 %6884 }
 0x2a6   :  { %6546 = vmatprep.subr.mxu0 %v6532_v22  ;;  %6254 = vmatprep.mubr.f32.mxu0 %v23501_v44  ;;  %v16715_v22 = vld [vmem:[%s20080_s18 + $0x88] sm:$0x3] }
 0x2a7   :  { %17505 = vmatprep.mubr.msk.f32.mxu1 %vm3723_vm15, %v16704_v3 }
 0x2a8   :  { %16707 = vmatmul.mubr.msk.f32.gmra.mrb[6].mxu0 %vm3723_vm15, %v16705_v34 }
 0x2a9   :  { %17506 = vmatmul.mubr.msk.f32.vlgmr.msra.gmra.mrb[10].mxu1 %vm3723_vm15, %v16705_v34  ;;  %6402 = vmatprep.mubr.f32.mxu0 %v23501_v44  ;;  %v20484_v53 = vpop.permute.xlu1 %6910 }
 0x2aa   :  { %6624 = vmatpush1.msra.mxu1 %v6533_v54  ;;  %6687 = vmatprep.mubr.f32.mxu1 %v23501_v44 }
 0x2ab   :  { %17508 = vmatprep.subr.mxu1 %v23537_v28 }
 0x2ac   :  { %16710 = vmatmul.mubr.msk.f32.vlgmr.msra.gmra.mrb[8].mxu0 %vm3723_vm15, %v16704_v3  ;;  %v23539_v3 = vld [vmem:[#allocation41_spill] sm:$0xff] }
 0x2ad   :  { %6547 = vmatpush1.msra.mxu0 %v6531_v21  ;;  %16718 = vmatmul.mubr.msk.f32.vlgmr.msra.gmra.mrb[6].mxu1 %vm3723_vm15, %v16714_v20  ;;  %v6535_v45 = vmul.f32 %v6522_v41, %v23539_v3 }
 0x2ae   :  { %6700 = vmatprep.subr.mxu0 %v6536_v62  ;;  %6408 = vmatprep.mubr.f32.mxu0 %v23501_v44 }
 0x2af   :  { %6693 = vmatprep.mubr.f32.mxu1 %v23501_v44  ;;  %17509 = vmatpush3.msra.mxu1 %v23537_v28 }
 0x2b0   :  { %16711 = vmatmul.mubr.msk.f32.gmra.mrb[10].mxu0 %vm3723_vm15, %v16705_v34 }
 0x2b1   :  { %16719 = vmatmul.mubr.msk.f32.gmra.mrb[8].mxu1 %vm3723_vm15, %v16715_v22  ;;  %6610 = vmatprep.mubr.f32.mxu0 %v23501_v44 }
 0x2b2   :  { %17510 = vmatprep.mubr.msk.f32.mxu1 %vm3723_vm15, %v16714_v20 }
 0x2b4   :  { %16716 = vmatmul.mubr.msk.f32.vlgmr.msra.gmra.mrb[4].mxu0 %vm3723_vm15, %v16714_v20 }
 0x2b5   :  { %6701 = vmatpush1.msra.mxu0 %v6535_v45  ;;  %17511 = vmatmul.mubr.msk.f32.vlgmr.msra.gmra.mrb[10].mxu1 %vm3723_vm15, %v16715_v22  ;;  %v20479_v45 = vpop.permute.xlu0 %6889 }
 0x2b6   :  { %6616 = vmatprep.mubr.f32.mxu0 %v23501_v44  ;;  %7170 = vmatprep.mubr.f32.mxu1 %v23501_v44 }
 0x2b8   :  { %16717 = vmatmul.mubr.msk.f32.gmra.mrb[6].mxu0 %vm3723_vm15, %v16715_v22 }
 0x2b9   :  { %6764 = vmatprep.mubr.f32.mxu0 %v23501_v44 }
 0x2bc   :  { %16720 = vmatmul.mubr.msk.f32.vlgmr.msra.gmra.mrb[8].mxu0 %vm3723_vm15, %v16714_v20 }
 0x2bd   :  { %6770 = vmatprep.mubr.f32.mxu0 %v23501_v44 }
 0x2c0   :  { %16721 = vmatmul.mubr.msk.f32.gmra.mrb[10].mxu0 %vm3723_vm15, %v16715_v22  ;;  %vm20684_vm15 = vmpackc.low %vm7084_vm1, %vm19164_vm3 }
 0x380   :  { %v6689_v57 = vpop.f32.mrb[6].mxu1 }
 0x381   :  { %v6691_v34 = vpop.f32.mrb[7].mxu1  ;;  %v6868_v15 = vmax.f32 %v6689_v57, 0.0 }
 0x382   :  { %v6869_v58 = vmax.f32 %v6691_v34, 0.0 }
 0x384   :  { %v6695_v30 = vpop.f32.mrb[8].mxu1 }
 0x385   :  { %v6697_v54 = vpop.f32.mrb[9].mxu1  ;;  %v6875_v34 = vmax.f32 %v6695_v30, 0.0 }
 0x387   :  { %v6612_v56 = vpop.f32.mrb[4].mxu0 }
 0x388   :  { %v6866_v21 = vmax.f32 %v6612_v56, 0.0  ;;  %v6614_v62 = vpop.f32.mrb[5].mxu0  ;;  %v20477_v41 = vpop.f32.mrb[10].mxu1 }
 0x389   :  { %v6867_v28 = vmax.f32 %v6614_v62, 0.0  ;;  %v20481_v3 = vpop.f32.mrb[11].mxu1 }
 0x38a   :  { %v6892_v20 = vmul.f32 %v20475_v33, %v6866_v21  ;;  %v20496_v21 = vpop.permute.xlu0 %6915 }
 0x38b   :  { %v6893_v22 = vmul.f32 %v20475_v33, %v6867_v28  ;;  %v6618_v12 = vpop.f32.mrb[6].mxu0 }
 0x38c   :  { %v20488_v38 = vadd.f32 %v20484_v53, %v6892_v20  ;;  %v6873_v56 = vmax.f32 %v6618_v12, 0.0  ;;  %v6620_v2 = vpop.f32.mrb[7].mxu0  ;;  %v6894_v12 = vmul.f32 %v20475_v33, %v6868_v15 }
 0x38d   :  { %v20491_v37 = vadd.f32 %v20484_v53, %v6893_v22  ;;  %v6874_v62 = vmax.f32 %v6620_v2, 0.0  ;;  %v6895_v22 = vmul.f32 %v20475_v33, %v6869_v58 }
 0x38e   :  { %v6899_v0 = vmul.f32 %v20479_v45, %v6873_v56  ;;  %7010 = vrot.lane.b32.xlu1 %v20488_v38, %s19146_s6  ;;  %v6876_v56 = vmax.f32 %v6697_v54, 0.0  ;;  %v20514_v15 = vadd.f32 %v20484_v53, %v6894_v12 }
 0x38f   :  { %v6900_v28 = vmul.f32 %v20479_v45, %v6874_v62  ;;  %7012 = vrot.lane.b32.xlu0 %v20491_v37, %s19146_s6  ;;  %v6766_v57 = vpop.f32.mrb[8].mxu0  ;;  %v20518_v58 = vadd.f32 %v20484_v53, %v6895_v22 }
 0x390   :  { %v20503_v20 = vadd.f32 %v20496_v21, %v6899_v0  ;;  %v6768_v2 = vpop.f32.mrb[9].mxu0  ;;  %v6901_v0 = vmul.f32 %v20479_v45, %v6875_v34  ;;  %v6870_v30 = vmax.f32 %v6766_v57, 0.0  ;;  %v6902_v54 = vmul.f32 %v20479_v45, %v6876_v56 }
 0x391   :  { %v20507_v59 = vadd.f32 %v20496_v21, %v6900_v28  ;;  %v6871_v28 = vmax.f32 %v6768_v2, 0.0 }
 0x392   :  { %7022 = vrot.lane.b32.xlu1 %v20503_v20, %s19146_s6  ;;  %v20526_v55 = vadd.f32 %v20496_v21, %v6901_v0  ;;  %v6896_v12 = vmul.f32 %v20475_v33, %v6870_v30  ;;  %v20530_v57 = vadd.f32 %v20496_v21, %v6902_v54  ;;  %v6879_v54 = vmax.f32 %v20477_v41, 0.0 }
 0x393   :  { %7024 = vrot.lane.b32.xlu0 %v20507_v59, %s19146_s6  ;;  %v6772_v62 = vpop.f32.mrb[10].mxu0  ;;  %v6897_v22 = vmul.f32 %v20475_v33, %v6871_v28 }
 0x394   :  { %v6774_v19 = vpop.f32.mrb[11].mxu0  ;;  %v6877_v34 = vmax.f32 %v6772_v62, 0.0  ;;  %v20538_v2 = vadd.f32 %v20484_v53, %v6896_v12  ;;  %v6905_v12 = vmul.f32 %v20479_v45, %v6879_v54 }
 0x395   :  { %v6878_v36 = vmax.f32 %v6774_v19, 0.0  ;;  %v20542_v0 = vadd.f32 %v20484_v53, %v6897_v22 }
 0x396   :  { %7014 = vrot.lane.b32.xlu1 %v20514_v15, %s19146_s6  ;;  %v6903_v56 = vmul.f32 %v20479_v45, %v6877_v34  ;;  %v20639_v41 = vadd.f32 %v20496_v21, %v6905_v12 }
 0x397   :  { %7016 = vrot.lane.b32.xlu0 %v20518_v58, %s19146_s6  ;;  %v6904_v62 = vmul.f32 %v20479_v45, %v6878_v36  ;;  %v6872_v36 = vmax.f32 %v20481_v3, 0.0 }
 0x398   :  { %v20550_v19 = vadd.f32 %v20496_v21, %v6903_v56 }
 0x399   :  { %v20553_v30 = vadd.f32 %v20496_v21, %v6904_v62  ;;  %v6898_v28 = vmul.f32 %v20475_v33, %v6872_v36  ;;  %v23540_v62 = vld [vmem:[#allocation8_spill] sm:$0xff] }
 0x39a   :  { %7026 = vrot.lane.b32.xlu1 %v20526_v55, %s19146_s6 }
 0x39b   :  { %7028 = vrot.lane.b32.xlu0 %v20530_v57, %s19146_s6  ;;  %v20636_v3 = vadd.f32 %v20484_v53, %v6898_v28  ;;  %v23541_v28 = vld [vmem:[#allocation7_spill] sm:$0xff] }
 0x39e   :  { %7018 = vrot.lane.b32.xlu1 %v20538_v2, %s19146_s6 }
 0x39f   :  { %7020 = vrot.lane.b32.xlu0 %v20542_v0, %s19146_s6 }
 0x3a2   :  { %7030 = vrot.lane.b32.xlu1 %v20550_v19, %s19146_s6 }
 0x3a3   :  { %7032 = vrot.lane.b32.xlu0 %v20553_v30, %s19146_s6 }
 0x3a6   :  { %6944 = vrot.lane.b32.xlu1 %v20488_v38, %s19148_s7 }
 0x3a7   :  { %6946 = vrot.lane.b32.xlu0 %v20491_v37, %s19148_s7 }
 0x3aa   :  { %6956 = vrot.lane.b32.xlu1 %v20503_v20, %s19148_s7 }
 0x3ab   :  { %6958 = vrot.lane.b32.xlu0 %v20507_v59, %s19148_s7 }
 0x3ae   :  { %6948 = vrot.lane.b32.xlu1 %v20514_v15, %s19148_s7 }
 0x3af   :  { %6950 = vrot.lane.b32.xlu0 %v20518_v58, %s19148_s7 }
 0x3b2   :  { %6960 = vrot.lane.b32.xlu1 %v20526_v55, %s19148_s7 }
 0x3b3   :  { %6962 = vrot.lane.b32.xlu0 %v20530_v57, %s19148_s7 }
 0x3b6   :  { %6952 = vrot.lane.b32.xlu1 %v20538_v2, %s19148_s7 }
 0x3b7   :  { %6954 = vrot.lane.b32.xlu0 %v20542_v0, %s19148_s7 }
 0x3ba   :  { %6964 = vrot.lane.b32.xlu1 %v20550_v19, %s19148_s7 }
 0x3bb   :  { %6966 = vrot.lane.b32.xlu0 %v20553_v30, %s19148_s7 }
 0x3be   :  { %7745 = vrot.lane.b32.xlu1 %v20488_v38, %s19149_s8 }
 0x3bf   :  { %7747 = vrot.lane.b32.xlu0 %v20491_v37, %s19149_s8 }
 0x3c2   :  { %7757 = vrot.lane.b32.xlu1 %v20503_v20, %s19149_s8 }
 0x3c3   :  { %7759 = vrot.lane.b32.xlu0 %v20507_v59, %s19149_s8 }
 0x3c6   :  { %7749 = vrot.lane.b32.xlu1 %v20514_v15, %s19149_s8 }
 0x3c7   :  { %7751 = vrot.lane.b32.xlu0 %v20518_v58, %s19149_s8 }
 0x3ca   :  { %7761 = vrot.lane.b32.xlu1 %v20526_v55, %s19149_s8 }
 0x3cb   :  { %7763 = vrot.lane.b32.xlu0 %v20530_v57, %s19149_s8 }
 0x3ce   :  { %7753 = vrot.lane.b32.xlu1 %v20538_v2, %s19149_s8 }
 0x3cf   :  { %7755 = vrot.lane.b32.xlu0 %v20542_v0, %s19149_s8 }
 0x3d2   :  { %7765 = vrot.lane.b32.xlu1 %v20550_v19, %s19149_s8 }
 0x3d3   :  { %7767 = vrot.lane.b32.xlu0 %v20553_v30, %s19149_s8 }
 0x3d6   :  { %8161 = vrot.lane.b32.xlu1 %v20488_v38, %s19150_s9 }
 0x3d7   :  { %8163 = vrot.lane.b32.xlu0 %v20491_v37, %s19150_s9 }
 0x3da   :  { %8175 = vrot.lane.b32.xlu1 %v20503_v20, %s19150_s9 }
 0x3db   :  { %8177 = vrot.lane.b32.xlu0 %v20507_v59, %s19150_s9 }
 0x3de   :  { %8165 = vrot.lane.b32.xlu1 %v20514_v15, %s19150_s9 }
 0x3df   :  { %8167 = vrot.lane.b32.xlu0 %v20518_v58, %s19150_s9 }
 0x3e2   :  { %8179 = vrot.lane.b32.xlu1 %v20526_v55, %s19150_s9 }
 0x3e3   :  { %8181 = vrot.lane.b32.xlu0 %v20530_v57, %s19150_s9 }
 0x3e6   :  { %8169 = vrot.lane.b32.xlu1 %v20538_v2, %s19150_s9 }
 0x3e7   :  { %8171 = vrot.lane.b32.xlu0 %v20542_v0, %s19150_s9 }
 0x3ea   :  { %8183 = vrot.lane.b32.xlu1 %v20550_v19, %s19150_s9 }
 0x3eb   :  { %8185 = vrot.lane.b32.xlu0 %v20553_v30, %s19150_s9 }
 0x3ee   :  { %8173 = vrot.lane.b32.xlu1 %v20636_v3, %s19150_s9 }
 0x3ef   :  { %8187 = vrot.lane.b32.xlu0 %v20639_v41, %s19150_s9 }
 0x3f2   :  { %8947 = vrot.lane.b32.xlu1 %v20491_v37, %s19151_s10 }
 0x3f3   :  { %8949 = vrot.lane.b32.xlu0 %v20514_v15, %s19151_s10 }
 0x3f6   :  { %8961 = vrot.lane.b32.xlu1 %v20507_v59, %s19151_s10 }
 0x3f7   :  { %8963 = vrot.lane.b32.xlu0 %v20526_v55, %s19151_s10 }
 0x3fa   :  { %8945 = vrot.lane.b32.xlu1 %v20488_v38, %s19151_s10 }
 0x3fb   :  { %8959 = vrot.lane.b32.xlu0 %v20503_v20, %s19151_s10 }
 0x3fe   :  { %8951 = vrot.lane.b32.xlu1 %v20518_v58, %s19151_s10 }
 0x3ff   :  { %8953 = vrot.lane.b32.xlu0 %v20538_v2, %s19151_s10 }
 0x400   :  { %v7011_v53 = vpop.permute.xlu1 %7010 }
 0x401   :  { %v7013_v33 = vpop.permute.xlu0 %7012  ;;  %v7058_v34 = vsel %vm225_vm0, 0.0, %v7011_v53 }
 0x402   :  { %8965 = vrot.lane.b32.xlu1 %v20530_v57, %s19151_s10  ;;  %v7034_v45 = vsel %vm225_vm0, %v7011_v53, %v7013_v33  ;;  %v7060_v53 = vmul.f32 %v7058_v34, %v23540_v62 }
 0x403   :  { %8967 = vrot.lane.b32.xlu0 %v20550_v19, %s19151_s10  ;;  %v7061_v12 = vmul.f32 %v7034_v45, %v23541_v28 }
 0x404   :  { %v7023_v21 = vpop.permute.xlu1 %7022 }
 0x405   :  { %v7059_v22 = vsel %vm225_vm0, 0.0, %v7023_v21  ;;  %v7025_v56 = vpop.permute.xlu0 %7024 }
 0x406   :  { %v7067_v36 = vmul.f32 %v7059_v22, %v23540_v62  ;;  %v7039_v54 = vsel %vm225_vm0, %v7023_v21, %v7025_v56  ;;  %8955 = vrot.lane.b32.xlu1 %v20542_v0, %s19151_s10  ;;  %v20698_v62 = vld [vmem:[%s20669_s22 + $0x10] sm:$0xff]  ;;  %v10895_v22 = vld [vmem:[%s21528_s3 + $0x8] sm:$0xff] }
 0x407   :  { %v7068_v50 = vmul.f32 %v7039_v54, %v23541_v28  ;;  %8957 = vrot.lane.b32.xlu0 %v20636_v3, %s19151_s10 }
 0x408   :  { %v7015_v39 = vpop.permute.xlu1 %7014  ;;  %v17752_v11 = vpack.c.bf16 %v7067_v36, %v7060_v53 }
 0x409   :  { %v17749_v21 = vpack.c.bf16 %v7068_v50, %v7061_v12  ;;  %v7017_v13 = vpop.permute.xlu0 %7016  ;;  %v7035_v50 = vsel %vm225_vm0, %v7013_v33, %v7015_v39 }
 0x40a   :  { %8969 = vrot.lane.b32.xlu1 %v20553_v30, %s19151_s10  ;;  %v7036_v45 = vsel %vm225_vm0, %v7015_v39, %v7017_v13  ;;  %v7062_v39 = vmul.f32 %v7035_v50, %v19366_v40 }
 0x40b   :  { %17751 = vmatprep.subr.msk.bf16.mxu1 %vm20684_vm15, %v17749_v21  ;;  %8971 = vrot.lane.b32.xlu0 %v20639_v41, %s19151_s10  ;;  %v7063_v53 = vmul.f32 %v7036_v45, %v19371_v43 }
 0x40c   :  { %v7027_v34 = vpop.permute.xlu1 %7026  ;;  %17754 = vmatpush1.bf16.msk.msra.mxu1 %vm20684_vm15, %v17752_v11 }
 0x40d   :  { %v7040_v36 = vsel %vm225_vm0, %v7025_v56, %v7027_v34  ;;  %v7029_v54 = vpop.permute.xlu0 %7028  ;;  %v20715_v56 = vld [vmem:[%s20669_s22 + $0x18] sm:$0xf] }
 0x40e   :  { %v7069_v28 = vmul.f32 %v7040_v36, %v19366_v40  ;;  %v7041_v12 = vsel %vm225_vm0, %v7027_v34, %v7029_v54  ;;  %9367 = vrot.lane.b32.xlu1 %v20491_v37, %s19152_s11 }
 0x40f   :  { %v7070_v11 = vmul.f32 %v7041_v12, %v19371_v43  ;;  %16728 = vmatmul.mubr.msk.f32.vlgmr.msra.gmra.mrb[12].mxu1 %vm7077_vm4, %v20698_v62  ;;  %9369 = vrot.lane.b32.xlu0 %v20514_v15, %s19152_s11  ;;  %v23544_v12 = vld [vmem:[#allocation6_spill] sm:$0xff] }
 0x410   :  { %v7019_v33 = vpop.permute.xlu1 %7018  ;;  %7176 = vmatprep.mubr.f32.mxu1 %v23501_v44  ;;  %v17758_v36 = vpack.c.bf16 %v7069_v28, %v7062_v39  ;;  %v23545_v39 = vld [vmem:[#allocation4_spill] sm:$0xff] }
 0x411   :  { %v17755_v21 = vpack.c.bf16 %v7070_v11, %v7063_v53  ;;  %v7021_v34 = vpop.permute.xlu0 %7020  ;;  %v7037_v45 = vsel %vm225_vm0, %v7017_v13, %v7019_v33 }
 0x412   :  { %9381 = vrot.lane.b32.xlu1 %v20507_v59, %s19152_s11  ;;  %v7038_v43 = vsel %vm225_vm0, %v7019_v33, %v7021_v34  ;;  %v7064_v13 = vmul.f32 %v7037_v45, %v23544_v12  ;;  %v7066_v33 = vmul.f32 %v7021_v34, %v19385_v49  ;;  %v23546_v34 = vld [vmem:[#allocation9_spill] sm:$0xff] }
 0x413   :  { %16729 = vmatmul.mubr.msk.f32.gmra.mrb[14].mxu1 %vm7077_vm4, %v20715_v56  ;;  %17757 = vmatprep.subr.msk.bf16.mxu1 %vm20684_vm15, %v17755_v21  ;;  %v7065_v21 = vmul.f32 %v7038_v43, %v23545_v39 }
 0x414   :  { %9383 = vrot.lane.b32.xlu0 %v20526_v55, %s19152_s11  ;;  %17760 = vmatpush1.bf16.msk.msra.mxu1 %vm20684_vm15, %v17758_v36  ;;  %v7031_v40 = vpop.permute.xlu1 %7030 }
 0x415   :  { %v7042_v50 = vsel %vm225_vm0, %v7029_v54, %v7031_v40  ;;  %v7033_v28 = vpop.permute.xlu0 %7032  ;;  %7247 = vmatprep.mubr.f32.mxu1 %v23501_v44 }
 0x416   :  { %v7071_v53 = vmul.f32 %v7042_v50, %v23544_v12  ;;  %v7043_v11 = vsel %vm225_vm0, %v7031_v40, %v7033_v28  ;;  %9365 = vrot.lane.b32.xlu1 %v20488_v38, %s19152_s11  ;;  %v7073_v36 = vmul.f32 %v7033_v28, %v19385_v49  ;;  %vm11090_vm0 = vcmask 130048  }
 0x417   :  { %v7072_v60 = vmul.f32 %v7043_v11, %v23545_v39  ;;  %16732 = vmatmul.mubr.msk.f32.vlgmr.msra.gmra.mrb[16].mxu1 %vm7077_vm4, %v20698_v62 }
 0x418   :  { %9379 = vrot.lane.b32.xlu0 %v20503_v20, %s19152_s11  ;;  %v6945_v54 = vpop.permute.xlu1 %6944  ;;  %7253 = vmatprep.mubr.f32.mxu1 %v23501_v44  ;;  %v17764_v43 = vpack.c.bf16 %v7071_v53, %v7064_v13  ;;  %v17767_v28 = vpack.c.bf16 %v7073_v36, %v7066_v33 }
 0x419   :  { %v17761_v40 = vpack.c.bf16 %v7072_v60, %v7065_v21  ;;  %v6947_v50 = vpop.permute.xlu0 %6946  ;;  %v6992_v36 = vsel %vm152_vm2, 0.0, %v6945_v54 }
 0x41a   :  { %9371 = vrot.lane.b32.xlu1 %v20518_v58, %s19152_s11  ;;  %v6968_v45 = vsel %vm152_vm2, %v6945_v54, %v6947_v50 }
 0x41b   :  { %16733 = vmatmul.mubr.msk.f32.gmra.mrb[18].mxu1 %vm7077_vm4, %v20715_v56  ;;  %17763 = vmatprep.subr.msk.bf16.mxu1 %vm20684_vm15, %v17761_v40  ;;  %v6995_v53 = vmul.f32 %v6968_v45, %v23546_v34  ;;  %v23547_v40 = vld [vmem:[#allocation10_spill] sm:$0xff] }
 0x41c   :  { %9373 = vrot.lane.b32.xlu0 %v20538_v2, %s19152_s11  ;;  %v6957_v12 = vpop.permute.xlu1 %6956  ;;  %17766 = vmatpush1.bf16.msk.msra.mxu1 %vm20684_vm15, %v17764_v43  ;;  %v6994_v45 = vmul.f32 %v6992_v36, %v23547_v40 }
 0x41d   :  { %17769 = vmatprep.subr.msk.bf16.mxu1 %vm20684_vm15, %v17767_v28  ;;  %v6959_v49 = vpop.permute.xlu0 %6958  ;;  %7324 = vmatprep.mubr.f32.mxu1 %v23501_v44  ;;  %v6993_v11 = vsel %vm152_vm2, 0.0, %v6957_v12 }
 0x41e   :  { %v6973_v60 = vsel %vm152_vm2, %v6957_v12, %v6959_v49  ;;  %9385 = vrot.lane.b32.xlu1 %v20530_v57, %s19152_s11  ;;  %v7001_v43 = vmul.f32 %v6993_v11, %v23547_v40 }
 0x41f   :  { %v7002_v39 = vmul.f32 %v6973_v60, %v23546_v34  ;;  %16736 = vmatmul.mubr.msk.f32.vlgmr.msra.gmra.mrb[20].mxu1 %vm7077_vm4, %v20698_v62 }
 0x420   :  { %9387 = vrot.lane.b32.xlu0 %v20550_v19, %s19152_s11  ;;  %v6949_v21 = vpop.permute.xlu1 %6948  ;;  %17772 = vmatpush3.bf16.msk.msra.mxu1 %vm20684_vm15, %v17767_v28 }
 0x421   :  { %v17773_v13 = vpack.c.bf16 %v7002_v39, %v6995_v53  ;;  %v6951_v33 = vpop.permute.xlu0 %6950  ;;  %7330 = vmatprep.mubr.f32.mxu1 %v23501_v44  ;;  %v6969_v12 = vsel %vm152_vm2, %v6947_v50, %v6949_v21  ;;  %v17776_v53 = vpack.c.bf16 %v7001_v43, %v6994_v45  ;;  %v20817_v43 = vld [vmem:[%s20669_s22 + $0x8] sm:$0xf] }
 0x422   :  { %9375 = vrot.lane.b32.xlu1 %v20542_v0, %s19152_s11  ;;  %v6970_v28 = vsel %vm152_vm2, %v6949_v21, %v6951_v33 }
 0x423   :  { %16737 = vmatmul.mubr.msk.f32.gmra.mrb[22].mxu1 %vm7077_vm4, %v20715_v56  ;;  %17775 = vmatprep.subr.msk.bf16.mxu1 %vm20684_vm15, %v17773_v13  ;;  %v6997_v36 = vmul.f32 %v6970_v28, %v19441_v23 }
 0x424   :  { %9377 = vrot.lane.b32.xlu0 %v20636_v3, %s19152_s11  ;;  %v6961_v54 = vpop.permute.xlu1 %6960  ;;  %17517 = vmatprep.mubr.msk.f32.mxu1 %vm7077_vm4, %v20698_v62  ;;  %v6996_v62 = vmul.f32 %v6969_v12, %v19437_v18  ;;  %v23548_v12 = vld [vmem:[#allocation12_spill] sm:$0xff] }
 0x425   :  { %v6974_v60 = vsel %vm152_vm2, %v6959_v49, %v6961_v54  ;;  %v6963_v34 = vpop.permute.xlu0 %6962  ;;  %v20802_v49 = vld [vmem:[%s20669_s22] sm:$0xff] }
 0x426   :  { %v7003_v11 = vmul.f32 %v6974_v60, %v19437_v18  ;;  %v6975_v39 = vsel %vm152_vm2, %v6961_v54, %v6963_v34  ;;  %9389 = vrot.lane.b32.xlu1 %v20553_v30, %s19152_s11 }
 0x427   :  { %v7004_v13 = vmul.f32 %v6975_v39, %v19441_v23  ;;  %17518 = vmatmul.mubr.msk.f32.vlgmr.msra.gmra.mrb[24].mxu1 %vm7077_vm4, %v20715_v56 }
 0x428   :  { %9391 = vrot.lane.b32.xlu0 %v20639_v41, %s19152_s11  ;;  %17778 = vmatpush1.bf16.msk.msra.mxu1 %vm20684_vm15, %v17776_v53  ;;  %v6953_v50 = vpop.permute.xlu1 %6952  ;;  %v17782_v23 = vpack.c.bf16 %v7003_v11, %v6996_v62  ;;  %v23549_v11 = vld [vmem:[#allocation11_spill] sm:$0xff]  ;;  %s19165_s11 = smov 8  }
 0x429   :  { %v17779_v21 = vpack.c.bf16 %v7004_v13, %v6997_v36  ;;  %v6955_v40 = vpop.permute.xlu0 %6954  ;;  %7503 = vmatprep.mubr.f32.mxu1 %v23501_v44  ;;  %v6971_v45 = vsel %vm152_vm2, %v6951_v33, %v6953_v50  ;;  %s20968_s25 = sld [smem:[%s23391_s0 + %s19165_s11]]  }
 0x42a   :  { %9782 = vrot.lane.b32.xlu1 %v20491_v37, %s19153_s12  ;;  %v6972_v18 = vsel %vm152_vm2, %v6953_v50, %v6955_v40  ;;  %v6998_v33 = vmul.f32 %v6971_v45, %v23548_v12  ;;  %v7000_v62 = vmul.f32 %v6955_v40, %v19457_v35  ;;  %s23269_s11 = sld [smem:[%s23391_s0 + %s19146_s6]]   ;;  %s19188_s6 = smov 30  }
 0x42b   :  { %16743 = vmatmul.mubr.msk.f32.vlgmr.msra.gmra.mrb[12].mxu1 %vm7077_vm4, %v20802_v49  ;;  %17781 = vmatprep.subr.msk.bf16.mxu1 %vm20684_vm15, %v17779_v21  ;;  %v6999_v39 = vmul.f32 %v6972_v18, %v23549_v11  ;;  %s16511_s27 = sld [smem:[%s23391_s0 + %s19188_s6]]  }
 0x42c   :  { %9784 = vrot.lane.b32.xlu0 %v20514_v15, %s19153_s12  ;;  %v6965_v56 = vpop.permute.xlu1 %6964  ;;  %17784 = vmatpush1.bf16.msk.msra.mxu1 %vm20684_vm15, %v17782_v23 }
 0x42d   :  { %v6976_v28 = vsel %vm152_vm2, %v6963_v34, %v6965_v56  ;;  %v6967_v54 = vpop.permute.xlu0 %6966  ;;  %7509 = vmatprep.mubr.f32.mxu1 %v23501_v44 }
 0x42e   :  { %v7005_v60 = vmul.f32 %v6976_v28, %v23548_v12  ;;  %v6977_v53 = vsel %vm152_vm2, %v6965_v56, %v6967_v54  ;;  %9796 = vrot.lane.b32.xlu1 %v20507_v59, %s19153_s12  ;;  %v7007_v13 = vmul.f32 %v6967_v54, %v19457_v35  ;;  %v23550_v28 = vld [vmem:[#allocation13_spill] sm:$0xff]  ;;  %vm11414_vm2 = vcmask 1043456  }
 0x42f   :  { %v7006_v36 = vmul.f32 %v6977_v53, %v23549_v11  ;;  %16744 = vmatmul.mubr.msk.f32.gmra.mrb[14].mxu1 %vm7077_vm4, %v20817_v43 }
 0x430   :  { %9798 = vrot.lane.b32.xlu0 %v20526_v55, %s19153_s12  ;;  %v7746_v34 = vpop.permute.xlu1 %7745  ;;  %7580 = vmatprep.mubr.f32.mxu1 %v23501_v44  ;;  %v17788_v23 = vpack.c.bf16 %v7005_v60, %v6998_v33  ;;  %v17791_v18 = vpack.c.bf16 %v7007_v13, %v7000_v62 }
 0x431   :  { %v17785_v50 = vpack.c.bf16 %v7006_v36, %v6999_v39  ;;  %v7748_v21 = vpop.permute.xlu0 %7747  ;;  %v7793_v33 = vsel %vm916_vm5, 0.0, %v7746_v34 }
 0x432   :  { %9780 = vrot.lane.b32.xlu1 %v20488_v38, %s19153_s12  ;;  %v7769_v56 = vsel %vm916_vm5, %v7746_v34, %v7748_v21  ;;  %v7795_v34 = vmul.f32 %v7793_v33, %v19450_v25 }
 0x433   :  { %16747 = vmatmul.mubr.msk.f32.vlgmr.msra.gmra.mrb[16].mxu1 %vm7077_vm4, %v20802_v49  ;;  %17787 = vmatprep.subr.msk.bf16.mxu1 %vm20684_vm15, %v17785_v50  ;;  %v7796_v54 = vmul.f32 %v7769_v56, %v23550_v28 }
 0x434   :  { %9794 = vrot.lane.b32.xlu0 %v20503_v20, %s19153_s12  ;;  %v7758_v45 = vpop.permute.xlu1 %7757  ;;  %17790 = vmatpush1.bf16.msk.msra.mxu1 %vm20684_vm15, %v17788_v23 }
 0x435   :  { %17793 = vmatprep.subr.msk.bf16.mxu1 %vm20684_vm15, %v17791_v18  ;;  %v7760_v35 = vpop.permute.xlu0 %7759  ;;  %7586 = vmatprep.mubr.f32.mxu1 %v23501_v44  ;;  %v7794_v39 = vsel %vm916_vm5, 0.0, %v7758_v45 }
 0x436   :  { %v7774_v40 = vsel %vm916_vm5, %v7758_v45, %v7760_v35  ;;  %9786 = vrot.lane.b32.xlu1 %v20518_v58, %s19153_s12  ;;  %v7802_v50 = vmul.f32 %v7794_v39, %v19450_v25 }
 0x437   :  { %v7803_v12 = vmul.f32 %v7774_v40, %v23550_v28  ;;  %16748 = vmatmul.mubr.msk.f32.gmra.mrb[18].mxu1 %vm7077_vm4, %v20817_v43 }
 0x438   :  { %9788 = vrot.lane.b32.xlu0 %v20538_v2, %s19153_s12  ;;  %v7750_v60 = vpop.permute.xlu1 %7749  ;;  %7657 = vmatprep.mubr.f32.mxu1 %v23501_v44 }
 0x439   :  { %v17797_v53 = vpack.c.bf16 %v7803_v12, %v7796_v54  ;;  %v7752_v11 = vpop.permute.xlu0 %7751  ;;  %v7770_v28 = vsel %vm916_vm5, %v7748_v21, %v7750_v60  ;;  %v20901_v21 = vld [vmem:[%s20669_s22 + $0x20] sm:$0xff] }
 0x43a   :  { %9800 = vrot.lane.b32.xlu1 %v20530_v57, %s19153_s12  ;;  %v7771_v36 = vsel %vm916_vm5, %v7750_v60, %v7752_v11  ;;  %v7797_v25 = vmul.f32 %v7770_v28, %v19517_v14 }
 0x43b   :  { %16751 = vmatmul.mubr.msk.f32.vlgmr.msra.gmra.mrb[20].mxu1 %vm7077_vm4, %v20802_v49  ;;  %v7798_v56 = vmul.f32 %v7771_v36, %v19521_v16 }
 0x43c   :  { %9802 = vrot.lane.b32.xlu0 %v20550_v19, %s19153_s12  ;;  %17796 = vmatpush3.bf16.msk.msra.mxu1 %vm20684_vm15, %v17791_v18  ;;  %v7762_v13 = vpop.permute.xlu1 %7761 }
 0x43d   :  { %17799 = vmatprep.subr.msk.bf16.mxu1 %vm20684_vm15, %v17797_v53  ;;  %v7764_v62 = vpop.permute.xlu0 %7763  ;;  %7663 = vmatprep.mubr.f32.mxu1 %v23501_v44  ;;  %v7775_v18 = vsel %vm916_vm5, %v7760_v35, %v7762_v13  ;;  %v17800_v35 = vpack.c.bf16 %v7802_v50, %v7795_v34  ;;  %v20919_v50 = vld [vmem:[%s20669_s22 + $0x28] sm:$0xf] }
 0x43e   :  { %v7776_v23 = vsel %vm916_vm5, %v7762_v13, %v7764_v62  ;;  %9790 = vrot.lane.b32.xlu1 %v20542_v0, %s19153_s12 }
 0x43f   :  { %v7805_v45 = vmul.f32 %v7776_v23, %v19521_v16  ;;  %16752 = vmatmul.mubr.msk.f32.gmra.mrb[22].mxu1 %vm7077_vm4, %v20817_v43  ;;  %v7804_v16 = vmul.f32 %v7775_v18, %v19517_v14 }
 0x440   :  { %9792 = vrot.lane.b32.xlu0 %v20636_v3, %s19153_s12  ;;  %v7754_v40 = vpop.permute.xlu1 %7753  ;;  %17524 = vmatprep.mubr.msk.f32.mxu1 %vm7077_vm4, %v20802_v49 }
 0x441   :  { %v17803_v54 = vpack.c.bf16 %v7805_v45, %v7798_v56  ;;  %v7756_v12 = vpop.permute.xlu0 %7755  ;;  %v7772_v23 = vsel %vm916_vm5, %v7752_v11, %v7754_v40 }
 0x442   :  { %9804 = vrot.lane.b32.xlu1 %v20553_v30, %s19153_s12  ;;  %v7773_v53 = vsel %vm916_vm5, %v7754_v40, %v7756_v12  ;;  %v7799_v45 = vmul.f32 %v7772_v23, %v19494_v61  ;;  %v7801_v34 = vmul.f32 %v7756_v12, %v19536_v27 }
 0x443   :  { %17525 = vmatmul.mubr.msk.f32.vlgmr.msra.gmra.mrb[24].mxu1 %vm7077_vm4, %v20817_v43  ;;  %v17806_v43 = vpack.c.bf16 %v7804_v16, %v7797_v25  ;;  %v7800_v39 = vmul.f32 %v7773_v53, %v19471_v48 }
 0x444   :  { %9806 = vrot.lane.b32.xlu0 %v20639_v41, %s19153_s12  ;;  %17802 = vmatpush1.bf16.msk.msra.mxu1 %vm20684_vm15, %v17800_v35  ;;  %v7766_v49 = vpop.permute.xlu1 %7765 }
 0x445   :  { %17805 = vmatprep.subr.msk.bf16.mxu1 %vm20684_vm15, %v17803_v54  ;;  %v7768_v60 = vpop.permute.xlu0 %7767  ;;  %7903 = vmatprep.mubr.f32.mxu1 %v23501_v44  ;;  %v7777_v36 = vsel %vm916_vm5, %v7764_v62, %v7766_v49 }
 0x446   :  { %v7778_v14 = vsel %vm916_vm5, %v7766_v49, %v7768_v60  ;;  %10197 = vrot.lane.b32.xlu1 %v20491_v37, %s19154_s13  ;;  %v7808_v62 = vmul.f32 %v7768_v60, %v19536_v27  ;;  %vm11407_vm5 = vcmask 97280  }
 0x447   :  { %v7807_v13 = vmul.f32 %v7778_v14, %v19471_v48  ;;  %16760 = vmatmul.mubr.msk.f32.vlgmr.msra.gmra.mrb[12].mxu1 %vm7077_vm4, %v20901_v21  ;;  %v7806_v48 = vmul.f32 %v7777_v36, %v19494_v61 }
 0x448   :  { %10199 = vrot.lane.b32.xlu0 %v20514_v15, %s19154_s13  ;;  %17808 = vmatpush1.bf16.msk.msra.mxu1 %vm20684_vm15, %v17806_v43  ;;  %v8162_v33 = vpop.permute.xlu1 %8161  ;;  %v17815_v54 = vpack.c.bf16 %v7808_v62, %v7801_v34 }
 0x449   :  { %v17809_v56 = vpack.c.bf16 %v7807_v13, %v7800_v39  ;;  %v8164_v18 = vpop.permute.xlu0 %8163  ;;  %7909 = vmatprep.mubr.f32.mxu1 %v23501_v44  ;;  %v17812_v28 = vpack.c.bf16 %v7806_v48, %v7799_v45  ;;  %v8215_v39 = vsel %vm1308_vm6, 0.0, %v8162_v33 }
 0x44a   :  { %10211 = vrot.lane.b32.xlu1 %v20507_v59, %s19154_s13  ;;  %v8189_v12 = vsel %vm1308_vm6, %v8162_v33, %v8164_v18  ;;  %v8217_v48 = vmul.f32 %v8215_v39, %v19531_v26 }
 0x44b   :  { %16761 = vmatmul.mubr.msk.f32.gmra.mrb[14].mxu1 %vm7077_vm4, %v20919_v50  ;;  %17811 = vmatprep.subr.msk.bf16.mxu1 %vm20684_vm15, %v17809_v56  ;;  %v8218_v53 = vmul.f32 %v8189_v12, %v19525_v17 }
 0x44c   :  { %10213 = vrot.lane.b32.xlu0 %v20526_v55, %s19154_s13  ;;  %v8176_v11 = vpop.permute.xlu1 %8175  ;;  %7980 = vmatprep.mubr.f32.mxu1 %v23501_v44 }
 0x44d   :  { %v8178_v40 = vpop.permute.xlu0 %8177  ;;  %v8216_v60 = vsel %vm1308_vm6, 0.0, %v8176_v11 }
 0x44e   :  { %10195 = vrot.lane.b32.xlu1 %v20488_v38, %s19154_s13  ;;  %v8195_v35 = vsel %vm1308_vm6, %v8176_v11, %v8178_v40  ;;  %v8224_v13 = vmul.f32 %v8216_v60, %v19531_v26  ;;  %v10625_v60 = vld [vmem:[%s20968_s25 + $0x8] sm:$0xf] }
 0x44f   :  { %16764 = vmatmul.mubr.msk.f32.vlgmr.msra.gmra.mrb[16].mxu1 %vm7077_vm4, %v20901_v21  ;;  %v8225_v16 = vmul.f32 %v8195_v35, %v19525_v17 }
 0x450   :  { %10209 = vrot.lane.b32.xlu0 %v20503_v20, %s19154_s13  ;;  %17814 = vmatpush1.bf16.msk.msra.mxu1 %vm20684_vm15, %v17812_v28  ;;  %v8166_v61 = vpop.permute.xlu1 %8165  ;;  %v17824_v28 = vpack.c.bf16 %v8224_v13, %v8217_v48  ;;  %v16774_v13 = vld [vmem:[%s20669_s22 + $0x38] sm:$0xf] }
 0x451   :  { %17817 = vmatprep.subr.msk.bf16.mxu1 %vm20684_vm15, %v17815_v54  ;;  %v20947_v27 = vpop.permute.xlu0 %8167  ;;  %7986 = vmatprep.mubr.f32.mxu1 %v23501_v44  ;;  %v17821_v43 = vpack.c.bf16 %v8225_v16, %v8218_v53  ;;  %v8190_v11 = vsel %vm1308_vm6, %v8164_v18, %v8166_v61  ;;  %v16773_v16 = vld [vmem:[%s20669_s22 + $0x30] sm:$0xff] }
 0x452   :  { %10201 = vrot.lane.b32.xlu1 %v20518_v58, %s19154_s13  ;;  %v8191_v23 = vsel %vm1308_vm6, %v8166_v61, %v20947_v27  ;;  %v8219_v18 = vmul.f32 %v8190_v11, %v19576_v63 }
 0x453   :  { %16765 = vmatmul.mubr.msk.f32.gmra.mrb[18].mxu1 %vm7077_vm4, %v20919_v50  ;;  %v8220_v34 = vmul.f32 %v8191_v23, %v19594_v1 }
 0x454   :  { %10203 = vrot.lane.b32.xlu0 %v20538_v2, %s19154_s13  ;;  %v8180_v25 = vpop.permute.xlu1 %8179  ;;  %8057 = vmatprep.mubr.f32.mxu1 %v23501_v44 }
 0x455   :  { %v8182_v49 = vpop.permute.xlu0 %8181  ;;  %v8196_v33 = vsel %vm1308_vm6, %v8178_v40, %v8180_v25 }
 0x456   :  { %10215 = vrot.lane.b32.xlu1 %v20530_v57, %s19154_s13  ;;  %v8197_v14 = vsel %vm1308_vm6, %v8180_v25, %v8182_v49 }
 0x457   :  { %16768 = vmatmul.mubr.msk.f32.vlgmr.msra.gmra.mrb[20].mxu1 %vm7077_vm4, %v20901_v21  ;;  %v8227_v56 = vmul.f32 %v8197_v14, %v19594_v1  ;;  %v10624_v1 = vld [vmem:[%s20968_s25] sm:$0xff]  ;;  %s19172_s25 = smov 19  }
 0x458   :  { %10217 = vrot.lane.b32.xlu0 %v20550_v19, %s19154_s13  ;;  %17820 = vmatpush3.bf16.msk.msra.mxu1 %vm20684_vm15, %v17815_v54  ;;  %v8170_v17 = vpop.permute.xlu1 %8169  ;;  %v8226_v54 = vmul.f32 %v8196_v33, %v19576_v63  ;;  %s22099_s28 = sld [smem:[%s23391_s0 + %s19172_s25]]   ;;  %s19181_s25 = smov 20  }
 0x459   :  { %17823 = vmatprep.subr.msk.bf16.mxu1 %vm20684_vm15, %v17821_v43  ;;  %v8172_v36 = vpop.permute.xlu0 %8171  ;;  %8063 = vmatprep.mubr.f32.mxu1 %v23501_v44  ;;  %v17827_v35 = vpack.c.bf16 %v8227_v56, %v8220_v34  ;;  %v8192_v23 = vsel %vm1308_vm6, %v20947_v27, %v8170_v17 }
 0x45a   :  { %10205 = vrot.lane.b32.xlu1 %v20542_v0, %s19154_s13  ;;  %v8193_v62 = vsel %vm1308_vm6, %v8170_v17, %v8172_v36  ;;  %v17830_v53 = vpack.c.bf16 %v8226_v54, %v8219_v18  ;;  %v8582_v54 = vmul.f32 %v20491_v37, %v19510_v8  ;;  %v8584_v18 = vmul.f32 %v20518_v58, %v23520_v7 }
 0x45b   :  { %16769 = vmatmul.mubr.msk.f32.gmra.mrb[22].mxu1 %vm7077_vm4, %v20919_v50  ;;  %v8222_v12 = vmul.f32 %v8193_v62, %v19560_v29  ;;  %v8221_v62 = vmul.f32 %v8192_v23, %v19598_v52  ;;  %v8586_v58 = vmul.f32 %v20542_v0, %v19553_v47  ;;  %v8587_v0 = vmul.f32 %v20636_v3, %v19660_v9 }
 0x45c   :  { %10207 = vrot.lane.b32.xlu0 %v20636_v3, %s19154_s13  ;;  %v8184_v45 = vpop.permute.xlu1 %8183  ;;  %17531 = vmatprep.mubr.msk.f32.mxu1 %vm7077_vm4, %v20901_v21 }
 0x45d   :  { %v8186_v40 = vpop.permute.xlu0 %8185  ;;  %v8198_v63 = vsel %vm1308_vm6, %v8182_v49, %v8184_v45 }
 0x45e   :  { %v8199_v26 = vsel %vm1308_vm6, %v8184_v45, %v8186_v40  ;;  %10219 = vrot.lane.b32.xlu1 %v20553_v30, %s19154_s13  ;;  %v8228_v33 = vmul.f32 %v8198_v63, %v19598_v52  ;;  %v8585_v63 = vmul.f32 %v20538_v2, %v23521_v24 }
 0x45f   :  { %v8229_v21 = vmul.f32 %v8199_v26, %v19560_v29  ;;  %17532 = vmatmul.mubr.msk.f32.vlgmr.msra.gmra.mrb[24].mxu1 %vm7077_vm4, %v20919_v50  ;;  %v10650_v50 = vld [vmem:[%s20982_s29] sm:$0xff] }
 0x460   :  { %10221 = vrot.lane.b32.xlu0 %v20639_v41, %s19154_s13  ;;  %17826 = vmatpush1.bf16.msk.msra.mxu1 %vm20684_vm15, %v17824_v28  ;;  %v8174_v61 = vpop.permute.xlu1 %8173  ;;  %v17836_v45 = vpack.c.bf16 %v8228_v33, %v8221_v62 }
 0x461   :  { %v17833_v25 = vpack.c.bf16 %v8229_v21, %v8222_v12  ;;  %17829 = vmatprep.subr.msk.bf16.mxu1 %vm20684_vm15, %v17827_v35  ;;  %v8188_v29 = vpop.permute.xlu0 %8187  ;;  %8325 = vmatprep.mubr.f32.mxu1 %v23501_v44  ;;  %v8194_v43 = vsel %vm1308_vm6, %v8172_v36, %v8174_v61  ;;  %v10651_v36 = vld [vmem:[%s20982_s29 + $0x8] sm:$0xf]  ;;  %v8588_v12 = vmul.f32 %v20503_v20, %v19506_v6  ;;  %s19173_s29 = smov 16  }
 0x462   :  { %10628 = vperm.xlu1 %19058, %v10624_v1   ;;  %v8200_v14 = vsel %vm1308_vm6, %v8186_v40, %v8188_v29  ;;  %v8223_v56 = vmul.f32 %v8194_v43, %v19612_v51  ;;  %v8581_v21 = vmul.f32 %v20488_v38, %v19506_v6  ;;  %v8590_v20 = vmul.f32 %v20526_v55, %v23522_v32  ;;  %v16790_v38 = vld [vmem:[%s20669_s22 + $0x40] sm:$0xff]  ;;  %s22171_s20 = sld [smem:[%s23391_s0 + %s19173_s29]]  }
 0x463   :  { %16777 = vmatmul.mubr.msk.f32.vlgmr.msra.gmra.mrb[12].mxu1 %vm7077_vm4, %v16773_v16  ;;  %v8230_v48 = vmul.f32 %v8200_v14, %v19612_v51  ;;  %v8589_v51 = vmul.f32 %v20507_v59, %v19510_v8  ;;  %v8591_v8 = vmul.f32 %v20530_v57, %v23520_v7  ;;  %v8593_v57 = vmul.f32 %v20553_v30, %v19553_v47 }
 0x464   :  { %10654 = vperm.xlu0 %19059, %v10650_v50   ;;  %17832 = vmatpush1.bf16.msk.msra.mxu1 %vm20684_vm15, %v17830_v53  ;;  %v21027_v39 = vpop.permute.xlu1 %8947  ;;  %v17848_v61 = vpack.c.bf16 %v8588_v12, %v8581_v21  ;;  %v8583_v7 = vmul.f32 %v20514_v15, %v23522_v32  ;;  %v16791_v32 = vld [vmem:[%s20669_s22 + $0x48] sm:$0xf]  ;;  %v8592_v47 = vmul.f32 %v20550_v19, %v23521_v24 }
 0x465   :  { %17835 = vmatprep.subr.msk.bf16.mxu1 %vm20684_vm15, %v17833_v25  ;;  %v21034_v49 = vpop.permute.xlu0 %8949  ;;  %8331 = vmatprep.mubr.f32.mxu1 %v23501_v44  ;;  %v17839_v11 = vpack.c.bf16 %v8230_v48, %v8223_v56  ;;  %v17845_v26 = vpack.c.bf16 %v8589_v51, %v8582_v54  ;;  %v17851_v25 = vpack.c.bf16 %v8591_v8, %v8584_v18 }
 0x466   :  { %10633 = vperm.xlu1 %19058, %v10625_v60   ;;  %v17854_v30 = vpack.c.bf16 %v8590_v20, %v8583_v7  ;;  %v8594_v50 = vmul.f32 %v20639_v41, %v19660_v9  ;;  %v17860_v43 = vpack.c.bf16 %v8592_v47, %v8585_v63  ;;  %v8974_v24 = vsel %vm2060_vm7, %v21027_v39, %v21034_v49  ;;  %v23553_v20 = vld [vmem:[#allocation18_spill] sm:$0xff]  ;;  %v16808_v47 = vld [vmem:[%s20669_s22 + $0x58] sm:$0xf] }
 0x467   :  { %16778 = vmatmul.mubr.msk.f32.gmra.mrb[14].mxu1 %vm7077_vm4, %v16774_v13 }
 0x468   :  { %10659 = vperm.xlu0 %19059, %v10651_v36   ;;  %v21043_v27 = vpop.permute.xlu1 %8961  ;;  %8402 = vmatprep.mubr.f32.mxu1 %v23501_v44  ;;  %v17863_v19 = vpack.c.bf16 %v8594_v50, %v8587_v0 }
 0x469   :  { %v21046_v17 = vpop.permute.xlu0 %8963 }
 0x46a   :  { %v8980_v3 = vsel %vm2060_vm7, %v21043_v27, %v21046_v17 }
 0x46b   :  { %16781 = vmatmul.mubr.msk.f32.vlgmr.msra.gmra.mrb[16].mxu1 %vm7077_vm4, %v16773_v16  ;;  %v9009_v41 = vmul.f32 %v8980_v3, %v19643_v5 }
 0x46c   :  { %17838 = vmatpush1.bf16.msk.msra.mxu1 %vm20684_vm15, %v17836_v45  ;;  %v21051_v34 = vpop.permute.xlu1 %8945  ;;  %8408 = vmatprep.mubr.f32.mxu1 %v23501_v44 }
 0x46d   :  { %17841 = vmatprep.subr.msk.bf16.mxu1 %vm20684_vm15, %v17839_v11  ;;  %v21056_v52 = vpop.permute.xlu0 %8959  ;;  %v8973_v33 = vsel %vm2060_vm7, %v21051_v34, %v21027_v39  ;;  %v23551_v39 = vld [vmem:[#allocation17_spill] sm:$0xff] }
 0x46e   :  { %v8979_v56 = vsel %vm2060_vm7, %v21056_v52, %v21043_v27  ;;  %v9001_v62 = vmul.f32 %v8973_v33, %v23551_v39  ;;  %v23552_v52 = vld [vmem:[#allocation23_spill] sm:$0xff] }
 0x46f   :  { %16782 = vmatmul.mubr.msk.f32.gmra.mrb[18].mxu1 %vm7077_vm4, %v16774_v13  ;;  %v9008_v27 = vmul.f32 %v8979_v56, %v23551_v39 }
 0x470   :  { %v21061_v40 = vpop.permute.xlu1 %8951  ;;  %8479 = vmatprep.mubr.f32.mxu1 %v23501_v44 }
 0x471   :  { %v21064_v28 = vpop.permute.xlu0 %8953  ;;  %v8975_v12 = vsel %vm2060_vm7, %v21034_v49, %v21061_v40 }
 0x472   :  { %v8976_v45 = vsel %vm2060_vm7, %v21061_v40, %v21064_v28  ;;  %v16807_v40 = vld [vmem:[%s20669_s22 + $0x50] sm:$0xff] }
 0x473   :  { %16785 = vmatmul.mubr.msk.f32.vlgmr.msra.gmra.mrb[20].mxu1 %vm7077_vm4, %v16773_v16  ;;  %v9004_v8 = vmul.f32 %v8976_v45, %v23552_v52 }
 0x474   :  { %17844 = vmatpush3.bf16.msk.msra.mxu1 %vm20684_vm15, %v17839_v11  ;;  %v21071_v35 = vpop.permute.xlu1 %8965  ;;  %8485 = vmatprep.mubr.f32.mxu1 %v23501_v44 }
 0x475   :  { %17847 = vmatprep.subr.msk.bf16.mxu1 %vm20684_vm15, %v17845_v26  ;;  %v21076_v59 = vpop.permute.xlu0 %8967  ;;  %v8981_v34 = vsel %vm2060_vm7, %v21046_v17, %v21071_v35  ;;  %v17872_v17 = vpack.c.bf16 %v9008_v27, %v9001_v62 }
 0x476   :  { %v8982_v48 = vsel %vm2060_vm7, %v21071_v35, %v21076_v59  ;;  %v9010_v35 = vmul.f32 %v8981_v34, %v23526_v31  ;;  %v23554_v34 = vld [vmem:[#allocation29_spill] sm:$0xff] }
 0x477   :  { %16786 = vmatmul.mubr.msk.f32.gmra.mrb[22].mxu1 %vm7077_vm4, %v16774_v13  ;;  %v9011_v51 = vmul.f32 %v8982_v48, %v23552_v52 }
 0x478   :  { %v21083_v37 = vpop.permute.xlu1 %8955  ;;  %17538 = vmatprep.mubr.msk.f32.mxu1 %vm7077_vm4, %v16773_v16  ;;  %v17857_v16 = vpack.c.bf16 %v8593_v57, %v8586_v58  ;;  %v9003_v57 = vmul.f32 %v8975_v12, %v23526_v31 }
 0x479   :  { %v21088_v1 = vpop.permute.xlu0 %8957  ;;  %v8977_v0 = vsel %vm2060_vm7, %v21064_v28, %v21083_v37 }
 0x47a   :  { %v8978_v21 = vsel %vm2060_vm7, %v21083_v37, %v21088_v1  ;;  %v17878_v7 = vpack.c.bf16 %v9010_v35, %v9003_v57  ;;  %v9005_v63 = vmul.f32 %v8977_v0, %v23525_v10 }
 0x47b   :  { %17539 = vmatmul.mubr.msk.f32.vlgmr.msra.gmra.mrb[24].mxu1 %vm7077_vm4, %v16774_v13  ;;  %v9002_v13 = vmul.f32 %v8974_v24, %v19643_v5 }
 0x47c   :  { %17850 = vmatpush1.bf16.msk.msra.mxu1 %vm20684_vm15, %v17848_v61  ;;  %v21099_v6 = vpop.permute.xlu1 %8969  ;;  %8689 = vmatprep.mubr.f32.mxu1 %v23501_v44  ;;  %v17875_v61 = vpack.c.bf16 %v9011_v51, %v9004_v8 }
 0x47d   :  { %17853 = vmatprep.subr.msk.bf16.mxu1 %vm20684_vm15, %v17851_v25  ;;  %v21107_v55 = vpop.permute.xlu0 %8971  ;;  %v17869_v36 = vpack.c.bf16 %v9009_v41, %v9002_v13  ;;  %v8983_v31 = vsel %vm2060_vm7, %v21076_v59, %v21099_v6  ;;  %v8999_v59 = vsel %vm2074_vm9, %v21088_v1, 0.0 }
 0x47e   :  { %v8984_v54 = vsel %vm2060_vm7, %v21099_v6, %v21107_v55  ;;  %v9012_v6 = vmul.f32 %v8983_v31, %v23525_v10  ;;  %v9007_v28 = vmul.f32 %v8999_v59, %v23528_v42  ;;  %v16825_v31 = vld [vmem:[%s20669_s22 + $0x68] sm:$0xf] }
 0x47f   :  { %16794 = vmatmul.mubr.msk.f32.vlgmr.msra.gmra.mrb[12].mxu1 %vm7077_vm4, %v16790_v38  ;;  %v9013_v25 = vmul.f32 %v8984_v54, %v23553_v20 }
 0x480   :  { %17856 = vmatpush1.bf16.msk.msra.mxu1 %vm20684_vm15, %v17854_v30  ;;  %v21114_v29 = vpop.permute.xlu1 %9367  ;;  %8695 = vmatprep.mubr.f32.mxu1 %v23501_v44  ;;  %v17884_v37 = vpack.c.bf16 %v9012_v6, %v9005_v63  ;;  %v23559_v63 = vld [vmem:[#allocation27_spill] sm:$0xff] }
 0x481   :  { %17859 = vmatprep.subr.msk.bf16.mxu1 %vm20684_vm15, %v17857_v16  ;;  %v21120_v15 = vpop.permute.xlu0 %9369  ;;  %v9000_v16 = vsel %vm2074_vm9, %v21107_v55, 0.0 }
 0x482   :  { %v9014_v50 = vmul.f32 %v9000_v16, %v23528_v42  ;;  %v9394_v42 = vsel %vm2453_vm8, %v21114_v29, %v21120_v15 }
 0x483   :  { %16795 = vmatmul.mubr.msk.f32.gmra.mrb[14].mxu1 %vm7077_vm4, %v16791_v32 }
 0x484   :  { %v21129_v53 = vpop.permute.xlu1 %9381  ;;  %8766 = vmatprep.mubr.f32.mxu1 %v23501_v44  ;;  %v17887_v1 = vpack.c.bf16 %v9014_v50, %v9007_v28 }
 0x486   :  { %v21134_v60 = vpop.permute.xlu0 %9383 }
 0x487   :  { %16798 = vmatmul.mubr.msk.f32.vlgmr.msra.gmra.mrb[16].mxu1 %vm7077_vm4, %v16790_v38  ;;  %v9400_v3 = vsel %vm2453_vm8, %v21129_v53, %v21134_v60 }
 0x488   :  { %17862 = vmatpush1.bf16.msk.msra.mxu1 %vm20684_vm15, %v17860_v43  ;;  %v21142_v9 = vpop.permute.xlu1 %9365  ;;  %8772 = vmatprep.mubr.f32.mxu1 %v23501_v44  ;;  %v9426_v41 = vmul.f32 %v9400_v3, %v23527_v46 }
 0x489   :  { %17865 = vmatprep.subr.msk.bf16.mxu1 %vm20684_vm15, %v17863_v19  ;;  %v9393_v48 = vsel %vm2453_vm8, %v21142_v9, %v21114_v29 }
 0x48a   :  { %v21150_v2 = vpop.permute.xlu0 %9379 }
 0x48b   :  { %16799 = vmatmul.mubr.msk.f32.gmra.mrb[18].mxu1 %vm7077_vm4, %v16791_v32  ;;  %v9399_v39 = vsel %vm2453_vm8, %v21150_v2, %v21129_v53  ;;  %v9419_v53 = vmul.f32 %v9393_v48, %v23529_v4 }
 0x48c   :  { %v21154_v14 = vpop.permute.xlu1 %9371  ;;  %8843 = vmatprep.mubr.f32.mxu1 %v23501_v44  ;;  %v9425_v9 = vmul.f32 %v9399_v39, %v23529_v4 }
 0x48d   :  { %v9395_v54 = vsel %vm2453_vm8, %v21120_v15, %v21154_v14  ;;  %v16824_v15 = vld [vmem:[%s20669_s22 + $0x60] sm:$0xff] }
 0x48e   :  { %v21158_v23 = vpop.permute.xlu0 %9373 }
 0x48f   :  { %16802 = vmatmul.mubr.msk.f32.vlgmr.msra.gmra.mrb[20].mxu1 %vm7077_vm4, %v16790_v38  ;;  %v9396_v2 = vsel %vm2453_vm8, %v21154_v14, %v21158_v23 }
 0x490   :  { %17868 = vmatpush3.bf16.msk.msra.mxu1 %vm20684_vm15, %v17863_v19  ;;  %v21172_v5 = vpop.permute.xlu1 %9385  ;;  %8849 = vmatprep.mubr.f32.mxu1 %v23501_v44  ;;  %v9422_v12 = vmul.f32 %v9396_v2, %v23554_v34 }
 0x491   :  { %17871 = vmatprep.subr.msk.bf16.mxu1 %vm20684_vm15, %v17869_v36  ;;  %v9420_v36 = vmul.f32 %v9394_v42, %v23527_v46  ;;  %v9401_v45 = vsel %vm2453_vm8, %v21134_v60, %v21172_v5  ;;  %v17896_v60 = vpack.c.bf16 %v9425_v9, %v9419_v53  ;;  %v23561_v53 = vld [vmem:[#allocation37_spill] sm:$0xff] }
 0x492   :  { %v21182_v11 = vpop.permute.xlu0 %9387 }
 0x493   :  { %16803 = vmatmul.mubr.msk.f32.gmra.mrb[22].mxu1 %vm7077_vm4, %v16791_v32  ;;  %v17893_v56 = vpack.c.bf16 %v9426_v41, %v9420_v36  ;;  %v9402_v62 = vsel %vm2453_vm8, %v21172_v5, %v21182_v11  ;;  %v23555_v5 = vld [vmem:[#allocation28_spill] sm:$0xff] }
 0x494   :  { %v21192_v26 = vpop.permute.xlu1 %9375  ;;  %17545 = vmatprep.mubr.msk.f32.mxu1 %vm7077_vm4, %v16790_v38  ;;  %v9006_v38 = vmul.f32 %v8978_v21, %v23553_v20  ;;  %v9428_v52 = vmul.f32 %v9402_v62, %v23554_v34  ;;  %v9427_v8 = vmul.f32 %v9401_v45, %v23555_v5 }
 0x496   :  { %v21203_v18 = vpop.permute.xlu0 %9377  ;;  %v17881_v30 = vpack.c.bf16 %v9013_v25, %v9006_v38  ;;  %v9421_v25 = vmul.f32 %v9395_v54, %v23555_v5 }
 0x497   :  { %17546 = vmatmul.mubr.msk.f32.vlgmr.msra.gmra.mrb[24].mxu1 %vm7077_vm4, %v16791_v32  ;;  %v9398_v51 = vsel %vm2453_vm8, %v21192_v26, %v21203_v18  ;;  %v17899_v18 = vpack.c.bf16 %v9428_v52, %v9422_v12  ;;  %v23563_v12 = vld [vmem:[#allocation31_spill] sm:$0xff] }
 0x498   :  { %17874 = vmatpush1.bf16.msk.msra.mxu1 %vm20684_vm15, %v17872_v17  ;;  %v21210_v49 = vpop.permute.xlu1 %9389  ;;  %9109 = vmatprep.mubr.f32.mxu1 %v23501_v44  ;;  %v9417_v17 = vsel %vm2466_vm10, %v9398_v51, 0.0  ;;  %v17902_v57 = vpack.c.bf16 %v9427_v8, %v9421_v25 }
 0x499   :  { %17877 = vmatprep.subr.msk.bf16.mxu1 %vm20684_vm15, %v17875_v61  ;;  %v23556_v61 = vld [vmem:[#allocation25_spill] sm:$0xff] }
 0x49a   :  { %v9392_v58 = vpop.permute.xlu0 %9391  ;;  %v9424_v14 = vmul.f32 %v9417_v17, %v23556_v61 }
 0x49b   :  { %16811 = vmatmul.mubr.msk.f32.vlgmr.msra.gmra.mrb[12].mxu1 %vm7077_vm4, %v16807_v40  ;;  %v9404_v29 = vsel %vm2453_vm8, %v21210_v49, %v9392_v58 }
 0x49c   :  { %17880 = vmatpush1.bf16.msk.msra.mxu1 %vm20684_vm15, %v17878_v7  ;;  %v21225_v32 = vpop.permute.xlu1 %9782  ;;  %9115 = vmatprep.mubr.f32.mxu1 %v23501_v44  ;;  %v9418_v4 = vsel %vm2466_vm10, %v9404_v29, 0.0  ;;  %vm11682_vm10 = vcmask 138240  }
 0x49d   :  { %17883 = vmatprep.subr.msk.bf16.mxu1 %vm20684_vm15, %v17881_v30  ;;  %v9430_v20 = vmul.f32 %v9418_v4, %v23556_v61  ;;  %v9397_v30 = vsel %vm2453_vm8, %v21158_v23, %v21192_v26 }
 0x49e   :  { %v21237_v55 = vpop.permute.xlu0 %9784 }
 0x49f   :  { %16812 = vmatmul.mubr.msk.f32.gmra.mrb[14].mxu1 %vm7077_vm4, %v16808_v47  ;;  %v17905_v38 = vpack.c.bf16 %v9430_v20, %v9424_v14  ;;  %v9809_v26 = vsel %vm2845_vm11, %v21225_v32, %v21237_v55  ;;  %v16842_v20 = vld [vmem:[%s20669_s22 + $0x78] sm:$0xf] }
 0x4a0   :  { %v21242_v43 = vpop.permute.xlu1 %9796  ;;  %9186 = vmatprep.mubr.f32.mxu1 %v23501_v44  ;;  %v9835_v3 = vmul.f32 %v9809_v26, %v23559_v63 }
 0x4a2   :  { %v21246_v19 = vpop.permute.xlu0 %9798 }
 0x4a3   :  { %16815 = vmatmul.mubr.msk.f32.vlgmr.msra.gmra.mrb[16].mxu1 %vm7077_vm4, %v16807_v40  ;;  %v9815_v23 = vsel %vm2845_vm11, %v21242_v43, %v21246_v19 }
 0x4a4   :  { %17886 = vmatpush1.bf16.msk.msra.mxu1 %vm20684_vm15, %v17884_v37  ;;  %v21254_v10 = vpop.permute.xlu1 %9780  ;;  %9192 = vmatprep.mubr.f32.mxu1 %v23501_v44  ;;  %v9841_v28 = vmul.f32 %v9815_v23, %v23559_v63 }
 0x4a5   :  { %17889 = vmatprep.subr.msk.bf16.mxu1 %vm20684_vm15, %v17887_v1  ;;  %v9808_v41 = vsel %vm2845_vm11, %v21254_v10, %v21225_v32  ;;  %v23560_v32 = vld [vmem:[#allocation30_spill] sm:$0xff] }
 0x4a6   :  { %v21262_v24 = vpop.permute.xlu0 %9794  ;;  %v17917_v42 = vpack.c.bf16 %v9841_v28, %v9835_v3  ;;  %v9834_v10 = vmul.f32 %v9808_v41, %v23560_v32  ;;  %v23567_v3 = vld [vmem:[#allocation34_spill] sm:$0xff] }
 0x4a7   :  { %16816 = vmatmul.mubr.msk.f32.gmra.mrb[18].mxu1 %vm7077_vm4, %v16808_v47  ;;  %v9814_v36 = vsel %vm2845_vm11, %v21262_v24, %v21242_v43 }
 0x4a8   :  { %v21266_v13 = vpop.permute.xlu1 %9786  ;;  %9263 = vmatprep.mubr.f32.mxu1 %v23501_v44  ;;  %v9840_v43 = vmul.f32 %v9814_v36, %v23560_v32  ;;  %v23568_v36 = vld [vmem:[#allocation40_spill] sm:$0xff] }
 0x4a9   :  { %v9810_v34 = vsel %vm2845_vm11, %v21237_v55, %v21266_v13  ;;  %v16841_v55 = vld [vmem:[%s20669_s22 + $0x70] sm:$0xff] }
 0x4aa   :  { %v21270_v33 = vpop.permute.xlu0 %9788  ;;  %v17920_v51 = vpack.c.bf16 %v9840_v43, %v9834_v10 }
 0x4ab   :  { %16819 = vmatmul.mubr.msk.f32.vlgmr.msra.gmra.mrb[20].mxu1 %vm7077_vm4, %v16807_v40  ;;  %v9811_v24 = vsel %vm2845_vm11, %v21266_v13, %v21270_v33 }
 0x4ac   :  { %17892 = vmatpush3.bf16.msk.msra.mxu1 %vm20684_vm15, %v17887_v1  ;;  %v21284_v46 = vpop.permute.xlu1 %9800  ;;  %9269 = vmatprep.mubr.f32.mxu1 %v23501_v44  ;;  %v9837_v52 = vmul.f32 %v9811_v24, %v23561_v53 }
 0x4ad   :  { %17895 = vmatprep.subr.msk.bf16.mxu1 %vm20684_vm15, %v17893_v56  ;;  %v9816_v29 = vsel %vm2845_vm11, %v21246_v19, %v21284_v46  ;;  %v23562_v19 = vld [vmem:[#allocation36_spill] sm:$0xff] }
 0x4ae   :  { %v21296_v27 = vpop.permute.xlu0 %9802  ;;  %v9836_v5 = vmul.f32 %v9810_v34, %v23562_v19 }
 0x4af   :  { %16820 = vmatmul.mubr.msk.f32.gmra.mrb[22].mxu1 %vm7077_vm4, %v16808_v47  ;;  %v9817_v56 = vsel %vm2845_vm11, %v21284_v46, %v21296_v27  ;;  %v9842_v46 = vmul.f32 %v9816_v29, %v23562_v19  ;;  %v16859_v19 = vld [vmem:[%s20669_s22 + $0x88] sm:$0xf] }
 0x4b0   :  { %17552 = vmatprep.mubr.msk.f32.mxu1 %vm7077_vm4, %v16807_v40  ;;  %v21314_v35 = vpop.permute.xlu1 %9790  ;;  %v9403_v40 = vsel %vm2453_vm8, %v21182_v11, %v21210_v49  ;;  %v23557_v11 = vld [vmem:[#allocation26_spill] sm:$0xff]  ;;  %v9843_v9 = vmul.f32 %v9817_v56, %v23561_v53  ;;  %vm11580_vm8 = vcmask 556032  }
 0x4b1   :  { %v9429_v49 = vmul.f32 %v9403_v40, %v23557_v11  ;;  %v9423_v16 = vmul.f32 %v9397_v30, %v23557_v11  ;;  %v9812_v25 = vsel %vm2845_vm11, %v21270_v33, %v21314_v35  ;;  %v23566_v11 = vld [vmem:[#allocation35_spill] sm:$0xff]  ;;  %v23570_v53 = vld [vmem:[#allocation38_spill] sm:$0xff] }
 0x4b2   :  { %v9793_v21 = vpop.permute.xlu0 %9792  ;;  %v17923_v54 = vpack.c.bf16 %v9843_v9, %v9837_v52 }
 0x4b3   :  { %17553 = vmatmul.mubr.msk.f32.vlgmr.msra.gmra.mrb[24].mxu1 %vm7077_vm4, %v16808_v47  ;;  %v23558_v47 = vld [vmem:[#allocation32_spill] sm:$0xff]  ;;  %v17908_v59 = vpack.c.bf16 %v9429_v49, %v9423_v16  ;;  %v9813_v2 = vsel %vm2845_vm11, %v21314_v35, %v9793_v21  ;;  %v17926_v21 = vpack.c.bf16 %v9842_v46, %v9836_v5 }
 0x4b4   :  { %17898 = vmatpush1.bf16.msk.msra.mxu1 %vm20684_vm15, %v17896_v60  ;;  %9524 = vmatprep.mubr.f32.mxu1 %v23501_v44  ;;  %v21330_v7 = vpop.permute.xlu1 %9804  ;;  %v17911_v0 = vpack.c.bf16 %v23558_v47, %v23558_v47  ;;  %v9832_v4 = vsel %vm2858_vm12, %v9813_v2, 0.0 }
 0x4b5   :  { %17901 = vmatprep.subr.msk.bf16.mxu1 %vm20684_vm15, %v17899_v18  ;;  %v9839_v13 = vmul.f32 %v9832_v4, %v23563_v12  ;;  %v9818_v18 = vsel %vm2845_vm11, %v21296_v27, %v21330_v7  ;;  %v23571_v4 = vld [vmem:[#allocation41_spill] sm:$0xff] }
 0x4b6   :  { %v9807_v58 = vpop.permute.xlu0 %9806 }
 0x4b7   :  { %16828 = vmatmul.mubr.msk.f32.vlgmr.msra.gmra.mrb[12].mxu1 %vm7077_vm4, %v16824_v15  ;;  %v9819_v48 = vsel %vm2845_vm11, %v21330_v7, %v9807_v58 }
 0x4b8   :  { %17904 = vmatpush1.bf16.msk.msra.mxu1 %vm20684_vm15, %v17902_v57  ;;  %9530 = vmatprep.mubr.f32.mxu1 %v23501_v44  ;;  %v21347_v6 = vpop.permute.xlu1 %10197  ;;  %v9833_v45 = vsel %vm2858_vm12, %v9819_v48, 0.0 }
 0x4b9   :  { %17907 = vmatprep.subr.msk.bf16.mxu1 %vm20684_vm15, %v17905_v38  ;;  %v9845_v60 = vmul.f32 %v9833_v45, %v23563_v12  ;;  %v23565_v38 = vld [vmem:[#allocation39_spill] sm:$0xff] }
 0x4ba   :  { %v21349_v50 = vpop.permute.xlu0 %10199  ;;  %v17935_v7 = vpack.c.bf16 %v23565_v38, %v23565_v38 }
 0x4bb   :  { %16829 = vmatmul.mubr.msk.f32.gmra.mrb[14].mxu1 %vm7077_vm4, %v16825_v31  ;;  %v17929_v61 = vpack.c.bf16 %v9845_v60, %v9839_v13  ;;  %v10224_v30 = vsel %vm3237_vm13, %v21347_v6, %v21349_v50  ;;  %v23572_v60 = vld [vmem:[#allocation43_spill] sm:$0xff] }
 0x4bc   :  { %9601 = vmatprep.mubr.f32.mxu1 %v23501_v44  ;;  %v21365_v37 = vpop.permute.xlu1 %10211  ;;  %v10250_v16 = vmul.f32 %v10224_v30, %v23566_v11  ;;  %v17959_v5 = vpack.c.bf16 %v23572_v60, %v23572_v60  ;;  %v10937_v60 = vld [vmem:[%s21528_s3 + $0x158] sm:$0xff] }
 0x4be   :  { %v21367_v1 = vpop.permute.xlu0 %10213 }
 0x4bf   :  { %16832 = vmatmul.mubr.msk.f32.vlgmr.msra.gmra.mrb[16].mxu1 %vm7077_vm4, %v16824_v15  ;;  %v10230_v33 = vsel %vm3237_vm13, %v21365_v37, %v21367_v1 }
 0x4c0   :  { %17910 = vmatpush1.bf16.msk.msra.mxu1 %vm20684_vm15, %v17908_v59  ;;  %9607 = vmatprep.mubr.f32.mxu1 %v23501_v44  ;;  %v10196_v39 = vpop.permute.xlu1 %10195  ;;  %v10256_v49 = vmul.f32 %v10230_v33, %v23566_v11  ;;  %v10907_v33 = vld [vmem:[%s21528_s3 + $0x68] sm:$0xff]  ;;  %v10906_v11 = vld [vmem:[%s21528_s3 + $0x60] sm:$0xff] }
 0x4c1   :  { %17913 = vmatprep.subr.msk.bf16.mxu1 %vm20684_vm15, %v17911_v0  ;;  %v10223_v23 = vsel %vm3237_vm13, %v10196_v39, %v21347_v6  ;;  %v23569_v39 = vld [vmem:[#allocation42_spill] sm:$0xff] }
 0x4c2   :  { %v10210_v62 = vpop.permute.xlu0 %10209  ;;  %v17941_v59 = vpack.c.bf16 %v10256_v49, %v10250_v16  ;;  %v10908_v49 = vld [vmem:[%s21528_s3 + $0x70] sm:$0xff]  ;;  %v10911_v16 = vld [vmem:[%s21528_s3 + $0x88] sm:$0xff] }
 0x4c3   :  { %16833 = vmatmul.mubr.msk.f32.gmra.mrb[18].mxu1 %vm7077_vm4, %v16825_v31  ;;  %v10229_v26 = vsel %vm3237_vm13, %v10210_v62, %v21365_v37 }
 0x4c4   :  { %9678 = vmatprep.mubr.f32.mxu1 %v23501_v44  ;;  %v10202_v8 = vpop.permute.xlu1 %10201  ;;  %v10255_v6 = vmul.f32 %v10229_v26, %v23567_v3  ;;  %v10912_v26 = vld [vmem:[%s21528_s3 + $0x90] sm:$0xff] }
 0x4c5   :  { %v10225_v10 = vsel %vm3237_vm13, %v21349_v50, %v10202_v8  ;;  %v16858_v50 = vld [vmem:[%s20669_s22 + $0x80] sm:$0xff]  ;;  %s19171_s22 = smov 12  }
 0x4c6   :  { %v21411_v17 = vpop.permute.xlu0 %10203  ;;  %v10251_v2 = vmul.f32 %v10225_v10, %v23569_v39  ;;  %v10920_v10 = vld [vmem:[%s21528_s3 + $0xd0] sm:$0xff]  ;;  %s16493_s24 = sld [smem:[%s23391_s0 + %s19171_s22]]   ;;  %s19180_s22 = smov 22  }
 0x4c7   :  { %16836 = vmatmul.mubr.msk.f32.vlgmr.msra.gmra.mrb[20].mxu1 %vm7077_vm4, %v16824_v15  ;;  %v10226_v37 = vsel %vm3237_vm13, %v10202_v8, %v21411_v17 }
 0x4c8   :  { %17916 = vmatpush3.bf16.msk.msra.mxu1 %vm20684_vm15, %v17911_v0  ;;  %9684 = vmatprep.mubr.f32.mxu1 %v23501_v44  ;;  %v10216_v57 = vpop.permute.xlu1 %10215  ;;  %v10252_v43 = vmul.f32 %v10226_v37, %v23568_v36  ;;  %v10916_v37 = vld [vmem:[%s21528_s3 + $0xb0] sm:$0xff] }
 0x4c9   :  { %17919 = vmatprep.subr.msk.bf16.mxu1 %vm20684_vm15, %v17917_v42  ;;  %v10249_v42 = vmul.f32 %v10223_v23, %v23567_v3  ;;  %v10231_v41 = vsel %vm3237_vm13, %v21367_v1, %v10216_v57  ;;  %v10910_v23 = vld [vmem:[%s21528_s3 + $0x80] sm:$0xff] }
 0x4ca   :  { %v10218_v27 = vpop.permute.xlu0 %10217  ;;  %v10257_v62 = vmul.f32 %v10231_v41, %v23569_v39  ;;  %v17983_v3 = vpack.c.bf16 %v10912_v26, %v10910_v23  ;;  %v10919_v41 = vld [vmem:[%s21528_s3 + $0xc8] sm:$0xff] }
 0x4cb   :  { %16837 = vmatmul.mubr.msk.f32.gmra.mrb[22].mxu1 %vm7077_vm4, %v16825_v31  ;;  %v10232_v63 = vsel %vm3237_vm13, %v10216_v57, %v10218_v27  ;;  %v17944_v24 = vpack.c.bf16 %v10255_v6, %v10249_v42  ;;  %v10903_v57 = vld [vmem:[%s21528_s3 + $0x48] sm:$0xff]  ;;  %v10914_v6 = vld [vmem:[%s21528_s3 + $0xa0] sm:$0xff] }
 0x4cc   :  { %17559 = vmatprep.mubr.msk.f32.mxu1 %vm7077_vm4, %v16824_v15  ;;  %v23564_v15 = vld [vmem:[#allocation33_spill] sm:$0xff]  ;;  %v10206_v35 = vpop.permute.xlu1 %10205  ;;  %v10258_v56 = vmul.f32 %v10232_v63, %v23568_v36  ;;  %v17950_v34 = vpack.c.bf16 %v10257_v62, %v10251_v2  ;;  %v10915_v63 = vld [vmem:[%s21528_s3 + $0xa8] sm:$0xff] }
 0x4cd   :  { %v9844_v14 = vmul.f32 %v9818_v18, %v23564_v15  ;;  %v9838_v40 = vmul.f32 %v9812_v25, %v23564_v15  ;;  %v10227_v46 = vsel %vm3237_vm13, %v21411_v17, %v10206_v35  ;;  %v10897_v17 = vld [vmem:[%s21528_s3 + $0x18] sm:$0xff]  ;;  %v10899_v18 = vld [vmem:[%s21528_s3 + $0x28] sm:$0xff]  ;;  %v10898_v15 = vld [vmem:[%s21528_s3 + $0x20] sm:$0xff] }
 0x4ce   :  { %v17947_v29 = vpack.c.bf16 %v10258_v56, %v10252_v43  ;;  %v10253_v12 = vmul.f32 %v10227_v46, %v23571_v4  ;;  %v17965_v13 = vpack.c.bf16 %v10897_v17, %v10895_v22  ;;  %v10921_v36 = vld [vmem:[%s21528_s3 + $0xd8] sm:$0xff]  ;;  %v17987_v56 = vpack.c.bf16 %v10916_v37, %v10914_v6  ;;  %v10923_v43 = vld [vmem:[%s21528_s3 + $0xe8] sm:$0xff]  ;;  %v10934_v22 = vld [vmem:[%s21528_s3 + $0x140] sm:$0xff] }
 0x4cf   :  { %17560 = vmatmul.mubr.msk.f32.vlgmr.msra.gmra.mrb[24].mxu1 %vm7077_vm4, %v16825_v31  ;;  %v17932_v58 = vpack.c.bf16 %v9844_v14, %v9838_v40  ;;  %v10208_v31 = vpop.permute.xlu0 %10207  ;;  %v10900_v14 = vld [vmem:[%s21528_s3 + $0x30] sm:$0xff]  ;;  %v10950_v37 = vld [vmem:[%s21528_s3 + $0x1c0] sm:$0xff] }
 0x4d0   :  { %17922 = vmatpush1.bf16.msk.msra.mxu1 %vm20684_vm15, %v17920_v51  ;;  %9939 = vmatprep.mubr.f32.mxu1 %v23501_v44  ;;  %v10220_v47 = vpop.permute.xlu1 %10219  ;;  %v10228_v48 = vsel %vm3237_vm13, %v10206_v35, %v10208_v31  ;;  %v17971_v40 = vpack.c.bf16 %v10900_v14, %v10898_v15  ;;  %v10909_v35 = vld [vmem:[%s21528_s3 + $0x78] sm:$0xff]  ;;  %v10936_v17 = vld [vmem:[%s21528_s3 + $0x150] sm:$0xff] }
 0x4d1   :  { %17925 = vmatprep.subr.msk.bf16.mxu1 %vm20684_vm15, %v17923_v54  ;;  %v10247_v1 = vsel %vm3250_vm14, %v10228_v48, 0.0  ;;  %v10233_v52 = vsel %vm3237_vm13, %v10218_v27, %v10220_v47  ;;  %17966 = vmatprep.subr.bf16.mxu0 %v17965_v13  ;;  %v10905_v27 = vld [vmem:[%s21528_s3 + $0x58] sm:$0xff]  ;;  %v17977_v30 = vpack.c.bf16 %v10909_v35, %v10907_v33  ;;  %v17989_v48 = vpack.c.bf16 %v10921_v36, %v10919_v41  ;;  %v10939_v13 = vld [vmem:[%s21528_s3 + $0x168] sm:$0xff]  ;;  %v10952_v41 = vld [vmem:[%s21528_s3 + $0x1d0] sm:$0xff] }
 0x4d2   :  { %v10254_v45 = vmul.f32 %v10247_v1, %v23570_v53  ;;  %v10259_v54 = vmul.f32 %v10233_v52, %v23571_v4  ;;  %v17973_v38 = vpack.c.bf16 %v10905_v27, %v10903_v57  ;;  %v10922_v1 = vld [vmem:[%s21528_s3 + $0xe0] sm:$0xff]  ;;  %v10931_v52 = vld [vmem:[%s21528_s3 + $0x128] sm:$0xff]  ;;  %v10945_v15 = vld [vmem:[%s21528_s3 + $0x198] sm:$0xff] }
 0x4d3   :  { %16845 = vmatmul.mubr.msk.f32.vlgmr.msra.gmra.mrb[12].mxu1 %vm7077_vm4, %v16841_v55  ;;  %v10222_v0 = vpop.permute.xlu0 %10221  ;;  %v10930_v4 = vld [vmem:[%s21528_s3 + $0x120] sm:$0xff] }
 0x4d4   :  { %17928 = vmatpush1.bf16.msk.msra.mxu1 %vm20684_vm15, %v17926_v21  ;;  %9945 = vmatprep.mubr.f32.mxu1 %v23501_v44  ;;  %v10234_v28 = vsel %vm3237_vm13, %v10220_v47, %v10222_v0  ;;  %v17956_v8 = vpack.c.bf16 %v10259_v54, %v10253_v12  ;;  %v10896_v21 = vld [vmem:[%s21528_s3 + $0x10] sm:$0xff]  ;;  %v10913_v47 = vld [vmem:[%s21528_s3 + $0x98] sm:$0xff]  ;;  %v17979_v0 = vpack.c.bf16 %v10908_v49, %v10906_v11  ;;  %v10935_v12 = vld [vmem:[%s21528_s3 + $0x148] sm:$0xff] }
 0x4d5   :  { %17931 = vmatprep.subr.msk.bf16.mxu1 %vm20684_vm15, %v17929_v61  ;;  %v10248_v32 = vsel %vm3250_vm14, %v10234_v28, 0.0  ;;  %v10901_v61 = vld [vmem:[%s21528_s3 + $0x38] sm:$0xff]  ;;  %v10932_v54 = vld [vmem:[%s21528_s3 + $0x130] sm:$0xff]  ;;  %v10942_v27 = vld [vmem:[%s21528_s3 + $0x180] sm:$0xff] }
 0x4d6   :  { %v10260_v9 = vmul.f32 %v10248_v32, %v23570_v53  ;;  %v17969_v25 = vpack.c.bf16 %v10901_v61, %v10899_v18  ;;  %v10917_v28 = vld [vmem:[%s21528_s3 + $0xb8] sm:$0xff]  ;;  %v10918_v32 = vld [vmem:[%s21528_s3 + $0xc0] sm:$0xff]  ;;  %v10927_v53 = vld [vmem:[%s21528_s3 + $0x108] sm:$0xff] }
 0x4d7   :  { %16846 = vmatmul.mubr.msk.f32.gmra.mrb[14].mxu1 %vm7077_vm4, %v16842_v20  ;;  %v17985_v42 = vpack.c.bf16 %v10917_v28, %v10915_v63  ;;  %v17991_v39 = vpack.c.bf16 %v10920_v10, %v10918_v32  ;;  %v10938_v18 = vld [vmem:[%s21528_s3 + $0x160] sm:$0xff] }
 0x4d8   :  { %10016 = vmatprep.mubr.f32.mxu1 %v23501_v44  ;;  %v17953_v51 = vpack.c.bf16 %v10260_v9, %v10254_v45  ;;  %v10929_v9 = vld [vmem:[%s21528_s3 + $0x118] sm:$0xff]  ;;  %v10926_v45 = vld [vmem:[%s21528_s3 + $0x100] sm:$0xff] }
 0x4db   :  { %16849 = vmatmul.mubr.msk.f32.vlgmr.msra.gmra.mrb[16].mxu1 %vm7077_vm4, %v16841_v55 }
 0x4dc   :  { %17934 = vmatpush1.bf16.msk.msra.mxu1 %vm20684_vm15, %v17932_v58  ;;  %10022 = vmatprep.mubr.f32.mxu1 %v23501_v44  ;;  %v10904_v58 = vld [vmem:[%s21528_s3 + $0x50] sm:$0xff] }
 0x4dd   :  { %17937 = vmatprep.subr.msk.bf16.mxu1 %vm20684_vm15, %v17935_v7 }
 0x4df   :  { %16850 = vmatmul.mubr.msk.f32.gmra.mrb[18].mxu1 %vm7077_vm4, %v16842_v20 }
 0x4e0   :  { %10093 = vmatprep.mubr.f32.mxu1 %v23501_v44 }
 0x4e1   :  { %v21582_v35 = vpop.permute.xlu1 %10628 }
 0x4e3   :  { %16853 = vmatmul.mubr.msk.f32.vlgmr.msra.gmra.mrb[20].mxu1 %vm7077_vm4, %v16841_v55 }
 0x4e4   :  { %17940 = vmatpush3.bf16.msk.msra.mxu1 %vm20684_vm15, %v17935_v7  ;;  %10099 = vmatprep.mubr.f32.mxu1 %v23501_v44  ;;  %v10902_v7 = vld [vmem:[%s21528_s3 + $0x40] sm:$0xff] }
 0x4e5   :  { %17943 = vmatprep.subr.msk.bf16.mxu1 %vm20684_vm15, %v17941_v59  ;;  %v17975_v31 = vpack.c.bf16 %v10904_v58, %v10902_v7  ;;  %v17981_v59 = vpack.c.bf16 %v10913_v47, %v10911_v16  ;;  %v10946_v16 = vld [vmem:[%s21528_s3 + $0x1a0] sm:$0xff]  ;;  %v10948_v47 = vld [vmem:[%s21528_s3 + $0x1b0] sm:$0xff] }
 0x4e6   :  { %v18019_v23 = vpack.c.bf16 %v10948_v47, %v10946_v16 }
 0x4e7   :  { %16854 = vmatmul.mubr.msk.f32.gmra.mrb[22].mxu1 %vm7077_vm4, %v16842_v20 }
 0x4e8   :  { %17566 = vmatprep.mubr.msk.f32.mxu1 %vm7077_vm4, %v16841_v55  ;;  %v10894_v55 = vld [vmem:[%s21528_s3] sm:$0xff] }
 0x4eb   :  { %17567 = vmatmul.mubr.msk.f32.vlgmr.msra.gmra.mrb[24].mxu1 %vm7077_vm4, %v16842_v20  ;;  %v17967_v20 = vpack.c.bf16 %v10896_v21, %v10894_v55  ;;  %v18007_v55 = vpack.c.bf16 %v10936_v17, %v10934_v22  ;;  %v10941_v21 = vld [vmem:[%s21528_s3 + $0x178] sm:$0xff] }
 0x4ec   :  { %17946 = vmatpush1.bf16.msk.msra.mxu1 %vm20684_vm15, %v17944_v24  ;;  %10354 = vmatprep.mubr.f32.mxu1 %v23501_v44  ;;  %v10925_v24 = vld [vmem:[%s21528_s3 + $0xf8] sm:$0xff]  ;;  %v18009_v61 = vpack.c.bf16 %v10941_v21, %v10939_v13 }
 0x4ed   :  { %17949 = vmatprep.subr.msk.bf16.mxu1 %vm20684_vm15, %v17947_v29  ;;  %17968 = vmatpush1.bf16.msra.mxu0 %v17967_v20  ;;  %v17993_v62 = vpack.c.bf16 %v10925_v24, %v10923_v43  ;;  %v10924_v29 = vld [vmem:[%s21528_s3 + $0xf0] sm:$0xff]  ;;  %v10955_v43 = vld [vmem:[%s21528_s3 + $0x1e8] sm:$0xff]  ;;  %v10957_v24 = vld [vmem:[%s21528_s3 + $0x1f8] sm:$0xff] }
 0x4ee   :  { %17970 = vmatprep.subr.bf16.mxu0 %v17969_v25  ;;  %v17995_v2 = vpack.c.bf16 %v10924_v29, %v10922_v1  ;;  %v10940_v20 = vld [vmem:[%s21528_s3 + $0x170] sm:$0xff]  ;;  %v10943_v25 = vld [vmem:[%s21528_s3 + $0x188] sm:$0xff]  ;;  %v18025_v1 = vpack.c.bf16 %v10957_v24, %v10955_v43  ;;  %v10954_v29 = vld [vmem:[%s21528_s3 + $0x1e0] sm:$0xff] }
 0x4ef   :  { %16862 = vmatmul.mubr.msk.f32.vlgmr.msra.gmra.mrb[12].mxu1 %vm7077_vm4, %v16858_v50  ;;  %v18011_v14 = vpack.c.bf16 %v10940_v20, %v10938_v18  ;;  %v18013_v57 = vpack.c.bf16 %v10945_v15, %v10943_v25  ;;  %v11569_v43 = vld [vmem:[%s16495_s19 + $0x8] sm:$0xff]  ;;  %v11502_v24 = vld [vmem:[%s16494_s15] sm:$0xff] }
 0x4f0   :  { %17952 = vmatpush1.bf16.msk.msra.mxu1 %vm20684_vm15, %v17950_v34  ;;  %10360 = vmatprep.mubr.f32.mxu1 %v23501_v44  ;;  %v10928_v34 = vld [vmem:[%s21528_s3 + $0x110] sm:$0xff] }
 0x4f1   :  { %17955 = vmatprep.subr.msk.bf16.mxu1 %vm20684_vm15, %v17953_v51  ;;  %17972 = vmatpush1.bf16.msra.mxu0 %v17971_v40  ;;  %v10933_v51 = vld [vmem:[%s21528_s3 + $0x138] sm:$0xff]  ;;  %v10944_v40 = vld [vmem:[%s21528_s3 + $0x190] sm:$0xff] }
 0x4f2   :  { %17974 = vmatprep.subr.bf16.mxu0 %v17973_v38  ;;  %v18001_v46 = vpack.c.bf16 %v10933_v51, %v10931_v52  ;;  %v18015_v38 = vpack.c.bf16 %v10944_v40, %v10942_v27  ;;  %v10959_v51 = vld [vmem:[%s21528_s3 + $0x208] sm:$0xff] }
 0x4f3   :  { %16863 = vmatmul.mubr.msk.f32.gmra.mrb[14].mxu1 %vm7077_vm4, %v16859_v19 }
 0x4f4   :  { %10431 = vmatprep.mubr.f32.mxu1 %v23501_v44 }
 0x4f5   :  { %17976 = vmatpush1.bf16.msra.mxu0 %v17975_v31  ;;  %v10947_v31 = vld [vmem:[%s21528_s3 + $0x1a8] sm:$0xff] }
 0x4f6   :  { %17978 = vmatprep.subr.bf16.mxu0 %v17977_v30  ;;  %v10949_v30 = vld [vmem:[%s21528_s3 + $0x1b8] sm:$0xff] }
 0x4f7   :  { %16866 = vmatmul.mubr.msk.f32.vlgmr.msra.gmra.mrb[16].mxu1 %vm7077_vm4, %v16858_v50  ;;  %v18017_v49 = vpack.c.bf16 %v10949_v30, %v10947_v31 }
 0x4f8   :  { %17958 = vmatpush1.bf16.msk.msra.mxu1 %vm20684_vm15, %v17956_v8  ;;  %10437 = vmatprep.mubr.f32.mxu1 %v23501_v44  ;;  %v18005_v8 = vpack.c.bf16 %v10937_v60, %v10935_v12 }
 0x4f9   :  { %17961 = vmatprep.subr.msk.bf16.mxu1 %vm20684_vm15, %v17959_v5  ;;  %17980 = vmatpush1.bf16.msra.mxu0 %v17979_v0  ;;  %v21589_v0 = vpop.permute.xlu0 %10654 }
 0x4fa   :  { %17982 = vmatprep.subr.bf16.mxu0 %v17981_v59 }
 0x4fb   :  { %16867 = vmatmul.mubr.msk.f32.gmra.mrb[18].mxu1 %vm7077_vm4, %v16859_v19 }
 0x4fc   :  { %10508 = vmatprep.mubr.f32.mxu1 %v23501_v44 }
 0x4fd   :  { %17984 = vmatpush1.bf16.msra.mxu0 %v17983_v3  ;;  %v10951_v3 = vld [vmem:[%s21528_s3 + $0x1c8] sm:$0xff] }
 0x4fe   :  { %17986 = vmatprep.subr.bf16.mxu0 %v17985_v42  ;;  %v10953_v42 = vld [vmem:[%s21528_s3 + $0x1d8] sm:$0xff] }
 0x4ff   :  { %16870 = vmatmul.mubr.msk.f32.vlgmr.msra.gmra.mrb[20].mxu1 %vm7077_vm4, %v16858_v50  ;;  %v18021_v6 = vpack.c.bf16 %v10953_v42, %v10951_v3 }
 0x500   :  { %10514 = vmatprep.mubr.f32.mxu1 %v23501_v44  ;;  %17964 = vmatpush3.bf16.msk.msra.mxu1 %vm20684_vm15, %v17959_v5  ;;  %v18003_v5 = vpack.c.bf16 %v10932_v54, %v10930_v4  ;;  %v10634_v54 = vpop.permute.xlu1 %10633 }
 0x501   :  { %17988 = vmatpush1.bf16.msra.mxu0 %v17987_v56  ;;  %v18023_v56 = vpack.c.bf16 %v10952_v41, %v10950_v37 }
 0x502   :  { %17990 = vmatprep.subr.bf16.mxu0 %v17989_v48 }
 0x503   :  { %16871 = vmatmul.mubr.msk.f32.gmra.mrb[22].mxu1 %vm7077_vm4, %v16859_v19 }
 0x504   :  { %17573 = vmatprep.mubr.msk.f32.mxu1 %vm7077_vm4, %v16858_v50  ;;  %v17997_v50 = vpack.c.bf16 %v10929_v9, %v10927_v53  ;;  %v10956_v53 = vld [vmem:[%s21528_s3 + $0x1f0] sm:$0xff] }
 0x505   :  { %17992 = vmatpush1.bf16.msra.mxu0 %v17991_v39 }
 0x506   :  { %17994 = vmatprep.subr.bf16.mxu0 %v17993_v62 }
 0x507   :  { %17574 = vmatmul.mubr.msk.f32.vlgmr.msra.gmra.mrb[24].mxu1 %vm7077_vm4, %v16859_v19  ;;  %v17999_v19 = vpack.c.bf16 %v10928_v34, %v10926_v45  ;;  %vm22034_vm4 = vmpackc.low %vm11414_vm2, %vm19164_vm3  ;;  %vm16476_vm3 = vcmask 1024  }
 0x508   :  { %11820 = vmatprep.mubr.f32.mxu1 %v23501_v44 }
 0x509   :  { %17996 = vmatpush1.bf16.msra.mxu0 %v17995_v2  ;;  %v18027_v2 = vpack.c.bf16 %v10956_v53, %v10954_v29 }
 0x50a   :  { %17998 = vmatprep.subr.bf16.mxu0 %v17997_v50 }
 0x50d   :  { %18000 = vmatpush1.bf16.msra.mxu0 %v17999_v19  ;;  %v10961_v19 = vld [vmem:[%s21528_s3 + $0x218] sm:$0xff] }
 0x50e   :  { %18002 = vmatprep.subr.bf16.mxu0 %v18001_v46 }
 0x511   :  { %18004 = vmatpush1.bf16.msra.mxu0 %v18003_v5 }
 0x512   :  { %18006 = vmatprep.subr.bf16.mxu0 %v18005_v8  ;;  %v18029_v8 = vpack.c.bf16 %v10961_v19, %v10959_v51 }
 0x515   :  { %18008 = vmatpush1.bf16.msra.mxu0 %v18007_v55  ;;  %v10660_v55 = vpop.permute.xlu0 %10659 }
 0x516   :  { %18010 = vmatprep.subr.bf16.mxu0 %v18009_v61 }
 0x519   :  { %18012 = vmatpush1.bf16.msra.mxu0 %v18011_v14 }
 0x51a   :  { %18014 = vmatprep.subr.bf16.mxu0 %v18013_v57 }
 0x51d   :  { %18016 = vmatpush1.bf16.msra.mxu0 %v18015_v38 }
 0x51e   :  { %18018 = vmatprep.subr.bf16.mxu0 %v18017_v49 }
 0x521   :  { %18020 = vmatpush1.bf16.msra.mxu0 %v18019_v23 }
 0x522   :  { %18022 = vmatprep.subr.bf16.mxu0 %v18021_v6 }
 0x525   :  { %18024 = vmatpush1.bf16.msra.mxu0 %v18023_v56 }
 0x526   :  { %18026 = vmatprep.subr.bf16.mxu0 %v18025_v1 }
 0x529   :  { %18028 = vmatpush1.bf16.msra.mxu0 %v18027_v2 }
 0x52a   :  { %18030 = vmatprep.subr.bf16.mxu0 %v18029_v8 }
 0x5c2   :  { %v10356_v7 = vpop.f32.mrb[12].mxu1 }
 0x5c3   :  { %v10610_v58 = vmax.f32 %v10356_v7, 0.0  ;;  %v10358_v33 = vpop.f32.mrb[13].mxu1 }
 0x5c4   :  { %v10611_v63 = vmax.f32 %v10358_v33, 0.0 }
 0x5c5   :  { %v10636_v11 = vmul.f32 %v21582_v35, %v10610_v58 }
 0x5c6   :  { %v10362_v59 = vpop.f32.mrb[14].mxu1  ;;  %v10637_v48 = vmul.f32 %v21582_v35, %v10611_v63 }
 0x5c7   :  { %v21592_v26 = vadd.f32 %v21589_v0, %v10636_v11  ;;  %v10364_v28 = vpop.f32.mrb[15].mxu1  ;;  %v10617_v45 = vmax.f32 %v10362_v59, 0.0 }
 0x5c8   :  { %v21607_v50 = vadd.f32 %v21589_v0, %v10637_v48  ;;  %v10618_v18 = vmax.f32 %v10364_v28, 0.0 }
 0x5c9   :  { %10690 = vrot.lane.b32.xlu0 %v21592_v26, %s19151_s10  ;;  %v10643_v60 = vmul.f32 %v10634_v54, %v10617_v45 }
 0x5ca   :  { %v10433_v36 = vpop.f32.mrb[16].mxu1  ;;  %v10644_v14 = vmul.f32 %v10634_v54, %v10618_v18  ;;  %v10960_v18 = vld [vmem:[%s21528_s3 + $0x210] sm:$0xff] }
 0x5cb   :  { %v10612_v32 = vmax.f32 %v10433_v36, 0.0  ;;  %v10435_v10 = vpop.f32.mrb[17].mxu1  ;;  %v21622_v21 = vadd.f32 %v10660_v55, %v10643_v60 }
 0x5cc   :  { %v10613_v62 = vmax.f32 %v10435_v10, 0.0  ;;  %v21634_v7 = vadd.f32 %v10660_v55, %v10644_v14  ;;  %v10965_v14 = vld [vmem:[%s21528_s3 + $0x238] sm:$0xff] }
 0x5cd   :  { %v10638_v39 = vmul.f32 %v21582_v35, %v10612_v32 }
 0x5ce   :  { %v10439_v9 = vpop.f32.mrb[18].mxu1  ;;  %v10639_v46 = vmul.f32 %v21582_v35, %v10613_v62 }
 0x5cf   :  { %v21610_v34 = vadd.f32 %v21589_v0, %v10638_v39  ;;  %v10441_v52 = vpop.f32.mrb[19].mxu1  ;;  %v10619_v17 = vmax.f32 %v10439_v9, 0.0  ;;  %v11568_v39 = vld [vmem:[%s16495_s19] sm:$0xff] }
 0x5d0   :  { %v21620_v22 = vadd.f32 %v21589_v0, %v10639_v46  ;;  %v10620_v58 = vmax.f32 %v10441_v52, 0.0 }
 0x5d1   :  { %v19065_v4 = vpack.i.bf16 %v21610_v34, %v21607_v50  ;;  %v10645_v20 = vmul.f32 %v10634_v54, %v10619_v17 }
 0x5d2   :  { %v10510_v12 = vpop.f32.mrb[20].mxu1  ;;  %v19075_v25 = vpack.i.bf16 %v21620_v22, %v21622_v21  ;;  %v10646_v11 = vmul.f32 %v10634_v54, %v10620_v58 }
 0x5d3   :  { %19066 = vrot.lane.b32.xlu0 %v19065_v4, %s19153_s12  ;;  %19061 = vrot.lane.b32.xlu1 %v19065_v4, %s19151_s10  ;;  %v10512_v5 = vpop.f32.mrb[21].mxu1  ;;  %v21632_v27 = vadd.f32 %v10660_v55, %v10645_v20  ;;  %v10614_v40 = vmax.f32 %v10510_v12, 0.0 }
 0x5d4   :  { %v21648_v59 = vadd.f32 %v10660_v55, %v10646_v11  ;;  %v10615_v63 = vmax.f32 %v10512_v5, 0.0  ;;  %v10962_v11 = vld [vmem:[%s21528_s3 + $0x220] sm:$0xff] }
 0x5d5   :  { %v10640_v33 = vmul.f32 %v21582_v35, %v10614_v40  ;;  %v19095_v30 = vpack.i.bf16 %v21632_v27, %v21634_v7 }
 0x5d6   :  { %v10516_v13 = vpop.f32.mrb[22].mxu1  ;;  %v10641_v37 = vmul.f32 %v21582_v35, %v10615_v63 }
 0x5d7   :  { %10814 = vrot.lane.b32.xlu0 %v21592_v26, %s19154_s13  ;;  %19071 = vrot.lane.b32.xlu1 %v19065_v4, %s19154_s13  ;;  %v10518_v61 = vpop.f32.mrb[23].mxu1  ;;  %v10621_v38 = vmax.f32 %v10516_v13, 0.0  ;;  %v21644_v49 = vadd.f32 %v21589_v0, %v10640_v33  ;;  %v10958_v13 = vld [vmem:[%s21528_s3 + $0x200] sm:$0xff] }
 0x5d8   :  { %v10622_v23 = vmax.f32 %v10518_v61, 0.0  ;;  %v21668_v48 = vadd.f32 %v21589_v0, %v10641_v37 }
 0x5d9   :  { %v10647_v31 = vmul.f32 %v10634_v54, %v10621_v38 }
 0x5da   :  { %v17575_v15 = vpop.f32.mrb[24].mxu1  ;;  %v10648_v6 = vmul.f32 %v10634_v54, %v10622_v23 }
 0x5db   :  { %10760 = vrot.lane.b32.xlu1 %v21592_v26, %s19153_s12  ;;  %19076 = vrot.lane.b32.xlu0 %v19075_v25, %s19151_s10  ;;  %v10587_v57 = vpop.f32.mrb[25].mxu1  ;;  %v21646_v16 = vadd.f32 %v10660_v55, %v10647_v31  ;;  %v10623_v47 = vmax.f32 %v17575_v15, 0.0  ;;  %v10963_v15 = vld [vmem:[%s21528_s3 + $0x228] sm:$0xff] }
 0x5dc   :  { %v10616_v3 = vmax.f32 %v10587_v57, 0.0  ;;  %v21662_v56 = vadd.f32 %v10660_v55, %v10648_v6 }
 0x5dd   :  { %v10649_v28 = vmul.f32 %v10634_v54, %v10623_v47  ;;  %v19105_v42 = vpack.i.bf16 %v21646_v16, %v21648_v59  ;;  %v10964_v47 = vld [vmem:[%s21528_s3 + $0x230] sm:$0xff] }
 0x5de   :  { %v10642_v36 = vmul.f32 %v21582_v35, %v10616_v3  ;;  %v10969_v3 = vld [vmem:[%s21528_s3 + $0x258] sm:$0xff]  ;;  %v18035_v37 = vpack.c.bf16 %v10964_v47, %v10962_v11 }
 0x5df   :  { %19081 = vrot.lane.b32.xlu1 %v19075_v25, %s19153_s12  ;;  %19086 = vrot.lane.b32.xlu0 %v19075_v25, %s19154_s13  ;;  %v21659_v41 = vadd.f32 %v10660_v55, %v10649_v28  ;;  %v10967_v28 = vld [vmem:[%s21528_s3 + $0x248] sm:$0xff] }
 0x5e0   :  { %v21671_v32 = vadd.f32 %v21589_v0, %v10642_v36  ;;  %v11503_v0 = vld [vmem:[%s16494_s15 + $0x8] sm:$0xff]  ;;  %s19178_s15 = smov 18  }
 0x5e1   :  { %v19130_v10 = vpack.i.bf16 %v21659_v41, %v21662_v56  ;;  %s16499_s18 = sld [smem:[%s23391_s0 + %s19178_s15]]   ;;  %s19184_s15 = smov 24  }
 0x5e2   :  { %v19135_v35 = vpack.i.bf16 %v21671_v32, %v21668_v48 }
 0x5e3   :  { %19096 = vrot.lane.b32.xlu0 %v19095_v30, %s19153_s12  ;;  %19091 = vrot.lane.b32.xlu1 %v19095_v30, %s19151_s10 }
 0x5e7   :  { %19101 = vrot.lane.b32.xlu1 %v19095_v30, %s19154_s13  ;;  %10768 = vrot.lane.b32.xlu0 %v21644_v49, %s19153_s12  ;;  %v18033_v30 = vpack.c.bf16 %v10965_v14, %v10963_v15 }
 0x5eb   :  { %10698 = vrot.lane.b32.xlu1 %v21644_v49, %s19151_s10  ;;  %19106 = vrot.lane.b32.xlu0 %v19105_v42, %s19151_s10 }
 0x5ef   :  { %10822 = vrot.lane.b32.xlu1 %v21644_v49, %s19154_s13  ;;  %19116 = vrot.lane.b32.xlu0 %v19105_v42, %s19154_s13 }
 0x5f3   :  { %10700 = vrot.lane.b32.xlu1 %v21668_v48, %s19151_s10  ;;  %19131 = vrot.lane.b32.xlu0 %v19130_v10, %s19154_s13 }
 0x5f7   :  { %19111 = vrot.lane.b32.xlu1 %v19105_v42, %s19153_s12  ;;  %19136 = vrot.lane.b32.xlu0 %v19135_v35, %s19154_s13 }
 0x5fb   :  { %10702 = vrot.lane.b32.xlu0 %v21671_v32, %s19151_s10  ;;  %19121 = vrot.lane.b32.xlu1 %v19135_v35, %s19153_s12 }
 0x5ff   :  { %10716 = vrot.lane.b32.xlu0 %v21659_v41, %s19151_s10  ;;  %19126 = vrot.lane.b32.xlu1 %v19130_v10, %s19153_s12  ;;  %s19170_s12 = smov 15  }
 0x600   :  { %s22025_s21 = sld [smem:[%s23391_s0 + %s19170_s12]]  }
 0x603   :  { %11511 = vperm.xlu0 %19059, %v11503_v0   ;;  %10714 = vrot.lane.b32.xlu1 %v21662_v56, %s19151_s10 }
 0x607   :  { %11577 = vperm.xlu0 %19059, %v11569_v43   ;;  %11506 = vperm.xlu1 %19058, %v11502_v24   ;;  %v18037_v43 = vpack.c.bf16 %v10969_v3, %v10967_v28  ;;  %v10966_v24 = vld [vmem:[%s21528_s3 + $0x240] sm:$0xff]  ;;  %v10976_v28 = vld [vmem:[%s21528_s3 + $0x290] sm:$0xff]  ;;  %v10979_v3 = vld [vmem:[%s21528_s3 + $0x2a8] sm:$0xff] }
 0x60b   :  { %11572 = vperm.xlu1 %19058, %v11568_v39   ;;  %v10968_v39 = vld [vmem:[%s21528_s3 + $0x250] sm:$0xff] }
 0x63b   :  { %v10691_v62 = vpop.permute.xlu0 %10690 }
 0x645   :  { %v19067_v1 = vpop.permute.xlu0 %19066  ;;  %v19062_v29 = vpop.permute.xlu1 %19061 }
 0x646   :  { %v19064_v53 = vunpack.i.h.bf16 %v19062_v29  ;;  %v19063_v9 = vunpack.i.l.bf16 %v19062_v29  ;;  %v19069_v2 = vunpack.i.h.bf16 %v19067_v1  ;;  %v19068_v45 = vunpack.i.l.bf16 %v19067_v1  ;;  %v10971_v29 = vld [vmem:[%s21528_s3 + $0x268] sm:$0xff] }
 0x648   :  { %v10719_v4 = vsel %vm2060_vm7, %v19063_v9, %v19064_v53  ;;  %v10718_v54 = vsel %vm2060_vm7, %v10691_v62, %v19063_v9  ;;  %v10789_v12 = vsel %vm2845_vm11, %v19068_v45, %v19069_v2 }
 0x649   :  { %v10815_v52 = vpop.permute.xlu0 %10814  ;;  %v19072_v51 = vpop.permute.xlu1 %19071  ;;  %v10747_v17 = vmax.f32 %v21607_v50, %v10719_v4  ;;  %v10746_v57 = vmax.f32 %v21592_v26, %v10718_v54  ;;  %v18031_v50 = vpack.c.bf16 %v10960_v18, %v10958_v13  ;;  %v10977_v4 = vld [vmem:[%s21528_s3 + $0x298] sm:$0xff] }
 0x64a   :  { %v19074_v19 = vunpack.i.h.bf16 %v19072_v51  ;;  %v19073_v46 = vunpack.i.l.bf16 %v19072_v51  ;;  %v18039_v51 = vpack.c.bf16 %v10968_v39, %v10966_v24  ;;  %v10978_v24 = vld [vmem:[%s21528_s3 + $0x2a0] sm:$0xff]  ;;  %v10980_v39 = vld [vmem:[%s21528_s3 + $0x2b0] sm:$0xff] }
 0x64c   :  { %v10843_v60 = vsel %vm3237_vm13, %v19073_v46, %v19074_v19  ;;  %v10842_v20 = vsel %vm3237_vm13, %v10815_v52, %v19073_v46  ;;  %v10975_v46 = vld [vmem:[%s21528_s3 + $0x288] sm:$0xff] }
 0x64d   :  { %v10761_v5 = vpop.permute.xlu1 %10760  ;;  %v21700_v8 = vpop.permute.xlu0 %19076  ;;  %v10869_v55 = vmax.f32 %v10789_v12, %v10843_v60  ;;  %v18045_v15 = vpack.c.bf16 %v10977_v4, %v10975_v46 }
 0x64e   :  { %v10788_v61 = vsel %vm2845_vm11, %v10761_v5, %v19068_v45  ;;  %v19079_v25 = vunpack.i.h.bf16 %v21700_v8 }
 0x64f   :  { %v10868_v40 = vmax.f32 %v10788_v61, %v10842_v20  ;;  %v10881_v38 = vmax.f32 %v10747_v17, %v10869_v55 }
 0x650   :  { %v10720_v23 = vsel %vm2060_vm7, %v19064_v53, %v19079_v25  ;;  %v10973_v53 = vld [vmem:[%s21528_s3 + $0x278] sm:$0xff] }
 0x651   :  { %v10880_v58 = vmax.f32 %v10746_v57, %v10868_v40  ;;  %11161 = vmatprep.mubr.f32.mxu0 %v10881_v38  ;;  %v21711_v33 = vpop.permute.xlu1 %19081  ;;  %v21713_v31 = vpop.permute.xlu0 %19086  ;;  %v10748_v36 = vmax.f32 %v21610_v34, %v10720_v23  ;;  %v10970_v34 = vld [vmem:[%s21528_s3 + $0x260] sm:$0xff]  ;;  %v18041_v5 = vpack.c.bf16 %v10973_v53, %v10971_v29  ;;  %v10985_v29 = vld [vmem:[%s21528_s3 + $0x2d8] sm:$0xff] }
 0x652   :  { %v19084_v63 = vunpack.i.h.bf16 %v21711_v33  ;;  %v19089_v26 = vunpack.i.h.bf16 %v21713_v31  ;;  %v19083_v54 = vunpack.i.l.bf16 %v21711_v33  ;;  %v19088_v12 = vunpack.i.l.bf16 %v21713_v31  ;;  %v10974_v23 = vld [vmem:[%s21528_s3 + $0x280] sm:$0xff] }
 0x653   :  { %11162 = vmatmul.mubr.f32.vlgmr.msra.gmra.mrb[12].mxu0 %v10880_v58 }
 0x654   :  { %v10790_v42 = vsel %vm2845_vm11, %v19069_v2, %v19084_v63  ;;  %v10844_v6 = vsel %vm3237_vm13, %v19074_v19, %v19089_v26  ;;  %18032 = vmatpush1.bf16.msra.mxu0 %v18031_v50  ;;  %v19078_v2 = vunpack.i.l.bf16 %v21700_v8  ;;  %v10972_v19 = vld [vmem:[%s21528_s3 + $0x270] sm:$0xff] }
 0x655   :  { %v10870_v10 = vmax.f32 %v10790_v42, %v10844_v6  ;;  %v21731_v35 = vpop.permute.xlu0 %19096  ;;  %v21733_v0 = vpop.permute.xlu1 %19091  ;;  %18034 = vmatprep.subr.bf16.mxu0 %v18033_v30  ;;  %v18043_v20 = vpack.c.bf16 %v10972_v19, %v10970_v34  ;;  %v10981_v42 = vld [vmem:[%s21528_s3 + $0x2b8] sm:$0xff] }
 0x656   :  { %v19094_v62 = vunpack.i.h.bf16 %v21733_v0  ;;  %v19093_v1 = vunpack.i.l.bf16 %v21733_v0  ;;  %v19099_v45 = vunpack.i.h.bf16 %v21731_v35  ;;  %v19098_v52 = vunpack.i.l.bf16 %v21731_v35  ;;  %v10989_v19 = vld [vmem:[%s21528_s3 + $0x2f8] sm:$0xff] }
 0x657   :  { %v21741_v9 = vmax.f32 %v10748_v36, %v10870_v10 }
 0x658   :  { %18036 = vmatpush1.bf16.msra.mxu0 %v18035_v37  ;;  %v10725_v13 = vsel %vm2060_vm7, %v19093_v1, %v19094_v62  ;;  %v10724_v18 = vsel %vm2060_vm7, %v19078_v2, %v19093_v1  ;;  %v10795_v14 = vsel %vm2845_vm11, %v19098_v52, %v19099_v45  ;;  %v10794_v40 = vsel %vm2845_vm11, %v19083_v54, %v19098_v52  ;;  %v10983_v1 = vld [vmem:[%s21528_s3 + $0x2c8] sm:$0xff] }
 0x659   :  { %v21752_v60 = vpop.permute.xlu1 %19101  ;;  %18038 = vmatprep.subr.bf16.mxu0 %v18037_v43  ;;  %v21760_v61 = vpop.permute.xlu0 %10768  ;;  %v10754_v58 = vmax.f32 %v21634_v7, %v10725_v13  ;;  %v10753_v11 = vmax.f32 %v21622_v21, %v10724_v18  ;;  %v18047_v7 = vpack.c.bf16 %v10976_v28, %v10974_v23  ;;  %v18049_v43 = vpack.c.bf16 %v10981_v42, %v10979_v3  ;;  %v10993_v13 = vld [vmem:[%s21528_s3 + $0x318] sm:$0xff]  ;;  %v10994_v28 = vld [vmem:[%s21528_s3 + $0x320] sm:$0xff]  ;;  %v10996_v3 = vld [vmem:[%s21528_s3 + $0x330] sm:$0xff] }
 0x65a   :  { %v19104_v17 = vunpack.i.h.bf16 %v21752_v60  ;;  %v19103_v55 = vunpack.i.l.bf16 %v21752_v60  ;;  %v10791_v8 = vsel %vm2845_vm11, %v19084_v63, %v21760_v61  ;;  %v18051_v2 = vpack.c.bf16 %v10980_v39, %v10978_v24  ;;  %v10982_v63 = vld [vmem:[%s21528_s3 + $0x2c0] sm:$0xff]  ;;  %v11031_v60 = vld [vmem:[%s21528_s3 + $0x448] sm:$0xff] }
 0x65b   :  { %v18053_v31 = vpack.c.bf16 %v10985_v29, %v10983_v1  ;;  %v18067_v39 = vpack.c.bf16 %v10996_v3, %v10994_v28  ;;  %v10998_v29 = vld [vmem:[%s21528_s3 + $0x340] sm:$0xff]  ;;  %v11017_v28 = vld [vmem:[%s21528_s3 + $0x3d8] sm:$0xff] }
 0x65c   :  { %18040 = vmatpush1.bf16.msra.mxu0 %v18039_v51  ;;  %v10849_v57 = vsel %vm3237_vm13, %v19103_v55, %v19104_v17  ;;  %v10848_v38 = vsel %vm3237_vm13, %v19088_v12, %v19103_v55  ;;  %v10984_v51 = vld [vmem:[%s21528_s3 + $0x2d0] sm:$0xff]  ;;  %v10986_v12 = vld [vmem:[%s21528_s3 + $0x2e0] sm:$0xff]  ;;  %v10991_v55 = vld [vmem:[%s21528_s3 + $0x308] sm:$0xff] }
 0x65d   :  { %v21770_v50 = vpop.permute.xlu1 %10698  ;;  %18042 = vmatprep.subr.bf16.mxu0 %v18041_v5  ;;  %v10875_v30 = vmax.f32 %v10795_v14, %v10849_v57  ;;  %v10874_v47 = vmax.f32 %v10794_v40, %v10848_v38  ;;  %v21782_v10 = vpop.permute.xlu0 %19106  ;;  %v10988_v5 = vld [vmem:[%s21528_s3 + $0x2f0] sm:$0xff]  ;;  %v18061_v14 = vpack.c.bf16 %v10993_v13, %v10991_v55  ;;  %v10990_v57 = vld [vmem:[%s21528_s3 + $0x300] sm:$0xff]  ;;  %v10995_v38 = vld [vmem:[%s21528_s3 + $0x328] sm:$0xff] }
 0x65e   :  { %v10721_v36 = vsel %vm2060_vm7, %v19079_v25, %v21770_v50  ;;  %v18059_v18 = vpack.c.bf16 %v10988_v5, %v10986_v12  ;;  %v10992_v40 = vld [vmem:[%s21528_s3 + $0x310] sm:$0xff]  ;;  %v11007_v12 = vld [vmem:[%s21528_s3 + $0x388] sm:$0xff]  ;;  %v11009_v5 = vld [vmem:[%s21528_s3 + $0x398] sm:$0xff] }
 0x65f   :  { %v10888_v6 = vmax.f32 %v10754_v58, %v10875_v30  ;;  %v10887_v37 = vmax.f32 %v10753_v11, %v10874_v47  ;;  %v10749_v53 = vmax.f32 %v21620_v22, %v10721_v36  ;;  %v18055_v22 = vpack.c.bf16 %v10984_v51, %v10982_v63  ;;  %v10997_v58 = vld [vmem:[%s21528_s3 + $0x338] sm:$0xff]  ;;  %v10999_v36 = vld [vmem:[%s21528_s3 + $0x348] sm:$0xff]  ;;  %v11006_v13 = vld [vmem:[%s21528_s3 + $0x380] sm:$0xff] }
 0x660   :  { %18044 = vmatpush1.bf16.msra.mxu0 %v18043_v20  ;;  %v18063_v11 = vpack.c.bf16 %v10992_v40, %v10990_v57  ;;  %v18065_v23 = vpack.c.bf16 %v10997_v58, %v10995_v38  ;;  %v11013_v57 = vld [vmem:[%s21528_s3 + $0x3b8] sm:$0xff]  ;;  %v11010_v58 = vld [vmem:[%s21528_s3 + $0x3a0] sm:$0xff] }
 0x661   :  { %11167 = vmatprep.mubr.f32.mxu0 %v10888_v6  ;;  %v21784_v21 = vpop.permute.xlu1 %10822  ;;  %18046 = vmatprep.subr.bf16.mxu0 %v18045_v15  ;;  %v21805_v46 = vpop.permute.xlu0 %19116 }
 0x662   :  { %v10845_v25 = vsel %vm3237_vm13, %v19089_v26, %v21784_v21  ;;  %11168 = vmatmul.mubr.f32.gmra.mrb[14].mxu0 %v10887_v37  ;;  %v10987_v26 = vld [vmem:[%s21528_s3 + $0x2e8] sm:$0xff]  ;;  %v19119_v42 = vunpack.i.h.bf16 %v21805_v46 }
 0x663   :  { %v10871_v34 = vmax.f32 %v10791_v8, %v10845_v25  ;;  %v18057_v54 = vpack.c.bf16 %v10989_v19, %v10987_v26  ;;  %v11002_v19 = vld [vmem:[%s21528_s3 + $0x360] sm:$0xff] }
 0x664   :  { %18048 = vmatpush1.bf16.msra.mxu0 %v18047_v7  ;;  %v11001_v7 = vld [vmem:[%s21528_s3 + $0x358] sm:$0xff] }
 0x665   :  { %v21799_v52 = vpop.permute.xlu1 %10700  ;;  %18050 = vmatprep.subr.bf16.mxu0 %v18049_v43  ;;  %v10883_v33 = vmax.f32 %v10749_v53, %v10871_v34  ;;  %v21813_v20 = vpop.permute.xlu0 %19131  ;;  %v19109_v43 = vunpack.i.h.bf16 %v21782_v10  ;;  %v18069_v1 = vpack.c.bf16 %v11001_v7, %v10999_v36  ;;  %v11000_v53 = vld [vmem:[%s21528_s3 + $0x350] sm:$0xff]  ;;  %v11014_v7 = vld [vmem:[%s21528_s3 + $0x3c0] sm:$0xff] }
 0x666   :  { %v19133_v30 = vunpack.i.l.bf16 %v21813_v20  ;;  %v18071_v51 = vpack.c.bf16 %v11000_v53, %v10998_v29 }
 0x667   :  { %11238 = vmatprep.mubr.f32.mxu0 %v10883_v33  ;;  %v11003_v33 = vld [vmem:[%s21528_s3 + $0x368] sm:$0xff] }
 0x668   :  { %18052 = vmatpush1.bf16.msra.mxu0 %v18051_v2  ;;  %v10852_v8 = vsel %vm3237_vm13, %v19119_v42, %v19133_v30 }
 0x669   :  { %v21807_v4 = vpop.permute.xlu1 %19111  ;;  %18054 = vmatprep.subr.bf16.mxu0 %v18053_v31  ;;  %v11005_v31 = vld [vmem:[%s21528_s3 + $0x378] sm:$0xff]  ;;  %v21872_v29 = vpop.permute.xlu0 %19136 }
 0x66a   :  { %v19114_v6 = vunpack.i.h.bf16 %v21807_v4  ;;  %v18073_v26 = vpack.c.bf16 %v11005_v31, %v11003_v33  ;;  %v19108_v33 = vunpack.i.l.bf16 %v21782_v10  ;;  %v19118_v31 = vunpack.i.l.bf16 %v21805_v46 }
 0x66c   :  { %18056 = vmatpush1.bf16.msra.mxu0 %v18055_v22  ;;  %v11004_v22 = vld [vmem:[%s21528_s3 + $0x370] sm:$0xff]  ;;  %v10850_v35 = vsel %vm3237_vm13, %v19104_v17, %v19118_v31 }
 0x66d   :  { %v21815_v15 = vpop.permute.xlu1 %19121  ;;  %18058 = vmatprep.subr.bf16.mxu0 %v18057_v54  ;;  %v18075_v55 = vpack.c.bf16 %v11004_v22, %v11002_v19  ;;  %v19139_v19 = vunpack.i.h.bf16 %v21872_v29  ;;  %v19138_v22 = vunpack.i.l.bf16 %v21872_v29 }
 0x66e   :  { %v19124_v53 = vunpack.i.h.bf16 %v21815_v15 }
 0x670   :  { %18060 = vmatpush1.bf16.msra.mxu0 %v18059_v18  ;;  %v11008_v18 = vld [vmem:[%s21528_s3 + $0x390] sm:$0xff] }
 0x671   :  { %v21822_v47 = vpop.permute.xlu1 %19126  ;;  %18062 = vmatprep.subr.bf16.mxu0 %v18061_v14  ;;  %v11011_v14 = vld [vmem:[%s21528_s3 + $0x3a8] sm:$0xff]  ;;  %v18079_v40 = vpack.c.bf16 %v11008_v18, %v11006_v13 }
 0x672   :  { %v19128_v37 = vunpack.i.l.bf16 %v21822_v47  ;;  %v18081_v38 = vpack.c.bf16 %v11013_v57, %v11011_v14  ;;  %v10727_v14 = vsel %vm2060_vm7, %v19108_v33, %v19109_v43  ;;  %v10851_v57 = vsel %vm3237_vm13, %v19118_v31, %v19119_v42  ;;  %v11032_v31 = vld [vmem:[%s21528_s3 + $0x450] sm:$0xff] }
 0x673   :  { %v10756_v42 = vmax.f32 %v21648_v59, %v10727_v14  ;;  %v11043_v14 = vld [vmem:[%s21528_s3 + $0x4a8] sm:$0xff] }
 0x674   :  { %v10798_v24 = vsel %vm2845_vm11, %v19114_v6, %v19128_v37  ;;  %18064 = vmatpush1.bf16.msra.mxu0 %v18063_v11  ;;  %v11012_v11 = vld [vmem:[%s21528_s3 + $0x3b0] sm:$0xff] }
 0x675   :  { %v21842_v25 = vpop.permute.xlu1 %10714  ;;  %18066 = vmatprep.subr.bf16.mxu0 %v18065_v23  ;;  %v10878_v34 = vmax.f32 %v10798_v24, %v10852_v8  ;;  %v11015_v23 = vld [vmem:[%s21528_s3 + $0x3c8] sm:$0xff]  ;;  %v18083_v3 = vpack.c.bf16 %v11012_v11, %v11010_v58  ;;  %v11016_v24 = vld [vmem:[%s21528_s3 + $0x3d0] sm:$0xff]  ;;  %v11021_v8 = vld [vmem:[%s21528_s3 + $0x3f8] sm:$0xff] }
 0x676   :  { %v10728_v2 = vsel %vm2060_vm7, %v19109_v43, %v21842_v25  ;;  %v18085_v36 = vpack.c.bf16 %v11017_v28, %v11015_v23  ;;  %v11027_v43 = vld [vmem:[%s21528_s3 + $0x428] sm:$0xff]  ;;  %v11029_v11 = vld [vmem:[%s21528_s3 + $0x438] sm:$0xff]  ;;  %v10726_v28 = vsel %vm2060_vm7, %v19094_v62, %v19108_v33  ;;  %v11030_v33 = vld [vmem:[%s21528_s3 + $0x440] sm:$0xff] }
 0x677   :  { %v10757_v63 = vmax.f32 %v21646_v16, %v10728_v2  ;;  %v18077_v16 = vpack.c.bf16 %v11009_v5, %v11007_v12  ;;  %v18087_v2 = vpack.c.bf16 %v11016_v24, %v11014_v7  ;;  %v11023_v12 = vld [vmem:[%s21528_s3 + $0x408] sm:$0xff]  ;;  %v11025_v5 = vld [vmem:[%s21528_s3 + $0x418] sm:$0xff]  ;;  %v11026_v7 = vld [vmem:[%s21528_s3 + $0x420] sm:$0xff]  ;;  %v10755_v17 = vmax.f32 %v21632_v27, %v10726_v28 }
 0x678   :  { %18068 = vmatpush1.bf16.msra.mxu0 %v18067_v39  ;;  %v11019_v39 = vld [vmem:[%s21528_s3 + $0x3e8] sm:$0xff]  ;;  %v18093_v18 = vpack.c.bf16 %v11025_v5, %v11023_v12  ;;  %v11028_v24 = vld [vmem:[%s21528_s3 + $0x430] sm:$0xff]  ;;  %v18103_v27 = vpack.c.bf16 %v11032_v31, %v11030_v33  ;;  %v11041_v5 = vld [vmem:[%s21528_s3 + $0x498] sm:$0xff] }
 0x679   :  { %18070 = vmatprep.subr.bf16.mxu0 %v18069_v1  ;;  %v21855_v54 = vmax.f32 %v10757_v63, %v10878_v34  ;;  %v19113_v1 = vunpack.i.l.bf16 %v21807_v4  ;;  %v19123_v34 = vunpack.i.l.bf16 %v21815_v15  ;;  %v18089_v63 = vpack.c.bf16 %v11021_v8, %v11019_v39  ;;  %v11022_v4 = vld [vmem:[%s21528_s3 + $0x400] sm:$0xff]  ;;  %v11033_v39 = vld [vmem:[%s21528_s3 + $0x458] sm:$0xff]  ;;  %v11039_v12 = vld [vmem:[%s21528_s3 + $0x488] sm:$0xff] }
 0x67a   :  { %v11051_v28 = vld [vmem:[%s21528_s3 + $0x4e8] sm:$0xff]  ;;  %v11060_v33 = vld [vmem:[%s21528_s3 + $0x530] sm:$0xff]  ;;  %v10722_v15 = vsel %vm2060_vm7, %v21770_v50, %v21799_v52 }
 0x67b   :  { %v10793_v13 = vsel %vm2845_vm11, %v19123_v34, %v19124_v53  ;;  %v10796_v10 = vsel %vm2845_vm11, %v19099_v45, %v19113_v1  ;;  %v11063_v31 = vld [vmem:[%s21528_s3 + $0x548] sm:$0xff] }
 0x67c   :  { %18072 = vmatpush1.bf16.msra.mxu0 %v18071_v51  ;;  %v11018_v51 = vld [vmem:[%s21528_s3 + $0x3e0] sm:$0xff]  ;;  %v10812_v46 = vsel %vm2858_vm12, %v10793_v13, 0.0 }
 0x67d   :  { %18074 = vmatprep.subr.bf16.mxu0 %v18073_v26  ;;  %v11020_v26 = vld [vmem:[%s21528_s3 + $0x3f0] sm:$0xff]  ;;  %v11038_v13 = vld [vmem:[%s21528_s3 + $0x480] sm:$0xff] }
 0x680   :  { %18076 = vmatpush1.bf16.msra.mxu0 %v18075_v55  ;;  %v10797_v55 = vsel %vm2845_vm11, %v19113_v1, %v19114_v6  ;;  %v10847_v6 = vsel %vm3237_vm13, %v19138_v22, %v19139_v19  ;;  %v18099_v1 = vpack.c.bf16 %v11028_v24, %v11026_v7  ;;  %v11036_v19 = vld [vmem:[%s21528_s3 + $0x470] sm:$0xff]  ;;  %v11055_v24 = vld [vmem:[%s21528_s3 + $0x508] sm:$0xff] }
 0x681   :  { %18078 = vmatprep.subr.bf16.mxu0 %v18077_v16  ;;  %v18091_v16 = vpack.c.bf16 %v11020_v26, %v11018_v51  ;;  %v10877_v58 = vmax.f32 %v10797_v55, %v10851_v57  ;;  %v10866_v59 = vsel %vm3250_vm14, %v10847_v6, 0.0  ;;  %v11035_v51 = vld [vmem:[%s21528_s3 + $0x468] sm:$0xff]  ;;  %v11034_v26 = vld [vmem:[%s21528_s3 + $0x460] sm:$0xff]  ;;  %v11045_v57 = vld [vmem:[%s21528_s3 + $0x4b8] sm:$0xff] }
 0x682   :  { %v10873_v62 = vmax.f32 %v10812_v46, %v10866_v59  ;;  %v18107_v55 = vpack.c.bf16 %v11036_v19, %v11034_v26  ;;  %v11042_v6 = vld [vmem:[%s21528_s3 + $0x4a0] sm:$0xff]  ;;  %v11052_v7 = vld [vmem:[%s21528_s3 + $0x4f0] sm:$0xff]  ;;  %v11057_v59 = vld [vmem:[%s21528_s3 + $0x518] sm:$0xff] }
 0x683   :  { %v10890_v0 = vmax.f32 %v10756_v42, %v10877_v58  ;;  %v11044_v58 = vld [vmem:[%s21528_s3 + $0x4b0] sm:$0xff]  ;;  %v11046_v42 = vld [vmem:[%s21528_s3 + $0x4c0] sm:$0xff]  ;;  %v11067_v26 = vld [vmem:[%s21528_s3 + $0x568] sm:$0xff] }
 0x684   :  { %18080 = vmatpush1.bf16.msra.mxu0 %v18079_v40  ;;  %v11024_v40 = vld [vmem:[%s21528_s3 + $0x410] sm:$0xff]  ;;  %v11069_v19 = vld [vmem:[%s21528_s3 + $0x578] sm:$0xff] }
 0x685   :  { %18082 = vmatprep.subr.bf16.mxu0 %v18081_v38  ;;  %v21901_v38 = vpop.permute.xlu0 %10702  ;;  %v18095_v23 = vpack.c.bf16 %v11024_v40, %v11022_v4  ;;  %v18113_v40 = vpack.c.bf16 %v11045_v57, %v11043_v14 }
 0x686   :  { %v10723_v45 = vsel %vm2060_vm7, %v21799_v52, %v21901_v38 }
 0x687   :  { %v10751_v8 = vmax.f32 %v21668_v48, %v10723_v45 }
 0x688   :  { %18084 = vmatpush1.bf16.msra.mxu0 %v18083_v3  ;;  %v10876_v3 = vmax.f32 %v10796_v10, %v10850_v35  ;;  %v11047_v10 = vld [vmem:[%s21528_s3 + $0x4c8] sm:$0xff]  ;;  %v11053_v35 = vld [vmem:[%s21528_s3 + $0x4f8] sm:$0xff] }
 0x689   :  { %18086 = vmatprep.subr.bf16.mxu0 %v18085_v36  ;;  %v18097_v36 = vpack.c.bf16 %v11029_v11, %v11027_v43  ;;  %v11049_v43 = vld [vmem:[%s21528_s3 + $0x4d8] sm:$0xff]  ;;  %v18115_v11 = vpack.c.bf16 %v11044_v58, %v11042_v6  ;;  %v11075_v6 = vld [vmem:[%s21528_s3 + $0x5a8] sm:$0xff] }
 0x68a   :  { %v10889_v53 = vmax.f32 %v10755_v17, %v10876_v3  ;;  %v18117_v46 = vpack.c.bf16 %v11049_v43, %v11047_v10  ;;  %v18121_v3 = vpack.c.bf16 %v11053_v35, %v11051_v28  ;;  %v11059_v17 = vld [vmem:[%s21528_s3 + $0x528] sm:$0xff]  ;;  %v11077_v58 = vld [vmem:[%s21528_s3 + $0x5b8] sm:$0xff]  ;;  %v19129_v28 = vunpack.i.h.bf16 %v21822_v47 }
 0x68b   :  { %v18145_v43 = vpack.c.bf16 %v11077_v58, %v11075_v6 }
 0x68c   :  { %18088 = vmatpush1.bf16.msra.mxu0 %v18087_v2  ;;  %v18101_v2 = vpack.c.bf16 %v11033_v39, %v11031_v60  ;;  %v11054_v60 = vld [vmem:[%s21528_s3 + $0x500] sm:$0xff]  ;;  %v11056_v39 = vld [vmem:[%s21528_s3 + $0x510] sm:$0xff] }
 0x68d   :  { %18090 = vmatprep.subr.bf16.mxu0 %v18089_v63  ;;  %v10885_v63 = vmax.f32 %v10751_v8, %v10873_v62  ;;  %v18125_v62 = vpack.c.bf16 %v11057_v59, %v11055_v24  ;;  %v11061_v8 = vld [vmem:[%s21528_s3 + $0x538] sm:$0xff]  ;;  %v11083_v24 = vld [vmem:[%s21528_s3 + $0x5e8] sm:$0xff] }
 0x68e   :  { %v11085_v59 = vld [vmem:[%s21528_s3 + $0x5f8] sm:$0xff] }
 0x690   :  { %18092 = vmatpush1.bf16.msra.mxu0 %v18091_v16  ;;  %v18109_v16 = vpack.c.bf16 %v11041_v5, %v11039_v12  ;;  %v18137_v5 = vpack.c.bf16 %v11069_v19, %v11067_v26  ;;  %v11521_v26 = vld [vmem:[%s22025_s21 + $0x18] sm:$0xff] }
 0x691   :  { %18094 = vmatprep.subr.bf16.mxu0 %v18093_v18  ;;  %v11040_v18 = vld [vmem:[%s21528_s3 + $0x490] sm:$0xff] }
 0x692   :  { %v18111_v4 = vpack.c.bf16 %v11040_v18, %v11038_v13  ;;  %v11071_v13 = vld [vmem:[%s21528_s3 + $0x588] sm:$0xff]  ;;  %v11073_v18 = vld [vmem:[%s21528_s3 + $0x598] sm:$0xff] }
 0x693   :  { %11239 = vmatmul.mubr.f32.vlgmr.msra.gmra.mrb[12].mxu0 %v21741_v9  ;;  %v11037_v9 = vld [vmem:[%s21528_s3 + $0x478] sm:$0xff]  ;;  %v18141_v57 = vpack.c.bf16 %v11073_v18, %v11071_v13  ;;  %v11518_v18 = vld [vmem:[%s22025_s21] sm:$0xff] }
 0x694   :  { %11244 = vmatprep.mubr.f32.mxu0 %v10890_v0  ;;  %18096 = vmatpush1.bf16.msra.mxu0 %v18095_v23  ;;  %v18105_v48 = vpack.c.bf16 %v11037_v9, %v11035_v51  ;;  %v11048_v23 = vld [vmem:[%s21528_s3 + $0x4d0] sm:$0xff] }
 0x695   :  { %18098 = vmatprep.subr.bf16.mxu0 %v18097_v36  ;;  %v18119_v45 = vpack.c.bf16 %v11048_v23, %v11046_v42  ;;  %v11050_v36 = vld [vmem:[%s21528_s3 + $0x4e0] sm:$0xff]  ;;  %v11079_v42 = vld [vmem:[%s21528_s3 + $0x5c8] sm:$0xff]  ;;  %v11081_v23 = vld [vmem:[%s21528_s3 + $0x5d8] sm:$0xff] }
 0x696   :  { %v18123_v0 = vpack.c.bf16 %v11052_v7, %v11050_v36  ;;  %v11080_v36 = vld [vmem:[%s21528_s3 + $0x5d0] sm:$0xff]  ;;  %v19134_v7 = vunpack.i.h.bf16 %v21813_v20 }
 0x697   :  { %11245 = vmatmul.mubr.f32.gmra.mrb[14].mxu0 %v10889_v53  ;;  %v18129_v53 = vpack.c.bf16 %v11061_v8, %v11059_v17  ;;  %v11084_v17 = vld [vmem:[%s21528_s3 + $0x5f0] sm:$0xff]  ;;  %v10792_v8 = vsel %vm2845_vm11, %v21760_v61, %v19123_v34  ;;  %v10846_v61 = vsel %vm3237_vm13, %v21784_v21, %v19138_v22  ;;  %v10744_v21 = vsel %vm2074_vm9, %v21901_v38, 0.0 }
 0x698   :  { %18100 = vmatpush1.bf16.msra.mxu0 %v18099_v1  ;;  %11315 = vmatprep.mubr.f32.mxu0 %v10885_v63  ;;  %v18127_v1 = vpack.c.bf16 %v11056_v39, %v11054_v60  ;;  %v11065_v63 = vld [vmem:[%s21528_s3 + $0x558] sm:$0xff]  ;;  %v18153_v60 = vpack.c.bf16 %v11085_v59, %v11083_v24  ;;  %v11082_v39 = vld [vmem:[%s21528_s3 + $0x5e0] sm:$0xff]  ;;  %v10853_v47 = vsel %vm3237_vm13, %v19133_v30, %v19134_v7  ;;  %vm12735_vm13 = vcmask 908288  }
 0x699   :  { %18102 = vmatprep.subr.bf16.mxu0 %v18101_v2  ;;  %v11058_v2 = vld [vmem:[%s21528_s3 + $0x520] sm:$0xff]  ;;  %v18133_v9 = vpack.c.bf16 %v11065_v63, %v11063_v31  ;;  %v18155_v20 = vpack.c.bf16 %v11084_v17, %v11082_v39  ;;  %v10872_v34 = vmax.f32 %v10792_v8, %v10846_v61  ;;  %v10867_v30 = vsel %vm3250_vm14, %v10853_v47, 0.0  ;;  %v11539_v47 = vld [vmem:[%s22025_s21 + $0xa8] sm:$0xff] }
 0x69a   :  { %v18131_v51 = vpack.c.bf16 %v11060_v33, %v11058_v2  ;;  %v11086_v63 = vld [vmem:[%s21528_s3 + $0x600] sm:$0xff]  ;;  %v10752_v22 = vmax.f32 %v21671_v32, %v10744_v21  ;;  %v11543_v61 = vld [vmem:[%s22025_s21 + $0xc8] sm:$0xff]  ;;  %vm12990_vm14 = vcmask 146432  }
 0x69b   :  { %v11530_v59 = vld [vmem:[%s22025_s21 + $0x60] sm:$0xff]  ;;  %v11551_v21 = vld [vmem:[%s22025_s21 + $0x108] sm:$0xff] }
 0x69c   :  { %18104 = vmatpush1.bf16.msra.mxu0 %v18103_v27  ;;  %v11062_v27 = vld [vmem:[%s21528_s3 + $0x540] sm:$0xff] }
 0x69d   :  { %18106 = vmatprep.subr.bf16.mxu0 %v18105_v48  ;;  %v11064_v48 = vld [vmem:[%s21528_s3 + $0x550] sm:$0xff]  ;;  %v11534_v8 = vld [vmem:[%s22025_s21 + $0x80] sm:$0xff] }
 0x69e   :  { %v18135_v12 = vpack.c.bf16 %v11064_v48, %v11062_v27  ;;  %v10750_v27 = vmax.f32 %v21644_v49, %v10722_v15  ;;  %v10886_v49 = vmax.f32 %v10752_v22, 0.0  ;;  %v11540_v15 = vld [vmem:[%s22025_s21 + $0xb0] sm:$0xff] }
 0x6a0   :  { %18108 = vmatpush1.bf16.msra.mxu0 %v18107_v55  ;;  %v11066_v55 = vld [vmem:[%s21528_s3 + $0x560] sm:$0xff]  ;;  %v10884_v52 = vmax.f32 %v10750_v27, %v10872_v34 }
 0x6a1   :  { %18110 = vmatprep.subr.bf16.mxu0 %v18109_v16  ;;  %v11068_v16 = vld [vmem:[%s21528_s3 + $0x570] sm:$0xff] }
 0x6a2   :  { %v18139_v14 = vpack.c.bf16 %v11068_v16, %v11066_v55 }
 0x6a4   :  { %18112 = vmatpush1.bf16.msra.mxu0 %v18111_v4  ;;  %v11070_v4 = vld [vmem:[%s21528_s3 + $0x580] sm:$0xff] }
 0x6a5   :  { %18114 = vmatprep.subr.bf16.mxu0 %v18113_v40  ;;  %v11072_v40 = vld [vmem:[%s21528_s3 + $0x590] sm:$0xff] }
 0x6a6   :  { %v18143_v10 = vpack.c.bf16 %v11072_v40, %v11070_v4  ;;  %v11525_v4 = vld [vmem:[%s22025_s21 + $0x38] sm:$0xff]  ;;  %v11405_v40 = vld [vmem:[%s16493_s24] sm:$0xff] }
 0x6a8   :  { %18116 = vmatpush1.bf16.msra.mxu0 %v18115_v11  ;;  %v11074_v11 = vld [vmem:[%s21528_s3 + $0x5a0] sm:$0xff] }
 0x6a9   :  { %18118 = vmatprep.subr.bf16.mxu0 %v18117_v46  ;;  %v11076_v46 = vld [vmem:[%s21528_s3 + $0x5b0] sm:$0xff] }
 0x6aa   :  { %v18147_v35 = vpack.c.bf16 %v11076_v46, %v11074_v11  ;;  %v11527_v11 = vld [vmem:[%s22025_s21 + $0x48] sm:$0xff]  ;;  %v11529_v46 = vld [vmem:[%s22025_s21 + $0x58] sm:$0xff] }
 0x6ac   :  { %18120 = vmatpush1.bf16.msra.mxu0 %v18119_v45  ;;  %v18149_v45 = vpack.c.bf16 %v11081_v23, %v11079_v42  ;;  %v11406_v42 = vld [vmem:[%s16493_s24 + $0x8] sm:$0xff]  ;;  %s22489_s24 = sld [smem:[%s23391_s0 + %s19180_s22]]  }
 0x6ad   :  { %18122 = vmatprep.subr.bf16.mxu0 %v18121_v3  ;;  %v11078_v3 = vld [vmem:[%s21528_s3 + $0x5c0] sm:$0xff] }
 0x6b0   :  { %18124 = vmatpush1.bf16.msra.mxu0 %v18123_v0  ;;  %v10799_v0 = vsel %vm2845_vm11, %v19128_v37, %v19129_v28  ;;  %v11089_v37 = vld [vmem:[%s21528_s3 + $0x618] sm:$0xff]  ;;  %v18175_v28 = vpack.c.bf16 %v11529_v46, %v11527_v11  ;;  %v11567_v11 = vld [vmem:[%s22025_s21 + $0x188] sm:$0xf]  ;;  %v11566_v46 = vld [vmem:[%s22025_s21 + $0x180] sm:$0xf]  ;;  %vm12463_vm11 = vcmask 924672  }
 0x6b1   :  { %18126 = vmatprep.subr.bf16.mxu0 %v18125_v62  ;;  %v18151_v62 = vpack.c.bf16 %v11080_v36, %v11078_v3  ;;  %v10813_v33 = vsel %vm2858_vm12, %v10799_v0, 0.0  ;;  %v11531_v3 = vld [vmem:[%s22025_s21 + $0x68] sm:$0xff]  ;;  %v11533_v36 = vld [vmem:[%s22025_s21 + $0x78] sm:$0xff]  ;;  %v11532_v0 = vld [vmem:[%s22025_s21 + $0x70] sm:$0xff]  ;;  %vm12599_vm12 = vcmask 916480  }
 0x6b2   :  { %v18179_v24 = vpack.c.bf16 %v11533_v36, %v11531_v3  ;;  %v18181_v39 = vpack.c.bf16 %v11532_v0, %v11530_v59 }
 0x6b4   :  { %18128 = vmatpush1.bf16.msra.mxu0 %v18127_v1  ;;  %v10717_v1 = vpop.permute.xlu0 %10716 }
 0x6b5   :  { %18130 = vmatprep.subr.bf16.mxu0 %v18129_v53  ;;  %v11087_v53 = vld [vmem:[%s21528_s3 + $0x608] sm:$0xff]  ;;  %v10729_v2 = vsel %vm2060_vm7, %v21842_v25, %v10717_v1  ;;  %v11088_v25 = vld [vmem:[%s21528_s3 + $0x610] sm:$0xff]  ;;  %v10745_v48 = vsel %vm2074_vm9, %v10717_v1, 0.0  ;;  %s19183_s3 = smov 25  }
 0x6b6   :  { %v18157_v31 = vpack.c.bf16 %v11089_v37, %v11087_v53  ;;  %v18159_v50 = vpack.c.bf16 %v11088_v25, %v11086_v63  ;;  %v11536_v1 = vld [vmem:[%s22025_s21 + $0x90] sm:$0xff]  ;;  %v11541_v53 = vld [vmem:[%s22025_s21 + $0xb8] sm:$0xff]  ;;  %v11547_v25 = vld [vmem:[%s22025_s21 + $0xe8] sm:$0xff] }
 0x6b7   :  { %v18185_v37 = vpack.c.bf16 %v11536_v1, %v11534_v8  ;;  %v11544_v63 = vld [vmem:[%s22025_s21 + $0xd0] sm:$0xff]  ;;  %v16909_v1 = vld [vmem:[%s22099_s28 + $0x4] ss:$8 sm:$0x3] }
 0x6b8   :  { %18132 = vmatpush1.bf16.msra.mxu0 %v18131_v51  ;;  %v10758_v51 = vmax.f32 %v21662_v56, %v10729_v2  ;;  %v10759_v56 = vmax.f32 %v21659_v41, %v10745_v48  ;;  %v18187_v2 = vpack.c.bf16 %v11541_v53, %v11539_v47 }
 0x6b9   :  { %18134 = vmatprep.subr.bf16.mxu0 %v18133_v9  ;;  %v10879_v9 = vmax.f32 %v10813_v33, %v10867_v30  ;;  %v11538_v33 = vld [vmem:[%s22025_s21 + $0xa0] sm:$0xff] }
 0x6ba   :  { %v10893_v38 = vmax.f32 %v10759_v56, 0.0  ;;  %v18189_v34 = vpack.c.bf16 %v11540_v15, %v11538_v33  ;;  %v11552_v56 = vld [vmem:[%s22025_s21 + $0x110] sm:$0xff] }
 0x6bb   :  { %v10892_v29 = vmax.f32 %v10758_v51, %v10879_v9  ;;  %v11549_v51 = vld [vmem:[%s22025_s21 + $0xf8] sm:$0xff] }
 0x6bc   :  { %18136 = vmatpush1.bf16.msra.mxu0 %v18135_v12  ;;  %v18195_v27 = vpack.c.bf16 %v11549_v51, %v11547_v25 }
 0x6bd   :  { %18138 = vmatprep.subr.bf16.mxu0 %v18137_v5 }
 0x6c0   :  { %18140 = vmatpush1.bf16.msra.mxu0 %v18139_v14  ;;  %v11520_v14 = vld [vmem:[%s22025_s21 + $0x10] sm:$0xff] }
 0x6c1   :  { %18142 = vmatprep.subr.bf16.mxu0 %v18141_v57  ;;  %v11523_v57 = vld [vmem:[%s22025_s21 + $0x28] sm:$0xff]  ;;  %v18169_v6 = vpack.c.bf16 %v11520_v14, %v11518_v18  ;;  %v11558_v18 = vld [vmem:[%s22025_s21 + $0x140] sm:$0xff]  ;;  %v11560_v14 = vld [vmem:[%s22025_s21 + $0x150] sm:$0xff] }
 0x6c2   :  { %v18171_v58 = vpack.c.bf16 %v11525_v4, %v11523_v57  ;;  %v18209_v57 = vpack.c.bf16 %v11560_v14, %v11558_v18  ;;  %v11563_v4 = vld [vmem:[%s22025_s21 + $0x168] sm:$0xff] }
 0x6c4   :  { %18144 = vmatpush1.bf16.msra.mxu0 %v18143_v10  ;;  %v11522_v10 = vld [vmem:[%s22025_s21 + $0x20] sm:$0xff] }
 0x6c5   :  { %18146 = vmatprep.subr.bf16.mxu0 %v18145_v43  ;;  %v11524_v43 = vld [vmem:[%s22025_s21 + $0x30] sm:$0xff] }
 0x6c6   :  { %v18173_v23 = vpack.c.bf16 %v11524_v43, %v11522_v10  ;;  %v11564_v10 = vld [vmem:[%s22025_s21 + $0x170] sm:$0xff] }
 0x6c8   :  { %18148 = vmatpush1.bf16.msra.mxu0 %v18147_v35  ;;  %v11526_v35 = vld [vmem:[%s22025_s21 + $0x40] sm:$0xff] }
 0x6c9   :  { %18150 = vmatprep.subr.bf16.mxu0 %v18149_v45  ;;  %v11528_v45 = vld [vmem:[%s22025_s21 + $0x50] sm:$0xff] }
 0x6ca   :  { %v18177_v7 = vpack.c.bf16 %v11528_v45, %v11526_v35  ;;  %v11507_v45 = vpop.permute.xlu1 %11506 }
 0x6cc   :  { %18152 = vmatpush1.bf16.msra.mxu0 %v18151_v62  ;;  %v11535_v62 = vld [vmem:[%s22025_s21 + $0x88] sm:$0xff] }
 0x6cd   :  { %18154 = vmatprep.subr.bf16.mxu0 %v18153_v60  ;;  %v11537_v60 = vld [vmem:[%s22025_s21 + $0x98] sm:$0xff] }
 0x6ce   :  { %v18183_v17 = vpack.c.bf16 %v11537_v60, %v11535_v62  ;;  %v11512_v62 = vpop.permute.xlu0 %11511 }
 0x6d0   :  { %18156 = vmatpush1.bf16.msra.mxu0 %v18155_v20  ;;  %v11545_v20 = vld [vmem:[%s22025_s21 + $0xd8] sm:$0xff] }
 0x6d1   :  { %18158 = vmatprep.subr.bf16.mxu0 %v18157_v31  ;;  %v18191_v30 = vpack.c.bf16 %v11545_v20, %v11543_v61  ;;  %v11542_v31 = vld [vmem:[%s22025_s21 + $0xc0] sm:$0xff]  ;;  %v23576_v20 = vld [vmem:[#allocation3_spill] sm:$0xff] }
 0x6d2   :  { %v18193_v9 = vpack.c.bf16 %v11544_v63, %v11542_v31  ;;  %v11578_v15 = vpop.permute.xlu0 %11577 }
 0x6d3   :  { %11316 = vmatmul.mubr.f32.vlgmr.msra.gmra.mrb[12].mxu0 %v10884_v52  ;;  %v11548_v52 = vld [vmem:[%s22025_s21 + $0xf0] sm:$0xff] }
 0x6d4   :  { %11321 = vmatprep.mubr.f32.mxu0 %v10892_v29  ;;  %18160 = vmatpush1.bf16.msra.mxu0 %v18159_v50  ;;  %v11546_v50 = vld [vmem:[%s22025_s21 + $0xe0] sm:$0xff]  ;;  %v11553_v29 = vld [vmem:[%s22025_s21 + $0x118] sm:$0xff] }
 0x6d5   :  { %v18197_v22 = vpack.c.bf16 %v11548_v52, %v11546_v50  ;;  %v18199_v48 = vpack.c.bf16 %v11553_v29, %v11551_v21  ;;  %v12869_v21 = vld [vmem:[%s16498_s5] sm:$0xff]  ;;  %v12870_v29 = vld [vmem:[%s16498_s5 + $0x8] sm:$0xff] }
 0x6d7   :  { %11322 = vmatmul.mubr.f32.gmra.mrb[14].mxu0 %v21855_v54  ;;  %v11519_v54 = vld [vmem:[%s22025_s21 + $0x8] sm:$0xff] }
 0x6d8   :  { %11392 = vmatprep.mubr.f32.mxu0 %v23501_v44  ;;  %v18167_v13 = vpack.c.bf16 %v11521_v26, %v11519_v54  ;;  %v11554_v26 = vld [vmem:[%s22025_s21 + $0x120] sm:$0xff] }
 0x6db   :  { %16875 = vmatmul.mubr.msk.f32.vlgmr.msra.gmra.mrb[12].mxu0 %vm11090_vm0, %v10886_v49  ;;  %v11550_v49 = vld [vmem:[%s22025_s21 + $0x100] sm:$0xff] }
 0x6dc   :  { %11398 = vmatprep.mubr.f32.mxu0 %v23501_v44 }
 0x6df   :  { %16876 = vmatmul.mubr.msk.f32.gmra.mrb[14].mxu0 %vm11090_vm0, %v10893_v38  ;;  %v11555_v38 = vld [vmem:[%s22025_s21 + $0x128] sm:$0xff] }
 0x6e0   :  { %11485 = vmatprep.mubr.f32.mxu0 %v23501_v44 }
 0x7ae   :  { %v11394_v41 = vpop.f32.mrb[12].mxu0 }
 0x7af   :  { %v11396_v32 = vpop.f32.mrb[13].mxu0 }
 0x7b2   :  { %v11400_v19 = vpop.f32.mrb[14].mxu0 }
 0x7b3   :  { %v18164_v12 = vpack.c.bf16 %v11400_v19, %v11394_v41  ;;  %v11402_v5 = vpop.f32.mrb[15].mxu0  ;;  %v11557_v41 = vld [vmem:[%s22025_s21 + $0x138] sm:$0xff]  ;;  %v11556_v19 = vld [vmem:[%s22025_s21 + $0x130] sm:$0xff] }
 0x7b4   :  { %v18161_v16 = vpack.c.bf16 %v11402_v5, %v11396_v32  ;;  %v18201_v32 = vpack.c.bf16 %v11552_v56, %v11550_v49  ;;  %v18203_v54 = vpack.c.bf16 %v11557_v41, %v11555_v38  ;;  %v11561_v5 = vld [vmem:[%s22025_s21 + $0x158] sm:$0xff]  ;;  %v12871_v49 = vld [vmem:[%s16498_s5 + $0x10] sm:$0x3]  ;;  %v16885_v38 = vld [vmem:[%s22099_s28 + $0x1] ss:$8 sm:$0x3] }
 0x7b5   :  { %v12895_v56 = vld [vmem:[%s16499_s18 + $0x10] sm:$0x3] }
 0x7b6   :  { %18163 = vmatprep.subr.msk.bf16.mxu0 %vm22034_vm4, %v18161_v16  ;;  %v18205_v16 = vpack.c.bf16 %v11556_v19, %v11554_v26 }
 0x7b7   :  { %18166 = vmatpush1.bf16.msk.msra.mxu0 %vm22034_vm4, %v18164_v12  ;;  %v11559_v12 = vld [vmem:[%s22025_s21 + $0x148] sm:$0xff] }
 0x7b8   :  { %18168 = vmatprep.subr.bf16.mxu0 %v18167_v13  ;;  %v18207_v13 = vpack.c.bf16 %v11561_v5, %v11559_v12 }
 0x7ba   :  { %16879 = vmatmul.mubr.msk.f32.vlgmr.msra.gmra.mrb[16].mxu0 %vm11407_vm5, %v11405_v40  ;;  %v11565_v40 = vld [vmem:[%s22025_s21 + $0x178] sm:$0xff] }
 0x7bb   :  { %11491 = vmatprep.mubr.f32.mxu0 %v23501_v44  ;;  %18170 = vmatpush1.bf16.msra.mxu0 %v18169_v6  ;;  %v18211_v6 = vpack.c.bf16 %v11565_v40, %v11563_v4 }
 0x7bc   :  { %18172 = vmatprep.subr.bf16.mxu0 %v18171_v58  ;;  %v11562_v58 = vld [vmem:[%s22025_s21 + $0x160] sm:$0xff] }
 0x7bd   :  { %v18213_v43 = vpack.c.bf16 %v11564_v10, %v11562_v58 }
 0x7be   :  { %16880 = vmatmul.mubr.msk.f32.gmra.mrb[18].mxu0 %vm11407_vm5, %v11406_v42 }
 0x7bf   :  { %18174 = vmatpush1.bf16.msra.mxu0 %v18173_v23 }
 0x7c0   :  { %18176 = vmatprep.subr.bf16.mxu0 %v18175_v28 }
 0x7c3   :  { %18178 = vmatpush1.bf16.msra.mxu0 %v18177_v7 }
 0x7c4   :  { %18180 = vmatprep.subr.bf16.mxu0 %v18179_v24 }
 0x7c7   :  { %18182 = vmatpush1.bf16.msra.mxu0 %v18181_v39 }
 0x7c8   :  { %18184 = vmatprep.subr.bf16.mxu0 %v18183_v17  ;;  %v11573_v17 = vpop.permute.xlu1 %11572 }
 0x7cb   :  { %18186 = vmatpush1.bf16.msra.mxu0 %v18185_v37 }
 0x7cc   :  { %18188 = vmatprep.subr.bf16.mxu0 %v18187_v2  ;;  %v23575_v2 = vld [vmem:[#allocation5_spill] sm:$0xff] }
 0x7cd   :  { %v22104_v33 = vrot.slane %v16909_v1, %v23575_v2  ;;  %v22174_v26 = vrot.slane %v16885_v38, %v23575_v2 }
 0x7cf   :  { %18190 = vmatpush1.bf16.msra.mxu0 %v18189_v34  ;;  %v22108_v34 = vrot.slane %v16909_v1, %v23576_v20 }
 0x7d0   :  { %18192 = vmatprep.subr.bf16.mxu0 %v18191_v30 }
 0x7d3   :  { %18194 = vmatpush1.bf16.msra.mxu0 %v18193_v9 }
 0x7d4   :  { %18196 = vmatprep.subr.bf16.mxu0 %v18195_v27 }
 0x7d7   :  { %18198 = vmatpush1.bf16.msra.mxu0 %v18197_v22  ;;  %v12893_v22 = vld [vmem:[%s16499_s18] sm:$0xff] }
 0x7d8   :  { %18200 = vmatprep.subr.bf16.mxu0 %v18199_v48  ;;  %v12894_v48 = vld [vmem:[%s16499_s18 + $0x8] sm:$0xff]  ;;  %s22839_s18 = sld [smem:[%s23391_s0 + %s19184_s15]]  }
 0x7db   :  { %18202 = vmatpush1.bf16.msra.mxu0 %v18201_v32 }
 0x7dc   :  { %18204 = vmatprep.subr.bf16.mxu0 %v18203_v54  ;;  %v22165_v54 = vrot.slane %v16885_v38, %v23576_v20  ;;  %v16902_v38 = vld [vmem:[%s22099_s28 + $0x3] ss:$8 sm:$0x3] }
 0x7df   :  { %18206 = vmatpush1.bf16.msra.mxu0 %v18205_v16 }
 0x7e0   :  { %18208 = vmatprep.subr.bf16.mxu0 %v18207_v13 }
 0x7e3   :  { %18210 = vmatpush1.bf16.msra.mxu0 %v18209_v57 }
 0x7e4   :  { %18212 = vmatprep.subr.bf16.mxu0 %v18211_v6  ;;  %v11691_v6 = vld [vmem:[%s22099_s28] ss:$8 sm:$0x3] }
 0x7e7   :  { %18214 = vmatpush1.bf16.msra.mxu0 %v18213_v43 }
 0x7e8   :  { %16881 = vmatprep.subr.msk.mxu0 %vm11414_vm2, %v11567_v11 }
 0x7eb   :  { %16882 = vmatpush1.msk.msra.mxu0 %vm11414_vm2, %v11566_v46  ;;  %v22186_v46 = vrot.slane %v11691_v6, %v23576_v20 }
 0x88d   :  { %v11487_v42 = vpop.f32.mrb[16].mxu0 }
 0x88e   :  { %v11498_v23 = vmax.f32 %v11487_v42, 0.0  ;;  %v11489_v28 = vpop.f32.mrb[17].mxu0  ;;  %v22189_v42 = vrot.slane %v11691_v6, %v23575_v2 }
 0x88f   :  { %v11499_v35 = vmax.f32 %v11489_v28, 0.0 }
 0x890   :  { %v11514_v7 = vmul.f32 %v11507_v45, %v11498_v23 }
 0x891   :  { %v11515_v3 = vmul.f32 %v11507_v45, %v11499_v35  ;;  %v11493_v36 = vpop.f32.mrb[18].mxu0  ;;  %v16886_v35 = vld [vmem:[%s22171_s20 + $0x18] sm:$0xff] }
 0x892   :  { %v11500_v24 = vmax.f32 %v11493_v36, 0.0  ;;  %v11495_v59 = vpop.f32.mrb[19].mxu0 }
 0x893   :  { %v11501_v0 = vmax.f32 %v11495_v59, 0.0  ;;  %16883 = vmatprep.mubr.msk.f32.mxu0 %vm11580_vm8, %v11515_v3 }
 0x894   :  { %11658 = vmatmul.mubr.f32.vlgmr.msra.gmra.mrb[20].mxu0 %v11514_v7  ;;  %v11516_v39 = vmul.f32 %v11512_v62, %v11500_v24 }
 0x895   :  { %v11517_v60 = vmul.f32 %v11512_v62, %v11501_v0 }
 0x897   :  { %16884 = vmatprep.mubr.msk.f32.mxu0 %vm11580_vm8, %v11517_v60  ;;  %v16895_v60 = vld [vmem:[%s22099_s28 + $0x2] ss:$8 sm:$0x3] }
 0x898   :  { %11664 = vmatmul.mubr.f32.gmra.mrb[22].mxu0 %v11516_v39 }
 0x899   :  { %13070 = vmatprep.mubr.f32.mxu0 %v23501_v44 }
 0x967   :  { %v11659_v8 = vpop.f32.mrb[20].mxu0 }
 0x968   :  { %v11660_v47 = vadd.f32 %v11659_v8, %v11573_v17  ;;  %v11661_v53 = vpop.f32.mrb[21].mxu0 }
 0x969   :  { %v11662_v37 = vadd.f32 %v11661_v53, %v11573_v17  ;;  %v16887_v17 = vld [vmem:[%s22171_s20 + $0x20] sm:$0xff]  ;;  %v22205_v53 = vrot.slane %v16895_v60, %v23576_v20 }
 0x96a   :  { %11710 = vrot.lane.b32.xlu1 %v11660_v47, %s19173_s29  ;;  %v22112_v25 = vmul.f32 %v22104_v33, %v11660_v47 }
 0x96b   :  { %11712 = vrot.lane.b32.xlu0 %v11662_v37, %s19173_s29  ;;  %v11665_v61 = vpop.f32.mrb[22].mxu0  ;;  %v22119_v9 = vmul.f32 %v22108_v34, %v11662_v37 }
 0x96c   :  { %v11666_v30 = vadd.f32 %v11665_v61, %v11578_v15  ;;  %v11667_v31 = vpop.f32.mrb[23].mxu0 }
 0x96d   :  { %v11668_v63 = vadd.f32 %v11667_v31, %v11578_v15 }
 0x96e   :  { %11714 = vrot.lane.b32.xlu1 %v11666_v30, %s19173_s29  ;;  %v22115_v51 = vmul.f32 %v22104_v33, %v11666_v30 }
 0x96f   :  { %11716 = vrot.lane.b32.xlu0 %v11668_v63, %s19173_s29  ;;  %v22122_v27 = vmul.f32 %v22108_v34, %v11668_v63 }
 0x970   :  { %v18233_v50 = vpack.c.bf16 %v22115_v51, %v22112_v25 }
 0x971   :  { %v18231_v52 = vpack.c.bf16 %v22122_v27, %v22119_v9 }
 0x972   :  { %11674 = vrot.lane.b32.xlu1 %v11660_v47, %s19174_s30 }
 0x973   :  { %11676 = vrot.lane.b32.xlu0 %v11662_v37, %s19174_s30 }
 0x976   :  { %11678 = vrot.lane.b32.xlu1 %v11666_v30, %s19174_s30 }
 0x977   :  { %11680 = vrot.lane.b32.xlu0 %v11668_v63, %s19174_s30 }
 0x97a   :  { %11931 = vrot.lane.b32.xlu1 %v11660_v47, %s19170_s12 }
 0x97b   :  { %11933 = vrot.lane.b32.xlu0 %v11662_v37, %s19170_s12 }
 0x97e   :  { %11935 = vrot.lane.b32.xlu1 %v11666_v30, %s19170_s12 }
 0x97f   :  { %11937 = vrot.lane.b32.xlu0 %v11668_v63, %s19170_s12 }
 0x982   :  { %12066 = vrot.lane.b32.xlu1 %v11660_v47, %s19150_s9 }
 0x983   :  { %12068 = vrot.lane.b32.xlu0 %v11662_v37, %s19150_s9 }
 0x986   :  { %12070 = vrot.lane.b32.xlu1 %v11666_v30, %s19150_s9 }
 0x987   :  { %12072 = vrot.lane.b32.xlu0 %v11668_v63, %s19150_s9 }
 0x98a   :  { %12322 = vrot.lane.b32.xlu1 %v11662_v37, %s19151_s10 }
 0x98b   :  { %12326 = vrot.lane.b32.xlu0 %v11668_v63, %s19151_s10 }
 0x98e   :  { %12320 = vrot.lane.b32.xlu1 %v11660_v47, %s19151_s10 }
 0x98f   :  { %12324 = vrot.lane.b32.xlu0 %v11666_v30, %s19151_s10 }
 0x992   :  { %12457 = vrot.lane.b32.xlu1 %v11662_v37, %s19175_s1 }
 0x993   :  { %12461 = vrot.lane.b32.xlu0 %v11668_v63, %s19175_s1 }
 0x996   :  { %12455 = vrot.lane.b32.xlu1 %v11660_v47, %s19175_s1 }
 0x997   :  { %12459 = vrot.lane.b32.xlu0 %v11666_v30, %s19175_s1 }
 0x99a   :  { %12593 = vrot.lane.b32.xlu1 %v11662_v37, %s19176_s2 }
 0x99b   :  { %12597 = vrot.lane.b32.xlu0 %v11668_v63, %s19176_s2 }
 0x99e   :  { %12591 = vrot.lane.b32.xlu1 %v11660_v47, %s19176_s2 }
 0x99f   :  { %12595 = vrot.lane.b32.xlu0 %v11666_v30, %s19176_s2 }
 0x9a2   :  { %12729 = vrot.lane.b32.xlu1 %v11662_v37, %s19177_s14  ;;  %v22209_v37 = vrot.slane %v16895_v60, %v23575_v2 }
 0x9a3   :  { %12733 = vrot.lane.b32.xlu0 %v11668_v63, %s19177_s14 }
 0x9a6   :  { %12727 = vrot.lane.b32.xlu1 %v11660_v47, %s19177_s14 }
 0x9a7   :  { %12731 = vrot.lane.b32.xlu0 %v11666_v30, %s19177_s14  ;;  %v16888_v30 = vld [vmem:[%s22171_s20 + $0x28] sm:$0x3] }
 0x9aa   :  { %12874 = vperm.xlu1 %19058, %v12869_v21  }
 0x9ab   :  { %12879 = vperm.xlu0 %19059, %v12870_v29  }
 0x9ae   :  { %12898 = vperm.xlu1 %19058, %v12893_v22  }
 0x9af   :  { %12903 = vperm.xlu0 %19059, %v12894_v48  }
 0x9b2   :  { %12884 = vperm.xlu1 %19058, %v12871_v49  }
 0x9b3   :  { %12908 = vperm.xlu0 %19059, %v12895_v56  }
 0x9dc   :  { %v11711_v41 = vpop.permute.xlu1 %11710 }
 0x9dd   :  { %v11713_v32 = vpop.permute.xlu0 %11712  ;;  %v11724_v5 = vsel %vm11090_vm0, 0.0, %v11711_v41 }
 0x9de   :  { %v11718_v19 = vsel %vm11090_vm0, %v11711_v41, %v11713_v32  ;;  %v11739_v40 = vmul.f32 %v22174_v26, %v11724_v5  ;;  %v11707_v32 = vld [vmem:[%s22171_s20] sm:$0xff] }
 0x9df   :  { %v11740_v57 = vmul.f32 %v22165_v54, %v11718_v19 }
 0x9e0   :  { %v11715_v12 = vpop.permute.xlu1 %11714 }
 0x9e1   :  { %v11725_v16 = vsel %vm11090_vm0, 0.0, %v11715_v12  ;;  %v11717_v13 = vpop.permute.xlu0 %11716 }
 0x9e2   :  { %v11741_v18 = vmul.f32 %v22174_v26, %v11725_v16  ;;  %v11719_v14 = vsel %vm11090_vm0, %v11715_v12, %v11717_v13  ;;  %v22226_v16 = vrot.slane %v16902_v38, %v23576_v20 }
 0x9e3   :  { %v11742_v4 = vmul.f32 %v22165_v54, %v11719_v14  ;;  %v11708_v14 = vld [vmem:[%s22171_s20 + $0x8] sm:$0xff] }
 0x9e4   :  { %v11675_v58 = vpop.permute.xlu1 %11674  ;;  %v18217_v11 = vpack.c.bf16 %v11741_v18, %v11739_v40 }
 0x9e5   :  { %v11677_v10 = vpop.permute.xlu0 %11676  ;;  %v18215_v43 = vpack.c.bf16 %v11742_v4, %v11740_v57  ;;  %v11689_v45 = vsel %vm11682_vm10, 0.0, %v11675_v58 }
 0x9e6   :  { %v11683_v23 = vsel %vm11682_vm10, %v11675_v58, %v11677_v10  ;;  %v11703_v62 = vmul.f32 %v22189_v42, %v11689_v45  ;;  %v22238_v10 = vrot.slane %v16902_v38, %v23575_v2  ;;  %v16896_v45 = vld [vmem:[%s22171_s20 + $0x30] sm:$0xff] }
 0x9e7   :  { %18216 = vmatprep.subr.bf16.mxu1 %v18215_v43  ;;  %v11704_v59 = vmul.f32 %v22186_v46, %v11683_v23  ;;  %v11709_v43 = vld [vmem:[%s22171_s20 + $0x10] sm:$0x3] }
 0x9e8   :  { %18218 = vmatpush1.bf16.msra.mxu1 %v18217_v11  ;;  %v11679_v28 = vpop.permute.xlu1 %11678 }
 0x9e9   :  { %v11690_v3 = vsel %vm11682_vm10, 0.0, %v11679_v28  ;;  %v11681_v36 = vpop.permute.xlu0 %11680 }
 0x9ea   :  { %v11705_v7 = vmul.f32 %v22189_v42, %v11690_v3  ;;  %v11684_v24 = vsel %vm11682_vm10, %v11679_v28, %v11681_v36  ;;  %v16916_v36 = vld [vmem:[%s22099_s28 + $0x5] ss:$8 sm:$0x3] }
 0x9eb   :  { %v11706_v0 = vmul.f32 %v22186_v46, %v11684_v24  ;;  %16889 = vmatmul.mubr.msk.f32.vlgmr.msra.gmra.mrb[26].mxu1 %vm11090_vm0, %v16886_v35 }
 0x9ec   :  { %v11932_v39 = vpop.permute.xlu1 %11931  ;;  %11826 = vmatprep.mubr.f32.mxu1 %v23501_v44  ;;  %v18221_v47 = vpack.c.bf16 %v11705_v7, %v11703_v62  ;;  %v16897_v7 = vld [vmem:[%s22171_s20 + $0x38] sm:$0xff] }
 0x9ed   :  { %v11934_v8 = vpop.permute.xlu0 %11933  ;;  %v18219_v1 = vpack.c.bf16 %v11706_v0, %v11704_v59  ;;  %v11945_v31 = vsel %vm2074_vm9, 0.0, %v11932_v39  ;;  %v22256_v0 = vrot.slane %v16916_v36, %v23576_v20 }
 0x9ee   :  { %v11939_v15 = vsel %vm2074_vm9, %v11932_v39, %v11934_v8  ;;  %v11960_v56 = vmul.f32 %v22209_v37, %v11945_v31  ;;  %v16898_v39 = vld [vmem:[%s22171_s20 + $0x40] sm:$0x3]  ;;  %v22276_v31 = vrot.slane %v16916_v36, %v23575_v2 }
 0x9ef   :  { %16890 = vmatmul.mubr.msk.f32.gmra.mrb[28].mxu1 %vm11090_vm0, %v16887_v17  ;;  %18220 = vmatprep.subr.bf16.mxu1 %v18219_v1  ;;  %v11961_v48 = vmul.f32 %v22205_v53, %v11939_v15  ;;  %v16904_v15 = vld [vmem:[%s22171_s20 + $0x50] sm:$0xff] }
 0x9f0   :  { %18222 = vmatpush1.bf16.msra.mxu1 %v18221_v47  ;;  %v11936_v61 = vpop.permute.xlu1 %11935  ;;  %11832 = vmatprep.mubr.f32.mxu1 %v23501_v44  ;;  %v16923_v47 = vld [vmem:[%s22099_s28 + $0x6] ss:$8 sm:$0x3] }
 0x9f1   :  { %v11946_v63 = vsel %vm2074_vm9, 0.0, %v11936_v61  ;;  %v11938_v21 = vpop.permute.xlu0 %11937 }
 0x9f2   :  { %v11962_v29 = vmul.f32 %v22209_v37, %v11946_v63  ;;  %v11940_v22 = vsel %vm2074_vm9, %v11936_v61, %v11938_v21 }
 0x9f3   :  { %v11963_v49 = vmul.f32 %v22205_v53, %v11940_v22  ;;  %16891 = vmatmul.mubr.msk.f32.gmra.mrb[30].mxu1 %vm11090_vm0, %v16888_v30 }
 0x9f4   :  { %v12067_v41 = vpop.permute.xlu1 %12066  ;;  %11912 = vmatprep.mubr.f32.mxu1 %v23501_v44  ;;  %v18225_v5 = vpack.c.bf16 %v11962_v29, %v11960_v56  ;;  %v22281_v29 = vrot.slane %v16923_v47, %v23576_v20 }
 0x9f5   :  { %v12069_v19 = vpop.permute.xlu0 %12068  ;;  %v18223_v12 = vpack.c.bf16 %v11963_v49, %v11961_v48  ;;  %v12080_v11 = vsel %vm1308_vm6, 0.0, %v12067_v41 }
 0x9f6   :  { %v12074_v13 = vsel %vm1308_vm6, %v12067_v41, %v12069_v19  ;;  %v12095_v35 = vmul.f32 %v22238_v10, %v12080_v11  ;;  %v16912_v11 = vld [vmem:[%s22171_s20 + $0x70] sm:$0x3] }
 0x9f7   :  { %16892 = vmatmul.mubr.msk.f32.vlgmr.msra.gmra.mrb[26].mxu1 %vm11090_vm0, %v11707_v32  ;;  %18224 = vmatprep.subr.bf16.mxu1 %v18223_v12  ;;  %v12096_v40 = vmul.f32 %v22226_v16, %v12074_v13  ;;  %v16910_v32 = vld [vmem:[%s22171_s20 + $0x60] sm:$0xff]  ;;  %v16911_v13 = vld [vmem:[%s22171_s20 + $0x68] sm:$0xff] }
 0x9f8   :  { %18226 = vmatpush1.bf16.msra.mxu1 %v18225_v5  ;;  %v12071_v18 = vpop.permute.xlu1 %12070  ;;  %11918 = vmatprep.mubr.f32.mxu1 %v23501_v44  ;;  %v16930_v5 = vld [vmem:[%s22099_s28 + $0x7] ss:$8 sm:$0x3] }
 0x9f9   :  { %v12073_v57 = vpop.permute.xlu0 %12072  ;;  %v12081_v6 = vsel %vm1308_vm6, 0.0, %v12071_v18 }
 0x9fa   :  { %v12075_v4 = vsel %vm1308_vm6, %v12071_v18, %v12073_v57  ;;  %v12097_v28 = vmul.f32 %v22238_v10, %v12081_v6  ;;  %v22300_v57 = vrot.slane %v16923_v47, %v23575_v2  ;;  %v22305_v6 = vrot.slane %v16930_v5, %v23576_v20 }
 0x9fb   :  { %v12098_v58 = vmul.f32 %v22226_v16, %v12075_v4  ;;  %16893 = vmatmul.mubr.msk.f32.gmra.mrb[28].mxu1 %vm11090_vm0, %v11708_v14 }
 0x9fc   :  { %11924 = vmatprep.mubr.f32.mxu1 %v23501_v44  ;;  %v18229_v3 = vpack.c.bf16 %v12097_v28, %v12095_v35  ;;  %v12323_v24 = vpop.permute.xlu1 %12322 }
 0x9fd   :  { %v18227_v23 = vpack.c.bf16 %v12098_v58, %v12096_v40  ;;  %v12327_v59 = vpop.permute.xlu0 %12326  ;;  %v12334_v62 = vsel %vm2060_vm7, %v12323_v24, 0.0 }
 0x9fe   :  { %v12335_v60 = vsel %vm2060_vm7, %v12327_v59, 0.0  ;;  %v12350_v17 = vmul.f32 %v22256_v0, %v12334_v62  ;;  %v16937_v62 = vld [vmem:[%s22099_s28 + $0x10] ss:$8 sm:$0x3]  ;;  %s22511_s28 = sld [smem:[%s23391_s0 + %s19181_s25]]  }
 0x9ff   :  { %16894 = vmatmul.mubr.msk.f32.gmra.mrb[30].mxu1 %vm11090_vm0, %v11709_v43  ;;  %18228 = vmatprep.subr.bf16.mxu1 %v18227_v23  ;;  %v12352_v8 = vmul.f32 %v22256_v0, %v12335_v60  ;;  %v16918_v60 = vld [vmem:[%s22171_s20 + $0x80] sm:$0xff]  ;;  %s16510_s25 = sld [smem:[%s23391_s0 + %s19148_s7]]  }
 0xa00   :  { %12041 = vmatprep.mubr.f32.mxu1 %v23501_v44  ;;  %v12321_v9 = vpop.permute.xlu1 %12320 }
 0xa01   :  { %v12325_v27 = vpop.permute.xlu0 %12324  ;;  %v18235_v1 = vpack.c.bf16 %v12352_v8, %v12350_v17  ;;  %v12328_v63 = vsel %vm2060_vm7, %v12321_v9, %v12323_v24  ;;  %v22324_v8 = vrot.slane %v16930_v5, %v23575_v2  ;;  %v16932_v5 = vld [vmem:[%s22171_s20 + $0xb0] sm:$0xff] }
 0xa02   :  { %v12329_v21 = vsel %vm2060_vm7, %v12325_v27, %v12327_v59  ;;  %v12349_v22 = vmul.f32 %v22276_v31, %v12328_v63 }
 0xa03   :  { %16899 = vmatmul.mubr.msk.f32.vlgmr.msra.gmra.mrb[26].mxu1 %vm11090_vm0, %v16896_v45  ;;  %v12351_v48 = vmul.f32 %v22276_v31, %v12329_v21 }
 0xa04   :  { %18230 = vmatpush1.bf16.msra.mxu1 %v18229_v3  ;;  %12047 = vmatprep.mubr.f32.mxu1 %v23501_v44  ;;  %v12458_v61 = vpop.permute.xlu1 %12457 }
 0xa05   :  { %18232 = vmatprep.subr.bf16.mxu1 %v18231_v52  ;;  %v16903_v52 = vld [vmem:[%s22171_s20 + $0x48] sm:$0xff]  ;;  %v12462_v30 = vpop.permute.xlu0 %12461  ;;  %v12470_v25 = vsel %vm12463_vm11, %v12458_v61, 0.0  ;;  %v18237_v19 = vpack.c.bf16 %v12351_v48, %v12349_v22  ;;  %v16925_v48 = vld [vmem:[%s22171_s20 + $0x98] sm:$0xff] }
 0xa06   :  { %v12471_v51 = vsel %vm12463_vm11, %v12462_v30, 0.0  ;;  %v12486_v49 = vmul.f32 %v22281_v29, %v12470_v25 }
 0xa07   :  { %16900 = vmatmul.mubr.msk.f32.gmra.mrb[28].mxu1 %vm11090_vm0, %v16897_v7  ;;  %v12488_v56 = vmul.f32 %v22281_v29, %v12471_v51  ;;  %v16917_v7 = vld [vmem:[%s22171_s20 + $0x78] sm:$0xff] }
 0xa08   :  { %12053 = vmatprep.mubr.f32.mxu1 %v23501_v44  ;;  %v12456_v38 = vpop.permute.xlu1 %12455 }
 0xa09   :  { %v12460_v41 = vpop.permute.xlu0 %12459  ;;  %v18239_v12 = vpack.c.bf16 %v12488_v56, %v12486_v49  ;;  %v12464_v4 = vsel %vm12463_vm11, %v12456_v38, %v12458_v61  ;;  %v22347_v49 = vrot.slane %v16937_v62, %v23575_v2  ;;  %v16931_v2 = vld [vmem:[%s22171_s20 + $0xa8] sm:$0xff] }
 0xa0a   :  { %v12465_v40 = vsel %vm12463_vm11, %v12460_v41, %v12462_v30  ;;  %v12485_v23 = vmul.f32 %v22300_v57, %v12464_v4  ;;  %v16926_v41 = vld [vmem:[%s22171_s20 + $0xa0] sm:$0x3]  ;;  %v16940_v4 = vld [vmem:[%s22171_s20 + $0xd0] sm:$0x3] }
 0xa0b   :  { %16901 = vmatmul.mubr.msk.f32.gmra.mrb[30].mxu1 %vm11090_vm0, %v16898_v39  ;;  %v12487_v28 = vmul.f32 %v22300_v57, %v12465_v40 }
 0xa0c   :  { %12176 = vmatprep.mubr.f32.mxu1 %v23501_v44  ;;  %v12594_v18 = vpop.permute.xlu1 %12593 }
 0xa0d   :  { %v12598_v14 = vpop.permute.xlu0 %12597  ;;  %v12606_v58 = vsel %vm12599_vm12, %v12594_v18, 0.0  ;;  %v18241_v24 = vpack.c.bf16 %v12487_v28, %v12485_v23 }
 0xa0e   :  { %v12607_v43 = vsel %vm12599_vm12, %v12598_v14, 0.0  ;;  %v12622_v35 = vmul.f32 %v22305_v6, %v12606_v58 }
 0xa0f   :  { %16906 = vmatmul.mubr.msk.f32.vlgmr.msra.gmra.mrb[26].mxu1 %vm11090_vm0, %v16903_v52  ;;  %v12624_v45 = vmul.f32 %v22305_v6, %v12607_v43  ;;  %v22329_v52 = vrot.slane %v16937_v62, %v23576_v20  ;;  %v16924_v20 = vld [vmem:[%s22171_s20 + $0x90] sm:$0xff] }
 0xa10   :  { %18234 = vmatpush1.bf16.msra.mxu1 %v18233_v50  ;;  %12182 = vmatprep.mubr.f32.mxu1 %v23501_v44  ;;  %v16905_v50 = vld [vmem:[%s22171_s20 + $0x58] sm:$0x3]  ;;  %v12592_v3 = vpop.permute.xlu1 %12591 }
 0xa11   :  { %18236 = vmatprep.subr.bf16.mxu1 %v18235_v1  ;;  %v12596_v36 = vpop.permute.xlu0 %12595  ;;  %v18243_v59 = vpack.c.bf16 %v12624_v45, %v12622_v35  ;;  %v12600_v9 = vsel %vm12599_vm12, %v12592_v3, %v12594_v18  ;;  %v16938_v18 = vld [vmem:[%s22171_s20 + $0xc0] sm:$0xff] }
 0xa12   :  { %v12601_v27 = vsel %vm12599_vm12, %v12596_v36, %v12598_v14  ;;  %v12621_v61 = vmul.f32 %v22324_v8, %v12600_v9  ;;  %v16939_v14 = vld [vmem:[%s22171_s20 + $0xc8] sm:$0xff] }
 0xa13   :  { %16907 = vmatmul.mubr.msk.f32.gmra.mrb[28].mxu1 %vm11090_vm0, %v16904_v15  ;;  %v16919_v15 = vld [vmem:[%s22171_s20 + $0x88] sm:$0x3]  ;;  %v12623_v30 = vmul.f32 %v22324_v8, %v12601_v27 }
 0xa14   :  { %12188 = vmatprep.mubr.f32.mxu1 %v23501_v44  ;;  %v12730_v39 = vpop.permute.xlu1 %12729 }
 0xa15   :  { %v12734_v17 = vpop.permute.xlu0 %12733  ;;  %v12742_v1 = vsel %vm12735_vm13, %v12730_v39, 0.0  ;;  %v18245_v25 = vpack.c.bf16 %v12623_v30, %v12621_v61 }
 0xa16   :  { %v12743_v47 = vsel %vm12735_vm13, %v12734_v17, 0.0  ;;  %v12758_v63 = vmul.f32 %v22329_v52, %v12742_v1 }
 0xa17   :  { %16908 = vmatmul.mubr.msk.f32.gmra.mrb[30].mxu1 %vm11090_vm0, %v16905_v50  ;;  %v12760_v21 = vmul.f32 %v22329_v52, %v12743_v47 }
 0xa18   :  { %12295 = vmatprep.mubr.f32.mxu1 %v23501_v44  ;;  %v12728_v50 = vpop.permute.xlu1 %12727 }
 0xa19   :  { %v18247_v51 = vpack.c.bf16 %v12760_v21, %v12758_v63  ;;  %v12732_v22 = vpop.permute.xlu0 %12731  ;;  %v12736_v56 = vsel %vm12735_vm13, %v12728_v50, %v12730_v39 }
 0xa1a   :  { %v12737_v38 = vsel %vm12735_vm13, %v12732_v22, %v12734_v17 }
 0xa1b   :  { %16913 = vmatmul.mubr.msk.f32.vlgmr.msra.gmra.mrb[26].mxu1 %vm11090_vm0, %v16910_v32  ;;  %v12757_v32 = vmul.f32 %v22347_v49, %v12736_v56 }
 0xa1c   :  { %18238 = vmatpush1.bf16.msra.mxu1 %v18237_v19  ;;  %12301 = vmatprep.mubr.f32.mxu1 %v23501_v44  ;;  %v12759_v19 = vmul.f32 %v22347_v49, %v12737_v38 }
 0xa1d   :  { %18240 = vmatprep.subr.bf16.mxu1 %v18239_v12 }
 0xa1e   :  { %v18249_v12 = vpack.c.bf16 %v12759_v19, %v12757_v32  ;;  %v14170_v32 = vld [vmem:[%s22489_s24 + $0x88] sm:$0xff]  ;;  %v14153_v19 = vld [vmem:[%s22489_s24] sm:$0xff] }
 0xa1f   :  { %16914 = vmatmul.mubr.msk.f32.gmra.mrb[28].mxu1 %vm11090_vm0, %v16911_v13  ;;  %v16933_v13 = vld [vmem:[%s22171_s20 + $0xb8] sm:$0x3]  ;;  %s22957_s20 = sld [smem:[%s23391_s0 + %s19149_s8]]  }
 0xa20   :  { %12307 = vmatprep.mubr.f32.mxu1 %v23501_v44 }
 0xa23   :  { %16915 = vmatmul.mubr.msk.f32.gmra.mrb[30].mxu1 %vm11090_vm0, %v16912_v11 }
 0xa24   :  { %12430 = vmatprep.mubr.f32.mxu1 %v23501_v44 }
 0xa27   :  { %16920 = vmatmul.mubr.msk.f32.vlgmr.msra.gmra.mrb[26].mxu1 %vm11090_vm0, %v16917_v7 }
 0xa28   :  { %18242 = vmatpush1.bf16.msra.mxu1 %v18241_v24  ;;  %12436 = vmatprep.mubr.f32.mxu1 %v23501_v44 }
 0xa29   :  { %18244 = vmatprep.subr.bf16.mxu1 %v18243_v59  ;;  %v12875_v40 = vpop.permute.xlu1 %12874 }
 0xa2a   :  { %v12880_v58 = vpop.permute.xlu0 %12879 }
 0xa2b   :  { %16921 = vmatmul.mubr.msk.f32.gmra.mrb[28].mxu1 %vm11090_vm0, %v16918_v60 }
 0xa2c   :  { %12442 = vmatprep.mubr.f32.mxu1 %v23501_v44 }
 0xa2d   :  { %v12899_v45 = vpop.permute.xlu1 %12898 }
 0xa2e   :  { %v12904_v62 = vpop.permute.xlu0 %12903 }
 0xa2f   :  { %16922 = vmatmul.mubr.msk.f32.gmra.mrb[30].mxu1 %vm11090_vm0, %v16919_v15 }
 0xa30   :  { %12566 = vmatprep.mubr.f32.mxu1 %v23501_v44 }
 0xa31   :  { %v12885_v61 = vpop.permute.xlu1 %12884 }
 0xa33   :  { %16927 = vmatmul.mubr.msk.f32.vlgmr.msra.gmra.mrb[26].mxu1 %vm11090_vm0, %v16924_v20  ;;  %v12909_v20 = vpop.permute.xlu0 %12908 }
 0xa34   :  { %18246 = vmatpush1.bf16.msra.mxu1 %v18245_v25  ;;  %12572 = vmatprep.mubr.f32.mxu1 %v23501_v44 }
 0xa35   :  { %18248 = vmatprep.subr.bf16.mxu1 %v18247_v51 }
 0xa37   :  { %16928 = vmatmul.mubr.msk.f32.gmra.mrb[28].mxu1 %vm11090_vm0, %v16925_v48 }
 0xa38   :  { %12578 = vmatprep.mubr.f32.mxu1 %v23501_v44 }
 0xa3b   :  { %16929 = vmatmul.mubr.msk.f32.gmra.mrb[30].mxu1 %vm11090_vm0, %v16926_v41  ;;  %v14169_v41 = vld [vmem:[%s22489_s24 + $0x80] sm:$0xff] }
 0xa3c   :  { %12702 = vmatprep.mubr.f32.mxu1 %v23501_v44 }
 0xa3f   :  { %16934 = vmatmul.mubr.msk.f32.vlgmr.msra.gmra.mrb[26].mxu1 %vm11090_vm0, %v16931_v2 }
 0xa40   :  { %18250 = vmatpush1.bf16.msra.mxu1 %v18249_v12  ;;  %12708 = vmatprep.mubr.f32.mxu1 %v23501_v44  ;;  %v18287_v12 = vpack.c.bf16 %v14170_v32, %v14169_v41  ;;  %v14177_v32 = vld [vmem:[%s22489_s24 + $0xc0] sm:$0xff] }
 0xa42   :  { %18288 = vmatprep.subr.bf16.mxu1 %v18287_v12 }
 0xa43   :  { %16935 = vmatmul.mubr.msk.f32.gmra.mrb[28].mxu1 %vm11090_vm0, %v16932_v5  ;;  %v14154_v5 = vld [vmem:[%s22489_s24 + $0x8] sm:$0xff] }
 0xa44   :  { %12714 = vmatprep.mubr.f32.mxu1 %v23501_v44 }
 0xa47   :  { %16936 = vmatmul.mubr.msk.f32.gmra.mrb[30].mxu1 %vm11090_vm0, %v16933_v13  ;;  %v14171_v13 = vld [vmem:[%s22489_s24 + $0x90] sm:$0xff] }
 0xa48   :  { %12838 = vmatprep.mubr.f32.mxu1 %v23501_v44 }
 0xa4b   :  { %16941 = vmatmul.mubr.msk.f32.vlgmr.msra.gmra.mrb[26].mxu1 %vm11090_vm0, %v16938_v18  ;;  %v14172_v18 = vld [vmem:[%s22489_s24 + $0x98] sm:$0xff] }
 0xa4c   :  { %12844 = vmatprep.mubr.f32.mxu1 %v23501_v44 }
 0xa4f   :  { %16942 = vmatmul.mubr.msk.f32.gmra.mrb[28].mxu1 %vm11090_vm0, %v16939_v14  ;;  %v18289_v14 = vpack.c.bf16 %v14154_v5, %v14153_v19  ;;  %v14178_v19 = vld [vmem:[%s22489_s24 + $0xc8] sm:$0xff] }
 0xa50   :  { %12850 = vmatprep.mubr.f32.mxu1 %v23501_v44 }
 0xa51   :  { %18290 = vmatpush3.bf16.msra.mxu1 %v18289_v14  ;;  %v18303_v14 = vpack.c.bf16 %v14178_v19, %v14177_v32 }
 0xa53   :  { %16943 = vmatmul.mubr.msk.f32.gmra.mrb[30].mxu1 %vm11090_vm0, %v16940_v4  ;;  %v18291_v4 = vpack.c.bf16 %v14172_v18, %v14171_v13 }
 0xa55   :  { %18292 = vmatprep.subr.bf16.mxu1 %v18291_v4  ;;  %v14161_v4 = vld [vmem:[%s22489_s24 + $0x40] sm:$0xff] }
 0xb1e   :  { %v12840_v43 = vpop.f32.mrb[26].mxu1 }
 0xb1f   :  { %v12863_v11 = vmax.f32 %v12840_v43, 0.0  ;;  %v12842_v23 = vpop.f32.mrb[27].mxu1  ;;  %v14173_v43 = vld [vmem:[%s22489_s24 + $0xa0] sm:$0xff] }
 0xb20   :  { %v12864_v28 = vmax.f32 %v12842_v23, 0.0 }
 0xb21   :  { %v12887_v35 = vmul.f32 %v12875_v40, %v12863_v11  ;;  %v14174_v11 = vld [vmem:[%s22489_s24 + $0xa8] sm:$0xff] }
 0xb22   :  { %v12888_v3 = vmul.f32 %v12875_v40, %v12864_v28  ;;  %v12846_v36 = vpop.f32.mrb[28].mxu1  ;;  %v14155_v40 = vld [vmem:[%s22489_s24 + $0x10] sm:$0xff] }
 0xb23   :  { %v22375_v7 = vadd.f32 %v12899_v45, %v12887_v35  ;;  %v12865_v24 = vmax.f32 %v12846_v36, 0.0  ;;  %v12848_v59 = vpop.f32.mrb[29].mxu1 }
 0xb24   :  { %v22377_v60 = vadd.f32 %v12899_v45, %v12888_v3  ;;  %v12866_v39 = vmax.f32 %v12848_v59, 0.0  ;;  %v14157_v59 = vld [vmem:[%s22489_s24 + $0x20] sm:$0xff] }
 0xb25   :  { %v12889_v17 = vmul.f32 %v12880_v58, %v12865_v24  ;;  %12956 = vrot.lane.b32.xlu1 %v22375_v7, %s19173_s29  ;;  %v18295_v24 = vpack.c.bf16 %v14174_v11, %v14173_v43  ;;  %v16944_v43 = vld [vmem:[%s22511_s28 + $0x18] sm:$0xff] }
 0xb26   :  { %v12890_v9 = vmul.f32 %v12880_v58, %v12866_v39  ;;  %12958 = vrot.lane.b32.xlu0 %v22377_v60, %s19173_s29  ;;  %v12852_v27 = vpop.f32.mrb[30].mxu1  ;;  %v14156_v58 = vld [vmem:[%s22489_s24 + $0x18] sm:$0xff] }
 0xb27   :  { %v22383_v1 = vadd.f32 %v12904_v62, %v12889_v17  ;;  %v12867_v47 = vmax.f32 %v12852_v27, 0.0  ;;  %v12854_v15 = vpop.f32.mrb[31].mxu1  ;;  %v18293_v35 = vpack.c.bf16 %v14156_v58, %v14155_v40  ;;  %v14176_v27 = vld [vmem:[%s22489_s24 + $0xb8] sm:$0xff]  ;;  %v14162_v40 = vld [vmem:[%s22489_s24 + $0x48] sm:$0xff] }
 0xb28   :  { %v22385_v30 = vadd.f32 %v12904_v62, %v12890_v9  ;;  %v12868_v63 = vmax.f32 %v12854_v15, 0.0  ;;  %v14158_v62 = vld [vmem:[%s22489_s24 + $0x28] sm:$0xff]  ;;  %v14175_v9 = vld [vmem:[%s22489_s24 + $0xb0] sm:$0xff]  ;;  %v14180_v11 = vld [vmem:[%s22489_s24 + $0xd8] sm:$0xff] }
 0xb29   :  { %v12891_v21 = vmul.f32 %v12885_v61, %v12867_v47  ;;  %12960 = vrot.lane.b32.xlu1 %v22383_v1, %s19173_s29  ;;  %18294 = vmatpush3.bf16.msra.mxu1 %v18293_v35  ;;  %v18305_v35 = vpack.c.bf16 %v14162_v40, %v14161_v4 }
 0xb2a   :  { %v12892_v25 = vmul.f32 %v12885_v61, %v12868_v63  ;;  %12962 = vrot.lane.b32.xlu0 %v22385_v30, %s19173_s29  ;;  %18296 = vmatprep.subr.bf16.mxu1 %v18295_v24  ;;  %v14163_v24 = vld [vmem:[%s22489_s24 + $0x50] sm:$0xff] }
 0xb2b   :  { %v22391_v51 = vadd.f32 %v12909_v20, %v12891_v21  ;;  %v18297_v21 = vpack.c.bf16 %v14158_v62, %v14157_v59  ;;  %v14164_v59 = vld [vmem:[%s22489_s24 + $0x58] sm:$0xff] }
 0xb2c   :  { %v22393_v50 = vadd.f32 %v12909_v20, %v12892_v25 }
 0xb2d   :  { %12964 = vrot.lane.b32.xlu1 %v22391_v51, %s19173_s29  ;;  %18298 = vmatpush3.bf16.msra.mxu1 %v18297_v21  ;;  %v18309_v21 = vpack.c.bf16 %v14164_v59, %v14163_v24  ;;  %v12955_v59 = vld [vmem:[%s22511_s28 + $0x10] sm:$0xf] }
 0xb2e   :  { %12966 = vrot.lane.b32.xlu0 %v22393_v50, %s19173_s29  ;;  %s19182_s29 = smov 23  }
 0xb31   :  { %12923 = vrot.lane.b32.xlu1 %v22375_v7, %s19174_s30 }
 0xb32   :  { %12925 = vrot.lane.b32.xlu0 %v22377_v60, %s19174_s30 }
 0xb35   :  { %12927 = vrot.lane.b32.xlu1 %v22383_v1, %s19174_s30 }
 0xb36   :  { %12929 = vrot.lane.b32.xlu0 %v22385_v30, %s19174_s30 }
 0xb39   :  { %12931 = vrot.lane.b32.xlu1 %v22391_v51, %s19174_s30 }
 0xb3a   :  { %12933 = vrot.lane.b32.xlu0 %v22393_v50, %s19174_s30 }
 0xb3d   :  { %13187 = vrot.lane.b32.xlu1 %v22375_v7, %s19170_s12 }
 0xb3e   :  { %13189 = vrot.lane.b32.xlu0 %v22377_v60, %s19170_s12 }
 0xb41   :  { %13191 = vrot.lane.b32.xlu1 %v22383_v1, %s19170_s12 }
 0xb42   :  { %13193 = vrot.lane.b32.xlu0 %v22385_v30, %s19170_s12 }
 0xb45   :  { %13195 = vrot.lane.b32.xlu1 %v22391_v51, %s19170_s12 }
 0xb46   :  { %13197 = vrot.lane.b32.xlu0 %v22393_v50, %s19170_s12 }
 0xb49   :  { %13325 = vrot.lane.b32.xlu1 %v22375_v7, %s19150_s9 }
 0xb4a   :  { %13327 = vrot.lane.b32.xlu0 %v22377_v60, %s19150_s9 }
 0xb4d   :  { %13329 = vrot.lane.b32.xlu1 %v22383_v1, %s19150_s9 }
 0xb4e   :  { %13331 = vrot.lane.b32.xlu0 %v22385_v30, %s19150_s9 }
 0xb51   :  { %13333 = vrot.lane.b32.xlu1 %v22391_v51, %s19150_s9 }
 0xb52   :  { %13335 = vrot.lane.b32.xlu0 %v22393_v50, %s19150_s9  ;;  %s19179_s9 = smov 21  }
 0xb53   :  { %s16502_s21 = sld [smem:[%s23391_s0 + %s19179_s9]]   ;;  %s19186_s9 = smov 26  }
 0xb55   :  { %13579 = vrot.lane.b32.xlu1 %v22377_v60, %s19151_s10 }
 0xb56   :  { %13583 = vrot.lane.b32.xlu0 %v22385_v30, %s19151_s10 }
 0xb59   :  { %13577 = vrot.lane.b32.xlu1 %v22375_v7, %s19151_s10  ;;  %v14129_v22 = vld [vmem:[%s16502_s21] sm:$0xff]  ;;  %v14130_v48 = vld [vmem:[%s16502_s21 + $0x8] sm:$0xff]  ;;  %v14131_v56 = vld [vmem:[%s16502_s21 + $0x10] sm:$0xf]  ;;  %s22963_s21 = sld [smem:[%s23391_s0 + %s19186_s9]]  }
 0xb5a   :  { %13581 = vrot.lane.b32.xlu0 %v22383_v1, %s19151_s10 }
 0xb5d   :  { %13587 = vrot.lane.b32.xlu1 %v22393_v50, %s19151_s10 }
 0xb5e   :  { %13585 = vrot.lane.b32.xlu0 %v22391_v51, %s19151_s10 }
 0xb61   :  { %13717 = vrot.lane.b32.xlu1 %v22377_v60, %s19175_s1 }
 0xb62   :  { %13721 = vrot.lane.b32.xlu0 %v22385_v30, %s19175_s1 }
 0xb65   :  { %13715 = vrot.lane.b32.xlu1 %v22375_v7, %s19175_s1 }
 0xb66   :  { %13719 = vrot.lane.b32.xlu0 %v22383_v1, %s19175_s1 }
 0xb69   :  { %13725 = vrot.lane.b32.xlu1 %v22393_v50, %s19175_s1 }
 0xb6a   :  { %13723 = vrot.lane.b32.xlu0 %v22391_v51, %s19175_s1 }
 0xb6d   :  { %13855 = vrot.lane.b32.xlu1 %v22377_v60, %s19176_s2 }
 0xb6e   :  { %13859 = vrot.lane.b32.xlu0 %v22385_v30, %s19176_s2 }
 0xb71   :  { %13853 = vrot.lane.b32.xlu1 %v22375_v7, %s19176_s2 }
 0xb72   :  { %13857 = vrot.lane.b32.xlu0 %v22383_v1, %s19176_s2 }
 0xb75   :  { %13863 = vrot.lane.b32.xlu1 %v22393_v50, %s19176_s2 }
 0xb76   :  { %13861 = vrot.lane.b32.xlu0 %v22391_v51, %s19176_s2  ;;  %s16504_s2 = sld [smem:[%s23391_s0 + %s19182_s29]]  }
 0xb79   :  { %13993 = vrot.lane.b32.xlu1 %v22377_v60, %s19177_s14 }
 0xb7a   :  { %13997 = vrot.lane.b32.xlu0 %v22385_v30, %s19177_s14 }
 0xb7d   :  { %13991 = vrot.lane.b32.xlu1 %v22375_v7, %s19177_s14 }
 0xb7e   :  { %13995 = vrot.lane.b32.xlu0 %v22383_v1, %s19177_s14 }
 0xb81   :  { %14001 = vrot.lane.b32.xlu1 %v22393_v50, %s19177_s14 }
 0xb82   :  { %13999 = vrot.lane.b32.xlu0 %v22391_v51, %s19177_s14  ;;  %s22741_s14 = sld [smem:[%s23391_s0 + %s19183_s3]]  }
 0xb85   :  { %14134 = vperm.xlu1 %19058, %v14129_v22   ;;  %v18299_v22 = vpack.c.bf16 %v14176_v27, %v14175_v9 }
 0xb86   :  { %14139 = vperm.xlu0 %19059, %v14130_v48   ;;  %v14159_v48 = vld [vmem:[%s22489_s24 + $0x30] sm:$0xff] }
 0xb87   :  { %18300 = vmatprep.subr.bf16.mxu1 %v18299_v22  ;;  %v14165_v22 = vld [vmem:[%s22489_s24 + $0x60] sm:$0xff] }
 0xb89   :  { %14144 = vperm.xlu1 %19058, %v14131_v56   ;;  %v14160_v56 = vld [vmem:[%s22489_s24 + $0x38] sm:$0xff] }
 0xb8a   :  { %v18301_v13 = vpack.c.bf16 %v14160_v56, %v14159_v48  ;;  %v14166_v48 = vld [vmem:[%s22489_s24 + $0x68] sm:$0xff] }
 0xb8c   :  { %18302 = vmatpush3.bf16.msra.mxu1 %v18301_v13 }
 0xb8d   :  { %18304 = vmatprep.subr.bf16.mxu1 %v18303_v14  ;;  %v12953_v14 = vld [vmem:[%s22511_s28] sm:$0xff] }
 0xb90   :  { %18306 = vmatpush3.bf16.msra.mxu1 %v18305_v35 }
 0xb97   :  { %v12957_v38 = vpop.permute.xlu1 %12956 }
 0xb98   :  { %v12959_v2 = vpop.permute.xlu0 %12958  ;;  %v12977_v45 = vsel %vm11090_vm0, 0.0, %v12957_v38 }
 0xb99   :  { %v12968_v23 = vsel %vm11090_vm0, %v12957_v38, %v12959_v2  ;;  %v12980_v61 = vmul.f32 %v12977_v45, %v22174_v26 }
 0xb9a   :  { %v12981_v47 = vmul.f32 %v12968_v23, %v22165_v54 }
 0xb9b   :  { %v12961_v28 = vpop.permute.xlu1 %12960 }
 0xb9c   :  { %v12978_v3 = vsel %vm11090_vm0, 0.0, %v12961_v28  ;;  %v12963_v36 = vpop.permute.xlu0 %12962 }
 0xb9d   :  { %v12982_v39 = vmul.f32 %v12978_v3, %v22174_v26  ;;  %v12969_v17 = vsel %vm11090_vm0, %v12961_v28, %v12963_v36 }
 0xb9e   :  { %v12983_v15 = vmul.f32 %v12969_v17, %v22165_v54  ;;  %v16945_v17 = vld [vmem:[%s22511_s28 + $0x20] sm:$0xff] }
 0xb9f   :  { %v12965_v63 = vpop.permute.xlu1 %12964  ;;  %v18253_v38 = vpack.c.bf16 %v12982_v39, %v12980_v61 }
 0xba0   :  { %v12967_v20 = vpop.permute.xlu0 %12966  ;;  %v18251_v25 = vpack.c.bf16 %v12983_v15, %v12981_v47  ;;  %v12979_v2 = vsel %vm11090_vm0, 0.0, %v12965_v63  ;;  %v14181_v47 = vld [vmem:[%s22489_s24 + $0xe0] sm:$0xff]  ;;  %v14182_v15 = vld [vmem:[%s22489_s24 + $0xe8] sm:$0xff] }
 0xba1   :  { %v12970_v41 = vsel %vm11090_vm0, %v12965_v63, %v12967_v20  ;;  %v12984_v58 = vmul.f32 %v12979_v2, %v22174_v26  ;;  %v18311_v32 = vpack.c.bf16 %v14182_v15, %v14181_v47  ;;  %v16957_v47 = vld [vmem:[%s22511_s28 + $0x30] sm:$0xff] }
 0xba2   :  { %v12985_v12 = vmul.f32 %v12970_v41, %v22165_v54  ;;  %18252 = vmatprep.subr.bf16.mxu0 %v18251_v25  ;;  %v14179_v54 = vld [vmem:[%s22489_s24 + $0xd0] sm:$0xff]  ;;  %v16946_v41 = vld [vmem:[%s22511_s28 + $0x28] sm:$0xf] }
 0xba3   :  { %18254 = vmatpush1.bf16.msra.mxu0 %v18253_v38  ;;  %v12924_v5 = vpop.permute.xlu1 %12923  ;;  %v18307_v36 = vpack.c.bf16 %v14180_v11, %v14179_v54  ;;  %v12954_v11 = vld [vmem:[%s22511_s28 + $0x8] sm:$0xff] }
 0xba4   :  { %16947 = vmatprep.subr.msk.mxu0 %vm7084_vm1, %v12985_v12  ;;  %v12926_v18 = vpop.permute.xlu0 %12925  ;;  %v12944_v45 = vsel %vm11682_vm10, 0.0, %v12924_v5 }
 0xba5   :  { %v12935_v23 = vsel %vm11682_vm10, %v12924_v5, %v12926_v18  ;;  %v12947_v61 = vmul.f32 %v12944_v45, %v22189_v42  ;;  %18308 = vmatprep.subr.bf16.mxu1 %v18307_v36  ;;  %v18313_v5 = vpack.c.bf16 %v14166_v48, %v14165_v22 }
 0xba6   :  { %v12948_v9 = vmul.f32 %v12935_v23, %v22186_v46  ;;  %18310 = vmatpush3.bf16.msra.mxu1 %v18309_v21 }
 0xba7   :  { %v12928_v28 = vpop.permute.xlu1 %12927  ;;  %16948 = vmatpush1.msk.msra.mxu0 %vm7084_vm1, %v12984_v58  ;;  %18312 = vmatprep.subr.bf16.mxu1 %v18311_v32 }
 0xba8   :  { %v12945_v26 = vsel %vm11682_vm10, 0.0, %v12928_v28  ;;  %16949 = vmatmul.mubr.msk.f32.vlgmr.msra.gmra.mrb[24].mxu0 %vm12990_vm14, %v16944_v43  ;;  %v12930_v3 = vpop.permute.xlu0 %12929 }
 0xba9   :  { %v12949_v62 = vmul.f32 %v12945_v26, %v22189_v42  ;;  %v12936_v39 = vsel %vm11682_vm10, %v12928_v28, %v12930_v3  ;;  %13076 = vmatprep.mubr.f32.mxu0 %v23501_v44 }
 0xbaa   :  { %v12950_v27 = vmul.f32 %v12936_v39, %v22186_v46  ;;  %18314 = vmatpush3.bf16.msra.mxu1 %v18313_v5 }
 0xbab   :  { %v12932_v63 = vpop.permute.xlu1 %12931  ;;  %v18257_v56 = vpack.c.bf16 %v12949_v62, %v12947_v61 }
 0xbac   :  { %16950 = vmatmul.mubr.msk.f32.gmra.mrb[26].mxu0 %vm12990_vm14, %v16945_v17  ;;  %v12934_v20 = vpop.permute.xlu0 %12933  ;;  %v18255_v25 = vpack.c.bf16 %v12950_v27, %v12948_v9  ;;  %v12946_v19 = vsel %vm11682_vm10, 0.0, %v12932_v63 }
 0xbad   :  { %v12937_v38 = vsel %vm11682_vm10, %v12932_v63, %v12934_v20  ;;  %13082 = vmatprep.mubr.f32.mxu0 %v23501_v44  ;;  %v12951_v18 = vmul.f32 %v12946_v19, %v22189_v42 }
 0xbae   :  { %v12952_v2 = vmul.f32 %v12937_v38, %v22186_v46  ;;  %18256 = vmatprep.subr.bf16.mxu0 %v18255_v25  ;;  %v16958_v25 = vld [vmem:[%s22511_s28 + $0x38] sm:$0xff] }
 0xbaf   :  { %v13188_v12 = vpop.permute.xlu1 %13187  ;;  %18258 = vmatpush1.bf16.msra.mxu0 %v18257_v56 }
 0xbb0   :  { %16951 = vmatmul.mubr.msk.f32.gmra.mrb[28].mxu0 %vm12990_vm14, %v16946_v41  ;;  %16952 = vmatprep.subr.msk.mxu0 %vm7084_vm1, %v12952_v2  ;;  %v13190_v13 = vpop.permute.xlu0 %13189  ;;  %v13208_v40 = vsel %vm2074_vm9, 0.0, %v13188_v12 }
 0xbb1   :  { %13168 = vmatprep.mubr.f32.mxu0 %v23501_v44  ;;  %v13199_v4 = vsel %vm2074_vm9, %v13188_v12, %v13190_v13  ;;  %v13211_v35 = vmul.f32 %v13208_v40, %v22209_v37  ;;  %v16959_v12 = vld [vmem:[%s22511_s28 + $0x40] sm:$0xf]  ;;  %v13464_v40 = vmul.f32 %v22377_v60, %v22108_v34 }
 0xbb2   :  { %v13212_v23 = vmul.f32 %v13199_v4, %v22205_v53  ;;  %v13465_v4 = vmul.f32 %v22383_v1, %v22104_v33  ;;  %v13463_v1 = vmul.f32 %v22375_v7, %v22104_v33  ;;  %v16966_v7 = vld [vmem:[%s22511_s28 + $0x50] sm:$0xff] }
 0xbb3   :  { %v13192_v46 = vpop.permute.xlu1 %13191  ;;  %16953 = vmatpush1.msk.msra.mxu0 %vm7084_vm1, %v12951_v18  ;;  %v13466_v18 = vmul.f32 %v22385_v30, %v22108_v34  ;;  %v16965_v30 = vld [vmem:[%s22511_s28 + $0x48] sm:$0xff] }
 0xbb4   :  { %v13209_v58 = vsel %vm2074_vm9, 0.0, %v13192_v46  ;;  %16954 = vmatmul.mubr.msk.f32.vlgmr.msra.gmra.mrb[24].mxu0 %vm12990_vm14, %v12953_v14  ;;  %v13194_v43 = vpop.permute.xlu0 %13193 }
 0xbb5   :  { %v13213_v42 = vmul.f32 %v13209_v58, %v22209_v37  ;;  %v13200_v54 = vsel %vm2074_vm9, %v13192_v46, %v13194_v43  ;;  %13174 = vmatprep.mubr.f32.mxu0 %v23501_v44 }
 0xbb6   :  { %v13214_v28 = vmul.f32 %v13200_v54, %v22205_v53 }
 0xbb7   :  { %v13196_v45 = vpop.permute.xlu1 %13195  ;;  %v18261_v36 = vpack.c.bf16 %v13213_v42, %v13211_v35  ;;  %v18267_v42 = vpack.c.bf16 %v13466_v18, %v13464_v40 }
 0xbb8   :  { %16955 = vmatmul.mubr.msk.f32.gmra.mrb[26].mxu0 %vm12990_vm14, %v12954_v11  ;;  %v13198_v26 = vpop.permute.xlu0 %13197  ;;  %v18259_v3 = vpack.c.bf16 %v13214_v28, %v13212_v23  ;;  %v13210_v62 = vsel %vm2074_vm9, 0.0, %v13196_v45  ;;  %v18269_v11 = vpack.c.bf16 %v13465_v4, %v13463_v1  ;;  %v13468_v28 = vmul.f32 %v22393_v50, %v22108_v34  ;;  %v16967_v34 = vld [vmem:[%s22511_s28 + $0x58] sm:$0xf] }
 0xbb9   :  { %v13201_v24 = vsel %vm2074_vm9, %v13196_v45, %v13198_v26  ;;  %13180 = vmatprep.mubr.f32.mxu0 %v23501_v44  ;;  %v13215_v27 = vmul.f32 %v13210_v62, %v22209_v37  ;;  %v13467_v45 = vmul.f32 %v22391_v51, %v22104_v33  ;;  %vm23578_vm9 = vmmov 0  }
 0xbba   :  { %v13216_v39 = vmul.f32 %v13201_v24, %v22205_v53  ;;  %18260 = vmatprep.subr.bf16.mxu0 %v18259_v3 }
 0xbbb   :  { %v13326_v17 = vpop.permute.xlu1 %13325  ;;  %18262 = vmatpush1.bf16.msra.mxu0 %v18261_v36 }
 0xbbc   :  { %16956 = vmatmul.mubr.msk.f32.gmra.mrb[28].mxu0 %vm12990_vm14, %v12955_v59  ;;  %16960 = vmatprep.subr.msk.mxu0 %vm7084_vm1, %v13216_v39  ;;  %v13328_v9 = vpop.permute.xlu0 %13327  ;;  %v13346_v53 = vsel %vm1308_vm6, 0.0, %v13326_v17 }
 0xbbd   :  { %13300 = vmatprep.mubr.f32.mxu0 %v23501_v44  ;;  %v13337_v15 = vsel %vm1308_vm6, %v13326_v17, %v13328_v9  ;;  %v13349_v56 = vmul.f32 %v13346_v53, %v22238_v10  ;;  %v16973_v9 = vld [vmem:[%s22511_s28 + $0x60] sm:$0xff] }
 0xbbe   :  { %v13350_v22 = vmul.f32 %v13337_v15, %v22226_v16 }
 0xbbf   :  { %v13330_v61 = vpop.permute.xlu1 %13329  ;;  %16961 = vmatpush1.msk.msra.mxu0 %vm7084_vm1, %v13215_v27 }
 0xbc0   :  { %v13347_v63 = vsel %vm1308_vm6, 0.0, %v13330_v61  ;;  %16962 = vmatmul.mubr.msk.f32.vlgmr.msra.gmra.mrb[24].mxu0 %vm12990_vm14, %v16957_v47  ;;  %v13332_v21 = vpop.permute.xlu0 %13331 }
 0xbc1   :  { %v13351_v20 = vmul.f32 %v13347_v63, %v22238_v10  ;;  %v13338_v37 = vsel %vm1308_vm6, %v13330_v61, %v13332_v21  ;;  %13306 = vmatprep.mubr.f32.mxu0 %v23501_v44 }
 0xbc2   :  { %v13352_v48 = vmul.f32 %v13338_v37, %v22226_v16 }
 0xbc3   :  { %v13334_v38 = vpop.permute.xlu1 %13333  ;;  %v18265_v19 = vpack.c.bf16 %v13351_v20, %v13349_v56  ;;  %v16974_v20 = vld [vmem:[%s22511_s28 + $0x68] sm:$0xff] }
 0xbc4   :  { %16963 = vmatmul.mubr.msk.f32.gmra.mrb[26].mxu0 %vm12990_vm14, %v16958_v25  ;;  %v13336_v41 = vpop.permute.xlu0 %13335  ;;  %v18263_v32 = vpack.c.bf16 %v13352_v48, %v13350_v22  ;;  %v13348_v5 = vsel %vm1308_vm6, 0.0, %v13334_v38 }
 0xbc5   :  { %v13339_v2 = vsel %vm1308_vm6, %v13334_v38, %v13336_v41  ;;  %13312 = vmatprep.mubr.f32.mxu0 %v23501_v44  ;;  %v13353_v58 = vmul.f32 %v13348_v5, %v22238_v10  ;;  %v16975_v38 = vld [vmem:[%s22511_s28 + $0x70] sm:$0xf]  ;;  %vm14366_vm6 = vcmask 15360  }
 0xbc6   :  { %v13354_v13 = vmul.f32 %v13339_v2, %v22226_v16  ;;  %18264 = vmatprep.subr.bf16.mxu0 %v18263_v32 }
 0xbc7   :  { %v13580_v14 = vpop.permute.xlu1 %13579  ;;  %18266 = vmatpush1.bf16.msra.mxu0 %v18265_v19 }
 0xbc8   :  { %16964 = vmatmul.mubr.msk.f32.gmra.mrb[28].mxu0 %vm12990_vm14, %v16959_v12  ;;  %16968 = vmatprep.subr.msk.mxu0 %vm7084_vm1, %v13354_v13  ;;  %v13584_v46 = vpop.permute.xlu0 %13583  ;;  %v13598_v16 = vsel %vm2060_vm7, %v13580_v14, 0.0  ;;  %v16981_v13 = vld [vmem:[%s22511_s28 + $0x78] sm:$0xff] }
 0xbc9   :  { %v13599_v43 = vsel %vm2060_vm7, %v13584_v46, 0.0  ;;  %13438 = vmatprep.mubr.f32.mxu0 %v23501_v44  ;;  %v13602_v60 = vmul.f32 %v13598_v16, %v22256_v0 }
 0xbca   :  { %v13604_v10 = vmul.f32 %v13599_v43, %v22256_v0  ;;  %v16982_v43 = vld [vmem:[%s22511_s28 + $0x80] sm:$0xff] }
 0xbcb   :  { %v13578_v54 = vpop.permute.xlu1 %13577  ;;  %16969 = vmatpush1.msk.msra.mxu0 %vm7084_vm1, %v13353_v58 }
 0xbcc   :  { %16970 = vmatmul.mubr.msk.f32.vlgmr.msra.gmra.mrb[24].mxu0 %vm12990_vm14, %v16965_v30  ;;  %18268 = vmatprep.subr.bf16.mxu0 %v18267_v42  ;;  %v13582_v23 = vpop.permute.xlu0 %13581  ;;  %v13589_v26 = vsel %vm2060_vm7, %v13578_v54, %v13580_v14  ;;  %v18271_v24 = vpack.c.bf16 %v13604_v10, %v13602_v60  ;;  %v16983_v60 = vld [vmem:[%s22511_s28 + $0x88] sm:$0xf] }
 0xbcd   :  { %18270 = vmatpush1.bf16.msra.mxu0 %v18269_v11  ;;  %13444 = vmatprep.mubr.f32.mxu0 %v23501_v44  ;;  %v13590_v3 = vsel %vm2060_vm7, %v13582_v23, %v13584_v46  ;;  %v13601_v50 = vmul.f32 %v13589_v26, %v22276_v31  ;;  %v16989_v26 = vld [vmem:[%s22511_s28 + $0x90] sm:$0xff] }
 0xbce   :  { %16976 = vmatprep.subr.msk.mxu0 %vm7084_vm1, %v13468_v28  ;;  %v13603_v59 = vmul.f32 %v13590_v3, %v22276_v31 }
 0xbcf   :  { %v13588_v35 = vpop.permute.xlu1 %13587 }
 0xbd0   :  { %16971 = vmatmul.mubr.msk.f32.gmra.mrb[26].mxu0 %vm12990_vm14, %v16966_v7  ;;  %v13586_v36 = vpop.permute.xlu0 %13585  ;;  %v13600_v62 = vsel %vm2060_vm7, %v13588_v35, 0.0  ;;  %v18273_v27 = vpack.c.bf16 %v13603_v59, %v13601_v50 }
 0xbd1   :  { %16977 = vmatpush1.msk.msra.mxu0 %vm7084_vm1, %v13467_v45  ;;  %13450 = vmatprep.mubr.f32.mxu0 %v23501_v44  ;;  %v13606_v15 = vmul.f32 %v13600_v62, %v22256_v0  ;;  %v13591_v61 = vsel %vm2060_vm7, %v13586_v36, %v13588_v35  ;;  %vm14835_vm7 = vcmask 162816  }
 0xbd2   :  { %18272 = vmatprep.subr.bf16.mxu0 %v18271_v24  ;;  %v13605_v37 = vmul.f32 %v13591_v61, %v22276_v31 }
 0xbd3   :  { %v13718_v33 = vpop.permute.xlu1 %13717 }
 0xbd4   :  { %16972 = vmatmul.mubr.msk.f32.gmra.mrb[28].mxu0 %vm12990_vm14, %v16967_v34  ;;  %v13722_v51 = vpop.permute.xlu0 %13721  ;;  %v13736_v39 = vsel %vm12463_vm11, %v13718_v33, 0.0 }
 0xbd5   :  { %v13737_v17 = vsel %vm12463_vm11, %v13722_v51, 0.0  ;;  %13552 = vmatprep.mubr.f32.mxu0 %v23501_v44  ;;  %v13740_v53 = vmul.f32 %v13736_v39, %v22281_v29 }
 0xbd6   :  { %v13742_v63 = vmul.f32 %v13737_v17, %v22281_v29 }
 0xbd7   :  { %v13716_v47 = vpop.permute.xlu1 %13715 }
 0xbd8   :  { %v13720_v21 = vpop.permute.xlu0 %13719  ;;  %16978 = vmatmul.mubr.msk.f32.vlgmr.msra.gmra.mrb[24].mxu0 %vm12990_vm14, %v16973_v9  ;;  %v13727_v0 = vsel %vm12463_vm11, %v13716_v47, %v13718_v33  ;;  %v18275_v56 = vpack.c.bf16 %v13742_v63, %v13740_v53  ;;  %v16991_v9 = vld [vmem:[%s22511_s28 + $0xa0] sm:$0xf]  ;;  %v16997_v53 = vld [vmem:[%s22511_s28 + $0xa8] sm:$0xff] }
 0xbd9   :  { %18274 = vmatpush1.bf16.msra.mxu0 %v18273_v27  ;;  %13558 = vmatprep.mubr.f32.mxu0 %v23501_v44  ;;  %v13728_v22 = vsel %vm12463_vm11, %v13720_v21, %v13722_v51  ;;  %v13739_v41 = vmul.f32 %v13727_v0, %v22300_v57  ;;  %v16990_v51 = vld [vmem:[%s22511_s28 + $0x98] sm:$0xff]  ;;  %v17005_v0 = vld [vmem:[%s22511_s28 + $0xc0] sm:$0xff] }
 0xbda   :  { %16984 = vmatprep.subr.msk.mxu0 %vm7084_vm1, %v13606_v15  ;;  %v13741_v31 = vmul.f32 %v13728_v22, %v22300_v57  ;;  %v17007_v22 = vld [vmem:[%s22511_s28 + $0xd0] sm:$0xf] }
 0xbdb   :  { %v13726_v25 = vpop.permute.xlu1 %13725 }
 0xbdc   :  { %v13724_v48 = vpop.permute.xlu0 %13723  ;;  %16979 = vmatmul.mubr.msk.f32.gmra.mrb[26].mxu0 %vm12990_vm14, %v16974_v20  ;;  %v13738_v2 = vsel %vm12463_vm11, %v13726_v25, 0.0  ;;  %v18277_v18 = vpack.c.bf16 %v13741_v31, %v13739_v41  ;;  %v14167_v41 = vld [vmem:[%s22489_s24 + $0x70] sm:$0xff]  ;;  %v14168_v31 = vld [vmem:[%s22489_s24 + $0x78] sm:$0xff] }
 0xbdd   :  { %16985 = vmatpush1.msk.msra.mxu0 %vm7084_vm1, %v13605_v37  ;;  %13564 = vmatprep.mubr.f32.mxu0 %v23501_v44  ;;  %v13744_v4 = vmul.f32 %v13738_v2, %v22281_v29  ;;  %v13729_v46 = vsel %vm12463_vm11, %v13724_v48, %v13726_v25  ;;  %v16998_v37 = vld [vmem:[%s22511_s28 + $0xb0] sm:$0xff] }
 0xbde   :  { %18276 = vmatprep.subr.bf16.mxu0 %v18275_v56  ;;  %v13743_v30 = vmul.f32 %v13729_v46, %v22300_v57  ;;  %v14183_v48 = vld [vmem:[%s22489_s24 + $0xf0] sm:$0xff]  ;;  %v14184_v56 = vld [vmem:[%s22489_s24 + $0xf8] sm:$0xff] }
 0xbdf   :  { %v13856_v32 = vpop.permute.xlu1 %13855 }
 0xbe0   :  { %v13860_v19 = vpop.permute.xlu0 %13859  ;;  %16980 = vmatmul.mubr.msk.f32.gmra.mrb[28].mxu0 %vm12990_vm14, %v16975_v38  ;;  %v13874_v12 = vsel %vm12599_vm12, %v13856_v32, 0.0  ;;  %v18315_v38 = vpack.c.bf16 %v14184_v56, %v14183_v48  ;;  %v14355_v48 = vld [vmem:[%s22741_s14 + $0x140] sm:$0xff]  ;;  %v14356_v56 = vld [vmem:[%s22741_s14 + $0x148] sm:$0xff] }
 0xbe1   :  { %v13875_v5 = vsel %vm12599_vm12, %v13860_v19, 0.0  ;;  %13690 = vmatprep.mubr.f32.mxu0 %v23501_v44  ;;  %v13878_v40 = vmul.f32 %v13874_v12, %v22305_v6 }
 0xbe2   :  { %v13880_v58 = vmul.f32 %v13875_v5, %v22305_v6  ;;  %18316 = vmatprep.subr.bf16.mxu1 %v18315_v38  ;;  %v14357_v38 = vld [vmem:[%s22741_s14 + $0x150] sm:$0xff] }
 0xbe3   :  { %v13854_v14 = vpop.permute.xlu1 %13853 }
 0xbe4   :  { %v13858_v16 = vpop.permute.xlu0 %13857  ;;  %16986 = vmatmul.mubr.msk.f32.vlgmr.msra.gmra.mrb[24].mxu0 %vm12990_vm14, %v16981_v13  ;;  %v13865_v29 = vsel %vm12599_vm12, %v13854_v14, %v13856_v32  ;;  %v18279_v11 = vpack.c.bf16 %v13880_v58, %v13878_v40  ;;  %v18317_v32 = vpack.c.bf16 %v14168_v31, %v14167_v41  ;;  %v14358_v41 = vld [vmem:[%s22741_s14 + $0x158] sm:$0xff]  ;;  %v14359_v31 = vld [vmem:[%s22741_s14 + $0x160] sm:$0xff] }
 0xbe5   :  { %18278 = vmatpush1.bf16.msra.mxu0 %v18277_v18  ;;  %13696 = vmatprep.mubr.f32.mxu0 %v23501_v44  ;;  %v13866_v42 = vsel %vm12599_vm12, %v13858_v16, %v13860_v19  ;;  %v13877_v10 = vmul.f32 %v13865_v29, %v22324_v8  ;;  %v14365_v19 = vld [vmem:[%s16504_s2] sm:$0x3] }
 0xbe6   :  { %16992 = vmatprep.subr.msk.mxu0 %vm7084_vm1, %v13744_v4  ;;  %v13879_v57 = vmul.f32 %v13866_v42, %v22324_v8  ;;  %18318 = vmatpush3.bf16.msra.mxu1 %v18317_v32  ;;  %v14315_v42 = vld [vmem:[%s22741_s14] sm:$0xff]  ;;  %v14360_v32 = vld [vmem:[%s22741_s14 + $0x168] sm:$0xff] }
 0xbe7   :  { %v13864_v1 = vpop.permute.xlu1 %13863  ;;  %17576 = vmatprep.subr.msk.mxu1 %vm7084_vm1, %v14365_v19 }
 0xbe8   :  { %v13862_v54 = vpop.permute.xlu0 %13861  ;;  %16987 = vmatmul.mubr.msk.f32.gmra.mrb[26].mxu0 %vm12990_vm14, %v16982_v43  ;;  %v13876_v7 = vsel %vm12599_vm12, %v13864_v1, 0.0  ;;  %v18281_v3 = vpack.c.bf16 %v13879_v57, %v13877_v10  ;;  %v14319_v10 = vld [vmem:[%s22741_s14 + $0x20] sm:$0xff]  ;;  %v14320_v57 = vld [vmem:[%s22741_s14 + $0x28] sm:$0xff] }
 0xbe9   :  { %16993 = vmatpush1.msk.msra.mxu0 %vm7084_vm1, %v13743_v30  ;;  %13702 = vmatprep.mubr.f32.mxu0 %v23501_v44  ;;  %v13882_v36 = vmul.f32 %v13876_v7, %v22305_v6  ;;  %v13867_v24 = vsel %vm12599_vm12, %v13862_v54, %v13864_v1  ;;  %v14316_v54 = vld [vmem:[%s22741_s14 + $0x8] sm:$0xff]  ;;  %v14323_v7 = vld [vmem:[%s22741_s14 + $0x40] sm:$0xff] }
 0xbea   :  { %18280 = vmatprep.subr.bf16.mxu0 %v18279_v11  ;;  %v13881_v62 = vmul.f32 %v13867_v24, %v22324_v8  ;;  %v14317_v11 = vld [vmem:[%s22741_s14 + $0x10] sm:$0xff] }
 0xbeb   :  { %v13994_v23 = vpop.permute.xlu1 %13993  ;;  %v14329_v24 = vld [vmem:[%s22741_s14 + $0x70] sm:$0xff] }
 0xbec   :  { %v13998_v28 = vpop.permute.xlu0 %13997  ;;  %16988 = vmatmul.mubr.msk.f32.gmra.mrb[28].mxu0 %vm12990_vm14, %v16983_v60  ;;  %v14012_v35 = vsel %vm12735_vm13, %v13994_v23, 0.0  ;;  %v14318_v60 = vld [vmem:[%s22741_s14 + $0x18] sm:$0xff] }
 0xbed   :  { %v14013_v45 = vsel %vm12735_vm13, %v13998_v28, 0.0  ;;  %13828 = vmatprep.mubr.f32.mxu0 %v23501_v44  ;;  %v14016_v34 = vmul.f32 %v14012_v35, %v22329_v52  ;;  %v14324_v35 = vld [vmem:[%s22741_s14 + $0x48] sm:$0xff] }
 0xbee   :  { %v14018_v50 = vmul.f32 %v14013_v45, %v22329_v52  ;;  %v14325_v45 = vld [vmem:[%s22741_s14 + $0x50] sm:$0xff] }
 0xbef   :  { %v13992_v59 = vpop.permute.xlu1 %13991 }
 0xbf0   :  { %16994 = vmatmul.mubr.msk.f32.vlgmr.msra.gmra.mrb[24].mxu0 %vm12990_vm14, %v16989_v26  ;;  %v13996_v33 = vpop.permute.xlu0 %13995  ;;  %v14003_v6 = vsel %vm12735_vm13, %v13992_v59, %v13994_v23  ;;  %v18283_v17 = vpack.c.bf16 %v14018_v50, %v14016_v34  ;;  %v14321_v23 = vld [vmem:[%s22741_s14 + $0x30] sm:$0xff]  ;;  %v14326_v26 = vld [vmem:[%s22741_s14 + $0x58] sm:$0xff]  ;;  %v14331_v50 = vld [vmem:[%s22741_s14 + $0x80] sm:$0xff] }
 0xbf1   :  { %18282 = vmatpush1.bf16.msra.mxu0 %v18281_v3  ;;  %13834 = vmatprep.mubr.f32.mxu0 %v23501_v44  ;;  %v14004_v39 = vsel %vm12735_vm13, %v13996_v33, %v13998_v28  ;;  %v14015_v47 = vmul.f32 %v14003_v6, %v22347_v49  ;;  %v14322_v28 = vld [vmem:[%s22741_s14 + $0x38] sm:$0xff]  ;;  %v14327_v3 = vld [vmem:[%s22741_s14 + $0x60] sm:$0xff]  ;;  %v14332_v59 = vld [vmem:[%s22741_s14 + $0x88] sm:$0xff] }
 0xbf2   :  { %17000 = vmatprep.subr.msk.mxu0 %vm7084_vm1, %v13882_v36  ;;  %v14017_v8 = vmul.f32 %v14004_v39, %v22347_v49  ;;  %v14328_v36 = vld [vmem:[%s22741_s14 + $0x68] sm:$0xff]  ;;  %v14330_v34 = vld [vmem:[%s22741_s14 + $0x78] sm:$0xff]  ;;  %v14333_v33 = vld [vmem:[%s22741_s14 + $0x90] sm:$0xff] }
 0xbf3   :  { %v14002_v27 = vpop.permute.xlu1 %14001  ;;  %v14336_v6 = vld [vmem:[%s22741_s14 + $0xa8] sm:$0xff]  ;;  %v14337_v39 = vld [vmem:[%s22741_s14 + $0xb0] sm:$0xff] }
 0xbf4   :  { %16995 = vmatmul.mubr.msk.f32.gmra.mrb[26].mxu0 %vm12990_vm14, %v16990_v51  ;;  %v14014_v15 = vsel %vm12735_vm13, %v14002_v27, 0.0  ;;  %v14000_v61 = vpop.permute.xlu0 %13999  ;;  %v18285_v63 = vpack.c.bf16 %v14017_v8, %v14015_v47  ;;  %v14334_v51 = vld [vmem:[%s22741_s14 + $0x98] sm:$0xff]  ;;  %v14341_v47 = vld [vmem:[%s22741_s14 + $0xd0] sm:$0xff] }
 0xbf5   :  { %17001 = vmatpush1.msk.msra.mxu0 %vm7084_vm1, %v13881_v62  ;;  %13840 = vmatprep.mubr.f32.mxu0 %v23501_v44  ;;  %v14020_v21 = vmul.f32 %v14014_v15, %v22329_v52  ;;  %v14005_v20 = vsel %vm12735_vm13, %v14000_v61, %v14002_v27  ;;  %v16999_v52 = vld [vmem:[%s22511_s28 + $0xb8] sm:$0xf]  ;;  %v14335_v62 = vld [vmem:[%s22741_s14 + $0xa0] sm:$0xff]  ;;  %v14340_v27 = vld [vmem:[%s22741_s14 + $0xc8] sm:$0xff] }
 0xbf6   :  { %18284 = vmatprep.subr.bf16.mxu0 %v18283_v17  ;;  %v14019_v25 = vmul.f32 %v14005_v20, %v22347_v49  ;;  %v17006_v49 = vld [vmem:[%s22511_s28 + $0xc8] sm:$0xff]  ;;  %v14338_v17 = vld [vmem:[%s22741_s14 + $0xb8] sm:$0xff]  ;;  %v14343_v15 = vld [vmem:[%s22741_s14 + $0xe0] sm:$0xff]  ;;  %s19189_s28 = smov 31  }
 0xbf7   :  { %v14342_v8 = vld [vmem:[%s22741_s14 + $0xd8] sm:$0xff]  ;;  %v14344_v61 = vld [vmem:[%s22741_s14 + $0xe8] sm:$0xff]  ;;  %s16512_s1 = sld [smem:[%s23391_s0 + %s19189_s28]]  }
 0xbf8   :  { %16996 = vmatmul.mubr.msk.f32.gmra.mrb[28].mxu0 %vm12990_vm14, %v16991_v9  ;;  %v14339_v9 = vld [vmem:[%s22741_s14 + $0xc0] sm:$0xff]  ;;  %v14348_v20 = vld [vmem:[%s22741_s14 + $0x108] sm:$0xff] }
 0xbf9   :  { %13966 = vmatprep.mubr.f32.mxu0 %v23501_v44 }
 0xbfc   :  { %17002 = vmatmul.mubr.msk.f32.vlgmr.msra.gmra.mrb[24].mxu0 %vm12990_vm14, %v16997_v53  ;;  %v14345_v53 = vld [vmem:[%s22741_s14 + $0xf0] sm:$0xff] }
 0xbfd   :  { %18286 = vmatpush1.bf16.msra.mxu0 %v18285_v63  ;;  %13972 = vmatprep.mubr.f32.mxu0 %v23501_v44  ;;  %v14346_v63 = vld [vmem:[%s22741_s14 + $0xf8] sm:$0xff] }
 0xbfe   :  { %17008 = vmatprep.subr.msk.mxu0 %vm7084_vm1, %v14020_v21  ;;  %v14347_v21 = vld [vmem:[%s22741_s14 + $0x100] sm:$0xff] }
 0xc00   :  { %17003 = vmatmul.mubr.msk.f32.gmra.mrb[26].mxu0 %vm12990_vm14, %v16998_v37  ;;  %v14349_v37 = vld [vmem:[%s22741_s14 + $0x110] sm:$0xff] }
 0xc01   :  { %17009 = vmatpush1.msk.msra.mxu0 %vm7084_vm1, %v14019_v25  ;;  %13978 = vmatprep.mubr.f32.mxu0 %v23501_v44  ;;  %v14350_v25 = vld [vmem:[%s22741_s14 + $0x118] sm:$0xff] }
 0xc04   :  { %17004 = vmatmul.mubr.msk.f32.gmra.mrb[28].mxu0 %vm12990_vm14, %v16999_v52  ;;  %v14135_v12 = vpop.permute.xlu1 %14134  ;;  %v14351_v52 = vld [vmem:[%s22741_s14 + $0x120] sm:$0xff] }
 0xc05   :  { %14104 = vmatprep.mubr.f32.mxu0 %v23501_v44  ;;  %v14140_v4 = vpop.permute.xlu0 %14139 }
 0xc08   :  { %17010 = vmatmul.mubr.msk.f32.vlgmr.msra.gmra.mrb[24].mxu0 %vm12990_vm14, %v17005_v0  ;;  %v14145_v43 = vpop.permute.xlu1 %14144  ;;  %v14352_v0 = vld [vmem:[%s22741_s14 + $0x128] sm:$0xff] }
 0xc09   :  { %14110 = vmatprep.mubr.f32.mxu0 %v23501_v44 }
 0xc0c   :  { %17011 = vmatmul.mubr.msk.f32.gmra.mrb[26].mxu0 %vm12990_vm14, %v17006_v49  ;;  %v14353_v49 = vld [vmem:[%s22741_s14 + $0x130] sm:$0xff] }
 0xc0d   :  { %14116 = vmatprep.mubr.f32.mxu0 %v23501_v44 }
 0xc10   :  { %17012 = vmatmul.mubr.msk.f32.gmra.mrb[28].mxu0 %vm12990_vm14, %v17007_v22  ;;  %v14354_v22 = vld [vmem:[%s22741_s14 + $0x138] sm:$0xff] }
 0xcdb   :  { %v14106_v2 = vpop.f32.mrb[24].mxu0 }
 0xcdc   :  { %v14108_v5 = vpop.f32.mrb[25].mxu0  ;;  %v14147_v18 = vadd.f32 %v14135_v12, %v14106_v2  ;;  %v14362_v2 = vld [vmem:[%s22741_s14 + $0x178] sm:$0xff] }
 0xcdd   :  { %v14148_v13 = vadd.f32 %v14135_v12, %v14108_v5  ;;  %v14363_v12 = vld [vmem:[%s22741_s14 + $0x180] sm:$0xff]  ;;  %v14364_v5 = vld [vmem:[%s22741_s14 + $0x188] sm:$0xff] }
 0xcdf   :  { %v14112_v14 = vpop.f32.mrb[26].mxu0  ;;  %14249 = vmatprep.mubr.f32.mxu1 %v14148_v13  ;;  %v14265_v13 = vld [vmem:[%s22839_s18] sm:$0xff] }
 0xce0   :  { %v14114_v46 = vpop.f32.mrb[27].mxu0  ;;  %14250 = vmatmul.mubr.f32.vlgmr.msra.gmra.mrb[32].mxu1 %v14147_v18  ;;  %v14149_v58 = vadd.f32 %v14140_v4, %v14112_v14 }
 0xce1   :  { %v14150_v40 = vadd.f32 %v14140_v4, %v14114_v46  ;;  %17577 = vmatpush3.msk.msra.mxu1 %vm7084_vm1, %v14365_v19  ;;  %v14361_v19 = vld [vmem:[%s22741_s14 + $0x170] sm:$0xff]  ;;  %vm16327_vm1 = vcmask 359424  }
 0xce3   :  { %v14118_v16 = vpop.f32.mrb[28].mxu0  ;;  %14254 = vmatprep.mubr.f32.mxu1 %v14150_v40 }
 0xce4   :  { %v14120_v30 = vpop.f32.mrb[29].mxu0  ;;  %14255 = vmatmul.mubr.f32.gmra.mrb[34].mxu1 %v14149_v58  ;;  %v14151_v29 = vadd.f32 %v14145_v43, %v14118_v16 }
 0xce5   :  { %v14152_v1 = vadd.f32 %v14145_v43, %v14120_v30 }
 0xce7   :  { %14259 = vmatprep.mubr.f32.mxu1 %v14152_v1 }
 0xce8   :  { %14260 = vmatmul.mubr.f32.gmra.mrb[36].mxu1 %v14151_v29  ;;  %v14266_v29 = vld [vmem:[%s22839_s18 + $0x8] sm:$0xff] }
 0xce9   :  { %17578 = vmatprep.mubr.msk.f32.mxu1 %vm14366_vm6, %v14315_v42  ;;  %v14267_v42 = vld [vmem:[%s22839_s18 + $0x10] sm:$0xff] }
 0xcec   :  { %17579 = vmatmul.mubr.msk.f32.vlgmr.msra.gmra.mrb[38].mxu1 %vm14366_vm6, %v14316_v54  ;;  %v14268_v54 = vld [vmem:[%s22839_s18 + $0x18] sm:$0xff] }
 0xced   :  { %17581 = vmatprep.mubr.msk.f32.mxu1 %vm14366_vm6, %v14317_v11  ;;  %v14269_v11 = vld [vmem:[%s22839_s18 + $0x20] sm:$0xff] }
 0xcf0   :  { %17582 = vmatmul.mubr.msk.f32.gmra.mrb[40].mxu1 %vm14366_vm6, %v14318_v60  ;;  %v14270_v60 = vld [vmem:[%s22839_s18 + $0x28] sm:$0xff] }
 0xcf1   :  { %17584 = vmatprep.mubr.msk.f32.mxu1 %vm14366_vm6, %v14319_v10  ;;  %v14271_v10 = vld [vmem:[%s22839_s18 + $0x30] sm:$0xff] }
 0xcf4   :  { %17585 = vmatmul.mubr.msk.f32.gmra.mrb[42].mxu1 %vm14366_vm6, %v14320_v57  ;;  %v14272_v57 = vld [vmem:[%s22839_s18 + $0x38] sm:$0xff] }
 0xcf5   :  { %17587 = vmatprep.mubr.msk.f32.mxu1 %vm14366_vm6, %v14321_v23  ;;  %v14273_v23 = vld [vmem:[%s22839_s18 + $0x40] sm:$0xff] }
 0xcf8   :  { %17588 = vmatmul.mubr.msk.f32.gmra.mrb[44].mxu1 %vm14366_vm6, %v14322_v28  ;;  %v14274_v28 = vld [vmem:[%s22839_s18 + $0x48] sm:$0xff] }
 0xcf9   :  { %17590 = vmatprep.mubr.msk.f32.mxu1 %vm14366_vm6, %v14323_v7  ;;  %v14275_v7 = vld [vmem:[%s22839_s18 + $0x50] sm:$0xff] }
 0xcfc   :  { %17591 = vmatmul.mubr.msk.f32.gmra.mrb[46].mxu1 %vm14366_vm6, %v14324_v35  ;;  %v14276_v35 = vld [vmem:[%s22839_s18 + $0x58] sm:$0xff] }
 0xcfd   :  { %17593 = vmatprep.mubr.msk.f32.mxu1 %vm14366_vm6, %v14325_v45  ;;  %v14277_v45 = vld [vmem:[%s22839_s18 + $0x60] sm:$0xff] }
 0xd00   :  { %17594 = vmatmul.mubr.msk.f32.gmra.mrb[48].mxu1 %vm14366_vm6, %v14326_v26  ;;  %v14278_v26 = vld [vmem:[%s22839_s18 + $0x68] sm:$0xff] }
 0xd01   :  { %17596 = vmatprep.mubr.msk.f32.mxu1 %vm14366_vm6, %v14327_v3  ;;  %v14279_v3 = vld [vmem:[%s22839_s18 + $0x70] sm:$0xff] }
 0xd04   :  { %17597 = vmatmul.mubr.msk.f32.gmra.mrb[50].mxu1 %vm14366_vm6, %v14328_v36  ;;  %v14280_v36 = vld [vmem:[%s22839_s18 + $0x78] sm:$0xff] }
 0xd05   :  { %17599 = vmatprep.mubr.msk.f32.mxu1 %vm14366_vm6, %v14329_v24  ;;  %v14281_v24 = vld [vmem:[%s22839_s18 + $0x80] sm:$0xff] }
 0xd08   :  { %17600 = vmatmul.mubr.msk.f32.gmra.mrb[52].mxu1 %vm14366_vm6, %v14330_v34  ;;  %v14282_v34 = vld [vmem:[%s22839_s18 + $0x88] sm:$0xff] }
 0xd09   :  { %17602 = vmatprep.mubr.msk.f32.mxu1 %vm14366_vm6, %v14331_v50  ;;  %v14283_v50 = vld [vmem:[%s22839_s18 + $0x90] sm:$0xff] }
 0xd0c   :  { %17603 = vmatmul.mubr.msk.f32.gmra.mrb[54].mxu1 %vm14366_vm6, %v14332_v59  ;;  %v14284_v59 = vld [vmem:[%s22839_s18 + $0x98] sm:$0xff] }
 0xd0d   :  { %17605 = vmatprep.mubr.msk.f32.mxu1 %vm14366_vm6, %v14333_v33  ;;  %v14285_v33 = vld [vmem:[%s22839_s18 + $0xa0] sm:$0xff] }
 0xd10   :  { %17606 = vmatmul.mubr.msk.f32.gmra.mrb[56].mxu1 %vm14366_vm6, %v14334_v51  ;;  %v14286_v51 = vld [vmem:[%s22839_s18 + $0xa8] sm:$0xff] }
 0xd11   :  { %17608 = vmatprep.mubr.msk.f32.mxu1 %vm14366_vm6, %v14335_v62  ;;  %v14287_v62 = vld [vmem:[%s22839_s18 + $0xb0] sm:$0xff] }
 0xd14   :  { %17609 = vmatmul.mubr.msk.f32.gmra.mrb[58].mxu1 %vm14366_vm6, %v14336_v6  ;;  %v14288_v6 = vld [vmem:[%s22839_s18 + $0xb8] sm:$0xff] }
 0xd15   :  { %17611 = vmatprep.mubr.msk.f32.mxu1 %vm14366_vm6, %v14337_v39  ;;  %v14289_v39 = vld [vmem:[%s22839_s18 + $0xc0] sm:$0xff] }
 0xd18   :  { %17612 = vmatmul.mubr.msk.f32.gmra.mrb[60].mxu1 %vm14366_vm6, %v14338_v17  ;;  %v14290_v17 = vld [vmem:[%s22839_s18 + $0xc8] sm:$0xff] }
 0xd19   :  { %17614 = vmatprep.mubr.msk.f32.mxu1 %vm14366_vm6, %v14339_v9  ;;  %v14291_v9 = vld [vmem:[%s22839_s18 + $0xd0] sm:$0xff] }
 0xd1c   :  { %17615 = vmatmul.mubr.msk.f32.gmra.mrb[62].mxu1 %vm14366_vm6, %v14340_v27  ;;  %v14292_v27 = vld [vmem:[%s22839_s18 + $0xd8] sm:$0xff] }
 0xd1d   :  { %17617 = vmatprep.mubr.msk.f32.mxu1 %vm14366_vm6, %v14341_v47  ;;  %v14293_v47 = vld [vmem:[%s22839_s18 + $0xe0] sm:$0xff] }
 0xd20   :  { %17618 = vmatmul.mubr.msk.f32.gmra.mrb[64].mxu1 %vm14366_vm6, %v14342_v8  ;;  %v14294_v8 = vld [vmem:[%s22839_s18 + $0xe8] sm:$0xff] }
 0xd21   :  { %17620 = vmatprep.mubr.msk.f32.mxu1 %vm14366_vm6, %v14343_v15  ;;  %v14295_v15 = vld [vmem:[%s22839_s18 + $0xf0] sm:$0xff] }
 0xd24   :  { %17621 = vmatmul.mubr.msk.f32.gmra.mrb[66].mxu1 %vm14366_vm6, %v14344_v61  ;;  %v14296_v61 = vld [vmem:[%s22839_s18 + $0xf8] sm:$0xff] }
 0xd25   :  { %17623 = vmatprep.mubr.msk.f32.mxu1 %vm14366_vm6, %v14345_v53  ;;  %v14297_v53 = vld [vmem:[%s22839_s18 + $0x100] sm:$0xff] }
 0xd28   :  { %17624 = vmatmul.mubr.msk.f32.gmra.mrb[68].mxu1 %vm14366_vm6, %v14346_v63  ;;  %v14298_v63 = vld [vmem:[%s22839_s18 + $0x108] sm:$0xff] }
 0xd29   :  { %17626 = vmatprep.mubr.msk.f32.mxu1 %vm14366_vm6, %v14347_v21  ;;  %v14299_v21 = vld [vmem:[%s22839_s18 + $0x110] sm:$0xff] }
 0xd2c   :  { %17627 = vmatmul.mubr.msk.f32.gmra.mrb[70].mxu1 %vm14366_vm6, %v14348_v20  ;;  %v14300_v20 = vld [vmem:[%s22839_s18 + $0x118] sm:$0xff] }
 0xd2d   :  { %17629 = vmatprep.mubr.msk.f32.mxu1 %vm14366_vm6, %v14349_v37  ;;  %v14301_v37 = vld [vmem:[%s22839_s18 + $0x120] sm:$0xff] }
 0xd30   :  { %17630 = vmatmul.mubr.msk.f32.gmra.mrb[72].mxu1 %vm14366_vm6, %v14350_v25  ;;  %v14302_v25 = vld [vmem:[%s22839_s18 + $0x128] sm:$0xff] }
 0xd31   :  { %17632 = vmatprep.mubr.msk.f32.mxu1 %vm14366_vm6, %v14351_v52  ;;  %v14303_v52 = vld [vmem:[%s22839_s18 + $0x130] sm:$0xff] }
 0xd34   :  { %17633 = vmatmul.mubr.msk.f32.gmra.mrb[74].mxu1 %vm14366_vm6, %v14352_v0  ;;  %v14304_v0 = vld [vmem:[%s22839_s18 + $0x138] sm:$0xff] }
 0xd35   :  { %17635 = vmatprep.mubr.msk.f32.mxu1 %vm14366_vm6, %v14353_v49  ;;  %v14305_v49 = vld [vmem:[%s22839_s18 + $0x140] sm:$0xff] }
 0xd38   :  { %17636 = vmatmul.mubr.msk.f32.gmra.mrb[76].mxu1 %vm14366_vm6, %v14354_v22  ;;  %v14306_v22 = vld [vmem:[%s22839_s18 + $0x148] sm:$0xff] }
 0xd39   :  { %17638 = vmatprep.mubr.msk.f32.mxu1 %vm14366_vm6, %v14355_v48  ;;  %v14307_v48 = vld [vmem:[%s22839_s18 + $0x150] sm:$0xff] }
 0xd3c   :  { %17639 = vmatmul.mubr.msk.f32.gmra.mrb[78].mxu1 %vm14366_vm6, %v14356_v56  ;;  %v14308_v56 = vld [vmem:[%s22839_s18 + $0x158] sm:$0xff] }
 0xd3d   :  { %17641 = vmatprep.mubr.msk.f32.mxu1 %vm14366_vm6, %v14357_v38  ;;  %v14309_v38 = vld [vmem:[%s22839_s18 + $0x160] sm:$0xff] }
 0xd40   :  { %17642 = vmatmul.mubr.msk.f32.gmra.mrb[80].mxu1 %vm14366_vm6, %v14358_v41  ;;  %v14310_v41 = vld [vmem:[%s22839_s18 + $0x168] sm:$0xff] }
 0xd41   :  { %17644 = vmatprep.mubr.msk.f32.mxu1 %vm14366_vm6, %v14359_v31  ;;  %v14311_v31 = vld [vmem:[%s22839_s18 + $0x170] sm:$0xff] }
 0xd44   :  { %17645 = vmatmul.mubr.msk.f32.gmra.mrb[82].mxu1 %vm14366_vm6, %v14360_v32  ;;  %v14312_v32 = vld [vmem:[%s22839_s18 + $0x178] sm:$0xff] }
 0xd45   :  { %17647 = vmatprep.mubr.msk.f32.mxu1 %vm14366_vm6, %v14361_v19  ;;  %v14313_v19 = vld [vmem:[%s22839_s18 + $0x180] sm:$0xff] }
 0xd48   :  { %17648 = vmatmul.mubr.msk.f32.gmra.mrb[84].mxu1 %vm14366_vm6, %v14362_v2  ;;  %v19185_v2 = vmov 0.0|0.0  }
 0xd49   :  { %17650 = vmatprep.mubr.msk.f32.mxu1 %vm14366_vm6, %v14363_v12  ;;  %18323 = vmatprep.subr.bf16.mxu0 %v19185_v2  ;;  %v14314_v12 = vld [vmem:[%s22839_s18 + $0x188] sm:$0xff] }
 0xd4c   :  { %17651 = vmatmul.mubr.msk.f32.gmra.mrb[86].mxu1 %vm14366_vm6, %v14364_v5  ;;  %v15455_v5 = vld [vmem:[%s22957_s20 + $0x8] sm:$0xff] }
 0xd4d   :  { %17659 = vmatprep.mubr.msk.f32.mxu1 %vm14835_vm7, %v14265_v13  ;;  %15822 = vmatprep.mubr.f32.mxu0 %v15455_v5  ;;  %v15305_v13 = vld [vmem:[%s22963_s21 + $0x8] sm:$0xff]  ;;  %v15319_v5 = vld [vmem:[%s22963_s21 + $0x78] sm:$0xff] }
 0xdb3   :  { %v17268_v18 = vpop.f32.mrb[32].mxu1 }
 0xdb4   :  { %v17269_v14 = vpop.f32.mrb[33].mxu1 }
 0xdb5   :  { %v17270_v4 = vadd.f32 %v17269_v14, %v17268_v18  ;;  %v15304_v18 = vld [vmem:[%s22963_s21] sm:$0xff] }
 0xdb7   :  { %v17271_v46 = vpop.f32.mrb[34].mxu1 }
 0xdb8   :  { %v17272_v40 = vpop.f32.mrb[35].mxu1 }
 0xdb9   :  { %v17273_v58 = vadd.f32 %v17272_v40, %v17271_v46 }
 0xdbb   :  { %v18319_v16 = vpack.c.bf16 %v17273_v58, %v17270_v4  ;;  %v17274_v43 = vpop.f32.mrb[36].mxu1  ;;  %v15307_v58 = vld [vmem:[%s22963_s21 + $0x18] sm:$0xff] }
 0xdbc   :  { %v17275_v30 = vpop.f32.mrb[37].mxu1 }
 0xdbd   :  { %v17276_v1 = vadd.f32 %v17275_v30, %v17274_v43  ;;  %18320 = vmatprep.subr.bf16.mxu1 %v18319_v16  ;;  %v15306_v43 = vld [vmem:[%s22963_s21 + $0x10] sm:$0xff] }
 0xdbe   :  { %18322 = vmatpush3.bf16.msra.mxu1 %v18319_v16 }
 0xdbf   :  { %17657 = vmatprep.subr.msk.mxu1 %vm11414_vm2, %v17276_v1 }
 0xdc2   :  { %17658 = vmatpush3.msk.msra.mxu1 %vm11414_vm2, %v17276_v1 }
 0xdc3   :  { %17660 = vmatmul.mubr.msk.f32.vlgmr.msra.gmra.mrb[38].mxu1 %vm14835_vm7, %v14266_v29  ;;  %18440 = vmatprep.subr.bf16.mxu1 %v19185_v2 }
 0xdc4   :  { %17662 = vmatprep.mubr.msk.f32.mxu1 %vm14835_vm7, %v14267_v42 }
 0xdc7   :  { %17663 = vmatmul.mubr.msk.f32.gmra.mrb[40].mxu1 %vm14835_vm7, %v14268_v54 }
 0xdc8   :  { %17665 = vmatprep.mubr.msk.f32.mxu1 %vm14835_vm7, %v14269_v11 }
 0xdcb   :  { %17666 = vmatmul.mubr.msk.f32.gmra.mrb[42].mxu1 %vm14835_vm7, %v14270_v60  ;;  %v15309_v60 = vld [vmem:[%s22963_s21 + $0x28] sm:$0xff] }
 0xdcc   :  { %17668 = vmatprep.mubr.msk.f32.mxu1 %vm14835_vm7, %v14271_v10 }
 0xdcf   :  { %17669 = vmatmul.mubr.msk.f32.gmra.mrb[44].mxu1 %vm14835_vm7, %v14272_v57  ;;  %v15308_v57 = vld [vmem:[%s22963_s21 + $0x20] sm:$0xff] }
 0xdd0   :  { %17671 = vmatprep.mubr.msk.f32.mxu1 %vm14835_vm7, %v14273_v23 }
 0xdd3   :  { %17672 = vmatmul.mubr.msk.f32.gmra.mrb[46].mxu1 %vm14835_vm7, %v14274_v28 }
 0xdd4   :  { %17674 = vmatprep.mubr.msk.f32.mxu1 %vm14835_vm7, %v14275_v7 }
 0xdd7   :  { %17675 = vmatmul.mubr.msk.f32.gmra.mrb[48].mxu1 %vm14835_vm7, %v14276_v35 }
 0xdd8   :  { %17677 = vmatprep.mubr.msk.f32.mxu1 %vm14835_vm7, %v14277_v45 }
 0xddb   :  { %17678 = vmatmul.mubr.msk.f32.gmra.mrb[50].mxu1 %vm14835_vm7, %v14278_v26 }
 0xddc   :  { %17680 = vmatprep.mubr.msk.f32.mxu1 %vm14835_vm7, %v14279_v3  ;;  %v15311_v3 = vld [vmem:[%s22963_s21 + $0x38] sm:$0xff] }
 0xddf   :  { %17681 = vmatmul.mubr.msk.f32.gmra.mrb[52].mxu1 %vm14835_vm7, %v14280_v36 }
 0xde0   :  { %17683 = vmatprep.mubr.msk.f32.mxu1 %vm14835_vm7, %v14281_v24  ;;  %v15310_v24 = vld [vmem:[%s22963_s21 + $0x30] sm:$0xff] }
 0xde3   :  { %17684 = vmatmul.mubr.msk.f32.gmra.mrb[54].mxu1 %vm14835_vm7, %v14282_v34 }
 0xde4   :  { %17686 = vmatprep.mubr.msk.f32.mxu1 %vm14835_vm7, %v14283_v50 }
 0xde7   :  { %17687 = vmatmul.mubr.msk.f32.gmra.mrb[56].mxu1 %vm14835_vm7, %v14284_v59 }
 0xde8   :  { %17689 = vmatprep.mubr.msk.f32.mxu1 %vm14835_vm7, %v14285_v33 }
 0xdeb   :  { %17690 = vmatmul.mubr.msk.f32.gmra.mrb[58].mxu1 %vm14835_vm7, %v14286_v51 }
 0xdec   :  { %17692 = vmatprep.mubr.msk.f32.mxu1 %vm14835_vm7, %v14287_v62 }
 0xdef   :  { %17693 = vmatmul.mubr.msk.f32.gmra.mrb[60].mxu1 %vm14835_vm7, %v14288_v6  ;;  %v15313_v6 = vld [vmem:[%s22963_s21 + $0x48] sm:$0xff] }
 0xdf0   :  { %17695 = vmatprep.mubr.msk.f32.mxu1 %vm14835_vm7, %v14289_v39 }
 0xdf3   :  { %17696 = vmatmul.mubr.msk.f32.gmra.mrb[62].mxu1 %vm14835_vm7, %v14290_v17  ;;  %v15312_v17 = vld [vmem:[%s22963_s21 + $0x40] sm:$0xff] }
 0xdf4   :  { %17698 = vmatprep.mubr.msk.f32.mxu1 %vm14835_vm7, %v14291_v9 }
 0xdf7   :  { %17699 = vmatmul.mubr.msk.f32.gmra.mrb[64].mxu1 %vm14835_vm7, %v14292_v27 }
 0xdf8   :  { %17701 = vmatprep.mubr.msk.f32.mxu1 %vm14835_vm7, %v14293_v47 }
 0xdfb   :  { %17702 = vmatmul.mubr.msk.f32.gmra.mrb[66].mxu1 %vm14835_vm7, %v14294_v8 }
 0xdfc   :  { %17704 = vmatprep.mubr.msk.f32.mxu1 %vm14835_vm7, %v14295_v15 }
 0xdff   :  { %17705 = vmatmul.mubr.msk.f32.gmra.mrb[68].mxu1 %vm14835_vm7, %v14296_v61 }
 0xe00   :  { %17707 = vmatprep.mubr.msk.f32.mxu1 %vm14835_vm7, %v14297_v53  ;;  %v15315_v53 = vld [vmem:[%s22963_s21 + $0x58] sm:$0xff] }
 0xe03   :  { %17708 = vmatmul.mubr.msk.f32.gmra.mrb[70].mxu1 %vm14835_vm7, %v14298_v63 }
 0xe04   :  { %17710 = vmatprep.mubr.msk.f32.mxu1 %vm14835_vm7, %v14299_v21  ;;  %v15314_v21 = vld [vmem:[%s22963_s21 + $0x50] sm:$0xff] }
 0xe07   :  { %17711 = vmatmul.mubr.msk.f32.gmra.mrb[72].mxu1 %vm14835_vm7, %v14300_v20 }
 0xe08   :  { %17713 = vmatprep.mubr.msk.f32.mxu1 %vm14835_vm7, %v14301_v37 }
 0xe0b   :  { %17714 = vmatmul.mubr.msk.f32.gmra.mrb[74].mxu1 %vm14835_vm7, %v14302_v25 }
 0xe0c   :  { %17716 = vmatprep.mubr.msk.f32.mxu1 %vm14835_vm7, %v14303_v52 }
 0xe0f   :  { %17717 = vmatmul.mubr.msk.f32.gmra.mrb[76].mxu1 %vm14835_vm7, %v14304_v0 }
 0xe10   :  { %17719 = vmatprep.mubr.msk.f32.mxu1 %vm14835_vm7, %v14305_v49 }
 0xe13   :  { %17720 = vmatmul.mubr.msk.f32.gmra.mrb[78].mxu1 %vm14835_vm7, %v14306_v22  ;;  %v15317_v22 = vld [vmem:[%s22963_s21 + $0x68] sm:$0xff] }
 0xe14   :  { %17722 = vmatprep.mubr.msk.f32.mxu1 %vm14835_vm7, %v14307_v48 }
 0xe17   :  { %17723 = vmatmul.mubr.msk.f32.gmra.mrb[80].mxu1 %vm14835_vm7, %v14308_v56  ;;  %v15316_v56 = vld [vmem:[%s22963_s21 + $0x60] sm:$0xff] }
 0xe18   :  { %17725 = vmatprep.mubr.msk.f32.mxu1 %vm14835_vm7, %v14309_v38 }
 0xe1b   :  { %17726 = vmatmul.mubr.msk.f32.gmra.mrb[82].mxu1 %vm14835_vm7, %v14310_v41 }
 0xe1c   :  { %17728 = vmatprep.mubr.msk.f32.mxu1 %vm14835_vm7, %v14311_v31 }
 0xe1f   :  { %17729 = vmatmul.mubr.msk.f32.gmra.mrb[84].mxu1 %vm14835_vm7, %v14312_v32 }
 0xe20   :  { %17731 = vmatprep.mubr.msk.f32.mxu1 %vm14835_vm7, %v14313_v19 }
 0xe23   :  { %17732 = vmatmul.mubr.msk.f32.gmra.mrb[86].mxu1 %vm14835_vm7, %v14314_v12 }
 0xe96   :  { %v17661_v14 = vpop.f32.mrb[38].mxu1 }
 0xe97   :  { %v15355_v4 = vadd.f32 %v17661_v14, %v15305_v13  ;;  %v15055_v46 = vpop.f32.mrb[39].mxu1 }
 0xe98   :  { %v15354_v40 = vadd.f32 %v15304_v18, %v15055_v46  ;;  %v15318_v18 = vld [vmem:[%s22963_s21 + $0x70] sm:$0xff] }
 0xe99   :  { %v15405_v16 = vmax.f32 %v15355_v4, 0.0 }
 0xe9a   :  { %v15404_v30 = vmax.f32 %v15354_v40, 0.0  ;;  %v17664_v1 = vpop.f32.mrb[40].mxu1 }
 0xe9b   :  { %v15357_v29 = vadd.f32 %v17664_v1, %v15307_v58  ;;  %v15065_v42 = vpop.f32.mrb[41].mxu1  ;;  %v15320_v1 = vld [vmem:[%s22963_s21 + $0x80] sm:$0xff] }
 0xe9c   :  { %v18324_v54 = vpack.c.bf16 %v15405_v16, %v15404_v30  ;;  %v15356_v11 = vadd.f32 %v15306_v43, %v15065_v42  ;;  %v15321_v43 = vld [vmem:[%s22963_s21 + $0x88] sm:$0xff] }
 0xe9d   :  { %v15407_v10 = vmax.f32 %v15357_v29, 0.0 }
 0xe9e   :  { %v15406_v23 = vmax.f32 %v15356_v11, 0.0  ;;  %v17667_v28 = vpop.f32.mrb[42].mxu1  ;;  %18325 = vmatpush1.bf16.msra.mxu0 %v18324_v54  ;;  %18456 = vmatpush1.bf16.msra.mxu1 %v18324_v54 }
 0xe9f   :  { %v15359_v7 = vadd.f32 %v17667_v28, %v15309_v60  ;;  %v15075_v35 = vpop.f32.mrb[43].mxu1  ;;  %18326 = vmatprep.subr.bf16.mxu0 %v19185_v2  ;;  %18441 = vmatprep.subr.bf16.mxu1 %v19185_v2  ;;  %v15322_v28 = vld [vmem:[%s22963_s21 + $0x90] sm:$0xff] }
 0xea0   :  { %v18327_v45 = vpack.c.bf16 %v15407_v10, %v15406_v23  ;;  %v15358_v26 = vadd.f32 %v15308_v57, %v15075_v35  ;;  %v15323_v57 = vld [vmem:[%s22963_s21 + $0x98] sm:$0xff] }
 0xea1   :  { %v15409_v36 = vmax.f32 %v15359_v7, 0.0 }
 0xea2   :  { %v15408_v34 = vmax.f32 %v15358_v26, 0.0  ;;  %v17670_v50 = vpop.f32.mrb[44].mxu1  ;;  %18328 = vmatpush1.bf16.msra.mxu0 %v18327_v45  ;;  %18457 = vmatpush1.bf16.msra.mxu1 %v18327_v45 }
 0xea3   :  { %v15361_v59 = vadd.f32 %v17670_v50, %v15311_v3  ;;  %v15085_v33 = vpop.f32.mrb[45].mxu1  ;;  %18329 = vmatprep.subr.bf16.mxu0 %v19185_v2  ;;  %18442 = vmatprep.subr.bf16.mxu1 %v19185_v2  ;;  %v15324_v50 = vld [vmem:[%s22963_s21 + $0xa0] sm:$0xff] }
 0xea4   :  { %v18330_v51 = vpack.c.bf16 %v15409_v36, %v15408_v34  ;;  %v15360_v62 = vadd.f32 %v15310_v24, %v15085_v33  ;;  %v15325_v24 = vld [vmem:[%s22963_s21 + $0xa8] sm:$0xff] }
 0xea5   :  { %v15411_v39 = vmax.f32 %v15361_v59, 0.0 }
 0xea6   :  { %v15410_v9 = vmax.f32 %v15360_v62, 0.0  ;;  %v17673_v27 = vpop.f32.mrb[46].mxu1  ;;  %18331 = vmatpush1.bf16.msra.mxu0 %v18330_v51  ;;  %18458 = vmatpush1.bf16.msra.mxu1 %v18330_v51 }
 0xea7   :  { %v15363_v47 = vadd.f32 %v17673_v27, %v15313_v6  ;;  %v15095_v8 = vpop.f32.mrb[47].mxu1  ;;  %18332 = vmatprep.subr.bf16.mxu0 %v19185_v2  ;;  %18443 = vmatprep.subr.bf16.mxu1 %v19185_v2  ;;  %v15326_v27 = vld [vmem:[%s22963_s21 + $0xb0] sm:$0xff] }
 0xea8   :  { %v18333_v15 = vpack.c.bf16 %v15411_v39, %v15410_v9  ;;  %v15362_v61 = vadd.f32 %v15312_v17, %v15095_v8  ;;  %v15327_v17 = vld [vmem:[%s22963_s21 + $0xb8] sm:$0xff] }
 0xea9   :  { %v15413_v63 = vmax.f32 %v15363_v47, 0.0 }
 0xeaa   :  { %v15412_v20 = vmax.f32 %v15362_v61, 0.0  ;;  %v17676_v37 = vpop.f32.mrb[48].mxu1  ;;  %18334 = vmatpush1.bf16.msra.mxu0 %v18333_v15  ;;  %18459 = vmatpush1.bf16.msra.mxu1 %v18333_v15 }
 0xeab   :  { %v15365_v25 = vadd.f32 %v17676_v37, %v15315_v53  ;;  %v15105_v52 = vpop.f32.mrb[49].mxu1  ;;  %18335 = vmatprep.subr.bf16.mxu0 %v19185_v2  ;;  %18444 = vmatprep.subr.bf16.mxu1 %v19185_v2  ;;  %v15328_v37 = vld [vmem:[%s22963_s21 + $0xc0] sm:$0xff] }
 0xeac   :  { %v18336_v0 = vpack.c.bf16 %v15413_v63, %v15412_v20  ;;  %v15364_v49 = vadd.f32 %v15314_v21, %v15105_v52  ;;  %v15329_v21 = vld [vmem:[%s22963_s21 + $0xc8] sm:$0xff] }
 0xead   :  { %v15415_v48 = vmax.f32 %v15365_v25, 0.0 }
 0xeae   :  { %v15414_v38 = vmax.f32 %v15364_v49, 0.0  ;;  %v17679_v41 = vpop.f32.mrb[50].mxu1  ;;  %18337 = vmatpush1.bf16.msra.mxu0 %v18336_v0  ;;  %18460 = vmatpush1.bf16.msra.mxu1 %v18336_v0 }
 0xeaf   :  { %v15367_v31 = vadd.f32 %v17679_v41, %v15317_v22  ;;  %v15115_v32 = vpop.f32.mrb[51].mxu1  ;;  %18338 = vmatprep.subr.bf16.mxu0 %v19185_v2  ;;  %18445 = vmatprep.subr.bf16.mxu1 %v19185_v2  ;;  %v15330_v41 = vld [vmem:[%s22963_s21 + $0xd0] sm:$0xff] }
 0xeb0   :  { %v18339_v19 = vpack.c.bf16 %v15415_v48, %v15414_v38  ;;  %v15366_v12 = vadd.f32 %v15316_v56, %v15115_v32  ;;  %v15331_v56 = vld [vmem:[%s22963_s21 + $0xd8] sm:$0xff] }
 0xeb1   :  { %v15417_v13 = vmax.f32 %v15367_v31, 0.0 }
 0xeb2   :  { %v15416_v14 = vmax.f32 %v15366_v12, 0.0  ;;  %v17682_v4 = vpop.f32.mrb[52].mxu1  ;;  %18340 = vmatpush1.bf16.msra.mxu0 %v18339_v19  ;;  %18461 = vmatpush1.bf16.msra.mxu1 %v18339_v19 }
 0xeb3   :  { %v15369_v46 = vadd.f32 %v17682_v4, %v15319_v5  ;;  %v15125_v40 = vpop.f32.mrb[53].mxu1  ;;  %18341 = vmatprep.subr.bf16.mxu0 %v19185_v2  ;;  %18446 = vmatprep.subr.bf16.mxu1 %v19185_v2  ;;  %v15332_v4 = vld [vmem:[%s22963_s21 + $0xe0] sm:$0xff] }
 0xeb4   :  { %v18342_v58 = vpack.c.bf16 %v15417_v13, %v15416_v14  ;;  %v15368_v16 = vadd.f32 %v15318_v18, %v15125_v40  ;;  %v15333_v18 = vld [vmem:[%s22963_s21 + $0xe8] sm:$0xff] }
 0xeb5   :  { %v15419_v30 = vmax.f32 %v15369_v46, 0.0 }
 0xeb6   :  { %v15418_v29 = vmax.f32 %v15368_v16, 0.0  ;;  %v17685_v42 = vpop.f32.mrb[54].mxu1  ;;  %18343 = vmatpush1.bf16.msra.mxu0 %v18342_v58  ;;  %18462 = vmatpush1.bf16.msra.mxu1 %v18342_v58 }
 0xeb7   :  { %v15371_v54 = vadd.f32 %v17685_v42, %v15321_v43  ;;  %v15135_v11 = vpop.f32.mrb[55].mxu1  ;;  %18344 = vmatprep.subr.bf16.mxu0 %v19185_v2  ;;  %18447 = vmatprep.subr.bf16.mxu1 %v19185_v2  ;;  %v15334_v42 = vld [vmem:[%s22963_s21 + $0xf0] sm:$0xff] }
 0xeb8   :  { %v18345_v60 = vpack.c.bf16 %v15419_v30, %v15418_v29  ;;  %v15370_v10 = vadd.f32 %v15320_v1, %v15135_v11  ;;  %v15335_v1 = vld [vmem:[%s22963_s21 + $0xf8] sm:$0xff] }
 0xeb9   :  { %v15421_v23 = vmax.f32 %v15371_v54, 0.0 }
 0xeba   :  { %v15420_v7 = vmax.f32 %v15370_v10, 0.0  ;;  %v17688_v35 = vpop.f32.mrb[56].mxu1  ;;  %18346 = vmatpush1.bf16.msra.mxu0 %v18345_v60  ;;  %18463 = vmatpush1.bf16.msra.mxu1 %v18345_v60 }
 0xebb   :  { %v15373_v45 = vadd.f32 %v17688_v35, %v15323_v57  ;;  %v15145_v26 = vpop.f32.mrb[57].mxu1  ;;  %18347 = vmatprep.subr.bf16.mxu0 %v19185_v2  ;;  %18448 = vmatprep.subr.bf16.mxu1 %v19185_v2  ;;  %v15336_v35 = vld [vmem:[%s22963_s21 + $0x100] sm:$0xff] }
 0xebc   :  { %v18348_v3 = vpack.c.bf16 %v15421_v23, %v15420_v7  ;;  %v15372_v36 = vadd.f32 %v15322_v28, %v15145_v26  ;;  %v15337_v28 = vld [vmem:[%s22963_s21 + $0x108] sm:$0xff] }
 0xebd   :  { %v15423_v34 = vmax.f32 %v15373_v45, 0.0 }
 0xebe   :  { %v15422_v59 = vmax.f32 %v15372_v36, 0.0  ;;  %v17691_v33 = vpop.f32.mrb[58].mxu1  ;;  %18349 = vmatpush1.bf16.msra.mxu0 %v18348_v3  ;;  %18464 = vmatpush1.bf16.msra.mxu1 %v18348_v3 }
 0xebf   :  { %v15375_v51 = vadd.f32 %v17691_v33, %v15325_v24  ;;  %v15155_v62 = vpop.f32.mrb[59].mxu1  ;;  %18350 = vmatprep.subr.bf16.mxu0 %v19185_v2  ;;  %18449 = vmatprep.subr.bf16.mxu1 %v19185_v2  ;;  %v15338_v33 = vld [vmem:[%s22963_s21 + $0x110] sm:$0xff] }
 0xec0   :  { %v18351_v6 = vpack.c.bf16 %v15423_v34, %v15422_v59  ;;  %v15374_v39 = vadd.f32 %v15324_v50, %v15155_v62  ;;  %v15339_v50 = vld [vmem:[%s22963_s21 + $0x118] sm:$0xff] }
 0xec1   :  { %v15425_v9 = vmax.f32 %v15375_v51, 0.0 }
 0xec2   :  { %v15424_v47 = vmax.f32 %v15374_v39, 0.0  ;;  %v17694_v8 = vpop.f32.mrb[60].mxu1  ;;  %18352 = vmatpush1.bf16.msra.mxu0 %v18351_v6  ;;  %18465 = vmatpush1.bf16.msra.mxu1 %v18351_v6  ;;  %v15454_v6 = vld [vmem:[%s22957_s20] sm:$0xff] }
 0xec3   :  { %v15377_v15 = vadd.f32 %v17694_v8, %v15327_v17  ;;  %v15165_v61 = vpop.f32.mrb[61].mxu1  ;;  %18353 = vmatprep.subr.bf16.mxu0 %v19185_v2  ;;  %18450 = vmatprep.subr.bf16.mxu1 %v19185_v2  ;;  %v15341_v8 = vld [vmem:[%s22963_s21 + $0x128] sm:$0xff] }
 0xec4   :  { %v18354_v53 = vpack.c.bf16 %v15425_v9, %v15424_v47  ;;  %v15376_v63 = vadd.f32 %v15326_v27, %v15165_v61  ;;  %v15459_v9 = vld [vmem:[%s22957_s20 + $0x28] sm:$0xff]  ;;  %v15340_v61 = vld [vmem:[%s22963_s21 + $0x120] sm:$0xff] }
 0xec5   :  { %v15427_v20 = vmax.f32 %v15377_v15, 0.0 }
 0xec6   :  { %v15426_v25 = vmax.f32 %v15376_v63, 0.0  ;;  %v17697_v52 = vpop.f32.mrb[62].mxu1  ;;  %18355 = vmatpush1.bf16.msra.mxu0 %v18354_v53  ;;  %18466 = vmatpush1.bf16.msra.mxu1 %v18354_v53 }
 0xec7   :  { %v15379_v0 = vadd.f32 %v17697_v52, %v15329_v21  ;;  %v15175_v49 = vpop.f32.mrb[63].mxu1  ;;  %18356 = vmatprep.subr.bf16.mxu0 %v19185_v2  ;;  %18451 = vmatprep.subr.bf16.mxu1 %v19185_v2  ;;  %v15458_v21 = vld [vmem:[%s22957_s20 + $0x20] sm:$0xff] }
 0xec8   :  { %v18357_v22 = vpack.c.bf16 %v15427_v20, %v15426_v25  ;;  %v15378_v48 = vadd.f32 %v15328_v37, %v15175_v49  ;;  %v15463_v25 = vld [vmem:[%s22957_s20 + $0x48] sm:$0xff]  ;;  %v15343_v49 = vld [vmem:[%s22963_s21 + $0x138] sm:$0xff] }
 0xec9   :  { %v15429_v38 = vmax.f32 %v15379_v0, 0.0 }
 0xeca   :  { %v15428_v31 = vmax.f32 %v15378_v48, 0.0  ;;  %v17700_v32 = vpop.f32.mrb[64].mxu1  ;;  %18358 = vmatpush1.bf16.msra.mxu0 %v18357_v22  ;;  %18467 = vmatpush1.bf16.msra.mxu1 %v18357_v22  ;;  %v15342_v48 = vld [vmem:[%s22963_s21 + $0x130] sm:$0xff] }
 0xecb   :  { %v15381_v19 = vadd.f32 %v17700_v32, %v15331_v56  ;;  %v15185_v12 = vpop.f32.mrb[65].mxu1  ;;  %18359 = vmatprep.subr.bf16.mxu0 %v19185_v2  ;;  %18452 = vmatprep.subr.bf16.mxu1 %v19185_v2 }
 0xecc   :  { %v18360_v5 = vpack.c.bf16 %v15429_v38, %v15428_v31  ;;  %v15380_v13 = vadd.f32 %v15330_v41, %v15185_v12  ;;  %v15462_v41 = vld [vmem:[%s22957_s20 + $0x40] sm:$0xff] }
 0xecd   :  { %v15431_v14 = vmax.f32 %v15381_v19, 0.0  ;;  %v15467_v19 = vld [vmem:[%s22957_s20 + $0x68] sm:$0xff] }
 0xece   :  { %v15430_v46 = vmax.f32 %v15380_v13, 0.0  ;;  %v17703_v40 = vpop.f32.mrb[66].mxu1  ;;  %18361 = vmatpush1.bf16.msra.mxu0 %v18360_v5  ;;  %18468 = vmatpush1.bf16.msra.mxu1 %v18360_v5  ;;  %v15345_v13 = vld [vmem:[%s22963_s21 + $0x148] sm:$0xff] }
 0xecf   :  { %v15383_v58 = vadd.f32 %v17703_v40, %v15333_v18  ;;  %v15195_v16 = vpop.f32.mrb[67].mxu1  ;;  %18362 = vmatprep.subr.bf16.mxu0 %v19185_v2  ;;  %18453 = vmatprep.subr.bf16.mxu1 %v19185_v2  ;;  %v15466_v40 = vld [vmem:[%s22957_s20 + $0x60] sm:$0xff] }
 0xed0   :  { %v18363_v43 = vpack.c.bf16 %v15431_v14, %v15430_v46  ;;  %v15382_v30 = vadd.f32 %v15332_v4, %v15195_v16  ;;  %v15344_v14 = vld [vmem:[%s22963_s21 + $0x140] sm:$0xff] }
 0xed1   :  { %v15433_v29 = vmax.f32 %v15383_v58, 0.0 }
 0xed2   :  { %v15432_v54 = vmax.f32 %v15382_v30, 0.0  ;;  %v17706_v11 = vpop.f32.mrb[68].mxu1  ;;  %18364 = vmatpush1.bf16.msra.mxu0 %v18363_v43  ;;  %18469 = vmatpush1.bf16.msra.mxu1 %v18363_v43  ;;  %v15471_v43 = vld [vmem:[%s22957_s20 + $0x88] sm:$0xff] }
 0xed3   :  { %v15385_v60 = vadd.f32 %v17706_v11, %v15335_v1  ;;  %v15205_v10 = vpop.f32.mrb[69].mxu1  ;;  %18365 = vmatprep.subr.bf16.mxu0 %v19185_v2  ;;  %18454 = vmatprep.subr.bf16.mxu1 %v19185_v2 }
 0xed4   :  { %v18366_v57 = vpack.c.bf16 %v15433_v29, %v15432_v54  ;;  %v15384_v23 = vadd.f32 %v15334_v42, %v15205_v10  ;;  %v15347_v29 = vld [vmem:[%s22963_s21 + $0x158] sm:$0xff]  ;;  %v15346_v54 = vld [vmem:[%s22963_s21 + $0x150] sm:$0xff]  ;;  %v15470_v10 = vld [vmem:[%s22957_s20 + $0x80] sm:$0xff] }
 0xed5   :  { %v15435_v7 = vmax.f32 %v15385_v60, 0.0 }
 0xed6   :  { %v15434_v45 = vmax.f32 %v15384_v23, 0.0  ;;  %v17709_v26 = vpop.f32.mrb[70].mxu1  ;;  %18367 = vmatpush1.bf16.msra.mxu0 %v18366_v57  ;;  %18470 = vmatpush1.bf16.msra.mxu1 %v18366_v57 }
 0xed7   :  { %v15387_v3 = vadd.f32 %v17709_v26, %v15337_v28  ;;  %v15215_v36 = vpop.f32.mrb[71].mxu1  ;;  %18368 = vmatprep.subr.bf16.mxu0 %v19185_v2  ;;  %18455 = vmatprep.subr.bf16.mxu1 %v19185_v2  ;;  %v15475_v28 = vld [vmem:[%s22957_s20 + $0xa8] sm:$0xff] }
 0xed8   :  { %v18369_v24 = vpack.c.bf16 %v15435_v7, %v15434_v45  ;;  %v15386_v34 = vadd.f32 %v15336_v35, %v15215_v36  ;;  %v15349_v45 = vld [vmem:[%s22963_s21 + $0x168] sm:$0xff] }
 0xed9   :  { %v15437_v59 = vmax.f32 %v15387_v3, 0.0  ;;  %v15348_v3 = vld [vmem:[%s22963_s21 + $0x160] sm:$0xff] }
 0xeda   :  { %v15436_v51 = vmax.f32 %v15386_v34, 0.0  ;;  %v17712_v62 = vpop.f32.mrb[72].mxu1  ;;  %18370 = vmatpush1.bf16.msra.mxu0 %v18369_v24  ;;  %18471 = vmatpush1.bf16.msra.mxu1 %v18369_v24  ;;  %v15474_v34 = vld [vmem:[%s22957_s20 + $0xa0] sm:$0xff] }
 0xedb   :  { %v15389_v39 = vadd.f32 %v17712_v62, %v15339_v50  ;;  %v15225_v17 = vpop.f32.mrb[73].mxu1  ;;  %18371 = vmatprep.subr.bf16.mxu0 %v19185_v2 }
 0xedc   :  { %v18372_v27 = vpack.c.bf16 %v15437_v59, %v15436_v51  ;;  %v15388_v47 = vadd.f32 %v15338_v33, %v15225_v17  ;;  %v15479_v33 = vld [vmem:[%s22957_s20 + $0xc8] sm:$0xff]  ;;  %v15350_v17 = vld [vmem:[%s22963_s21 + $0x170] sm:$0xff] }
 0xedd   :  { %v15439_v15 = vmax.f32 %v15389_v39, 0.0  ;;  %15823 = vmatmul.mubr.f32.vlgmr.msra.gmra.mrb[30].mxu0 %v15454_v6  ;;  %v15351_v6 = vld [vmem:[%s22963_s21 + $0x178] sm:$0xff] }
 0xede   :  { %v15438_v53 = vmax.f32 %v15388_v47, 0.0  ;;  %v17715_v63 = vpop.f32.mrb[74].mxu1  ;;  %18373 = vmatpush1.bf16.msra.mxu0 %v18372_v27  ;;  %15827 = vmatprep.mubr.f32.mxu0 %v15459_v9  ;;  %v15478_v47 = vld [vmem:[%s22957_s20 + $0xc0] sm:$0xff] }
 0xedf   :  { %v15391_v20 = vadd.f32 %v17715_v63, %v15341_v8  ;;  %v15235_v37 = vpop.f32.mrb[75].mxu1  ;;  %18374 = vmatprep.subr.bf16.mxu0 %v19185_v2 }
 0xee0   :  { %v18375_v52 = vpack.c.bf16 %v15439_v15, %v15438_v53  ;;  %v15390_v0 = vadd.f32 %v15340_v61, %v15235_v37  ;;  %v15483_v61 = vld [vmem:[%s22957_s20 + $0xe8] sm:$0xff]  ;;  %v15352_v37 = vld [vmem:[%s22963_s21 + $0x180] sm:$0xff] }
 0xee1   :  { %v15441_v22 = vmax.f32 %v15391_v20, 0.0  ;;  %15828 = vmatmul.mubr.f32.gmra.mrb[32].mxu0 %v15458_v21  ;;  %v15353_v21 = vld [vmem:[%s22963_s21 + $0x188] sm:$0xff] }
 0xee2   :  { %v15440_v56 = vmax.f32 %v15390_v0, 0.0  ;;  %v17718_v38 = vpop.f32.mrb[76].mxu1  ;;  %18376 = vmatpush1.bf16.msra.mxu0 %v18375_v52  ;;  %15832 = vmatprep.mubr.f32.mxu0 %v15463_v25  ;;  %v15482_v0 = vld [vmem:[%s22957_s20 + $0xe0] sm:$0xff] }
 0xee3   :  { %v15393_v31 = vadd.f32 %v17718_v38, %v15343_v49  ;;  %v15245_v32 = vpop.f32.mrb[77].mxu1  ;;  %18377 = vmatprep.subr.bf16.mxu0 %v19185_v2 }
 0xee4   :  { %v18378_v12 = vpack.c.bf16 %v15441_v22, %v15440_v56  ;;  %v15392_v5 = vadd.f32 %v15342_v48, %v15245_v32  ;;  %v15487_v48 = vld [vmem:[%s22957_s20 + $0x108] sm:$0xff]  ;;  %v15534_v32 = vld [vmem:[%s22957_s20 + $0x280] sm:$0xff] }
 0xee5   :  { %v15443_v18 = vmax.f32 %v15393_v31, 0.0  ;;  %15833 = vmatmul.mubr.f32.gmra.mrb[34].mxu0 %v15462_v41  ;;  %v15535_v31 = vld [vmem:[%s22957_s20 + $0x288] sm:$0xff] }
 0xee6   :  { %v15442_v4 = vmax.f32 %v15392_v5, 0.0  ;;  %v17721_v46 = vpop.f32.mrb[78].mxu1  ;;  %18379 = vmatpush1.bf16.msra.mxu0 %v18378_v12  ;;  %15837 = vmatprep.mubr.f32.mxu0 %v15467_v19  ;;  %v15486_v12 = vld [vmem:[%s22957_s20 + $0x100] sm:$0xff]  ;;  %v15491_v5 = vld [vmem:[%s22957_s20 + $0x128] sm:$0xff] }
 0xee7   :  { %v15395_v58 = vadd.f32 %v17721_v46, %v15345_v13  ;;  %v15255_v16 = vpop.f32.mrb[79].mxu1  ;;  %18380 = vmatprep.subr.bf16.mxu0 %v19185_v2  ;;  %15922 = vmatprep.mubr.f32.mxu1 %v15535_v31  ;;  %v15495_v46 = vld [vmem:[%s22957_s20 + $0x148] sm:$0xff]  ;;  %v15469_v31 = vld [vmem:[%s22957_s20 + $0x78] sm:$0xff] }
 0xee8   :  { %v18381_v30 = vpack.c.bf16 %v15443_v18, %v15442_v4  ;;  %v15394_v1 = vadd.f32 %v15344_v14, %v15255_v16  ;;  %15923 = vmatmul.mubr.f32.vlgmr.msra.gmra.mrb[88].mxu1 %v15534_v32  ;;  %v15539_v18 = vld [vmem:[%s22957_s20 + $0x2a8] sm:$0xff]  ;;  %v15538_v14 = vld [vmem:[%s22957_s20 + $0x2a0] sm:$0xff] }
 0xee9   :  { %v15445_v42 = vmax.f32 %v15395_v58, 0.0  ;;  %15838 = vmatmul.mubr.f32.gmra.mrb[36].mxu0 %v15466_v40  ;;  %v15490_v4 = vld [vmem:[%s22957_s20 + $0x120] sm:$0xff]  ;;  %15927 = vmatprep.mubr.f32.mxu1 %v15539_v18  ;;  %v15543_v40 = vld [vmem:[%s22957_s20 + $0x2c8] sm:$0xff]  ;;  %v15472_v18 = vld [vmem:[%s22957_s20 + $0x90] sm:$0xff] }
 0xeea   :  { %v15444_v11 = vmax.f32 %v15394_v1, 0.0  ;;  %v17724_v60 = vpop.f32.mrb[80].mxu1  ;;  %18382 = vmatpush1.bf16.msra.mxu0 %v18381_v30  ;;  %15842 = vmatprep.mubr.f32.mxu0 %v15471_v43  ;;  %v15542_v58 = vld [vmem:[%s22957_s20 + $0x2c0] sm:$0xff]  ;;  %v15499_v43 = vld [vmem:[%s22957_s20 + $0x168] sm:$0xff] }
 0xeeb   :  { %v15397_v57 = vadd.f32 %v17724_v60, %v15347_v29  ;;  %v15265_v23 = vpop.f32.mrb[81].mxu1  ;;  %18383 = vmatprep.subr.bf16.mxu0 %v19185_v2  ;;  %v15494_v16 = vld [vmem:[%s22957_s20 + $0x140] sm:$0xff]  ;;  %v15547_v30 = vld [vmem:[%s22957_s20 + $0x2e8] sm:$0xff] }
 0xeec   :  { %v18384_v7 = vpack.c.bf16 %v15445_v42, %v15444_v11  ;;  %v15396_v35 = vadd.f32 %v15346_v54, %v15265_v23  ;;  %15928 = vmatmul.mubr.f32.gmra.mrb[90].mxu1 %v15538_v14  ;;  %v15546_v1 = vld [vmem:[%s22957_s20 + $0x2e0] sm:$0xff]  ;;  %v15503_v42 = vld [vmem:[%s22957_s20 + $0x188] sm:$0xff] }
 0xeed   :  { %v15447_v26 = vmax.f32 %v15397_v57, 0.0  ;;  %15843 = vmatmul.mubr.f32.gmra.mrb[38].mxu0 %v15470_v10  ;;  %15932 = vmatprep.mubr.f32.mxu1 %v15543_v40  ;;  %v15498_v29 = vld [vmem:[%s22957_s20 + $0x160] sm:$0xff]  ;;  %v15551_v54 = vld [vmem:[%s22957_s20 + $0x308] sm:$0xff]  ;;  %v15476_v40 = vld [vmem:[%s22957_s20 + $0xb0] sm:$0xff] }
 0xeee   :  { %v15446_v36 = vmax.f32 %v15396_v35, 0.0  ;;  %v17727_v24 = vpop.f32.mrb[82].mxu1  ;;  %18385 = vmatpush1.bf16.msra.mxu0 %v18384_v7  ;;  %15847 = vmatprep.mubr.f32.mxu0 %v15475_v28  ;;  %v15550_v11 = vld [vmem:[%s22957_s20 + $0x300] sm:$0xff]  ;;  %v15507_v10 = vld [vmem:[%s22957_s20 + $0x1a8] sm:$0xff] }
 0xeef   :  { %v15399_v50 = vadd.f32 %v17727_v24, %v15349_v45  ;;  %v15275_v59 = vpop.f32.mrb[83].mxu1  ;;  %18386 = vmatprep.subr.bf16.mxu0 %v19185_v2  ;;  %v15502_v60 = vld [vmem:[%s22957_s20 + $0x180] sm:$0xff]  ;;  %v15555_v57 = vld [vmem:[%s22957_s20 + $0x328] sm:$0xff] }
 0xef0   :  { %v18387_v51 = vpack.c.bf16 %v15447_v26, %v15446_v36  ;;  %v15398_v62 = vadd.f32 %v15348_v3, %v15275_v59  ;;  %15933 = vmatmul.mubr.f32.gmra.mrb[92].mxu1 %v15542_v58  ;;  %v15554_v23 = vld [vmem:[%s22957_s20 + $0x320] sm:$0xff]  ;;  %v15511_v7 = vld [vmem:[%s22957_s20 + $0x1c8] sm:$0xff] }
 0xef1   :  { %v15449_v39 = vmax.f32 %v15399_v50, 0.0  ;;  %15848 = vmatmul.mubr.f32.gmra.mrb[40].mxu0 %v15474_v34  ;;  %15937 = vmatprep.mubr.f32.mxu1 %v15547_v30  ;;  %v15506_v28 = vld [vmem:[%s22957_s20 + $0x1a0] sm:$0xff]  ;;  %v15559_v35 = vld [vmem:[%s22957_s20 + $0x348] sm:$0xff]  ;;  %v15485_v30 = vld [vmem:[%s22957_s20 + $0xf8] sm:$0xff] }
 0xef2   :  { %v15448_v9 = vmax.f32 %v15398_v62, 0.0  ;;  %v17730_v27 = vpop.f32.mrb[84].mxu1  ;;  %18388 = vmatpush1.bf16.msra.mxu0 %v18387_v51  ;;  %15852 = vmatprep.mubr.f32.mxu0 %v15479_v33  ;;  %v15558_v45 = vld [vmem:[%s22957_s20 + $0x340] sm:$0xff]  ;;  %v15515_v3 = vld [vmem:[%s22957_s20 + $0x1e8] sm:$0xff] }
 0xef3   :  { %v15401_v8 = vadd.f32 %v17730_v27, %v15351_v6  ;;  %v15285_v15 = vpop.f32.mrb[85].mxu1  ;;  %18389 = vmatprep.subr.bf16.mxu0 %v19185_v2  ;;  %v15510_v26 = vld [vmem:[%s22957_s20 + $0x1c0] sm:$0xff]  ;;  %v15563_v36 = vld [vmem:[%s22957_s20 + $0x368] sm:$0xff] }
 0xef4   :  { %v18390_v53 = vpack.c.bf16 %v15449_v39, %v15448_v9  ;;  %v15400_v63 = vadd.f32 %v15350_v17, %v15285_v15  ;;  %15938 = vmatmul.mubr.f32.gmra.mrb[94].mxu1 %v15546_v1  ;;  %v15562_v24 = vld [vmem:[%s22957_s20 + $0x360] sm:$0xff]  ;;  %v15519_v50 = vld [vmem:[%s22957_s20 + $0x208] sm:$0xff]  ;;  %v15484_v1 = vld [vmem:[%s22957_s20 + $0xf0] sm:$0xff] }
 0xef5   :  { %v15451_v20 = vmax.f32 %v15401_v8, 0.0  ;;  %15853 = vmatmul.mubr.f32.gmra.mrb[42].mxu0 %v15478_v47  ;;  %15942 = vmatprep.mubr.f32.mxu1 %v15551_v54  ;;  %v15514_v34 = vld [vmem:[%s22957_s20 + $0x1e0] sm:$0xff]  ;;  %v15567_v59 = vld [vmem:[%s22957_s20 + $0x388] sm:$0xff]  ;;  %v15493_v54 = vld [vmem:[%s22957_s20 + $0x138] sm:$0xff] }
 0xef6   :  { %v15450_v25 = vmax.f32 %v15400_v63, 0.0  ;;  %v17733_v52 = vpop.f32.mrb[86].mxu1  ;;  %18391 = vmatpush1.bf16.msra.mxu0 %v18390_v53  ;;  %15857 = vmatprep.mubr.f32.mxu0 %v15483_v61  ;;  %v15566_v33 = vld [vmem:[%s22957_s20 + $0x380] sm:$0xff]  ;;  %v15523_v62 = vld [vmem:[%s22957_s20 + $0x228] sm:$0xff] }
 0xef7   :  { %v15403_v49 = vadd.f32 %v17733_v52, %v15353_v21  ;;  %v15295_v22 = vpop.f32.mrb[87].mxu1  ;;  %18392 = vmatprep.subr.bf16.mxu0 %v19185_v2  ;;  %v15518_v51 = vld [vmem:[%s22957_s20 + $0x200] sm:$0xff]  ;;  %v15571_v6 = vld [vmem:[%s22957_s20 + $0x3a8] sm:$0xff]  ;;  %v15457_v21 = vld [vmem:[%s22957_s20 + $0x18] sm:$0xff] }
 0xef8   :  { %v18393_v56 = vpack.c.bf16 %v15451_v20, %v15450_v25  ;;  %v15402_v38 = vadd.f32 %v15352_v37, %v15295_v22  ;;  %15943 = vmatmul.mubr.f32.gmra.mrb[96].mxu1 %v15550_v11  ;;  %v15570_v39 = vld [vmem:[%s22957_s20 + $0x3a0] sm:$0xff]  ;;  %v15527_v9 = vld [vmem:[%s22957_s20 + $0x248] sm:$0xff]  ;;  %v15456_v25 = vld [vmem:[%s22957_s20 + $0x10] sm:$0xff] }
 0xef9   :  { %v15453_v41 = vmax.f32 %v15403_v49, 0.0  ;;  %15858 = vmatmul.mubr.f32.gmra.mrb[44].mxu0 %v15482_v0  ;;  %15947 = vmatprep.mubr.f32.mxu1 %v15555_v57  ;;  %v15522_v17 = vld [vmem:[%s22957_s20 + $0x220] sm:$0xff]  ;;  %v15575_v27 = vld [vmem:[%s22957_s20 + $0x3c8] sm:$0xff]  ;;  %v15461_v52 = vld [vmem:[%s22957_s20 + $0x38] sm:$0xff] }
 0xefa   :  { %v15452_v19 = vmax.f32 %v15402_v38, 0.0  ;;  %18394 = vmatpush1.bf16.msra.mxu0 %v18393_v56  ;;  %15862 = vmatprep.mubr.f32.mxu0 %v15487_v48  ;;  %v15574_v47 = vld [vmem:[%s22957_s20 + $0x3c0] sm:$0xff]  ;;  %v15531_v15 = vld [vmem:[%s22957_s20 + $0x268] sm:$0xff]  ;;  %v15460_v22 = vld [vmem:[%s22957_s20 + $0x30] sm:$0xff] }
 0xefb   :  { %18395 = vmatprep.subr.bf16.mxu0 %v19185_v2  ;;  %v15526_v8 = vld [vmem:[%s22957_s20 + $0x240] sm:$0xff]  ;;  %v15579_v61 = vld [vmem:[%s22957_s20 + $0x3e8] sm:$0xff]  ;;  %v15465_v48 = vld [vmem:[%s22957_s20 + $0x58] sm:$0xff] }
 0xefc   :  { %v18396_v13 = vpack.c.bf16 %v15453_v41, %v15452_v19  ;;  %15948 = vmatmul.mubr.f32.gmra.mrb[98].mxu1 %v15554_v23  ;;  %v15578_v53 = vld [vmem:[%s22957_s20 + $0x3e0] sm:$0xff]  ;;  %v15583_v20 = vld [vmem:[%s22957_s20 + $0x408] sm:$0xff]  ;;  %v15464_v41 = vld [vmem:[%s22957_s20 + $0x50] sm:$0xff] }
 0xefd   :  { %15863 = vmatmul.mubr.f32.gmra.mrb[46].mxu0 %v15486_v12  ;;  %15952 = vmatprep.mubr.f32.mxu1 %v15559_v35  ;;  %v15530_v63 = vld [vmem:[%s22957_s20 + $0x260] sm:$0xff]  ;;  %v15587_v0 = vld [vmem:[%s22957_s20 + $0x428] sm:$0xff]  ;;  %v15468_v19 = vld [vmem:[%s22957_s20 + $0x70] sm:$0xff] }
 0xefe   :  { %18397 = vmatpush1.bf16.msra.mxu0 %v18396_v13  ;;  %15867 = vmatprep.mubr.f32.mxu0 %v15491_v5  ;;  %v15582_v37 = vld [vmem:[%s22957_s20 + $0x400] sm:$0xff]  ;;  %v15591_v56 = vld [vmem:[%s22957_s20 + $0x448] sm:$0xff]  ;;  %v15473_v5 = vld [vmem:[%s22957_s20 + $0x98] sm:$0xff] }
 0xeff   :  { %v15586_v49 = vld [vmem:[%s22957_s20 + $0x420] sm:$0xff]  ;;  %v15595_v32 = vld [vmem:[%s22957_s20 + $0x468] sm:$0xff]  ;;  %v15492_v11 = vld [vmem:[%s22957_s20 + $0x130] sm:$0xff] }
 0xf00   :  { %15953 = vmatmul.mubr.f32.gmra.mrb[100].mxu1 %v15558_v45  ;;  %v15590_v38 = vld [vmem:[%s22957_s20 + $0x440] sm:$0xff]  ;;  %v15599_v13 = vld [vmem:[%s22957_s20 + $0x488] sm:$0xff]  ;;  %v15501_v57 = vld [vmem:[%s22957_s20 + $0x178] sm:$0xff] }
 0xf01   :  { %15868 = vmatmul.mubr.f32.gmra.mrb[48].mxu0 %v15490_v4  ;;  %15957 = vmatprep.mubr.f32.mxu1 %v15563_v36  ;;  %v15594_v12 = vld [vmem:[%s22957_s20 + $0x460] sm:$0xff]  ;;  %v15477_v4 = vld [vmem:[%s22957_s20 + $0xb8] sm:$0xff]  ;;  %v15500_v23 = vld [vmem:[%s22957_s20 + $0x170] sm:$0xff] }
 0xf02   :  { %15872 = vmatprep.mubr.f32.mxu0 %v15495_v46  ;;  %v15598_v14 = vld [vmem:[%s22957_s20 + $0x480] sm:$0xff]  ;;  %v15603_v46 = vld [vmem:[%s22957_s20 + $0x4a8] sm:$0xf]  ;;  %v15509_v35 = vld [vmem:[%s22957_s20 + $0x1b8] sm:$0xff] }
 0xf03   :  { %v15602_v58 = vld [vmem:[%s22957_s20 + $0x4a0] sm:$0xf]  ;;  %v15508_v45 = vld [vmem:[%s22957_s20 + $0x1b0] sm:$0xff]  ;;  %v15517_v36 = vld [vmem:[%s22957_s20 + $0x1f8] sm:$0xff] }
 0xf04   :  { %15958 = vmatmul.mubr.f32.gmra.mrb[102].mxu1 %v15562_v24  ;;  %v15516_v24 = vld [vmem:[%s22957_s20 + $0x1f0] sm:$0xff] }
 0xf05   :  { %15873 = vmatmul.mubr.f32.gmra.mrb[50].mxu0 %v15494_v16  ;;  %15962 = vmatprep.mubr.f32.mxu1 %v15567_v59  ;;  %v15481_v16 = vld [vmem:[%s22957_s20 + $0xd8] sm:$0xff] }
 0xf06   :  { %15877 = vmatprep.mubr.f32.mxu0 %v15499_v43  ;;  %v15480_v43 = vld [vmem:[%s22957_s20 + $0xd0] sm:$0xff]  ;;  %v15525_v59 = vld [vmem:[%s22957_s20 + $0x238] sm:$0xff] }
 0xf08   :  { %15963 = vmatmul.mubr.f32.gmra.mrb[104].mxu1 %v15566_v33  ;;  %v15524_v33 = vld [vmem:[%s22957_s20 + $0x230] sm:$0xff] }
 0xf09   :  { %15878 = vmatmul.mubr.f32.gmra.mrb[52].mxu0 %v15498_v29  ;;  %15967 = vmatprep.mubr.f32.mxu1 %v15571_v6  ;;  %v15489_v29 = vld [vmem:[%s22957_s20 + $0x118] sm:$0xff] }
 0xf0a   :  { %15882 = vmatprep.mubr.f32.mxu0 %v15503_v42  ;;  %v15488_v42 = vld [vmem:[%s22957_s20 + $0x110] sm:$0xff]  ;;  %v15533_v6 = vld [vmem:[%s22957_s20 + $0x278] sm:$0xff] }
 0xf0c   :  { %15968 = vmatmul.mubr.f32.gmra.mrb[106].mxu1 %v15570_v39  ;;  %v15532_v39 = vld [vmem:[%s22957_s20 + $0x270] sm:$0xff] }
 0xf0d   :  { %15883 = vmatmul.mubr.f32.gmra.mrb[54].mxu0 %v15502_v60  ;;  %15972 = vmatprep.mubr.f32.mxu1 %v15575_v27  ;;  %v15497_v60 = vld [vmem:[%s22957_s20 + $0x158] sm:$0xff] }
 0xf0e   :  { %15887 = vmatprep.mubr.f32.mxu0 %v15507_v10  ;;  %v15496_v10 = vld [vmem:[%s22957_s20 + $0x150] sm:$0xff]  ;;  %v15541_v27 = vld [vmem:[%s22957_s20 + $0x2b8] sm:$0xff] }
 0xf10   :  { %15973 = vmatmul.mubr.f32.gmra.mrb[108].mxu1 %v15574_v47  ;;  %v15540_v47 = vld [vmem:[%s22957_s20 + $0x2b0] sm:$0xff] }
 0xf11   :  { %15888 = vmatmul.mubr.f32.gmra.mrb[56].mxu0 %v15506_v28  ;;  %15977 = vmatprep.mubr.f32.mxu1 %v15579_v61  ;;  %v15505_v28 = vld [vmem:[%s22957_s20 + $0x198] sm:$0xff] }
 0xf12   :  { %15892 = vmatprep.mubr.f32.mxu0 %v15511_v7  ;;  %v15504_v7 = vld [vmem:[%s22957_s20 + $0x190] sm:$0xff]  ;;  %v15549_v61 = vld [vmem:[%s22957_s20 + $0x2f8] sm:$0xff] }
 0xf14   :  { %15978 = vmatmul.mubr.f32.gmra.mrb[110].mxu1 %v15578_v53  ;;  %v15548_v53 = vld [vmem:[%s22957_s20 + $0x2f0] sm:$0xff] }
 0xf15   :  { %15893 = vmatmul.mubr.f32.gmra.mrb[58].mxu0 %v15510_v26  ;;  %15982 = vmatprep.mubr.f32.mxu1 %v15583_v20  ;;  %v15513_v26 = vld [vmem:[%s22957_s20 + $0x1d8] sm:$0xff] }
 0xf16   :  { %15897 = vmatprep.mubr.f32.mxu0 %v15515_v3  ;;  %v15512_v3 = vld [vmem:[%s22957_s20 + $0x1d0] sm:$0xff]  ;;  %v15557_v20 = vld [vmem:[%s22957_s20 + $0x338] sm:$0xff] }
 0xf18   :  { %15983 = vmatmul.mubr.f32.gmra.mrb[112].mxu1 %v15582_v37  ;;  %v15556_v37 = vld [vmem:[%s22957_s20 + $0x330] sm:$0xff] }
 0xf19   :  { %15898 = vmatmul.mubr.f32.gmra.mrb[60].mxu0 %v15514_v34  ;;  %15987 = vmatprep.mubr.f32.mxu1 %v15587_v0  ;;  %v15521_v34 = vld [vmem:[%s22957_s20 + $0x218] sm:$0xff] }
 0xf1a   :  { %15902 = vmatprep.mubr.f32.mxu0 %v15519_v50  ;;  %v15520_v50 = vld [vmem:[%s22957_s20 + $0x210] sm:$0xff]  ;;  %v15565_v0 = vld [vmem:[%s22957_s20 + $0x378] sm:$0xff] }
 0xf1c   :  { %15988 = vmatmul.mubr.f32.gmra.mrb[114].mxu1 %v15586_v49  ;;  %v15564_v49 = vld [vmem:[%s22957_s20 + $0x370] sm:$0xff] }
 0xf1d   :  { %15903 = vmatmul.mubr.f32.gmra.mrb[62].mxu0 %v15518_v51  ;;  %15992 = vmatprep.mubr.f32.mxu1 %v15591_v56  ;;  %v15529_v51 = vld [vmem:[%s22957_s20 + $0x258] sm:$0xff] }
 0xf1e   :  { %15907 = vmatprep.mubr.f32.mxu0 %v15523_v62  ;;  %v15528_v62 = vld [vmem:[%s22957_s20 + $0x250] sm:$0xff]  ;;  %v15573_v56 = vld [vmem:[%s22957_s20 + $0x3b8] sm:$0xff] }
 0xf20   :  { %15993 = vmatmul.mubr.f32.gmra.mrb[116].mxu1 %v15590_v38  ;;  %v15572_v38 = vld [vmem:[%s22957_s20 + $0x3b0] sm:$0xff] }
 0xf21   :  { %15908 = vmatmul.mubr.f32.gmra.mrb[64].mxu0 %v15522_v17  ;;  %15997 = vmatprep.mubr.f32.mxu1 %v15595_v32  ;;  %v15537_v17 = vld [vmem:[%s22957_s20 + $0x298] sm:$0xff] }
 0xf22   :  { %15912 = vmatprep.mubr.f32.mxu0 %v15527_v9  ;;  %v15536_v9 = vld [vmem:[%s22957_s20 + $0x290] sm:$0xff]  ;;  %v15581_v32 = vld [vmem:[%s22957_s20 + $0x3f8] sm:$0xff] }
 0xf24   :  { %15998 = vmatmul.mubr.f32.gmra.mrb[118].mxu1 %v15594_v12  ;;  %v15585_v12 = vld [vmem:[%s22957_s20 + $0x418] sm:$0xff] }
 0xf25   :  { %15913 = vmatmul.mubr.f32.gmra.mrb[66].mxu0 %v15526_v8  ;;  %16002 = vmatprep.mubr.f32.mxu1 %v15599_v13  ;;  %v15545_v8 = vld [vmem:[%s22957_s20 + $0x2d8] sm:$0xff] }
 0xf26   :  { %15917 = vmatprep.mubr.f32.mxu0 %v15531_v15  ;;  %v15544_v15 = vld [vmem:[%s22957_s20 + $0x2d0] sm:$0xff]  ;;  %v15589_v13 = vld [vmem:[%s22957_s20 + $0x438] sm:$0xff] }
 0xf28   :  { %16003 = vmatmul.mubr.f32.gmra.mrb[120].mxu1 %v15598_v14  ;;  %v15593_v14 = vld [vmem:[%s22957_s20 + $0x458] sm:$0xff] }
 0xf29   :  { %15918 = vmatmul.mubr.f32.gmra.mrb[68].mxu0 %v15530_v63  ;;  %16007 = vmatprep.mubr.f32.mxu1 %v15603_v46  ;;  %v15553_v63 = vld [vmem:[%s22957_s20 + $0x318] sm:$0xff] }
 0xf2a   :  { %17115 = vmatprep.mubr.msk.f32.mxu0 %vm11090_vm0, %v15457_v21  ;;  %v15552_v21 = vld [vmem:[%s22957_s20 + $0x310] sm:$0xff]  ;;  %v15597_v46 = vld [vmem:[%s22957_s20 + $0x478] sm:$0xff] }
 0xf2c   :  { %16008 = vmatmul.mubr.f32.gmra.mrb[122].mxu1 %v15602_v58  ;;  %v15601_v58 = vld [vmem:[%s22957_s20 + $0x498] sm:$0xff] }
 0xf2d   :  { %16078 = vmatmul.mubr.f32.vlgmr.msra.gmra.mrb[30].mxu0 %v15456_v25  ;;  %v15561_v25 = vld [vmem:[%s22957_s20 + $0x358] sm:$0xff] }
 0xf2e   :  { %17116 = vmatprep.mubr.msk.f32.mxu0 %vm11090_vm0, %v15461_v52  ;;  %v15560_v52 = vld [vmem:[%s22957_s20 + $0x350] sm:$0xff] }
 0xf31   :  { %16083 = vmatmul.mubr.f32.gmra.mrb[32].mxu0 %v15460_v22  ;;  %v15569_v22 = vld [vmem:[%s22957_s20 + $0x398] sm:$0xff] }
 0xf32   :  { %17117 = vmatprep.mubr.msk.f32.mxu0 %vm11090_vm0, %v15465_v48  ;;  %v15568_v48 = vld [vmem:[%s22957_s20 + $0x390] sm:$0xff] }
 0xf35   :  { %16088 = vmatmul.mubr.f32.gmra.mrb[34].mxu0 %v15464_v41  ;;  %v15577_v41 = vld [vmem:[%s22957_s20 + $0x3d8] sm:$0xff] }
 0xf36   :  { %17118 = vmatprep.mubr.msk.f32.mxu0 %vm11090_vm0, %v15469_v31  ;;  %v15576_v31 = vld [vmem:[%s22957_s20 + $0x3d0] sm:$0xff] }
 0xf39   :  { %16093 = vmatmul.mubr.f32.gmra.mrb[36].mxu0 %v15468_v19  ;;  %v15580_v19 = vld [vmem:[%s22957_s20 + $0x3f0] sm:$0xff] }
 0xf3a   :  { %17119 = vmatprep.mubr.msk.f32.mxu0 %vm11090_vm0, %v15473_v5  ;;  %v15584_v5 = vld [vmem:[%s22957_s20 + $0x410] sm:$0xff] }
 0xf3d   :  { %16098 = vmatmul.mubr.f32.gmra.mrb[38].mxu0 %v15472_v18  ;;  %v15588_v18 = vld [vmem:[%s22957_s20 + $0x430] sm:$0xff] }
 0xf3e   :  { %17120 = vmatprep.mubr.msk.f32.mxu0 %vm11090_vm0, %v15477_v4  ;;  %v15592_v4 = vld [vmem:[%s22957_s20 + $0x450] sm:$0xff] }
 0xf41   :  { %16103 = vmatmul.mubr.f32.gmra.mrb[40].mxu0 %v15476_v40  ;;  %v15596_v40 = vld [vmem:[%s22957_s20 + $0x470] sm:$0xff] }
 0xf42   :  { %17121 = vmatprep.mubr.msk.f32.mxu0 %vm11090_vm0, %v15481_v16  ;;  %v15600_v16 = vld [vmem:[%s22957_s20 + $0x490] sm:$0xff] }
 0xf45   :  { %16108 = vmatmul.mubr.f32.gmra.mrb[42].mxu0 %v15480_v43  ;;  %v15605_v43 = vld [vmem:[%s22957_s20 + $0x4b8] sm:$0xf] }
 0xf46   :  { %17122 = vmatprep.mubr.msk.f32.mxu0 %vm11090_vm0, %v15485_v30  ;;  %v15604_v30 = vld [vmem:[%s22957_s20 + $0x4b0] sm:$0xf] }
 0xf49   :  { %16113 = vmatmul.mubr.f32.gmra.mrb[44].mxu0 %v15484_v1 }
 0xf4a   :  { %17123 = vmatprep.mubr.msk.f32.mxu0 %vm11090_vm0, %v15489_v29 }
 0xf4d   :  { %16118 = vmatmul.mubr.f32.gmra.mrb[46].mxu0 %v15488_v42 }
 0xf4e   :  { %17124 = vmatprep.mubr.msk.f32.mxu0 %vm11090_vm0, %v15493_v54 }
 0xf51   :  { %16123 = vmatmul.mubr.f32.gmra.mrb[48].mxu0 %v15492_v11 }
 0xf52   :  { %17125 = vmatprep.mubr.msk.f32.mxu0 %vm11090_vm0, %v15497_v60 }
 0xf55   :  { %16128 = vmatmul.mubr.f32.gmra.mrb[50].mxu0 %v15496_v10 }
 0xf56   :  { %17126 = vmatprep.mubr.msk.f32.mxu0 %vm11090_vm0, %v15501_v57 }
 0xf59   :  { %16133 = vmatmul.mubr.f32.gmra.mrb[52].mxu0 %v15500_v23 }
 0xf5a   :  { %17127 = vmatprep.mubr.msk.f32.mxu0 %vm11090_vm0, %v15505_v28 }
 0xf5d   :  { %16138 = vmatmul.mubr.f32.gmra.mrb[54].mxu0 %v15504_v7 }
 0xf5e   :  { %17128 = vmatprep.mubr.msk.f32.mxu0 %vm11090_vm0, %v15509_v35 }
 0xf61   :  { %16143 = vmatmul.mubr.f32.gmra.mrb[56].mxu0 %v15508_v45 }
 0xf62   :  { %17129 = vmatprep.mubr.msk.f32.mxu0 %vm11090_vm0, %v15513_v26 }
 0xf65   :  { %16148 = vmatmul.mubr.f32.gmra.mrb[58].mxu0 %v15512_v3 }
 0xf66   :  { %17130 = vmatprep.mubr.msk.f32.mxu0 %vm11090_vm0, %v15517_v36 }
 0xf69   :  { %16153 = vmatmul.mubr.f32.gmra.mrb[60].mxu0 %v15516_v24 }
 0xf6a   :  { %17131 = vmatprep.mubr.msk.f32.mxu0 %vm11090_vm0, %v15521_v34 }
 0xf6d   :  { %16158 = vmatmul.mubr.f32.gmra.mrb[62].mxu0 %v15520_v50 }
 0xf6e   :  { %17132 = vmatprep.mubr.msk.f32.mxu0 %vm11090_vm0, %v15525_v59 }
 0xf71   :  { %16163 = vmatmul.mubr.f32.gmra.mrb[64].mxu0 %v15524_v33 }
 0xf72   :  { %17133 = vmatprep.mubr.msk.f32.mxu0 %vm11090_vm0, %v15529_v51 }
 0xf75   :  { %16168 = vmatmul.mubr.f32.gmra.mrb[66].mxu0 %v15528_v62 }
 0xf76   :  { %17134 = vmatprep.mubr.msk.f32.mxu0 %vm11090_vm0, %v15533_v6 }
 0xf79   :  { %16173 = vmatmul.mubr.f32.gmra.mrb[68].mxu0 %v15532_v39 }
 0xf7a   :  { %17135 = vmatprep.mubr.msk.f32.mxu0 %vm11090_vm0, %v15537_v17  ;;  %v15606_v17 = vld [vmem:[%s23269_s11] sm:$0xff] }
 0xf7d   :  { %16178 = vmatmul.mubr.f32.gmra.mrb[70].mxu0 %v15536_v9 }
 0xf7e   :  { %17136 = vmatprep.mubr.msk.f32.mxu0 %vm11090_vm0, %v15541_v27 }
 0xf81   :  { %16183 = vmatmul.mubr.f32.gmra.mrb[72].mxu0 %v15540_v47 }
 0xf82   :  { %17137 = vmatprep.mubr.msk.f32.mxu0 %vm11090_vm0, %v15545_v8  ;;  %v19187_v8 = vmov 1983009808  }
 0xf85   :  { %16188 = vmatmul.mubr.f32.gmra.mrb[74].mxu0 %v15544_v15  ;;  %v16311_v15 = vunpack.c.l.s4 %v19187_v8 }
 0xf86   :  { %17138 = vmatprep.mubr.msk.f32.mxu0 %vm11090_vm0, %v15549_v61  ;;  %v15607_v61 = vld [vmem:[%s23269_s11 + $0x8] sm:$0xff] }
 0xf89   :  { %16193 = vmatmul.mubr.f32.gmra.mrb[76].mxu0 %v15548_v53 }
 0xf8a   :  { %17139 = vmatprep.mubr.msk.f32.mxu0 %vm11090_vm0, %v15553_v63 }
 0xf8d   :  { %16198 = vmatmul.mubr.f32.gmra.mrb[78].mxu0 %v15552_v21  ;;  %v16312_v21 = vunpack.c.0.s8 %v16311_v15  ;;  %v15612_v15 = vld [vmem:[%s23269_s11 + $0x30] sm:$0xff] }
 0xf8e   :  { %17140 = vmatprep.mubr.msk.f32.mxu0 %vm11090_vm0, %v15557_v20 }
 0xf91   :  { %16203 = vmatmul.mubr.f32.gmra.mrb[80].mxu0 %v15556_v37 }
 0xf92   :  { %17141 = vmatprep.mubr.msk.f32.mxu0 %vm11090_vm0, %v15561_v25 }
 0xf95   :  { %16208 = vmatmul.mubr.f32.gmra.mrb[82].mxu0 %v15560_v52 }
 0xf96   :  { %17142 = vmatprep.mubr.msk.f32.mxu0 %vm11090_vm0, %v15565_v0  ;;  %v23577_v0 = vld [vmem:[#allocation2_spill] sm:$0xff] }
 0xf99   :  { %16213 = vmatmul.mubr.f32.gmra.mrb[84].mxu0 %v15564_v49  ;;  %v16315_v49 = vsub.s32 %v16312_v21, %v23577_v0 }
 0xf9a   :  { %17143 = vmatprep.mubr.msk.f32.mxu0 %vm11090_vm0, %v15569_v22  ;;  %v16306_v22 = vld [vmem:[%s16510_s25] sm:$0x3f] }
 0xf9d   :  { %16218 = vmatmul.mubr.f32.gmra.mrb[86].mxu0 %v15568_v48 }
 0xf9e   :  { %17144 = vmatprep.mubr.msk.f32.mxu0 %vm11090_vm0, %v15573_v56 }
 0xfa1   :  { %16223 = vmatmul.mubr.f32.gmra.mrb[88].mxu0 %v15572_v38 }
 0xfa2   :  { %17145 = vmatprep.mubr.msk.f32.mxu0 %vm11090_vm0, %v15577_v41  ;;  %v23286_v41 = vrot.slane %v16306_v22, %v16315_v49 }
 0xfa5   :  { %16228 = vmatmul.mubr.f32.gmra.mrb[90].mxu0 %v15576_v31  ;;  %v15608_v31 = vld [vmem:[%s23269_s11 + $0x10] sm:$0xff] }
 0xfa6   :  { %17146 = vmatprep.mubr.msk.f32.mxu0 %vm11090_vm0, %v15581_v32 }
 0xfa9   :  { %16233 = vmatmul.mubr.f32.gmra.mrb[92].mxu0 %v15580_v19 }
 0xfaa   :  { %17147 = vmatprep.mubr.msk.f32.mxu0 %vm11090_vm0, %v15585_v12 }
 0xfad   :  { %16238 = vmatmul.mubr.f32.gmra.mrb[94].mxu0 %v15584_v5 }
 0xfae   :  { %17148 = vmatprep.mubr.msk.f32.mxu0 %vm11090_vm0, %v15589_v13  ;;  %v16324_v13 = vcombine.high %v23286_v41, %v23286_v41 }
 0xfb0   :  { %16397 = vmatprep.mubr.f32.mxu1 %v16324_v13 }
 0xfb1   :  { %16243 = vmatmul.mubr.f32.gmra.mrb[96].mxu0 %v15588_v18  ;;  %v15609_v18 = vld [vmem:[%s23269_s11 + $0x18] sm:$0xff] }
 0xfb2   :  { %17149 = vmatprep.mubr.msk.f32.mxu0 %vm11090_vm0, %v15593_v14 }
 0xfb5   :  { %16248 = vmatmul.mubr.f32.gmra.mrb[98].mxu0 %v15592_v4 }
 0xfb6   :  { %17150 = vmatprep.mubr.msk.f32.mxu0 %vm11090_vm0, %v15597_v46  ;;  %v16309_v46 = vcombine.high %v16306_v22, %v16306_v22 }
 0xfb9   :  { %16253 = vmatmul.mubr.f32.gmra.mrb[100].mxu0 %v15596_v40 }
 0xfba   :  { %17151 = vmatprep.mubr.msk.f32.mxu0 %vm11090_vm0, %v15601_v58 }
 0xfbb   :  { %v23243_v1 = vpop.f32.mrb[88].mxu1 }
 0xfbc   :  { %v15926_v29 = vpop.f32.mrb[89].mxu1 }
 0xfbd   :  { %16258 = vmatmul.mubr.f32.gmra.mrb[102].mxu0 %v15600_v16 }
 0xfbe   :  { %17152 = vmatprep.mubr.msk.f32.mxu0 %vm11090_vm0, %v15605_v43 }
 0xfbf   :  { %v23245_v42 = vpop.f32.mrb[90].mxu1 }
 0xfc0   :  { %v15931_v54 = vpop.f32.mrb[91].mxu1 }
 0xfc1   :  { %16263 = vmatmul.mubr.f32.gmra.mrb[104].mxu0 %v15604_v30  ;;  %v23296_v30 = vrot.slane %v16309_v46, %v16315_v49 }
 0xfc3   :  { %v23247_v11 = vpop.f32.mrb[92].mxu1 }
 0xfc4   :  { %v15936_v60 = vpop.f32.mrb[93].mxu1 }
 0xfc7   :  { %v23249_v10 = vpop.f32.mrb[94].mxu1 }
 0xfc8   :  { %v15941_v57 = vpop.f32.mrb[95].mxu1 }
 0xfc9   :  { %v15610_v57 = vld [vmem:[%s23269_s11 + $0x20] sm:$0xff] }
 0xfcb   :  { %v23251_v23 = vpop.f32.mrb[96].mxu1 }
 0xfcc   :  { %v15946_v28 = vpop.f32.mrb[97].mxu1 }
 0xfcf   :  { %v23253_v7 = vpop.f32.mrb[98].mxu1 }
 0xfd0   :  { %v15951_v35 = vpop.f32.mrb[99].mxu1 }
 0xfd3   :  { %v23255_v45 = vpop.f32.mrb[100].mxu1 }
 0xfd4   :  { %v15956_v26 = vpop.f32.mrb[101].mxu1 }
 0xfd7   :  { %v23257_v3 = vpop.f32.mrb[102].mxu1 }
 0xfd8   :  { %v15961_v36 = vpop.f32.mrb[103].mxu1 }
 0xfdb   :  { %v23259_v24 = vpop.f32.mrb[104].mxu1 }
 0xfdc   :  { %v15966_v34 = vpop.f32.mrb[105].mxu1 }
 0xfdd   :  { %v15611_v34 = vld [vmem:[%s23269_s11 + $0x28] sm:$0xff] }
 0xfdf   :  { %v23261_v50 = vpop.f32.mrb[106].mxu1 }
 0xfe0   :  { %v15971_v59 = vpop.f32.mrb[107].mxu1 }
 0xfe3   :  { %v23263_v33 = vpop.f32.mrb[108].mxu1 }
 0xfe4   :  { %v15976_v51 = vpop.f32.mrb[109].mxu1 }
 0xfe7   :  { %v23271_v62 = vpop.f32.mrb[110].mxu1 }
 0xfe8   :  { %v15981_v6 = vpop.f32.mrb[111].mxu1 }
 0xfeb   :  { %v23273_v39 = vpop.f32.mrb[112].mxu1 }
 0xfec   :  { %v15986_v27 = vpop.f32.mrb[113].mxu1 }
 0xfef   :  { %v23281_v63 = vpop.f32.mrb[114].mxu1 }
 0xff0   :  { %v15991_v37 = vpop.f32.mrb[115].mxu1 }
 0xff3   :  { %v23284_v38 = vpop.f32.mrb[116].mxu1 }
 0xff4   :  { %v15996_v19 = vpop.f32.mrb[117].mxu1 }
 0xff5   :  { %v15615_v19 = vld [vmem:[%s23269_s11 + $0x48] sm:$0xff] }
 0xff7   :  { %v23294_v4 = vpop.f32.mrb[118].mxu1 }
 0xff8   :  { %v16001_v58 = vpop.f32.mrb[119].mxu1 }
 0xff9   :  { %v15616_v58 = vld [vmem:[%s23269_s11 + $0x50] sm:$0xff] }
 0xffb   :  { %v23298_v60 = vpop.f32.mrb[120].mxu1 }
 0xffc   :  { %v16006_v35 = vpop.f32.mrb[121].mxu1 }
 0xfff   :  { %v23304_v51 = vpop.f32.mrb[122].mxu1 }
0x1000   :  { %v16079_v9 = vpop.f32.mrb[30].mxu0 }
0x1001   :  { %v16081_v47 = vpop.f32.mrb[31].mxu0  ;;  %v18474_v53 = vadd.f32 %v16079_v9, %v15606_v17  ;;  %v16011_v17 = vpop.f32.mrb[123].mxu1 }
0x1003   :  { %v16268_v48 = vmax.f32 %v18474_v53, 0.0 }
0x1004   :  { %v16084_v20 = vpop.f32.mrb[32].mxu0 }
0x1005   :  { %v18475_v25 = vadd.f32 %v16084_v20, %v15607_v61  ;;  %v16086_v52 = vpop.f32.mrb[33].mxu0  ;;  %v15613_v20 = vld [vmem:[%s23269_s11 + $0x38] sm:$0xff] }
0x1007   :  { %v16269_v56 = vmax.f32 %v18475_v25, 0.0 }
0x1008   :  { %v16089_v32 = vpop.f32.mrb[34].mxu0 }
0x1009   :  { %v23289_v12 = vpack.c.bf16 %v16269_v56, %v16268_v48  ;;  %v16091_v5 = vpop.f32.mrb[35].mxu0  ;;  %v18476_v14 = vadd.f32 %v16089_v32, %v15608_v31  ;;  %v15614_v48 = vld [vmem:[%s23269_s11 + $0x40] sm:$0xff] }
0x100b   :  { %v16270_v29 = vmax.f32 %v18476_v14, 0.0 }
0x100c   :  { %v16094_v40 = vpop.f32.mrb[36].mxu0 }
0x100d   :  { %v18477_v16 = vadd.f32 %v16094_v40, %v15609_v18  ;;  %v16096_v43 = vpop.f32.mrb[37].mxu0 }
0x100f   :  { %v16271_v54 = vmax.f32 %v18477_v16, 0.0 }
0x1010   :  { %v16099_v28 = vpop.f32.mrb[38].mxu0 }
0x1011   :  { %v23301_v26 = vpack.c.bf16 %v16271_v54, %v16270_v29  ;;  %v16101_v36 = vpop.f32.mrb[39].mxu0  ;;  %v18478_v59 = vadd.f32 %v16099_v28, %v15610_v57  ;;  %v15617_v54 = vld [vmem:[%s23269_s11 + $0x58] sm:$0xff] }
0x1013   :  { %v16272_v47 = vmax.f32 %v18478_v59, 0.0 }
0x1014   :  { %v16104_v6 = vpop.f32.mrb[40].mxu0 }
0x1015   :  { %v18479_v9 = vadd.f32 %v16104_v6, %v15611_v34  ;;  %v16106_v27 = vpop.f32.mrb[41].mxu0  ;;  %v15618_v6 = vld [vmem:[%s23269_s11 + $0x60] sm:$0xff] }
0x1017   :  { %v16273_v8 = vmax.f32 %v18479_v9, 0.0 }
0x1018   :  { %v16109_v61 = vpop.f32.mrb[42].mxu0 }
0x1019   :  { %v23307_v53 = vpack.c.bf16 %v16273_v8, %v16272_v47  ;;  %v16111_v21 = vpop.f32.mrb[43].mxu0  ;;  %v18480_v37 = vadd.f32 %v16109_v61, %v15612_v15  ;;  %v15619_v47 = vld [vmem:[%s23269_s11 + $0x68] sm:$0xff] }
0x101b   :  { %v16274_v49 = vmax.f32 %v18480_v37, 0.0 }
0x101c   :  { %v16114_v25 = vpop.f32.mrb[44].mxu0 }
0x101d   :  { %v18481_v52 = vadd.f32 %v16114_v25, %v15613_v20  ;;  %v16116_v0 = vpop.f32.mrb[45].mxu0  ;;  %v15620_v25 = vld [vmem:[%s23269_s11 + $0x70] sm:$0xff] }
0x101f   :  { %v16275_v22 = vmax.f32 %v18481_v52, 0.0 }
0x1020   :  { %v16119_v56 = vpop.f32.mrb[46].mxu0 }
0x1021   :  { %v23311_v31 = vpack.c.bf16 %v16275_v22, %v16274_v49  ;;  %v16121_v32 = vpop.f32.mrb[47].mxu0  ;;  %v18482_v5 = vadd.f32 %v16119_v56, %v15614_v48  ;;  %v15621_v22 = vld [vmem:[%s23269_s11 + $0x78] sm:$0xff] }
0x1023   :  { %v16276_v46 = vmax.f32 %v18482_v5, 0.0 }
0x1024   :  { %v16124_v13 = vpop.f32.mrb[48].mxu0 }
0x1025   :  { %v18483_v18 = vadd.f32 %v16124_v13, %v15615_v19  ;;  %v16126_v14 = vpop.f32.mrb[49].mxu0 }
0x1027   :  { %v16277_v40 = vmax.f32 %v18483_v18, 0.0  ;;  %v15622_v18 = vld [vmem:[%s23269_s11 + $0x80] sm:$0xff] }
0x1028   :  { %v16129_v16 = vpop.f32.mrb[50].mxu0 }
0x1029   :  { %v23315_v43 = vpack.c.bf16 %v16277_v40, %v16276_v46  ;;  %v16131_v29 = vpop.f32.mrb[51].mxu0  ;;  %v18484_v57 = vadd.f32 %v16129_v16, %v15616_v58  ;;  %v15623_v58 = vld [vmem:[%s23269_s11 + $0x88] sm:$0xff] }
0x102b   :  { %v16278_v34 = vmax.f32 %v18484_v57, 0.0 }
0x102c   :  { %v16134_v28 = vpop.f32.mrb[52].mxu0 }
0x102d   :  { %v18485_v35 = vadd.f32 %v16134_v28, %v15617_v54  ;;  %v16136_v36 = vpop.f32.mrb[53].mxu0 }
0x102e   :  { %v15624_v36 = vld [vmem:[%s23269_s11 + $0x90] sm:$0xff] }
0x102f   :  { %v16279_v59 = vmax.f32 %v18485_v35, 0.0 }
0x1030   :  { %v16139_v17 = vpop.f32.mrb[54].mxu0 }
0x1031   :  { %v23319_v9 = vpack.c.bf16 %v16279_v59, %v16278_v34  ;;  %v16141_v27 = vpop.f32.mrb[55].mxu0  ;;  %v18486_v8 = vadd.f32 %v16139_v17, %v15618_v6  ;;  %v15625_v17 = vld [vmem:[%s23269_s11 + $0x98] sm:$0xff] }
0x1032   :  { %v15626_v27 = vld [vmem:[%s23269_s11 + $0xa0] sm:$0xff] }
0x1033   :  { %v16280_v20 = vmax.f32 %v18486_v8, 0.0 }
0x1034   :  { %v16144_v15 = vpop.f32.mrb[56].mxu0 }
0x1035   :  { %v18487_v61 = vadd.f32 %v16144_v15, %v15619_v47  ;;  %v16146_v21 = vpop.f32.mrb[57].mxu0 }
0x1037   :  { %v16281_v37 = vmax.f32 %v18487_v61, 0.0  ;;  %v15925_v61 = vadd.f32 %v23243_v1, %v15626_v27 }
0x1038   :  { %v16149_v52 = vpop.f32.mrb[58].mxu0 }
0x1039   :  { %v23323_v0 = vpack.c.bf16 %v16281_v37, %v16280_v20  ;;  %v16151_v49 = vpop.f32.mrb[59].mxu0  ;;  %v18488_v48 = vadd.f32 %v16149_v52, %v15620_v25  ;;  %v15627_v20 = vld [vmem:[%s23269_s11 + $0xa8] sm:$0xff] }
0x103b   :  { %v16282_v5 = vmax.f32 %v18488_v48, 0.0 }
0x103c   :  { %v16154_v56 = vpop.f32.mrb[60].mxu0 }
0x103d   :  { %v18489_v32 = vadd.f32 %v16154_v56, %v15621_v22  ;;  %v16156_v19 = vpop.f32.mrb[61].mxu0  ;;  %v15930_v22 = vadd.f32 %v23245_v42, %v15627_v20 }
0x103f   :  { %v16283_v13 = vmax.f32 %v18489_v32, 0.0  ;;  %v15628_v32 = vld [vmem:[%s23269_s11 + $0xb0] sm:$0xff] }
0x1040   :  { %v16159_v14 = vpop.f32.mrb[62].mxu0  ;;  %v15935_v1 = vadd.f32 %v23247_v11, %v15628_v32  ;;  %v15635_v32 = vld [vmem:[%s23269_s11 + $0xe8] sm:$0xff] }
0x1041   :  { %v23327_v46 = vpack.c.bf16 %v16283_v13, %v16282_v5  ;;  %v16161_v40 = vpop.f32.mrb[63].mxu0  ;;  %v18490_v16 = vadd.f32 %v16159_v14, %v15622_v18  ;;  %v15629_v13 = vld [vmem:[%s23269_s11 + $0xb8] sm:$0xff] }
0x1042   :  { %v15940_v42 = vadd.f32 %v23249_v10, %v15629_v13 }
0x1043   :  { %v16284_v28 = vmax.f32 %v18490_v16, 0.0 }
0x1044   :  { %v16164_v29 = vpop.f32.mrb[64].mxu0 }
0x1045   :  { %v18491_v54 = vadd.f32 %v16164_v29, %v15623_v58  ;;  %v16166_v57 = vpop.f32.mrb[65].mxu0 }
0x1047   :  { %v16285_v35 = vmax.f32 %v18491_v54, 0.0  ;;  %v15630_v54 = vld [vmem:[%s23269_s11 + $0xc0] sm:$0xff] }
0x1048   :  { %v16169_v34 = vpop.f32.mrb[66].mxu0  ;;  %v15945_v11 = vadd.f32 %v23251_v23, %v15630_v54 }
0x1049   :  { %v18398_v59 = vpack.c.bf16 %v16285_v35, %v16284_v28  ;;  %v16171_v6 = vpop.f32.mrb[67].mxu0  ;;  %v18492_v47 = vadd.f32 %v16169_v34, %v15624_v36  ;;  %v15631_v35 = vld [vmem:[%s23269_s11 + $0xc8] sm:$0xff] }
0x104a   :  { %v15950_v10 = vadd.f32 %v23253_v7, %v15631_v35 }
0x104b   :  { %18399 = vmatprep.subr.bf16.mxu1 %v18398_v59  ;;  %v16286_v37 = vmax.f32 %v18492_v47, 0.0  ;;  %v15632_v47 = vld [vmem:[%s23269_s11 + $0xd0] sm:$0xff] }
0x104c   :  { %v16174_v8 = vpop.f32.mrb[68].mxu0  ;;  %18401 = vmatpush3.bf16.msra.mxu1 %v23289_v12  ;;  %v15955_v23 = vadd.f32 %v23255_v45, %v15632_v47 }
0x104d   :  { %v18493_v15 = vadd.f32 %v16174_v8, %v15625_v17  ;;  %v16176_v21 = vpop.f32.mrb[69].mxu0 }
0x104f   :  { %v16287_v25 = vmax.f32 %v18493_v15, 0.0 }
0x1050   :  { %v16179_v52 = vpop.f32.mrb[70].mxu0 }
0x1051   :  { %v18402_v49 = vpack.c.bf16 %v16287_v25, %v16286_v37  ;;  %v16180_v48 = vadd.f32 %v16179_v52, %v15925_v61  ;;  %v16181_v56 = vpop.f32.mrb[71].mxu0  ;;  %v15633_v61 = vld [vmem:[%s23269_s11 + $0xd8] sm:$0xff] }
0x1052   :  { %v15960_v7 = vadd.f32 %v23257_v3, %v15633_v61  ;;  %v15970_v3 = vadd.f32 %v23261_v50, %v15635_v32 }
0x1053   :  { %18403 = vmatprep.subr.bf16.mxu1 %v18402_v49  ;;  %v16288_v18 = vmax.f32 %v16180_v48, 0.0 }
0x1054   :  { %v16184_v19 = vpop.f32.mrb[72].mxu0  ;;  %18405 = vmatpush3.bf16.msra.mxu1 %v23301_v26 }
0x1055   :  { %v16185_v12 = vadd.f32 %v16184_v19, %v15930_v22  ;;  %v16186_v5 = vpop.f32.mrb[73].mxu0  ;;  %v15634_v22 = vld [vmem:[%s23269_s11 + $0xe0] sm:$0xff] }
0x1056   :  { %v15965_v45 = vadd.f32 %v23259_v24, %v15634_v22 }
0x1057   :  { %v16289_v14 = vmax.f32 %v16185_v12, 0.0 }
0x1058   :  { %v16189_v40 = vpop.f32.mrb[74].mxu0 }
0x1059   :  { %v18406_v58 = vpack.c.bf16 %v16289_v14, %v16288_v18  ;;  %v16190_v16 = vadd.f32 %v16189_v40, %v15935_v1  ;;  %v16191_v29 = vpop.f32.mrb[75].mxu0  ;;  %v15636_v14 = vld [vmem:[%s23269_s11 + $0xf0] sm:$0xff] }
0x105a   :  { %v15975_v24 = vadd.f32 %v23263_v33, %v15636_v14 }
0x105b   :  { %18407 = vmatprep.subr.bf16.mxu1 %v18406_v58  ;;  %v16290_v36 = vmax.f32 %v16190_v16, 0.0 }
0x105c   :  { %v16194_v57 = vpop.f32.mrb[76].mxu0  ;;  %18409 = vmatpush3.bf16.msra.mxu1 %v23307_v53 }
0x105d   :  { %v16195_v26 = vadd.f32 %v16194_v57, %v15940_v42  ;;  %v16196_v28 = vpop.f32.mrb[77].mxu0  ;;  %v15637_v42 = vld [vmem:[%s23269_s11 + $0xf8] sm:$0xff] }
0x105e   :  { %v15980_v50 = vadd.f32 %v23271_v62, %v15637_v42  ;;  %v15638_v28 = vld [vmem:[%s23269_s11 + $0x100] sm:$0xff] }
0x105f   :  { %v16291_v34 = vmax.f32 %v16195_v26, 0.0  ;;  %v15985_v33 = vadd.f32 %v23273_v39, %v15638_v28 }
0x1060   :  { %v16199_v59 = vpop.f32.mrb[78].mxu0 }
0x1061   :  { %v18410_v6 = vpack.c.bf16 %v16291_v34, %v16290_v36  ;;  %v16200_v17 = vadd.f32 %v16199_v59, %v15945_v11  ;;  %v16201_v27 = vpop.f32.mrb[79].mxu0  ;;  %v15639_v34 = vld [vmem:[%s23269_s11 + $0x108] sm:$0xff] }
0x1062   :  { %v15990_v62 = vadd.f32 %v23281_v63, %v15639_v34 }
0x1063   :  { %18411 = vmatprep.subr.bf16.mxu1 %v18410_v6  ;;  %v16292_v21 = vmax.f32 %v16200_v17, 0.0 }
0x1064   :  { %v16204_v8 = vpop.f32.mrb[80].mxu0  ;;  %18413 = vmatpush3.bf16.msra.mxu1 %v23311_v31 }
0x1065   :  { %v16205_v53 = vadd.f32 %v16204_v8, %v15950_v10  ;;  %v16206_v15 = vpop.f32.mrb[81].mxu0  ;;  %v15640_v8 = vld [vmem:[%s23269_s11 + $0x110] sm:$0xff] }
0x1066   :  { %v15995_v39 = vadd.f32 %v23284_v38, %v15640_v8  ;;  %v15641_v15 = vld [vmem:[%s23269_s11 + $0x118] sm:$0xff] }
0x1067   :  { %v16293_v20 = vmax.f32 %v16205_v53, 0.0 }
0x1068   :  { %v16209_v37 = vpop.f32.mrb[82].mxu0 }
0x1069   :  { %v18414_v25 = vpack.c.bf16 %v16293_v20, %v16292_v21  ;;  %v16210_v52 = vadd.f32 %v16209_v37, %v15955_v23  ;;  %v16211_v49 = vpop.f32.mrb[83].mxu0 }
0x106b   :  { %18415 = vmatprep.subr.bf16.mxu1 %v18414_v25  ;;  %v16294_v19 = vmax.f32 %v16210_v52, 0.0 }
0x106c   :  { %v16214_v48 = vpop.f32.mrb[84].mxu0  ;;  %18417 = vmatpush3.bf16.msra.mxu1 %v23315_v43 }
0x106d   :  { %v16215_v31 = vadd.f32 %v16214_v48, %v15960_v7  ;;  %v16216_v56 = vpop.f32.mrb[85].mxu0  ;;  %v15642_v7 = vld [vmem:[%s23269_s11 + $0x120] sm:$0xff]  ;;  %v15643_v48 = vld [vmem:[%s23269_s11 + $0x128] sm:$0xf] }
0x106e   :  { %v16005_v49 = vadd.f32 %v23298_v60, %v15642_v7 }
0x106f   :  { %v16295_v12 = vmax.f32 %v16215_v31, 0.0 }
0x1070   :  { %v16219_v1 = vpop.f32.mrb[86].mxu0 }
0x1071   :  { %v18418_v5 = vpack.c.bf16 %v16295_v12, %v16294_v19  ;;  %v16220_v13 = vadd.f32 %v16219_v1, %v15965_v45  ;;  %v16221_v18 = vpop.f32.mrb[87].mxu0 }
0x1073   :  { %18419 = vmatprep.subr.bf16.mxu1 %v18418_v5  ;;  %v16296_v16 = vmax.f32 %v16220_v13, 0.0 }
0x1074   :  { %v16224_v40 = vpop.f32.mrb[88].mxu0  ;;  %18421 = vmatpush3.bf16.msra.mxu1 %v23319_v9 }
0x1075   :  { %v16225_v43 = vadd.f32 %v16224_v40, %v15970_v3  ;;  %v16226_v58 = vpop.f32.mrb[89].mxu0 }
0x1077   :  { %v16297_v29 = vmax.f32 %v16225_v43, 0.0 }
0x1078   :  { %v16229_v54 = vpop.f32.mrb[90].mxu0 }
0x1079   :  { %v18422_v57 = vpack.c.bf16 %v16297_v29, %v16296_v16  ;;  %v16230_v26 = vadd.f32 %v16229_v54, %v15975_v24  ;;  %v16231_v11 = vpop.f32.mrb[91].mxu0 }
0x107b   :  { %18423 = vmatprep.subr.bf16.mxu1 %v18422_v57  ;;  %v16298_v59 = vmax.f32 %v16230_v26, 0.0 }
0x107c   :  { %v16234_v35 = vpop.f32.mrb[92].mxu0  ;;  %18425 = vmatpush3.bf16.msra.mxu1 %v23323_v0 }
0x107d   :  { %v16235_v9 = vadd.f32 %v16234_v35, %v15980_v50  ;;  %v16236_v36 = vpop.f32.mrb[93].mxu0 }
0x107f   :  { %v16299_v6 = vmax.f32 %v16235_v9, 0.0 }
0x1080   :  { %v16239_v10 = vpop.f32.mrb[94].mxu0 }
0x1081   :  { %v18426_v17 = vpack.c.bf16 %v16299_v6, %v16298_v59  ;;  %v16240_v27 = vadd.f32 %v16239_v10, %v15985_v33  ;;  %v16241_v47 = vpop.f32.mrb[95].mxu0 }
0x1083   :  { %18427 = vmatprep.subr.bf16.mxu1 %v18426_v17  ;;  %v16300_v61 = vmax.f32 %v16240_v27, 0.0 }
0x1084   :  { %18429 = vmatpush3.bf16.msra.mxu1 %v23327_v46  ;;  %v16244_v0 = vpop.f32.mrb[96].mxu0  ;;  %v16000_v46 = vadd.f32 %v23294_v4, %v15641_v15 }
0x1085   :  { %v16245_v53 = vadd.f32 %v16244_v0, %v15990_v62  ;;  %v16246_v23 = vpop.f32.mrb[97].mxu0  ;;  %18430 = vmatprep.subr.bf16.mxu1 %v19185_v2 }
0x1087   :  { %v16301_v21 = vmax.f32 %v16245_v53, 0.0  ;;  %16398 = vmatmul.mubr.f32.vlgmr.msra.gmra.mrb[124].mxu1 %v23286_v41 }
0x1088   :  { %v16249_v63 = vpop.f32.mrb[98].mxu0  ;;  %17746 = vmatprep.mubr.msk.f32.mxu1 %vm23578_vm9, %v23501_v44  ;;  %v16010_v44 = vadd.f32 %v23304_v51, %v15643_v48 }
0x1089   :  { %v18431_v20 = vpack.c.bf16 %v16301_v21, %v16300_v61  ;;  %v16250_v37 = vadd.f32 %v16249_v63, %v15995_v39  ;;  %v16251_v25 = vpop.f32.mrb[99].mxu0 }
0x108b   :  { %18432 = vmatpush3.bf16.msra.mxu1 %v18431_v20  ;;  %v16302_v41 = vmax.f32 %v16250_v37, 0.0 }
0x108c   :  { %v16254_v38 = vpop.f32.mrb[100].mxu0  ;;  %18433 = vmatprep.subr.bf16.mxu1 %v19185_v2 }
0x108d   :  { %v16255_v52 = vadd.f32 %v16254_v38, %v16000_v46  ;;  %v16256_v22 = vpop.f32.mrb[101].mxu0 }
0x108f   :  { %v16303_v31 = vmax.f32 %v16255_v52, 0.0 }
0x1090   :  { %v16259_v45 = vpop.f32.mrb[102].mxu0 }
0x1091   :  { %v18434_v56 = vpack.c.bf16 %v16303_v31, %v16302_v41  ;;  %v16260_v32 = vadd.f32 %v16259_v45, %v16005_v49  ;;  %v16261_v4 = vpop.f32.mrb[103].mxu0 }
0x1093   :  { %18435 = vmatpush3.bf16.msra.mxu1 %v18434_v56  ;;  %v16304_v5 = vmax.f32 %v16260_v32, 0.0 }
0x1094   :  { %v16264_v19 = vpop.f32.mrb[104].mxu0  ;;  %18436 = vmatprep.subr.bf16.mxu1 %v19185_v2  ;;  %v16307_v2 = vld [vmem:[%s16511_s27] sm:$0x3] }
0x1095   :  { %v16265_v12 = vadd.f32 %v16264_v19, %v16010_v44  ;;  %v16266_v1 = vpop.f32.mrb[105].mxu0 }
0x1097   :  { %v16305_v3 = vmax.f32 %v16265_v12, 0.0 }
0x1099   :  { %v18437_v13 = vpack.c.bf16 %v16305_v3, %v16304_v5 }
0x109b   :  { %18439 = vmatpush3.bf16.msk.msra.mxu1 %vm22034_vm4, %v18437_v13 }
0x109e   :  { %17747 = vmatmul.mubr.msk.f32.vlgmr.msra.gmra.mrb[126].mxu1 %vm16327_vm1, %v23296_v30 }
0x115a   :  { %v17413_v60 = vpop.f32.mrb[124].mxu1 }
0x115b   :  { %v17414_v18 = vpop.f32.mrb[125].mxu1 }
0x115c   :  { %v17415_v51 = vadd.f32 %v17414_v18, %v17413_v60 }
0x115e   :  { %v16400_v14 = vadd.f32 %v17415_v51, %v16307_v2 }
0x1171   :  { %v16469_v40 = vpop.f32.mrb[126].mxu1 }
0x1172   :  { %v16470_v43 = vadd.f32 %v16469_v40, %v16400_v14  ;;  %v17748_v24 = vpop.f32.mrb[127].mxu1 }
0x1174   :  { %v16473_v58 = vmul.f32 10.0, %v16470_v43 }
0x1176   :  { %19144 = vtanh.f32 %v16473_v58 }
0x1180   :  { %v19145_v55 = vpop.eup %19144 }
0x1181   :  { %v16475_v30 = vmul.f32 2.0, %v19145_v55 }
0x1183   :  { %16477 = vst.msk [vmem:[%s16512_s1] sm:$0x3] %vm16476_vm3, %v16475_v30 }

</bundles_post_ra>
